<compile_context>
chip_gen: v7x
topology: tpu7x:2x2x1
jax: 0.10.0
libtpu: 0.0.40
codegen_flags: <defaults>
</compile_context>

<pallas_src>
import jax
import jax.numpy as jnp
from jax import lax
from jax.experimental import pallas as pl
from jax.experimental.pallas import tpu as pltpu


# ----------------------------------------------------------------------------
# Fused kernel: MaxUnpool2d(2,2) -> 3x (Conv3x3 pad=1 + folded BN + ReLU)
# ----------------------------------------------------------------------------
def _segnet_up3_kernel(xw_ref, iw_ref, mask_ref, w1_ref, w2_ref, w3_ref,
                       sh_ref, o_ref, up_ref, pa_ref, pb_ref):
    # xw_ref  : (1, Hin, Wout, Cin)   bf16  pooled input, repeated 2x along W
    # iw_ref  : (1, Hin, Wout, Cin)   i32   pooling indices, repeated 2x along W
    # mask_ref: (Hout*Wp, 1)          f32   1.0 on valid columns (m % Wp < Wout) else 0.0
    # w*_ref  : (9, Cin_l, Cout)      bf16  conv taps (BN scale folded), tap t = 3*dy + dx
    # sh_ref  : (3, Cout)             f32   folded BN/bias shift per layer
    # o_ref   : (1, Hout*Wp, Cout)    bf16  flat padded-width output (wrapper strips 2 cols)
    # up_ref  : ((Hout+3)*Wp, Cin)    bf16  padded unpool activation (flat row-major)
    # pa/pb   : ((Hout+3)*Wp, Cout)   bf16  padded conv1 / conv2 activations
    _, Hin, Wout, Cin = xw_ref.shape
    Cout = o_ref.shape[-1]
    Hout = 2 * Hin
    Wp = Wout + 2
    M = Hout * Wp

    # ---- border-only zeroing (every grid step; NOT gated on program_id) --------------
    # top padding row + left pad of row 1, and the bottom padding row.  The interior
    # padding columns are written as zeros by the stores below (gap stores / masked
    # conv stores).  Slack rows (>= Hout+2) stay stale: they feed only wrap columns,
    # which are dropped with jnp.where (NaN-safe).
    up_ref[pl.ds(0, Wp + 1), :] = jnp.zeros((Wp + 1, Cin), up_ref.dtype)
    up_ref[pl.ds((Hout + 1) * Wp, Wp), :] = jnp.zeros((Wp, Cin), up_ref.dtype)
    for r in (pa_ref, pb_ref):
        r[pl.ds(0, Wp + 1), :] = jnp.zeros((Wp + 1, Cout), r.dtype)
        r[pl.ds((Hout + 1) * Wp, Wp), :] = jnp.zeros((Wp, Cout), r.dtype)

    # ---- MaxUnpool2d(2,2): compare-and-select, written straight into padded scratch ----
    xw = xw_ref[0]                                            # (Hin, Wout, Cin) bf16
    iw = iw_ref[0]                                            # (Hin, Wout, Cin) i32
    col = lax.broadcasted_iota(jnp.int32, (Hin, Wout, Cin), 1)
    row = lax.broadcasted_iota(jnp.int32, (Hin, Wout, Cin), 0)
    zgap = jnp.zeros((2, Cin), up_ref.dtype)
    for di in range(2):
        tgt = (2 * row + di) * Wout + col                     # flat target index of (2i+di, w)
        plane = jnp.where(iw == tgt, xw, jnp.zeros_like(xw))  # rows 2*i+di of the unpool out
        for i in range(Hin):
            base = (2 * i + di + 1) * Wp                      # padded row 2i+di+1
            up_ref[pl.ds(base + 1, Wout), :] = plane[i]       # data cols 1..Wout
            # 2-wide gap: right pad of this row + left pad of the next row
            up_ref[pl.ds(base + Wout + 1, 2), :] = zgap

    # ---- 3x (Conv3x3 + shift + ReLU), row-chunked slab matmuls ------------------------
    # chunk size ~ keeps the f32 accumulator (tm x Cout) register-resident
    TM = min(M, max(128, (512 * 128) // max(Cout, 128)))
    TM = max(8, (TM // 8) * 8)

    def conv_layer(pin_ref, w_ref, layer, dst_ref, masked):
        shift = sh_ref[pl.ds(layer, 1), :]                    # (1, Cout) f32
        m0 = 0
        while m0 < M:                                         # static Python chunk loop
            tm = min(TM, M - m0)
            # accumulator initialised with the first tap (no zeros + add)
            acc = jnp.dot(pin_ref[pl.ds(m0, tm), :], w_ref[0],
                          preferred_element_type=jnp.float32)
            for t in range(1, 9):
                off = (t // 3) * Wp + (t % 3)
                acc = acc + jnp.dot(pin_ref[pl.ds(m0 + off, tm), :], w_ref[t],
                                    preferred_element_type=jnp.float32)
            y = jnp.maximum(acc + shift, 0.0)                 # BN scale already in weights
            if masked:
                # NaN-safe select: wrap columns -> exact zeros in the padding columns of
                # the next layer's slab (this also writes the left/right padding).
                valid = mask_ref[pl.ds(m0, tm), :] > 0.0      # (tm, 1) bool
                y = jnp.where(valid, y, 0.0)
                dst_ref[pl.ds(Wp + 1 + m0, tm), :] = y.astype(dst_ref.dtype)
            else:
                # final layer: wrap columns left as-is, wrapper strips them
                dst_ref[0, pl.ds(m0, tm), :] = y.astype(dst_ref.dtype)
            m0 += tm

    # TODO(synk): dx K-packing (K = 3*Cin, 3 dots/layer) for better MXU fill on v6e/v7x.
    conv_layer(up_ref, w1_ref, 0, pa_ref, True)
    conv_layer(pa_ref, w2_ref, 1, pb_ref, True)
    conv_layer(pb_ref, w3_ref, 2, o_ref, False)


def segnet_up3_fused(xw, iw, colmask, w1, w2, w3, shifts):
    N, Hin, Wout, Cin = xw.shape
    Cout = w1.shape[-1]
    Hout = 2 * Hin
    Wp = Wout + 2
    M = Hout * Wp
    slab = (Hout + 3) * Wp

    # rough VMEM footprint: persistent scratch slabs + double-buffered pipeline blocks
    est = (slab * Cin * 2 + 2 * slab * Cout * 2
           + 2 * (Hin * Wout * Cin * (2 + 4) + M * 4
                  + 9 * Cin * Cout * 2 + 2 * 9 * Cout * Cout * 2
                  + 3 * Cout * 4 + M * Cout * 2))
    vmem_limit = int(min(max(est * 5 // 4, 32 * 1024 * 1024), 96 * 1024 * 1024))

    return pl.pallas_call(
        _segnet_up3_kernel,
        out_shape=jax.ShapeDtypeStruct((N, M, Cout), jnp.bfloat16),
        grid_spec=pltpu.PrefetchScalarGridSpec(
            num_scalar_prefetch=0,
            grid=(N,),
            in_specs=[
                pl.BlockSpec((1, Hin, Wout, Cin), lambda n: (n, 0, 0, 0)),
                pl.BlockSpec((1, Hin, Wout, Cin), lambda n: (n, 0, 0, 0)),
                pl.BlockSpec((M, 1), lambda n: (0, 0)),
                pl.BlockSpec((9, Cin, Cout), lambda n: (0, 0, 0)),
                pl.BlockSpec((9, Cout, Cout), lambda n: (0, 0, 0)),
                pl.BlockSpec((9, Cout, Cout), lambda n: (0, 0, 0)),
                pl.BlockSpec((3, Cout), lambda n: (0, 0)),
            ],
            out_specs=pl.BlockSpec((1, M, Cout), lambda n: (n, 0, 0)),
            scratch_shapes=[
                pltpu.VMEM((slab, Cin), jnp.bfloat16),
                pltpu.VMEM((slab, Cout), jnp.bfloat16),
                pltpu.VMEM((slab, Cout), jnp.bfloat16),
            ],
        ),
        compiler_params=pltpu.CompilerParams(
            dimension_semantics=("parallel",),
            vmem_limit_bytes=vmem_limit,
        ),
    )(xw, iw, colmask, w1, w2, w3, shifts)


# ----------------------------------------------------------------------------
# Module wrapper (deterministic params, mirrors SegnetUp3.__init__ shapes).
# BatchNorm is eval-mode (running stats); scale folded into the conv weights,
# bias/mean/beta folded into a per-layer shift.
# ----------------------------------------------------------------------------
class SegnetUp3Pallas:
    def __init__(self, in_channels, out_channels, key):
        eps = 1e-5
        self.out_channels = out_channels
        self.layers = []
        cin = in_channels
        for i in range(3):
            lk = jax.random.fold_in(key, i)
            kw, kb, kg, kbe, km = jax.random.split(lk, 5)
            # Conv2d weight (Cout, Cin, 3, 3) stored as (9, Cin, Cout), tap = 3*dy + dx.
            w9 = 0.1 * jax.random.normal(kw, (9, cin, out_channels), jnp.float32)
            bias = 0.1 * jax.random.normal(kb, (out_channels,), jnp.float32)
            gamma = 1.0 + 0.1 * jax.random.normal(kg, (out_channels,), jnp.float32)
            beta = 0.1 * jax.random.normal(kbe, (out_channels,), jnp.float32)
            run_mean = 0.1 * jax.random.normal(km, (out_channels,), jnp.float32)
            run_var = jnp.ones((out_channels,), jnp.float32)
            scale = gamma / jnp.sqrt(run_var + eps)                       # (Cout,)
            shift = beta + (bias - run_mean) * scale                      # (Cout,)
            w9_folded = (w9 * scale[None, None, :]).astype(jnp.bfloat16)  # fold BN scale
            self.layers.append((w9_folded, shift))
            cin = out_channels
        self.shifts = jnp.stack([l[1] for l in self.layers], axis=0)      # (3, Cout) f32

    def __call__(self, inputs_nchw, indices_nchw, output_shape):
        N, C, Hin, Win = inputs_nchw.shape
        Hout, Wout = int(output_shape[2]), int(output_shape[3])
        assert (Hout, Wout) == (2 * Hin, 2 * Win), \
            "this implementation assumes output_size == 2x input size"
        Wp = Wout + 2
        Cout = self.out_channels

        # TODO(synk): keep activations NHWC end-to-end across the model (these transposes
        # are a full HBM pass each) and pass a compact 2-bit unpool window code instead of
        # the W-repeated int32 indices to shrink the input DMA further.
        x = jnp.transpose(inputs_nchw, (0, 2, 3, 1)).astype(jnp.bfloat16)       # NHWC bf16
        idx = jnp.transpose(indices_nchw.astype(jnp.int32), (0, 2, 3, 1))       # NHWC i32
        xw = jnp.repeat(x, 2, axis=2)     # (N, Hin, Wout, C) — W-repeat so the kernel's
        iw = jnp.repeat(idx, 2, axis=2)   # unpool only needs contiguous row stores
        colmask = ((jnp.arange(Hout * Wp, dtype=jnp.int32) % Wp) < Wout
                   ).astype(jnp.float32).reshape(-1, 1)                         # (Hout*Wp, 1)

        w1, w2, w3 = (l[0] for l in self.layers)
        out = segnet_up3_fused(xw, iw, colmask, w1, w2, w3, self.shifts)   # bf16
        out = out.reshape(N, Hout, Wp, Cout)[:, :, :Wout, :]   # strip 2 padded columns
        return jnp.transpose(out, (0, 3, 1, 2)).astype(jnp.float32)        # NHWC -> NCHW f32


# ----------------------------------------------------------------------------
# Pure-JAX reference (precision-matched: bf16 matmuls/activations, f32 accumulation,
# bf16 final output).
# ----------------------------------------------------------------------------
def reference_forward(model, x_nchw, idx_nchw):
    N, C, Hin, Win = x_nchw.shape
    Hout, Wout = 2 * Hin, 2 * Win
    x_up = jnp.repeat(jnp.repeat(x_nchw, 2, axis=2), 2, axis=3)
    idx_up = jnp.repeat(jnp.repeat(idx_nchw, 2, axis=2), 2, axis=3)
    flat = jnp.arange(Hout * Wout, dtype=jnp.int32).reshape(Hout, Wout)
    up = jnp.where(idx_up == flat[None, None], x_up, 0.0)
    y = jnp.transpose(up, (0, 2, 3, 1))                                 # NHWC f32
    for (w9, shift) in model.layers:
        w = w9.reshape(3, 3, w9.shape[1], w9.shape[2])                  # HWIO bf16 (folded)
        conv = lax.conv_general_dilated(
            y.astype(jnp.bfloat16), w, (1, 1), ((1, 1), (1, 1)),
            dimension_numbers=("NHWC", "HWIO", "NHWC"),
            preferred_element_type=jnp.float32)
        y = jnp.maximum(conv + shift, 0.0)                              # f32
    y = y.astype(jnp.bfloat16).astype(jnp.float32)                      # match bf16 output
    return jnp.transpose(y, (0, 3, 1, 2))


if __name__ == "__main__":
    key = jax.random.PRNGKey(0)
    N, Cin, Cout, Hin, Win = 2, 16, 16, 8, 8
    k1, k2, k3, k4 = jax.random.split(key, 4)

    inputs = jax.random.normal(k1, (N, Cin, Hin, Win), jnp.float32)
    # Valid MaxPool2d(2,2) indices: each pooled pixel picks one position of its 2x2 window
    # in the (2Hin, 2Win) output, flattened over H*W (PyTorch convention).
    di = jax.random.randint(k2, (N, Cin, Hin, Win), 0, 2)
    dj = jax.random.randint(k3, (N, Cin, Hin, Win), 0, 2)
    row = jnp.arange(Hin, dtype=jnp.int32)[None, None, :, None]
    col = jnp.arange(Win, dtype=jnp.int32)[None, None, None, :]
    indices = (2 * row + di) * (2 * Win) + (2 * col + dj)   # int32 (torch uses int64)
    output_shape = (N, Cout, 2 * Hin, 2 * Win)

    model = SegnetUp3Pallas(Cin, Cout, k4)
    out = model(inputs, indices, output_shape)
    out = jax.block_until_ready(out)

    ref = reference_forward(model, inputs, indices)
    assert out.shape == (N, Cout, 2 * Hin, 2 * Win)
    max_err = jnp.max(jnp.abs(out - ref))
    assert jnp.allclose(out, ref, atol=1e-2, rtol=1e-2), \
        f"mismatch vs JAX reference (max abs err {max_err})"

    print("KERNEL_OK")
</pallas_src>

<mosaic_0001>
module attributes {stable_mosaic.version = 11 : i64} {
  func.func @_segnet_up3_kernel(%arg0: i32, %arg1: memref<1x8x16x16xbf16, #tpu.memory_space<vmem>>, %arg2: memref<1x8x16x16xi32, #tpu.memory_space<vmem>>, %arg3: memref<288x1xf32, #tpu.memory_space<vmem>>, %arg4: memref<9x16x16xbf16, #tpu.memory_space<vmem>>, %arg5: memref<9x16x16xbf16, #tpu.memory_space<vmem>>, %arg6: memref<9x16x16xbf16, #tpu.memory_space<vmem>>, %arg7: memref<3x16xf32, #tpu.memory_space<vmem>>, %arg8: memref<1x288x16xbf16, #tpu.memory_space<vmem>>, %arg9: memref<342x16xbf16, #tpu.memory_space<vmem>>, %arg10: memref<342x16xbf16, #tpu.memory_space<vmem>>, %arg11: memref<342x16xbf16, #tpu.memory_space<vmem>>) attributes {dimension_semantics = [#tpu.dimension_semantics<parallel>], iteration_bounds = array<i64: 2>, scalar_prefetch = 0 : i64, scratch_operands = 3 : i64, tpu.core_type = #tpu.core_type<tc>, window_params = [{transform_indices = @transform_0, window_bounds = array<i64: 1, 8, 16, 16>}, {transform_indices = @transform_1, window_bounds = array<i64: 1, 8, 16, 16>}, {pipeline_mode = #tpu.pipeline_mode<synchronous>, transform_indices = @transform_2, window_bounds = array<i64: 288, 1>}, {pipeline_mode = #tpu.pipeline_mode<synchronous>, transform_indices = @transform_3, window_bounds = array<i64: 9, 16, 16>}, {pipeline_mode = #tpu.pipeline_mode<synchronous>, transform_indices = @transform_4, window_bounds = array<i64: 9, 16, 16>}, {pipeline_mode = #tpu.pipeline_mode<synchronous>, transform_indices = @transform_5, window_bounds = array<i64: 9, 16, 16>}, {pipeline_mode = #tpu.pipeline_mode<synchronous>, transform_indices = @transform_6, window_bounds = array<i64: 3, 16>}, {transform_indices = @transform_7, window_bounds = array<i64: 1, 288, 16>}]} {
    %cst = arith.constant 0.000000e+00 : bf16
    %0 = vector.broadcast %cst : bf16 to vector<19x16xbf16>
    %c0 = arith.constant 0 : index
    %c0_0 = arith.constant 0 : index
    %1 = vector.load %arg9[%c0, %c0_0] : memref<342x16xbf16, #tpu.memory_space<vmem>>, vector<19x16xbf16>
    tpu.vector_store %arg9[%c0, %c0_0], %0 {strides = array<i32>} : memref<342x16xbf16, #tpu.memory_space<vmem>>, vector<19x16xbf16>,
    %cst_1 = arith.constant 0.000000e+00 : bf16
    %2 = vector.broadcast %cst_1 : bf16 to vector<18x16xbf16>
    %c306 = arith.constant 306 : index
    %c0_2 = arith.constant 0 : index
    %3 = vector.load %arg9[%c306, %c0_2] : memref<342x16xbf16, #tpu.memory_space<vmem>>, vector<18x16xbf16>
    tpu.vector_store %arg9[%c306, %c0_2], %2 {strides = array<i32>} : memref<342x16xbf16, #tpu.memory_space<vmem>>, vector<18x16xbf16>,
    %cst_3 = arith.constant 0.000000e+00 : bf16
    %4 = vector.broadcast %cst_3 : bf16 to vector<19x16xbf16>
    %c0_4 = arith.constant 0 : index
    %c0_5 = arith.constant 0 : index
    %5 = vector.load %arg10[%c0_4, %c0_5] : memref<342x16xbf16, #tpu.memory_space<vmem>>, vector<19x16xbf16>
    tpu.vector_store %arg10[%c0_4, %c0_5], %4 {strides = array<i32>} : memref<342x16xbf16, #tpu.memory_space<vmem>>, vector<19x16xbf16>,
    %cst_6 = arith.constant 0.000000e+00 : bf16
    %6 = vector.broadcast %cst_6 : bf16 to vector<18x16xbf16>
    %c306_7 = arith.constant 306 : index
    %c0_8 = arith.constant 0 : index
    %7 = vector.load %arg10[%c306_7, %c0_8] : memref<342x16xbf16, #tpu.memory_space<vmem>>, vector<18x16xbf16>
    tpu.vector_store %arg10[%c306_7, %c0_8], %6 {strides = array<i32>} : memref<342x16xbf16, #tpu.memory_space<vmem>>, vector<18x16xbf16>,
    %cst_9 = arith.constant 0.000000e+00 : bf16
    %8 = vector.broadcast %cst_9 : bf16 to vector<19x16xbf16>
    %c0_10 = arith.constant 0 : index
    %c0_11 = arith.constant 0 : index
    %9 = vector.load %arg11[%c0_10, %c0_11] : memref<342x16xbf16, #tpu.memory_space<vmem>>, vector<19x16xbf16>
    tpu.vector_store %arg11[%c0_10, %c0_11], %8 {strides = array<i32>} : memref<342x16xbf16, #tpu.memory_space<vmem>>, vector<19x16xbf16>,
    %cst_12 = arith.constant 0.000000e+00 : bf16
    %10 = vector.broadcast %cst_12 : bf16 to vector<18x16xbf16>
    %c306_13 = arith.constant 306 : index
    %c0_14 = arith.constant 0 : index
    %11 = vector.load %arg11[%c306_13, %c0_14] : memref<342x16xbf16, #tpu.memory_space<vmem>>, vector<18x16xbf16>
    tpu.vector_store %arg11[%c306_13, %c0_14], %10 {strides = array<i32>} : memref<342x16xbf16, #tpu.memory_space<vmem>>, vector<18x16xbf16>,
    %c0_15 = arith.constant 0 : index
    %c0_16 = arith.constant 0 : index
    %c0_17 = arith.constant 0 : index
    %c0_18 = arith.constant 0 : index
    %12 = vector.load %arg1[%c0_15, %c0_16, %c0_17, %c0_18] : memref<1x8x16x16xbf16, #tpu.memory_space<vmem>>, vector<1x8x16x16xbf16>
    %13 = vector.shape_cast %12 : vector<1x8x16x16xbf16> to vector<8x16x16xbf16>
    %c0_19 = arith.constant 0 : index
    %c0_20 = arith.constant 0 : index
    %c0_21 = arith.constant 0 : index
    %c0_22 = arith.constant 0 : index
    %14 = vector.load %arg2[%c0_19, %c0_20, %c0_21, %c0_22] : memref<1x8x16x16xi32, #tpu.memory_space<vmem>>, vector<1x8x16x16xi32>
    %15 = vector.shape_cast %14 : vector<1x8x16x16xi32> to vector<8x16x16xi32>
    %16 = tpu.iota {dimensions = array<i32: 1>} : vector<8x16x16xi32>
    %17 = tpu.iota {dimensions = array<i32: 0>} : vector<8x16x16xi32>
    %cst_23 = arith.constant 0.000000e+00 : bf16
    %18 = vector.broadcast %cst_23 : bf16 to vector<2x16xbf16>
    %c2_i32 = arith.constant 2 : i32
    %19 = vector.broadcast %c2_i32 : i32 to vector<8x16x16xi32>
    %20 = arith.muli %19, %17 : vector<8x16x16xi32>
    %c0_i32 = arith.constant 0 : i32
    %21 = vector.broadcast %c0_i32 : i32 to vector<8x16x16xi32>
    %22 = arith.addi %20, %21 : vector<8x16x16xi32>
    %c16_i32 = arith.constant 16 : i32
    %23 = vector.broadcast %c16_i32 : i32 to vector<8x16x16xi32>
    %24 = arith.muli %22, %23 : vector<8x16x16xi32>
    %25 = arith.addi %24, %16 : vector<8x16x16xi32>
    %26 = arith.cmpi eq, %15, %25 : vector<8x16x16xi32>
    %cst_24 = arith.constant 0.000000e+00 : bf16
    %27 = vector.broadcast %cst_24 : bf16 to vector<8x16x16xbf16>
    %28 = arith.select %26, %13, %27 : vector<8x16x16xi1>, vector<8x16x16xbf16>
    %29 = vector.extract_strided_slice %28 {offsets = [0, 0, 0], sizes = [1, 16, 16], strides = [1, 1, 1]} : vector<8x16x16xbf16> to vector<1x16x16xbf16>
    %30 = vector.shape_cast %29 : vector<1x16x16xbf16> to vector<16x16xbf16>
    %c19 = arith.constant 19 : index
    %c0_25 = arith.constant 0 : index
    %31 = vector.load %arg9[%c19, %c0_25] : memref<342x16xbf16, #tpu.memory_space<vmem>>, vector<16x16xbf16>
    tpu.vector_store %arg9[%c19, %c0_25], %30 {strides = array<i32>} : memref<342x16xbf16, #tpu.memory_space<vmem>>, vector<16x16xbf16>,
    %c35 = arith.constant 35 : index
    %c0_26 = arith.constant 0 : index
    %32 = vector.load %arg9[%c35, %c0_26] : memref<342x16xbf16, #tpu.memory_space<vmem>>, vector<2x16xbf16>
    tpu.vector_store %arg9[%c35, %c0_26], %18 {strides = array<i32>} : memref<342x16xbf16, #tpu.memory_space<vmem>>, vector<2x16xbf16>,
    %33 = vector.extract_strided_slice %28 {offsets = [1, 0, 0], sizes = [1, 16, 16], strides = [1, 1, 1]} : vector<8x16x16xbf16> to vector<1x16x16xbf16>
    %34 = vector.shape_cast %33 : vector<1x16x16xbf16> to vector<16x16xbf16>
    %c55 = arith.constant 55 : index
    %c0_27 = arith.constant 0 : index
    %35 = vector.load %arg9[%c55, %c0_27] : memref<342x16xbf16, #tpu.memory_space<vmem>>, vector<16x16xbf16>
    tpu.vector_store %arg9[%c55, %c0_27], %34 {strides = array<i32>} : memref<342x16xbf16, #tpu.memory_space<vmem>>, vector<16x16xbf16>,
    %c71 = arith.constant 71 : index
    %c0_28 = arith.constant 0 : index
    %36 = vector.load %arg9[%c71, %c0_28] : memref<342x16xbf16, #tpu.memory_space<vmem>>, vector<2x16xbf16>
    tpu.vector_store %arg9[%c71, %c0_28], %18 {strides = array<i32>} : memref<342x16xbf16, #tpu.memory_space<vmem>>, vector<2x16xbf16>,
    %37 = vector.extract_strided_slice %28 {offsets = [2, 0, 0], sizes = [1, 16, 16], strides = [1, 1, 1]} : vector<8x16x16xbf16> to vector<1x16x16xbf16>
    %38 = vector.shape_cast %37 : vector<1x16x16xbf16> to vector<16x16xbf16>
    %c91 = arith.constant 91 : index
    %c0_29 = arith.constant 0 : index
    %39 = vector.load %arg9[%c91, %c0_29] : memref<342x16xbf16, #tpu.memory_space<vmem>>, vector<16x16xbf16>
    tpu.vector_store %arg9[%c91, %c0_29], %38 {strides = array<i32>} : memref<342x16xbf16, #tpu.memory_space<vmem>>, vector<16x16xbf16>,
    %c107 = arith.constant 107 : index
    %c0_30 = arith.constant 0 : index
    %40 = vector.load %arg9[%c107, %c0_30] : memref<342x16xbf16, #tpu.memory_space<vmem>>, vector<2x16xbf16>
    tpu.vector_store %arg9[%c107, %c0_30], %18 {strides = array<i32>} : memref<342x16xbf16, #tpu.memory_space<vmem>>, vector<2x16xbf16>,
    %41 = vector.extract_strided_slice %28 {offsets = [3, 0, 0], sizes = [1, 16, 16], strides = [1, 1, 1]} : vector<8x16x16xbf16> to vector<1x16x16xbf16>
    %42 = vector.shape_cast %41 : vector<1x16x16xbf16> to vector<16x16xbf16>
    %c127 = arith.constant 127 : index
    %c0_31 = arith.constant 0 : index
    %43 = vector.load %arg9[%c127, %c0_31] : memref<342x16xbf16, #tpu.memory_space<vmem>>, vector<16x16xbf16>
    tpu.vector_store %arg9[%c127, %c0_31], %42 {strides = array<i32>} : memref<342x16xbf16, #tpu.memory_space<vmem>>, vector<16x16xbf16>,
    %c143 = arith.constant 143 : index
    %c0_32 = arith.constant 0 : index
    %44 = vector.load %arg9[%c143, %c0_32] : memref<342x16xbf16, #tpu.memory_space<vmem>>, vector<2x16xbf16>
    tpu.vector_store %arg9[%c143, %c0_32], %18 {strides = array<i32>} : memref<342x16xbf16, #tpu.memory_space<vmem>>, vector<2x16xbf16>,
    %45 = vector.extract_strided_slice %28 {offsets = [4, 0, 0], sizes = [1, 16, 16], strides = [1, 1, 1]} : vector<8x16x16xbf16> to vector<1x16x16xbf16>
    %46 = vector.shape_cast %45 : vector<1x16x16xbf16> to vector<16x16xbf16>
    %c163 = arith.constant 163 : index
    %c0_33 = arith.constant 0 : index
    %47 = vector.load %arg9[%c163, %c0_33] : memref<342x16xbf16, #tpu.memory_space<vmem>>, vector<16x16xbf16>
    tpu.vector_store %arg9[%c163, %c0_33], %46 {strides = array<i32>} : memref<342x16xbf16, #tpu.memory_space<vmem>>, vector<16x16xbf16>,
    %c179 = arith.constant 179 : index
    %c0_34 = arith.constant 0 : index
    %48 = vector.load %arg9[%c179, %c0_34] : memref<342x16xbf16, #tpu.memory_space<vmem>>, vector<2x16xbf16>
    tpu.vector_store %arg9[%c179, %c0_34], %18 {strides = array<i32>} : memref<342x16xbf16, #tpu.memory_space<vmem>>, vector<2x16xbf16>,
    %49 = vector.extract_strided_slice %28 {offsets = [5, 0, 0], sizes = [1, 16, 16], strides = [1, 1, 1]} : vector<8x16x16xbf16> to vector<1x16x16xbf16>
    %50 = vector.shape_cast %49 : vector<1x16x16xbf16> to vector<16x16xbf16>
    %c199 = arith.constant 199 : index
    %c0_35 = arith.constant 0 : index
    %51 = vector.load %arg9[%c199, %c0_35] : memref<342x16xbf16, #tpu.memory_space<vmem>>, vector<16x16xbf16>
    tpu.vector_store %arg9[%c199, %c0_35], %50 {strides = array<i32>} : memref<342x16xbf16, #tpu.memory_space<vmem>>, vector<16x16xbf16>,
    %c215 = arith.constant 215 : index
    %c0_36 = arith.constant 0 : index
    %52 = vector.load %arg9[%c215, %c0_36] : memref<342x16xbf16, #tpu.memory_space<vmem>>, vector<2x16xbf16>
    tpu.vector_store %arg9[%c215, %c0_36], %18 {strides = array<i32>} : memref<342x16xbf16, #tpu.memory_space<vmem>>, vector<2x16xbf16>,
    %53 = vector.extract_strided_slice %28 {offsets = [6, 0, 0], sizes = [1, 16, 16], strides = [1, 1, 1]} : vector<8x16x16xbf16> to vector<1x16x16xbf16>
    %54 = vector.shape_cast %53 : vector<1x16x16xbf16> to vector<16x16xbf16>
    %c235 = arith.constant 235 : index
    %c0_37 = arith.constant 0 : index
    %55 = vector.load %arg9[%c235, %c0_37] : memref<342x16xbf16, #tpu.memory_space<vmem>>, vector<16x16xbf16>
    tpu.vector_store %arg9[%c235, %c0_37], %54 {strides = array<i32>} : memref<342x16xbf16, #tpu.memory_space<vmem>>, vector<16x16xbf16>,
    %c251 = arith.constant 251 : index
    %c0_38 = arith.constant 0 : index
    %56 = vector.load %arg9[%c251, %c0_38] : memref<342x16xbf16, #tpu.memory_space<vmem>>, vector<2x16xbf16>
    tpu.vector_store %arg9[%c251, %c0_38], %18 {strides = array<i32>} : memref<342x16xbf16, #tpu.memory_space<vmem>>, vector<2x16xbf16>,
    %57 = vector.extract_strided_slice %28 {offsets = [7, 0, 0], sizes = [1, 16, 16], strides = [1, 1, 1]} : vector<8x16x16xbf16> to vector<1x16x16xbf16>
    %58 = vector.shape_cast %57 : vector<1x16x16xbf16> to vector<16x16xbf16>
    %c271 = arith.constant 271 : index
    %c0_39 = arith.constant 0 : index
    %59 = vector.load %arg9[%c271, %c0_39] : memref<342x16xbf16, #tpu.memory_space<vmem>>, vector<16x16xbf16>
    tpu.vector_store %arg9[%c271, %c0_39], %58 {strides = array<i32>} : memref<342x16xbf16, #tpu.memory_space<vmem>>, vector<16x16xbf16>,
    %c287 = arith.constant 287 : index
    %c0_40 = arith.constant 0 : index
    %60 = vector.load %arg9[%c287, %c0_40] : memref<342x16xbf16, #tpu.memory_space<vmem>>, vector<2x16xbf16>
    tpu.vector_store %arg9[%c287, %c0_40], %18 {strides = array<i32>} : memref<342x16xbf16, #tpu.memory_space<vmem>>, vector<2x16xbf16>,
    %c2_i32_41 = arith.constant 2 : i32
    %61 = vector.broadcast %c2_i32_41 : i32 to vector<8x16x16xi32>
    %62 = arith.muli %61, %17 : vector<8x16x16xi32>
    %c1_i32 = arith.constant 1 : i32
    %63 = vector.broadcast %c1_i32 : i32 to vector<8x16x16xi32>
    %64 = arith.addi %62, %63 : vector<8x16x16xi32>
    %c16_i32_42 = arith.constant 16 : i32
    %65 = vector.broadcast %c16_i32_42 : i32 to vector<8x16x16xi32>
    %66 = arith.muli %64, %65 : vector<8x16x16xi32>
    %67 = arith.addi %66, %16 : vector<8x16x16xi32>
    %68 = arith.cmpi eq, %15, %67 : vector<8x16x16xi32>
    %cst_43 = arith.constant 0.000000e+00 : bf16
    %69 = vector.broadcast %cst_43 : bf16 to vector<8x16x16xbf16>
    %70 = arith.select %68, %13, %69 : vector<8x16x16xi1>, vector<8x16x16xbf16>
    %71 = vector.extract_strided_slice %70 {offsets = [0, 0, 0], sizes = [1, 16, 16], strides = [1, 1, 1]} : vector<8x16x16xbf16> to vector<1x16x16xbf16>
    %72 = vector.shape_cast %71 : vector<1x16x16xbf16> to vector<16x16xbf16>
    %c37 = arith.constant 37 : index
    %c0_44 = arith.constant 0 : index
    %73 = vector.load %arg9[%c37, %c0_44] : memref<342x16xbf16, #tpu.memory_space<vmem>>, vector<16x16xbf16>
    tpu.vector_store %arg9[%c37, %c0_44], %72 {strides = array<i32>} : memref<342x16xbf16, #tpu.memory_space<vmem>>, vector<16x16xbf16>,
    %c53 = arith.constant 53 : index
    %c0_45 = arith.constant 0 : index
    %74 = vector.load %arg9[%c53, %c0_45] : memref<342x16xbf16, #tpu.memory_space<vmem>>, vector<2x16xbf16>
    tpu.vector_store %arg9[%c53, %c0_45], %18 {strides = array<i32>} : memref<342x16xbf16, #tpu.memory_space<vmem>>, vector<2x16xbf16>,
    %75 = vector.extract_strided_slice %70 {offsets = [1, 0, 0], sizes = [1, 16, 16], strides = [1, 1, 1]} : vector<8x16x16xbf16> to vector<1x16x16xbf16>
    %76 = vector.shape_cast %75 : vector<1x16x16xbf16> to vector<16x16xbf16>
    %c73 = arith.constant 73 : index
    %c0_46 = arith.constant 0 : index
    %77 = vector.load %arg9[%c73, %c0_46] : memref<342x16xbf16, #tpu.memory_space<vmem>>, vector<16x16xbf16>
    tpu.vector_store %arg9[%c73, %c0_46], %76 {strides = array<i32>} : memref<342x16xbf16, #tpu.memory_space<vmem>>, vector<16x16xbf16>,
    %c89 = arith.constant 89 : index
    %c0_47 = arith.constant 0 : index
    %78 = vector.load %arg9[%c89, %c0_47] : memref<342x16xbf16, #tpu.memory_space<vmem>>, vector<2x16xbf16>
    tpu.vector_store %arg9[%c89, %c0_47], %18 {strides = array<i32>} : memref<342x16xbf16, #tpu.memory_space<vmem>>, vector<2x16xbf16>,
    %79 = vector.extract_strided_slice %70 {offsets = [2, 0, 0], sizes = [1, 16, 16], strides = [1, 1, 1]} : vector<8x16x16xbf16> to vector<1x16x16xbf16>
    %80 = vector.shape_cast %79 : vector<1x16x16xbf16> to vector<16x16xbf16>
    %c109 = arith.constant 109 : index
    %c0_48 = arith.constant 0 : index
    %81 = vector.load %arg9[%c109, %c0_48] : memref<342x16xbf16, #tpu.memory_space<vmem>>, vector<16x16xbf16>
    tpu.vector_store %arg9[%c109, %c0_48], %80 {strides = array<i32>} : memref<342x16xbf16, #tpu.memory_space<vmem>>, vector<16x16xbf16>,
    %c125 = arith.constant 125 : index
    %c0_49 = arith.constant 0 : index
    %82 = vector.load %arg9[%c125, %c0_49] : memref<342x16xbf16, #tpu.memory_space<vmem>>, vector<2x16xbf16>
    tpu.vector_store %arg9[%c125, %c0_49], %18 {strides = array<i32>} : memref<342x16xbf16, #tpu.memory_space<vmem>>, vector<2x16xbf16>,
    %83 = vector.extract_strided_slice %70 {offsets = [3, 0, 0], sizes = [1, 16, 16], strides = [1, 1, 1]} : vector<8x16x16xbf16> to vector<1x16x16xbf16>
    %84 = vector.shape_cast %83 : vector<1x16x16xbf16> to vector<16x16xbf16>
    %c145 = arith.constant 145 : index
    %c0_50 = arith.constant 0 : index
    %85 = vector.load %arg9[%c145, %c0_50] : memref<342x16xbf16, #tpu.memory_space<vmem>>, vector<16x16xbf16>
    tpu.vector_store %arg9[%c145, %c0_50], %84 {strides = array<i32>} : memref<342x16xbf16, #tpu.memory_space<vmem>>, vector<16x16xbf16>,
    %c161 = arith.constant 161 : index
    %c0_51 = arith.constant 0 : index
    %86 = vector.load %arg9[%c161, %c0_51] : memref<342x16xbf16, #tpu.memory_space<vmem>>, vector<2x16xbf16>
    tpu.vector_store %arg9[%c161, %c0_51], %18 {strides = array<i32>} : memref<342x16xbf16, #tpu.memory_space<vmem>>, vector<2x16xbf16>,
    %87 = vector.extract_strided_slice %70 {offsets = [4, 0, 0], sizes = [1, 16, 16], strides = [1, 1, 1]} : vector<8x16x16xbf16> to vector<1x16x16xbf16>
    %88 = vector.shape_cast %87 : vector<1x16x16xbf16> to vector<16x16xbf16>
    %c181 = arith.constant 181 : index
    %c0_52 = arith.constant 0 : index
    %89 = vector.load %arg9[%c181, %c0_52] : memref<342x16xbf16, #tpu.memory_space<vmem>>, vector<16x16xbf16>
    tpu.vector_store %arg9[%c181, %c0_52], %88 {strides = array<i32>} : memref<342x16xbf16, #tpu.memory_space<vmem>>, vector<16x16xbf16>,
    %c197 = arith.constant 197 : index
    %c0_53 = arith.constant 0 : index
    %90 = vector.load %arg9[%c197, %c0_53] : memref<342x16xbf16, #tpu.memory_space<vmem>>, vector<2x16xbf16>
    tpu.vector_store %arg9[%c197, %c0_53], %18 {strides = array<i32>} : memref<342x16xbf16, #tpu.memory_space<vmem>>, vector<2x16xbf16>,
    %91 = vector.extract_strided_slice %70 {offsets = [5, 0, 0], sizes = [1, 16, 16], strides = [1, 1, 1]} : vector<8x16x16xbf16> to vector<1x16x16xbf16>
    %92 = vector.shape_cast %91 : vector<1x16x16xbf16> to vector<16x16xbf16>
    %c217 = arith.constant 217 : index
    %c0_54 = arith.constant 0 : index
    %93 = vector.load %arg9[%c217, %c0_54] : memref<342x16xbf16, #tpu.memory_space<vmem>>, vector<16x16xbf16>
    tpu.vector_store %arg9[%c217, %c0_54], %92 {strides = array<i32>} : memref<342x16xbf16, #tpu.memory_space<vmem>>, vector<16x16xbf16>,
    %c233 = arith.constant 233 : index
    %c0_55 = arith.constant 0 : index
    %94 = vector.load %arg9[%c233, %c0_55] : memref<342x16xbf16, #tpu.memory_space<vmem>>, vector<2x16xbf16>
    tpu.vector_store %arg9[%c233, %c0_55], %18 {strides = array<i32>} : memref<342x16xbf16, #tpu.memory_space<vmem>>, vector<2x16xbf16>,
    %95 = vector.extract_strided_slice %70 {offsets = [6, 0, 0], sizes = [1, 16, 16], strides = [1, 1, 1]} : vector<8x16x16xbf16> to vector<1x16x16xbf16>
    %96 = vector.shape_cast %95 : vector<1x16x16xbf16> to vector<16x16xbf16>
    %c253 = arith.constant 253 : index
    %c0_56 = arith.constant 0 : index
    %97 = vector.load %arg9[%c253, %c0_56] : memref<342x16xbf16, #tpu.memory_space<vmem>>, vector<16x16xbf16>
    tpu.vector_store %arg9[%c253, %c0_56], %96 {strides = array<i32>} : memref<342x16xbf16, #tpu.memory_space<vmem>>, vector<16x16xbf16>,
    %c269 = arith.constant 269 : index
    %c0_57 = arith.constant 0 : index
    %98 = vector.load %arg9[%c269, %c0_57] : memref<342x16xbf16, #tpu.memory_space<vmem>>, vector<2x16xbf16>
    tpu.vector_store %arg9[%c269, %c0_57], %18 {strides = array<i32>} : memref<342x16xbf16, #tpu.memory_space<vmem>>, vector<2x16xbf16>,
    %99 = vector.extract_strided_slice %70 {offsets = [7, 0, 0], sizes = [1, 16, 16], strides = [1, 1, 1]} : vector<8x16x16xbf16> to vector<1x16x16xbf16>
    %100 = vector.shape_cast %99 : vector<1x16x16xbf16> to vector<16x16xbf16>
    %c289 = arith.constant 289 : index
    %c0_58 = arith.constant 0 : index
    %101 = vector.load %arg9[%c289, %c0_58] : memref<342x16xbf16, #tpu.memory_space<vmem>>, vector<16x16xbf16>
    tpu.vector_store %arg9[%c289, %c0_58], %100 {strides = array<i32>} : memref<342x16xbf16, #tpu.memory_space<vmem>>, vector<16x16xbf16>,
    %c305 = arith.constant 305 : index
    %c0_59 = arith.constant 0 : index
    %102 = vector.load %arg9[%c305, %c0_59] : memref<342x16xbf16, #tpu.memory_space<vmem>>, vector<2x16xbf16>
    tpu.vector_store %arg9[%c305, %c0_59], %18 {strides = array<i32>} : memref<342x16xbf16, #tpu.memory_space<vmem>>, vector<2x16xbf16>,
    %c0_60 = arith.constant 0 : index
    %c0_61 = arith.constant 0 : index
    %103 = vector.load %arg7[%c0_60, %c0_61] : memref<3x16xf32, #tpu.memory_space<vmem>>, vector<1x16xf32>
    %c0_62 = arith.constant 0 : index
    %c0_63 = arith.constant 0 : index
    %104 = vector.load %arg9[%c0_62, %c0_63] : memref<342x16xbf16, #tpu.memory_space<vmem>>, vector<288x16xbf16>
    %c0_64 = arith.constant 0 : index
    %c0_65 = arith.constant 0 : index
    %c0_66 = arith.constant 0 : index
    %105 = vector.load %arg4[%c0_64, %c0_65, %c0_66] : memref<9x16x16xbf16, #tpu.memory_space<vmem>>, vector<1x16x16xbf16>
    %106 = vector.shape_cast %105 : vector<1x16x16xbf16> to vector<16x16xbf16>
    %cst_67 = arith.constant dense<0.000000e+00> : vector<288x16xf32>
    %107 = tpu.matmul %104, %106, %cst_67 {dimension_numbers = #tpu.dot_dimension_numbers<[1], [0], [0], [1], [0, 0, 1, 1], [], []>} : vector<288x16xbf16>, vector<16x16xbf16>, vector<288x16xf32> -> vector<288x16xf32>
    %c1 = arith.constant 1 : index
    %c0_68 = arith.constant 0 : index
    %108 = vector.load %arg9[%c1, %c0_68] : memref<342x16xbf16, #tpu.memory_space<vmem>>, vector<288x16xbf16>
    %c1_69 = arith.constant 1 : index
    %c0_70 = arith.constant 0 : index
    %c0_71 = arith.constant 0 : index
    %109 = vector.load %arg4[%c1_69, %c0_70, %c0_71] : memref<9x16x16xbf16, #tpu.memory_space<vmem>>, vector<1x16x16xbf16>
    %110 = vector.shape_cast %109 : vector<1x16x16xbf16> to vector<16x16xbf16>
    %cst_72 = arith.constant dense<0.000000e+00> : vector<288x16xf32>
    %111 = tpu.matmul %108, %110, %cst_72 {dimension_numbers = #tpu.dot_dimension_numbers<[1], [0], [0], [1], [0, 0, 1, 1], [], []>} : vector<288x16xbf16>, vector<16x16xbf16>, vector<288x16xf32> -> vector<288x16xf32>
    %112 = arith.addf %107, %111 : vector<288x16xf32>
    %c2 = arith.constant 2 : index
    %c0_73 = arith.constant 0 : index
    %113 = vector.load %arg9[%c2, %c0_73] : memref<342x16xbf16, #tpu.memory_space<vmem>>, vector<288x16xbf16>
    %c2_74 = arith.constant 2 : index
    %c0_75 = arith.constant 0 : index
    %c0_76 = arith.constant 0 : index
    %114 = vector.load %arg4[%c2_74, %c0_75, %c0_76] : memref<9x16x16xbf16, #tpu.memory_space<vmem>>, vector<1x16x16xbf16>
    %115 = vector.shape_cast %114 : vector<1x16x16xbf16> to vector<16x16xbf16>
    %cst_77 = arith.constant dense<0.000000e+00> : vector<288x16xf32>
    %116 = tpu.matmul %113, %115, %cst_77 {dimension_numbers = #tpu.dot_dimension_numbers<[1], [0], [0], [1], [0, 0, 1, 1], [], []>} : vector<288x16xbf16>, vector<16x16xbf16>, vector<288x16xf32> -> vector<288x16xf32>
    %117 = arith.addf %112, %116 : vector<288x16xf32>
    %c18 = arith.constant 18 : index
    %c0_78 = arith.constant 0 : index
    %118 = vector.load %arg9[%c18, %c0_78] : memref<342x16xbf16, #tpu.memory_space<vmem>>, vector<288x16xbf16>
    %c3 = arith.constant 3 : index
    %c0_79 = arith.constant 0 : index
    %c0_80 = arith.constant 0 : index
    %119 = vector.load %arg4[%c3, %c0_79, %c0_80] : memref<9x16x16xbf16, #tpu.memory_space<vmem>>, vector<1x16x16xbf16>
    %120 = vector.shape_cast %119 : vector<1x16x16xbf16> to vector<16x16xbf16>
    %cst_81 = arith.constant dense<0.000000e+00> : vector<288x16xf32>
    %121 = tpu.matmul %118, %120, %cst_81 {dimension_numbers = #tpu.dot_dimension_numbers<[1], [0], [0], [1], [0, 0, 1, 1], [], []>} : vector<288x16xbf16>, vector<16x16xbf16>, vector<288x16xf32> -> vector<288x16xf32>
    %122 = arith.addf %117, %121 : vector<288x16xf32>
    %c19_82 = arith.constant 19 : index
    %c0_83 = arith.constant 0 : index
    %123 = vector.load %arg9[%c19_82, %c0_83] : memref<342x16xbf16, #tpu.memory_space<vmem>>, vector<288x16xbf16>
    %c4 = arith.constant 4 : index
    %c0_84 = arith.constant 0 : index
    %c0_85 = arith.constant 0 : index
    %124 = vector.load %arg4[%c4, %c0_84, %c0_85] : memref<9x16x16xbf16, #tpu.memory_space<vmem>>, vector<1x16x16xbf16>
    %125 = vector.shape_cast %124 : vector<1x16x16xbf16> to vector<16x16xbf16>
    %cst_86 = arith.constant dense<0.000000e+00> : vector<288x16xf32>
    %126 = tpu.matmul %123, %125, %cst_86 {dimension_numbers = #tpu.dot_dimension_numbers<[1], [0], [0], [1], [0, 0, 1, 1], [], []>} : vector<288x16xbf16>, vector<16x16xbf16>, vector<288x16xf32> -> vector<288x16xf32>
    %127 = arith.addf %122, %126 : vector<288x16xf32>
    %c20 = arith.constant 20 : index
    %c0_87 = arith.constant 0 : index
    %128 = vector.load %arg9[%c20, %c0_87] : memref<342x16xbf16, #tpu.memory_space<vmem>>, vector<288x16xbf16>
    %c5 = arith.constant 5 : index
    %c0_88 = arith.constant 0 : index
    %c0_89 = arith.constant 0 : index
    %129 = vector.load %arg4[%c5, %c0_88, %c0_89] : memref<9x16x16xbf16, #tpu.memory_space<vmem>>, vector<1x16x16xbf16>
    %130 = vector.shape_cast %129 : vector<1x16x16xbf16> to vector<16x16xbf16>
    %cst_90 = arith.constant dense<0.000000e+00> : vector<288x16xf32>
    %131 = tpu.matmul %128, %130, %cst_90 {dimension_numbers = #tpu.dot_dimension_numbers<[1], [0], [0], [1], [0, 0, 1, 1], [], []>} : vector<288x16xbf16>, vector<16x16xbf16>, vector<288x16xf32> -> vector<288x16xf32>
    %132 = arith.addf %127, %131 : vector<288x16xf32>
    %c36 = arith.constant 36 : index
    %c0_91 = arith.constant 0 : index
    %133 = vector.load %arg9[%c36, %c0_91] : memref<342x16xbf16, #tpu.memory_space<vmem>>, vector<288x16xbf16>
    %c6 = arith.constant 6 : index
    %c0_92 = arith.constant 0 : index
    %c0_93 = arith.constant 0 : index
    %134 = vector.load %arg4[%c6, %c0_92, %c0_93] : memref<9x16x16xbf16, #tpu.memory_space<vmem>>, vector<1x16x16xbf16>
    %135 = vector.shape_cast %134 : vector<1x16x16xbf16> to vector<16x16xbf16>
    %cst_94 = arith.constant dense<0.000000e+00> : vector<288x16xf32>
    %136 = tpu.matmul %133, %135, %cst_94 {dimension_numbers = #tpu.dot_dimension_numbers<[1], [0], [0], [1], [0, 0, 1, 1], [], []>} : vector<288x16xbf16>, vector<16x16xbf16>, vector<288x16xf32> -> vector<288x16xf32>
    %137 = arith.addf %132, %136 : vector<288x16xf32>
    %c37_95 = arith.constant 37 : index
    %c0_96 = arith.constant 0 : index
    %138 = vector.load %arg9[%c37_95, %c0_96] : memref<342x16xbf16, #tpu.memory_space<vmem>>, vector<288x16xbf16>
    %c7 = arith.constant 7 : index
    %c0_97 = arith.constant 0 : index
    %c0_98 = arith.constant 0 : index
    %139 = vector.load %arg4[%c7, %c0_97, %c0_98] : memref<9x16x16xbf16, #tpu.memory_space<vmem>>, vector<1x16x16xbf16>
    %140 = vector.shape_cast %139 : vector<1x16x16xbf16> to vector<16x16xbf16>
    %cst_99 = arith.constant dense<0.000000e+00> : vector<288x16xf32>
    %141 = tpu.matmul %138, %140, %cst_99 {dimension_numbers = #tpu.dot_dimension_numbers<[1], [0], [0], [1], [0, 0, 1, 1], [], []>} : vector<288x16xbf16>, vector<16x16xbf16>, vector<288x16xf32> -> vector<288x16xf32>
    %142 = arith.addf %137, %141 : vector<288x16xf32>
    %c38 = arith.constant 38 : index
    %c0_100 = arith.constant 0 : index
    %143 = vector.load %arg9[%c38, %c0_100] : memref<342x16xbf16, #tpu.memory_space<vmem>>, vector<288x16xbf16>
    %c8 = arith.constant 8 : index
    %c0_101 = arith.constant 0 : index
    %c0_102 = arith.constant 0 : index
    %144 = vector.load %arg4[%c8, %c0_101, %c0_102] : memref<9x16x16xbf16, #tpu.memory_space<vmem>>, vector<1x16x16xbf16>
    %145 = vector.shape_cast %144 : vector<1x16x16xbf16> to vector<16x16xbf16>
    %cst_103 = arith.constant dense<0.000000e+00> : vector<288x16xf32>
    %146 = tpu.matmul %143, %145, %cst_103 {dimension_numbers = #tpu.dot_dimension_numbers<[1], [0], [0], [1], [0, 0, 1, 1], [], []>} : vector<288x16xbf16>, vector<16x16xbf16>, vector<288x16xf32> -> vector<288x16xf32>
    %147 = arith.addf %142, %146 : vector<288x16xf32>
    %148 = vector.broadcast %103 : vector<1x16xf32> to vector<288x16xf32>
    %149 = arith.addf %147, %148 : vector<288x16xf32>
    %cst_104 = arith.constant 0.000000e+00 : f32
    %150 = vector.broadcast %cst_104 : f32 to vector<288x16xf32>
    %151 = arith.maximumf %149, %150 : vector<288x16xf32>
    %c0_105 = arith.constant 0 : index
    %c0_106 = arith.constant 0 : index
    %152 = vector.load %arg3[%c0_105, %c0_106] : memref<288x1xf32, #tpu.memory_space<vmem>>, vector<288x1xf32>
    %cst_107 = arith.constant 0.000000e+00 : f32
    %153 = vector.broadcast %cst_107 : f32 to vector<288x1xf32>
    %154 = arith.cmpf ogt, %152, %153 : vector<288x1xf32>
    %cst_108 = arith.constant 0.000000e+00 : f32
    %155 = vector.shape_cast %154 : vector<288x1xi1> to vector<288x1xi1>
    %156 = vector.broadcast %155 : vector<288x1xi1> to vector<288x16xi1>
    %157 = vector.broadcast %cst_108 : f32 to vector<288x16xf32>
    %158 = arith.select %156, %151, %157 : vector<288x16xi1>, vector<288x16xf32>
    %159 = arith.truncf %158 : vector<288x16xf32> to vector<288x16xbf16>
    %c19_109 = arith.constant 19 : index
    %c0_110 = arith.constant 0 : index
    %160 = vector.load %arg10[%c19_109, %c0_110] : memref<342x16xbf16, #tpu.memory_space<vmem>>, vector<288x16xbf16>
    tpu.vector_store %arg10[%c19_109, %c0_110], %159 {strides = array<i32>} : memref<342x16xbf16, #tpu.memory_space<vmem>>, vector<288x16xbf16>,
    %c1_111 = arith.constant 1 : index
    %c0_112 = arith.constant 0 : index
    %161 = vector.load %arg7[%c1_111, %c0_112] : memref<3x16xf32, #tpu.memory_space<vmem>>, vector<1x16xf32>
    %c0_113 = arith.constant 0 : index
    %c0_114 = arith.constant 0 : index
    %162 = vector.load %arg10[%c0_113, %c0_114] : memref<342x16xbf16, #tpu.memory_space<vmem>>, vector<288x16xbf16>
    %c0_115 = arith.constant 0 : index
    %c0_116 = arith.constant 0 : index
    %c0_117 = arith.constant 0 : index
    %163 = vector.load %arg5[%c0_115, %c0_116, %c0_117] : memref<9x16x16xbf16, #tpu.memory_space<vmem>>, vector<1x16x16xbf16>
    %164 = vector.shape_cast %163 : vector<1x16x16xbf16> to vector<16x16xbf16>
    %cst_118 = arith.constant dense<0.000000e+00> : vector<288x16xf32>
    %165 = tpu.matmul %162, %164, %cst_118 {dimension_numbers = #tpu.dot_dimension_numbers<[1], [0], [0], [1], [0, 0, 1, 1], [], []>} : vector<288x16xbf16>, vector<16x16xbf16>, vector<288x16xf32> -> vector<288x16xf32>
    %c1_119 = arith.constant 1 : index
    %c0_120 = arith.constant 0 : index
    %166 = vector.load %arg10[%c1_119, %c0_120] : memref<342x16xbf16, #tpu.memory_space<vmem>>, vector<288x16xbf16>
    %c1_121 = arith.constant 1 : index
    %c0_122 = arith.constant 0 : index
    %c0_123 = arith.constant 0 : index
    %167 = vector.load %arg5[%c1_121, %c0_122, %c0_123] : memref<9x16x16xbf16, #tpu.memory_space<vmem>>, vector<1x16x16xbf16>
    %168 = vector.shape_cast %167 : vector<1x16x16xbf16> to vector<16x16xbf16>
    %cst_124 = arith.constant dense<0.000000e+00> : vector<288x16xf32>
    %169 = tpu.matmul %166, %168, %cst_124 {dimension_numbers = #tpu.dot_dimension_numbers<[1], [0], [0], [1], [0, 0, 1, 1], [], []>} : vector<288x16xbf16>, vector<16x16xbf16>, vector<288x16xf32> -> vector<288x16xf32>
    %170 = arith.addf %165, %169 : vector<288x16xf32>
    %c2_125 = arith.constant 2 : index
    %c0_126 = arith.constant 0 : index
    %171 = vector.load %arg10[%c2_125, %c0_126] : memref<342x16xbf16, #tpu.memory_space<vmem>>, vector<288x16xbf16>
    %c2_127 = arith.constant 2 : index
    %c0_128 = arith.constant 0 : index
    %c0_129 = arith.constant 0 : index
    %172 = vector.load %arg5[%c2_127, %c0_128, %c0_129] : memref<9x16x16xbf16, #tpu.memory_space<vmem>>, vector<1x16x16xbf16>
    %173 = vector.shape_cast %172 : vector<1x16x16xbf16> to vector<16x16xbf16>
    %cst_130 = arith.constant dense<0.000000e+00> : vector<288x16xf32>
    %174 = tpu.matmul %171, %173, %cst_130 {dimension_numbers = #tpu.dot_dimension_numbers<[1], [0], [0], [1], [0, 0, 1, 1], [], []>} : vector<288x16xbf16>, vector<16x16xbf16>, vector<288x16xf32> -> vector<288x16xf32>
    %175 = arith.addf %170, %174 : vector<288x16xf32>
    %c18_131 = arith.constant 18 : index
    %c0_132 = arith.constant 0 : index
    %176 = vector.load %arg10[%c18_131, %c0_132] : memref<342x16xbf16, #tpu.memory_space<vmem>>, vector<288x16xbf16>
    %c3_133 = arith.constant 3 : index
    %c0_134 = arith.constant 0 : index
    %c0_135 = arith.constant 0 : index
    %177 = vector.load %arg5[%c3_133, %c0_134, %c0_135] : memref<9x16x16xbf16, #tpu.memory_space<vmem>>, vector<1x16x16xbf16>
    %178 = vector.shape_cast %177 : vector<1x16x16xbf16> to vector<16x16xbf16>
    %cst_136 = arith.constant dense<0.000000e+00> : vector<288x16xf32>
    %179 = tpu.matmul %176, %178, %cst_136 {dimension_numbers = #tpu.dot_dimension_numbers<[1], [0], [0], [1], [0, 0, 1, 1], [], []>} : vector<288x16xbf16>, vector<16x16xbf16>, vector<288x16xf32> -> vector<288x16xf32>
    %180 = arith.addf %175, %179 : vector<288x16xf32>
    %c19_137 = arith.constant 19 : index
    %c0_138 = arith.constant 0 : index
    %181 = vector.load %arg10[%c19_137, %c0_138] : memref<342x16xbf16, #tpu.memory_space<vmem>>, vector<288x16xbf16>
    %c4_139 = arith.constant 4 : index
    %c0_140 = arith.constant 0 : index
    %c0_141 = arith.constant 0 : index
    %182 = vector.load %arg5[%c4_139, %c0_140, %c0_141] : memref<9x16x16xbf16, #tpu.memory_space<vmem>>, vector<1x16x16xbf16>
    %183 = vector.shape_cast %182 : vector<1x16x16xbf16> to vector<16x16xbf16>
    %cst_142 = arith.constant dense<0.000000e+00> : vector<288x16xf32>
    %184 = tpu.matmul %181, %183, %cst_142 {dimension_numbers = #tpu.dot_dimension_numbers<[1], [0], [0], [1], [0, 0, 1, 1], [], []>} : vector<288x16xbf16>, vector<16x16xbf16>, vector<288x16xf32> -> vector<288x16xf32>
    %185 = arith.addf %180, %184 : vector<288x16xf32>
    %c20_143 = arith.constant 20 : index
    %c0_144 = arith.constant 0 : index
    %186 = vector.load %arg10[%c20_143, %c0_144] : memref<342x16xbf16, #tpu.memory_space<vmem>>, vector<288x16xbf16>
    %c5_145 = arith.constant 5 : index
    %c0_146 = arith.constant 0 : index
    %c0_147 = arith.constant 0 : index
    %187 = vector.load %arg5[%c5_145, %c0_146, %c0_147] : memref<9x16x16xbf16, #tpu.memory_space<vmem>>, vector<1x16x16xbf16>
    %188 = vector.shape_cast %187 : vector<1x16x16xbf16> to vector<16x16xbf16>
    %cst_148 = arith.constant dense<0.000000e+00> : vector<288x16xf32>
    %189 = tpu.matmul %186, %188, %cst_148 {dimension_numbers = #tpu.dot_dimension_numbers<[1], [0], [0], [1], [0, 0, 1, 1], [], []>} : vector<288x16xbf16>, vector<16x16xbf16>, vector<288x16xf32> -> vector<288x16xf32>
    %190 = arith.addf %185, %189 : vector<288x16xf32>
    %c36_149 = arith.constant 36 : index
    %c0_150 = arith.constant 0 : index
    %191 = vector.load %arg10[%c36_149, %c0_150] : memref<342x16xbf16, #tpu.memory_space<vmem>>, vector<288x16xbf16>
    %c6_151 = arith.constant 6 : index
    %c0_152 = arith.constant 0 : index
    %c0_153 = arith.constant 0 : index
    %192 = vector.load %arg5[%c6_151, %c0_152, %c0_153] : memref<9x16x16xbf16, #tpu.memory_space<vmem>>, vector<1x16x16xbf16>
    %193 = vector.shape_cast %192 : vector<1x16x16xbf16> to vector<16x16xbf16>
    %cst_154 = arith.constant dense<0.000000e+00> : vector<288x16xf32>
    %194 = tpu.matmul %191, %193, %cst_154 {dimension_numbers = #tpu.dot_dimension_numbers<[1], [0], [0], [1], [0, 0, 1, 1], [], []>} : vector<288x16xbf16>, vector<16x16xbf16>, vector<288x16xf32> -> vector<288x16xf32>
    %195 = arith.addf %190, %194 : vector<288x16xf32>
    %c37_155 = arith.constant 37 : index
    %c0_156 = arith.constant 0 : index
    %196 = vector.load %arg10[%c37_155, %c0_156] : memref<342x16xbf16, #tpu.memory_space<vmem>>, vector<288x16xbf16>
    %c7_157 = arith.constant 7 : index
    %c0_158 = arith.constant 0 : index
    %c0_159 = arith.constant 0 : index
    %197 = vector.load %arg5[%c7_157, %c0_158, %c0_159] : memref<9x16x16xbf16, #tpu.memory_space<vmem>>, vector<1x16x16xbf16>
    %198 = vector.shape_cast %197 : vector<1x16x16xbf16> to vector<16x16xbf16>
    %cst_160 = arith.constant dense<0.000000e+00> : vector<288x16xf32>
    %199 = tpu.matmul %196, %198, %cst_160 {dimension_numbers = #tpu.dot_dimension_numbers<[1], [0], [0], [1], [0, 0, 1, 1], [], []>} : vector<288x16xbf16>, vector<16x16xbf16>, vector<288x16xf32> -> vector<288x16xf32>
    %200 = arith.addf %195, %199 : vector<288x16xf32>
    %c38_161 = arith.constant 38 : index
    %c0_162 = arith.constant 0 : index
    %201 = vector.load %arg10[%c38_161, %c0_162] : memref<342x16xbf16, #tpu.memory_space<vmem>>, vector<288x16xbf16>
    %c8_163 = arith.constant 8 : index
    %c0_164 = arith.constant 0 : index
    %c0_165 = arith.constant 0 : index
    %202 = vector.load %arg5[%c8_163, %c0_164, %c0_165] : memref<9x16x16xbf16, #tpu.memory_space<vmem>>, vector<1x16x16xbf16>
    %203 = vector.shape_cast %202 : vector<1x16x16xbf16> to vector<16x16xbf16>
    %cst_166 = arith.constant dense<0.000000e+00> : vector<288x16xf32>
    %204 = tpu.matmul %201, %203, %cst_166 {dimension_numbers = #tpu.dot_dimension_numbers<[1], [0], [0], [1], [0, 0, 1, 1], [], []>} : vector<288x16xbf16>, vector<16x16xbf16>, vector<288x16xf32> -> vector<288x16xf32>
    %205 = arith.addf %200, %204 : vector<288x16xf32>
    %206 = vector.broadcast %161 : vector<1x16xf32> to vector<288x16xf32>
    %207 = arith.addf %205, %206 : vector<288x16xf32>
    %cst_167 = arith.constant 0.000000e+00 : f32
    %208 = vector.broadcast %cst_167 : f32 to vector<288x16xf32>
    %209 = arith.maximumf %207, %208 : vector<288x16xf32>
    %c0_168 = arith.constant 0 : index
    %c0_169 = arith.constant 0 : index
    %210 = vector.load %arg3[%c0_168, %c0_169] : memref<288x1xf32, #tpu.memory_space<vmem>>, vector<288x1xf32>
    %cst_170 = arith.constant 0.000000e+00 : f32
    %211 = vector.broadcast %cst_170 : f32 to vector<288x1xf32>
    %212 = arith.cmpf ogt, %210, %211 : vector<288x1xf32>
    %cst_171 = arith.constant 0.000000e+00 : f32
    %213 = vector.shape_cast %212 : vector<288x1xi1> to vector<288x1xi1>
    %214 = vector.broadcast %213 : vector<288x1xi1> to vector<288x16xi1>
    %215 = vector.broadcast %cst_171 : f32 to vector<288x16xf32>
    %216 = arith.select %214, %209, %215 : vector<288x16xi1>, vector<288x16xf32>
    %217 = arith.truncf %216 : vector<288x16xf32> to vector<288x16xbf16>
    %c19_172 = arith.constant 19 : index
    %c0_173 = arith.constant 0 : index
    %218 = vector.load %arg11[%c19_172, %c0_173] : memref<342x16xbf16, #tpu.memory_space<vmem>>, vector<288x16xbf16>
    tpu.vector_store %arg11[%c19_172, %c0_173], %217 {strides = array<i32>} : memref<342x16xbf16, #tpu.memory_space<vmem>>, vector<288x16xbf16>,
    %c2_174 = arith.constant 2 : index
    %c0_175 = arith.constant 0 : index
    %219 = vector.load %arg7[%c2_174, %c0_175] : memref<3x16xf32, #tpu.memory_space<vmem>>, vector<1x16xf32>
    %c0_176 = arith.constant 0 : index
    %c0_177 = arith.constant 0 : index
    %220 = vector.load %arg11[%c0_176, %c0_177] : memref<342x16xbf16, #tpu.memory_space<vmem>>, vector<288x16xbf16>
    %c0_178 = arith.constant 0 : index
    %c0_179 = arith.constant 0 : index
    %c0_180 = arith.constant 0 : index
    %221 = vector.load %arg6[%c0_178, %c0_179, %c0_180] : memref<9x16x16xbf16, #tpu.memory_space<vmem>>, vector<1x16x16xbf16>
    %222 = vector.shape_cast %221 : vector<1x16x16xbf16> to vector<16x16xbf16>
    %cst_181 = arith.constant dense<0.000000e+00> : vector<288x16xf32>
    %223 = tpu.matmul %220, %222, %cst_181 {dimension_numbers = #tpu.dot_dimension_numbers<[1], [0], [0], [1], [0, 0, 1, 1], [], []>} : vector<288x16xbf16>, vector<16x16xbf16>, vector<288x16xf32> -> vector<288x16xf32>
    %c1_182 = arith.constant 1 : index
    %c0_183 = arith.constant 0 : index
    %224 = vector.load %arg11[%c1_182, %c0_183] : memref<342x16xbf16, #tpu.memory_space<vmem>>, vector<288x16xbf16>
    %c1_184 = arith.constant 1 : index
    %c0_185 = arith.constant 0 : index
    %c0_186 = arith.constant 0 : index
    %225 = vector.load %arg6[%c1_184, %c0_185, %c0_186] : memref<9x16x16xbf16, #tpu.memory_space<vmem>>, vector<1x16x16xbf16>
    %226 = vector.shape_cast %225 : vector<1x16x16xbf16> to vector<16x16xbf16>
    %cst_187 = arith.constant dense<0.000000e+00> : vector<288x16xf32>
    %227 = tpu.matmul %224, %226, %cst_187 {dimension_numbers = #tpu.dot_dimension_numbers<[1], [0], [0], [1], [0, 0, 1, 1], [], []>} : vector<288x16xbf16>, vector<16x16xbf16>, vector<288x16xf32> -> vector<288x16xf32>
    %228 = arith.addf %223, %227 : vector<288x16xf32>
    %c2_188 = arith.constant 2 : index
    %c0_189 = arith.constant 0 : index
    %229 = vector.load %arg11[%c2_188, %c0_189] : memref<342x16xbf16, #tpu.memory_space<vmem>>, vector<288x16xbf16>
    %c2_190 = arith.constant 2 : index
    %c0_191 = arith.constant 0 : index
    %c0_192 = arith.constant 0 : index
    %230 = vector.load %arg6[%c2_190, %c0_191, %c0_192] : memref<9x16x16xbf16, #tpu.memory_space<vmem>>, vector<1x16x16xbf16>
    %231 = vector.shape_cast %230 : vector<1x16x16xbf16> to vector<16x16xbf16>
    %cst_193 = arith.constant dense<0.000000e+00> : vector<288x16xf32>
    %232 = tpu.matmul %229, %231, %cst_193 {dimension_numbers = #tpu.dot_dimension_numbers<[1], [0], [0], [1], [0, 0, 1, 1], [], []>} : vector<288x16xbf16>, vector<16x16xbf16>, vector<288x16xf32> -> vector<288x16xf32>
    %233 = arith.addf %228, %232 : vector<288x16xf32>
    %c18_194 = arith.constant 18 : index
    %c0_195 = arith.constant 0 : index
    %234 = vector.load %arg11[%c18_194, %c0_195] : memref<342x16xbf16, #tpu.memory_space<vmem>>, vector<288x16xbf16>
    %c3_196 = arith.constant 3 : index
    %c0_197 = arith.constant 0 : index
    %c0_198 = arith.constant 0 : index
    %235 = vector.load %arg6[%c3_196, %c0_197, %c0_198] : memref<9x16x16xbf16, #tpu.memory_space<vmem>>, vector<1x16x16xbf16>
    %236 = vector.shape_cast %235 : vector<1x16x16xbf16> to vector<16x16xbf16>
    %cst_199 = arith.constant dense<0.000000e+00> : vector<288x16xf32>
    %237 = tpu.matmul %234, %236, %cst_199 {dimension_numbers = #tpu.dot_dimension_numbers<[1], [0], [0], [1], [0, 0, 1, 1], [], []>} : vector<288x16xbf16>, vector<16x16xbf16>, vector<288x16xf32> -> vector<288x16xf32>
    %238 = arith.addf %233, %237 : vector<288x16xf32>
    %c19_200 = arith.constant 19 : index
    %c0_201 = arith.constant 0 : index
    %239 = vector.load %arg11[%c19_200, %c0_201] : memref<342x16xbf16, #tpu.memory_space<vmem>>, vector<288x16xbf16>
    %c4_202 = arith.constant 4 : index
    %c0_203 = arith.constant 0 : index
    %c0_204 = arith.constant 0 : index
    %240 = vector.load %arg6[%c4_202, %c0_203, %c0_204] : memref<9x16x16xbf16, #tpu.memory_space<vmem>>, vector<1x16x16xbf16>
    %241 = vector.shape_cast %240 : vector<1x16x16xbf16> to vector<16x16xbf16>
    %cst_205 = arith.constant dense<0.000000e+00> : vector<288x16xf32>
    %242 = tpu.matmul %239, %241, %cst_205 {dimension_numbers = #tpu.dot_dimension_numbers<[1], [0], [0], [1], [0, 0, 1, 1], [], []>} : vector<288x16xbf16>, vector<16x16xbf16>, vector<288x16xf32> -> vector<288x16xf32>
    %243 = arith.addf %238, %242 : vector<288x16xf32>
    %c20_206 = arith.constant 20 : index
    %c0_207 = arith.constant 0 : index
    %244 = vector.load %arg11[%c20_206, %c0_207] : memref<342x16xbf16, #tpu.memory_space<vmem>>, vector<288x16xbf16>
    %c5_208 = arith.constant 5 : index
    %c0_209 = arith.constant 0 : index
    %c0_210 = arith.constant 0 : index
    %245 = vector.load %arg6[%c5_208, %c0_209, %c0_210] : memref<9x16x16xbf16, #tpu.memory_space<vmem>>, vector<1x16x16xbf16>
    %246 = vector.shape_cast %245 : vector<1x16x16xbf16> to vector<16x16xbf16>
    %cst_211 = arith.constant dense<0.000000e+00> : vector<288x16xf32>
    %247 = tpu.matmul %244, %246, %cst_211 {dimension_numbers = #tpu.dot_dimension_numbers<[1], [0], [0], [1], [0, 0, 1, 1], [], []>} : vector<288x16xbf16>, vector<16x16xbf16>, vector<288x16xf32> -> vector<288x16xf32>
    %248 = arith.addf %243, %247 : vector<288x16xf32>
    %c36_212 = arith.constant 36 : index
    %c0_213 = arith.constant 0 : index
    %249 = vector.load %arg11[%c36_212, %c0_213] : memref<342x16xbf16, #tpu.memory_space<vmem>>, vector<288x16xbf16>
    %c6_214 = arith.constant 6 : index
    %c0_215 = arith.constant 0 : index
    %c0_216 = arith.constant 0 : index
    %250 = vector.load %arg6[%c6_214, %c0_215, %c0_216] : memref<9x16x16xbf16, #tpu.memory_space<vmem>>, vector<1x16x16xbf16>
    %251 = vector.shape_cast %250 : vector<1x16x16xbf16> to vector<16x16xbf16>
    %cst_217 = arith.constant dense<0.000000e+00> : vector<288x16xf32>
    %252 = tpu.matmul %249, %251, %cst_217 {dimension_numbers = #tpu.dot_dimension_numbers<[1], [0], [0], [1], [0, 0, 1, 1], [], []>} : vector<288x16xbf16>, vector<16x16xbf16>, vector<288x16xf32> -> vector<288x16xf32>
    %253 = arith.addf %248, %252 : vector<288x16xf32>
    %c37_218 = arith.constant 37 : index
    %c0_219 = arith.constant 0 : index
    %254 = vector.load %arg11[%c37_218, %c0_219] : memref<342x16xbf16, #tpu.memory_space<vmem>>, vector<288x16xbf16>
    %c7_220 = arith.constant 7 : index
    %c0_221 = arith.constant 0 : index
    %c0_222 = arith.constant 0 : index
    %255 = vector.load %arg6[%c7_220, %c0_221, %c0_222] : memref<9x16x16xbf16, #tpu.memory_space<vmem>>, vector<1x16x16xbf16>
    %256 = vector.shape_cast %255 : vector<1x16x16xbf16> to vector<16x16xbf16>
    %cst_223 = arith.constant dense<0.000000e+00> : vector<288x16xf32>
    %257 = tpu.matmul %254, %256, %cst_223 {dimension_numbers = #tpu.dot_dimension_numbers<[1], [0], [0], [1], [0, 0, 1, 1], [], []>} : vector<288x16xbf16>, vector<16x16xbf16>, vector<288x16xf32> -> vector<288x16xf32>
    %258 = arith.addf %253, %257 : vector<288x16xf32>
    %c38_224 = arith.constant 38 : index
    %c0_225 = arith.constant 0 : index
    %259 = vector.load %arg11[%c38_224, %c0_225] : memref<342x16xbf16, #tpu.memory_space<vmem>>, vector<288x16xbf16>
    %c8_226 = arith.constant 8 : index
    %c0_227 = arith.constant 0 : index
    %c0_228 = arith.constant 0 : index
    %260 = vector.load %arg6[%c8_226, %c0_227, %c0_228] : memref<9x16x16xbf16, #tpu.memory_space<vmem>>, vector<1x16x16xbf16>
    %261 = vector.shape_cast %260 : vector<1x16x16xbf16> to vector<16x16xbf16>
    %cst_229 = arith.constant dense<0.000000e+00> : vector<288x16xf32>
    %262 = tpu.matmul %259, %261, %cst_229 {dimension_numbers = #tpu.dot_dimension_numbers<[1], [0], [0], [1], [0, 0, 1, 1], [], []>} : vector<288x16xbf16>, vector<16x16xbf16>, vector<288x16xf32> -> vector<288x16xf32>
    %263 = arith.addf %258, %262 : vector<288x16xf32>
    %264 = vector.broadcast %219 : vector<1x16xf32> to vector<288x16xf32>
    %265 = arith.addf %263, %264 : vector<288x16xf32>
    %cst_230 = arith.constant 0.000000e+00 : f32
    %266 = vector.broadcast %cst_230 : f32 to vector<288x16xf32>
    %267 = arith.maximumf %265, %266 : vector<288x16xf32>
    %268 = arith.truncf %267 : vector<288x16xf32> to vector<288x16xbf16>
    %c0_231 = arith.constant 0 : index
    %c0_232 = arith.constant 0 : index
    %c0_233 = arith.constant 0 : index
    %269 = vector.load %arg8[%c0_231, %c0_232, %c0_233] : memref<1x288x16xbf16, #tpu.memory_space<vmem>>, vector<1x288x16xbf16>
    %270 = vector.shape_cast %269 : vector<1x288x16xbf16> to vector<288x16xbf16>
    %271 = vector.shape_cast %268 : vector<288x16xbf16> to vector<1x288x16xbf16>
    tpu.vector_store %arg8[%c0_231, %c0_232, %c0_233], %271 {strides = array<i32>} : memref<1x288x16xbf16, #tpu.memory_space<vmem>>, vector<1x288x16xbf16>,
    return
  }
  func.func @transform_0(%arg0: i32) -> (i32, i32, i32, i32) {
    %c0_i32 = arith.constant 0 : i32
    %c0_i32_0 = arith.constant 0 : i32
    %c0_i32_1 = arith.constant 0 : i32
    %c0_i32_2 = arith.constant 0 : i32
    return %arg0, %c0_i32, %c0_i32_0, %c0_i32_1 : i32, i32, i32, i32
  }
  func.func @transform_1(%arg0: i32) -> (i32, i32, i32, i32) {
    %c0_i32 = arith.constant 0 : i32
    %c0_i32_0 = arith.constant 0 : i32
    %c0_i32_1 = arith.constant 0 : i32
    %c0_i32_2 = arith.constant 0 : i32
    return %arg0, %c0_i32, %c0_i32_0, %c0_i32_1 : i32, i32, i32, i32
  }
  func.func @transform_2(%arg0: i32) -> (i32, i32) {
    %c0_i32 = arith.constant 0 : i32
    %c0_i32_0 = arith.constant 0 : i32
    %c0_i32_1 = arith.constant 0 : i32
    return %c0_i32, %c0_i32_0 : i32, i32
  }
  func.func @transform_3(%arg0: i32) -> (i32, i32, i32) {
    %c0_i32 = arith.constant 0 : i32
    %c0_i32_0 = arith.constant 0 : i32
    %c0_i32_1 = arith.constant 0 : i32
    %c0_i32_2 = arith.constant 0 : i32
    return %c0_i32, %c0_i32_0, %c0_i32_1 : i32, i32, i32
  }
  func.func @transform_4(%arg0: i32) -> (i32, i32, i32) {
    %c0_i32 = arith.constant 0 : i32
    %c0_i32_0 = arith.constant 0 : i32
    %c0_i32_1 = arith.constant 0 : i32
    %c0_i32_2 = arith.constant 0 : i32
    return %c0_i32, %c0_i32_0, %c0_i32_1 : i32, i32, i32
  }
  func.func @transform_5(%arg0: i32) -> (i32, i32, i32) {
    %c0_i32 = arith.constant 0 : i32
    %c0_i32_0 = arith.constant 0 : i32
    %c0_i32_1 = arith.constant 0 : i32
    %c0_i32_2 = arith.constant 0 : i32
    return %c0_i32, %c0_i32_0, %c0_i32_1 : i32, i32, i32
  }
  func.func @transform_6(%arg0: i32) -> (i32, i32) {
    %c0_i32 = arith.constant 0 : i32
    %c0_i32_0 = arith.constant 0 : i32
    %c0_i32_1 = arith.constant 0 : i32
    return %c0_i32, %c0_i32_0 : i32, i32
  }
  func.func @transform_7(%arg0: i32) -> (i32, i32, i32) {
    %c0_i32 = arith.constant 0 : i32
    %c0_i32_0 = arith.constant 0 : i32
    %c0_i32_1 = arith.constant 0 : i32
    return %arg0, %c0_i32, %c0_i32_0 : i32, i32, i32
  }
}

</mosaic_0001>

<bundles_post_ra>
// kernel: tpu_custom_call.1
= control target key start
LH: loop header
LB: loop body
LE: loop exit
PB: predicated region body
PF: predicated region fallthrough
CT: control target
= control target key end

     0   :  { %12 = vsyncpa [#allocation6], 0  ;;  %s22188_s0 = inlined_call_operand.hbm [shape: bf16[2,8,16,16], index: 0, kind: input, shape index: {}]   ;;  %s22189_s1 = inlined_call_operand.vmem [shape: s32[2,8,16,16], index: 1, kind: input, shape index: {}]   ;;  %s22190_s2 = inlined_call_operand.vmem [shape: f32[288,1], index: 2, kind: input, shape index: {}]   ;;  %s22191_s3 = inlined_call_operand.hbm [shape: bf16[9,16,16], index: 3, kind: input, shape index: {}]   ;;  %s22192_s4 = inlined_call_operand.hbm [shape: bf16[9,16,16], index: 4, kind: input, shape index: {}]   ;;  %s22193_s5 = inlined_call_operand.hbm [shape: bf16[9,16,16], index: 5, kind: input, shape index: {}]   ;;  %s22194_s6 = inlined_call_operand.vmem [shape: f32[3,16], index: 6, kind: input, shape index: {}]   ;;  %s22195_s7 = inlined_call_operand.vmem [shape: bf16[2,288,16], index: 7, kind: output, shape index: {}]  }
   0x1   :  { %14 = vsyncpa [#allocation6 + $0x1], 0 }
   0x2   :  { %15 = vsyncpa [#allocation8], 0 }
   0x3   :  { %16 = vsyncpa [#allocation11], 0  ;;  %s17625_s24 = smov 0   ;;  %s17627_s25 = smov 0  }
   0x4   :  { %s17629_s26 = smov 0   ;;  %s17631_s27 = smov 0  }
   0x5 LB: > { %s17644_s28 = sadd.s32 4294967295, %s17576_s27   ;;  %p42_p0 = scmp.ne.s32.totalorder %s17568_s25, %s17564_s24  ;;  %s17576_s27 = sphi %s17631_s27, %s23441_s27   ;;  %s17572_s26 = sphi %s17629_s26, %s23440_s26   ;;  %s17568_s25 = sphi %s17627_s25, %s23439_s25   ;;  %s17564_s24 = sphi %s17625_s24, %s23438_s24  }
   0x6   : > { %p22196_p1 = scmp.eq.s32.totalorder %s17644_s28, 0  ;;  %p13727_p2 = scmp.ge.s32.totalorder %s17576_s27, 1 }
   0x7   : > { %p210_p3 = scmp.lt.s32.totalorder %s17576_s27, 3  ;;  %s17578_s8 = smov [#allocation7]  }
   0x8   : > { %p17652_p4 = por %p22196_p1, %p42_p0  ;;  %s225_s9 = sshll.u32 %s17578_s8, 4  ;;  %s17660_s9 = int_to_ptr.vmem [resolvable:$true] %s225_s9 }
   0x9   : > { %p17656_p5 = pnand %p13727_p2, %p210_p3  ;;  %s17579_s11 = smov [#allocation9]  }
   0xa   : > { %s22277_s29 = scalar_select %p17652_p4, 1, 0 }
   0xb   : > { %s22278_s30 = scalar_select %p17656_p5, 1, 0 }
   0xc   : > { %p17085_p6 = pneg %p17656_p5  ;;  %s238_s12 = sshll.u32 %s17579_s11, 4  ;;  %s17670_s12 = int_to_ptr.vmem [resolvable:$true] %s238_s12 }
   0xd   : > { %s17580_s13 = smov [#allocation10]   ;;  %s17420_s17 = scalar_lea.hbm %s22191_s3, 1152 }
   0xe   : > { %p17666_p7 = pnand %p17085_p6, %p22196_p1  ;;  %s17672_s14 = sshll.u32 %s17580_s13, 4  ;;  %s252_s14 = int_to_ptr.vmem [resolvable:$true] %s17672_s14 }
   0xf   : > { %p17421_p8 = scmp.ne.s32.totalorder %s22191_s3, %s17420_s17  ;;  %p17427_p12 = scmp.lt.u32.totalorder %s17420_s17, %s22191_s3 }
  0x10   : > { %p17682_p9 = pneg %p17666_p7 }
  0x12   : > { %p17423_p10 = pnand %p17682_p9, %p17421_p8 }
  0x14   : > { %p17424_p11 = pneg %p17423_p10 }
  0x16   : > { %p17429_p13 = pnand %p17427_p12, %p17424_p11 }
  0x18   : > { %17432 = shalt.err (!%p17429_p13)
}
  0x19   : > { %s17433_s23 = scalar_lea.vmem %s17660_s9, 1152  ;;  %p17441_p6 = scmp.lt.s32.totalorder %s17660_s9, %s17660_s9 }
  0x1a   : > { %p17434_p0 = scmp.ne.s32.totalorder %s17660_s9, %s17433_s23  ;;  %p17442_p1 = scmp.lt.s32.totalorder %s17433_s23, %s17433_s23 }
  0x1c   : > { %p17436_p2 = pnand %p17434_p0, %p17682_p9  ;;  %p17443_p8 = por %p17442_p1, %p17441_p6 }
  0x1e   : > { %p17437_p3 = pneg %p17436_p2 }
  0x20   : > { %p17444_p10 = pnand %p17443_p8, %p17437_p3 }
  0x22   : > { %17447 = shalt.err (!%p17444_p10)
}
  0x23   : > { %s17581_s24 = smov 64   ;;  %s17582_s8 = smov 4  }
  0x24   : > { %17088 = dma.hbm_to_vmem [thread:$0]  (!%p17666_p7), %s22191_s3, 1152, %s17660_s9, [#allocation8], %s17581_s24, %s17581_s24, %s17582_s8  }
  0x25   : > { %s17448_s17 = scalar_lea.hbm %s22192_s4, 1152 }
  0x26   : > { %p17449_p1 = scmp.ne.s32.totalorder %s22192_s4, %s17448_s17  ;;  %p17455_p13 = scmp.lt.u32.totalorder %s17448_s17, %s22192_s4 }
  0x28   : > { %p17451_p11 = pnand %p17449_p1, %p17682_p9 }
  0x2a   : > { %p17452_p12 = pneg %p17451_p11 }
  0x2c   : > { %p17457_p0 = pnand %p17455_p13, %p17452_p12 }
  0x2e   : > { %17460 = shalt.err (!%p17457_p0)
}
  0x2f   : > { %s17461_s9 = scalar_lea.vmem %s17670_s12, 1152  ;;  %p17469_p8 = scmp.lt.s32.totalorder %s17670_s12, %s17670_s12 }
  0x30   : > { %p17462_p2 = scmp.ne.s32.totalorder %s17670_s12, %s17461_s9  ;;  %p17470_p10 = scmp.lt.s32.totalorder %s17461_s9, %s17461_s9 }
  0x32   : > { %p17464_p3 = pnand %p17462_p2, %p17682_p9  ;;  %p17471_p1 = por %p17470_p10, %p17469_p8 }
  0x34   : > { %p17465_p6 = pneg %p17464_p3 }
  0x36   : > { %p17472_p11 = pnand %p17471_p1, %p17465_p6 }
  0x38   : > { %17475 = shalt.err (!%p17472_p11)
}
  0x39   : > { %17091 = dma.hbm_to_vmem [thread:$0]  (!%p17666_p7), %s22192_s4, 1152, %s17670_s12, [#allocation8], %s17581_s24, %s17581_s24, %s17582_s8  }
  0x3a   : > { %s17476_s16 = scalar_lea.hbm %s22193_s5, 1152 }
  0x3b   : > { %p17477_p12 = scmp.ne.s32.totalorder %s22193_s5, %s17476_s16  ;;  %p17483_p2 = scmp.lt.u32.totalorder %s17476_s16, %s22193_s5 }
  0x3d   : > { %p17479_p13 = pnand %p17477_p12, %p17682_p9 }
  0x3f   : > { %p17480_p0 = pneg %p17479_p13 }
  0x41   : > { %p17485_p3 = pnand %p17483_p2, %p17480_p0 }
  0x43   : > { %17488 = shalt.err (!%p17485_p3)
}
  0x44   : > { %s17489_s22 = scalar_lea.vmem %s252_s14, 1152  ;;  %p17497_p1 = scmp.lt.s32.totalorder %s252_s14, %s252_s14 }
  0x45   : > { %p17490_p6 = scmp.ne.s32.totalorder %s252_s14, %s17489_s22  ;;  %p17498_p11 = scmp.lt.s32.totalorder %s17489_s22, %s17489_s22 }
  0x47   : > { %p17492_p8 = pnand %p17490_p6, %p17682_p9  ;;  %p17499_p4 = por %p17498_p11, %p17497_p1 }
  0x49   : > { %p17493_p10 = pneg %p17492_p8 }
  0x4b   : > { %p17500_p5 = pnand %p17499_p4, %p17493_p10 }
  0x4d   : > { %17503 = shalt.err (!%p17500_p5)
}
  0x4e   : > { %17094 = dma.hbm_to_vmem [thread:$0]  (!%p17666_p7), %s22193_s5, 1152, %s252_s14, [#allocation11], %s17581_s24, %s17581_s24, %s17582_s8  }
  0x4f   : > { %s17755_s20 = sadd.s32 1, %s17576_s27   ;;  %s29_s23 = sadd.s32 1, %s17572_s26 }
  0x50   : > { %s26_s10 = ssub.s32 %s17576_s27, %s17755_s20  ;;  %p36_p5 = scmp.ne.s32.totalorder %s17572_s26, %s17568_s25 }
  0x51   : > { %p27_p4 = scmp.eq.s32.totalorder %s26_s10, 0  ;;  %p37_p9 = scmp.eq.s32.totalorder %s17576_s27, 0 }
  0x52   : > { %p17102_p12 = scmp.lt.s32.totalorder %s17576_s27, 2  ;;  %s268_s13 = sand.u32 1, %s17572_s26  }
  0x53   : > { %s17765_s11 = scalar_select %p27_p4, %s17572_s26, %s29_s23  }
  0x54   : > { %p38_p13 = por %p37_p9, %p36_p5  ;;  %s13732_s15 = sshll.u32 %s268_s13, 6 }
  0x55   : > { %s14555_s16 = sshll.u32 %s17576_s27, 10  ;;  %s272_s14 = scalar_lea.vmem [#allocation5], %s13732_s15 }
  0x56   : > { %s17772_s19 = scalar_lea.hbm %s22188_s0, %s14555_s16  ;;  %s279_s21 = sshll.u32 %s272_s14, 4  ;;  %s17774_s21 = int_to_ptr.vmem [resolvable:$true] %s279_s21 }
  0x57   : > { %p17776_p7 = pnand %p17102_p12, %p38_p13  ;;  %s17780_s27 = scalar_lea.sflag [#allocation6], %s268_s13 }
  0x58   : > { %s17504_s12 = scalar_lea.hbm %s17772_s19, 1024  ;;  %s17509_s23 = scalar_lea.hbm %s22188_s0, 2048 }
  0x59   : > { %p17505_p0 = scmp.ne.s32.totalorder %s17772_s19, %s17504_s12  ;;  %p17506_p2 = pneg %p17776_p7 }
  0x5a   : > { %p17510_p8 = scmp.lt.u32.totalorder %s17772_s19, %s22188_s0  ;;  %p17511_p10 = scmp.lt.u32.totalorder %s17509_s23, %s17504_s12 }
  0x5b   : > { %p17507_p3 = pnand %p17506_p2, %p17505_p0  ;;  %p17513_p11 = scmp.lt.u32.totalorder %s17504_s12, %s17772_s19 }
  0x5c   : > { %p17512_p1 = por %p17511_p10, %p17510_p8 }
  0x5d   : > { %p17508_p6 = pneg %p17507_p3 }
  0x5e   : > { %p17514_p4 = por %p17513_p11, %p17512_p1 }
  0x60   : > { %p17515_p5 = pnand %p17514_p4, %p17508_p6 }
  0x62   : > { %17518 = shalt.err (!%p17515_p5)
}
  0x63   : > { %s17519_s13 = scalar_lea.vmem %s17774_s21, 1024  ;;  %s17583_s17 = smov [#allocation5]  }
  0x64   : > { %p17520_p9 = scmp.ne.s32.totalorder %s17774_s21, %s17519_s13  ;;  %s17524_s18 = sshll.u32 %s17583_s17, 4  ;;  %s17525_s18 = int_to_ptr.vmem [resolvable:$false] %s17524_s18 }
  0x65   : > { %s17526_s14 = scalar_lea.vmem %s17525_s18, 2048  ;;  %p17527_p0 = scmp.lt.s32.totalorder %s17774_s21, %s17525_s18 }
  0x66   : > { %p17522_p12 = pnand %p17520_p9, %p17506_p2  ;;  %p17528_p3 = scmp.lt.s32.totalorder %s17526_s14, %s17519_s13 }
  0x68   : > { %p17523_p13 = pneg %p17522_p12  ;;  %p17529_p8 = por %p17528_p3, %p17527_p0 }
  0x6a   : > { %p17530_p10 = pnand %p17529_p8, %p17523_p13 }
  0x6c   : > { %17533 = shalt.err (!%p17530_p10)
}
  0x6d   : > { %17098 = dma.hbm_to_vmem [thread:$0]  (!%p17776_p7), %s17772_s19, 1024, %s17774_s21, %s17780_s27, %s17581_s24, %s17581_s24, %s17582_s8  }
  0x6e   : > { %p22282_p2 = scmp.ne.s32.totalorder %s22278_s30, 0 }
  0x70   : > { %299 = sbr.rel (%p22282_p2) target bundleno = 2550 (0x9f6), region = 48 }
  0x77   : > { %s301_s12 = sand.u32 1, %s17568_s25   ;;  %p22283_p6 = scmp.ne.s32.totalorder %s22277_s29, 0 }
  0x78   : > { %s13736_s9 = sshll.u32 %s301_s12, 6  ;;  %s302_s10 = scalar_lea.sflag [#allocation6], %s301_s12 }
  0x79   : > { %s17814_s23 = scalar_lea.vmem [#allocation5], %s13736_s9 }
  0x7a   : > { %17551 = dma.done.wait (%p22283_p6), %s302_s10, 1024  }
  0x7b   : > { %17553 = vsyncadd (%p22283_p6), %s302_s10, 4294966272  ;;  %p22284_p1 = scmp.eq.s32.totalorder %s17644_s28, 0 }
  0x7d   : > { %17555 = dma.done.wait (%p22284_p1), [#allocation8], 2304   ;;  %p22285_p7 = pmov %p22284_p1 }
  0x7e   : > { %p22286_p11 = pmov %p22284_p1 }
  0x7f   : > { %17557 = vsyncadd (%p22285_p7), [#allocation8], 4294964992 }
  0x80   : > { %17559 = dma.done.wait (%p22286_p11), [#allocation11], 1152   ;;  %p22287_p4 = pmov %p22284_p1 }
  0x81   : > { %p353_p5 = scmp.lt.s32.totalorder %s17644_s28, 1  ;;  %vm22200_vm0 = vcmask 125952   ;;  %vm22199_vm1 = vcmask 123904   ;;  %v426_v0 = vlaneseq  ;;  %v22235_v1 = vmov 0   ;;  %v17146_v4 = vld [vmem:[#allocation7 + $0x8] sm:$0xff]   ;;  %v17147_v6 = vld [vmem:[#allocation7 + $0x20] sm:$0xff]  }
  0x82   : > { %17561 = vsyncadd (%p22287_p4), [#allocation11], 4294966144  ;;  %365 = vst.msk [vmem:[#allocation2] sm:$0xf] %vm22200_vm0, %v22235_v1  ;;  %vm373_vm2 = vcmask 125953   ;;  %17144 = vset.pattern.permute.xlu0 %v22235_v1  ;;  %17145 = vset.pattern.permute.xlu1 %v22235_v1  ;;  %v22288_v8 = vmov 0 }
  0x83   : > { %366 = vst.msk [vmem:[#allocation2 + $0x4] sm:$0xf] %vm22200_vm0, %v22235_v1  ;;  %375 = vst.msk [vmem:[#allocation2 + $0x9c] sm:$0xf] %vm22200_vm0, %v22235_v1  ;;  %s23443_s28 = smov (!%p353_p5, %s17644_s28), 1  ;;  %v17860_v2 = vshrl.u32 %v426_v0, 7  ;;  %15178 = vmatprep.subr.bf16.mxu1 %v17146_v4  ;;  %15330 = vmatprep.subr.bf16.mxu0 %v17147_v6 }
  0x84   : > { %377 = vst.msk [vmem:[#allocation2 + $0xa0] sm:$0x3] %vm22199_vm1, %v22235_v1  ;;  %385 = vst.msk [vmem:[#allocation3 + $0xa0] sm:$0x3] %vm22199_vm1, %v22235_v1  ;;  %s14556_s29 = sshll.u32 %s23443_s28, 7  ;;  %15179 = vmatpush3.bf16.msra.mxu1 %v17146_v4  ;;  %15331 = vmatpush3.bf16.msra.mxu0 %v17147_v6  ;;  %v17897_v20 = vld [vmem:[#allocation7 + $0x28] sm:$0xff]  }
  0x85   : > { %378 = vst.msk [vmem:[#allocation3] sm:$0xf] %vm22200_vm0, %v22235_v1  ;;  %379 = vst.msk [vmem:[#allocation3 + $0x4] sm:$0xf] %vm22200_vm0, %v22235_v1  ;;  %vm368_vm3 = vsmask.f32 1280  ;;  %s17875_s8 = scalar_lea.vmem %s22189_s1, %s14556_s29  ;;  %15368 = vmatprep.subr.bf16.mxu0 %v17897_v20 }
  0x86   : > { %384 = vst.msk [vmem:[#allocation3 + $0x9c] sm:$0xf] %vm22200_vm0, %v22235_v1  ;;  %386 = vst.msk [vmem:[#allocation4] sm:$0xf] %vm22200_vm0, %v22235_v1  ;;  %v17870_v3 = vadd.s32 8, %v17860_v2  ;;  %v778_v5 = vadd.s32 16, %v17860_v2 }
  0x87   : > { %387 = vst.msk [vmem:[#allocation4 + $0x4] sm:$0xf] %vm22200_vm0, %v22235_v1  ;;  %392 = vst.msk [vmem:[#allocation4 + $0x9c] sm:$0xf] %vm22200_vm0, %v22235_v1  ;;  %vm491_vm4 = vsmask.f32 5392 }
  0x88   : > { %393 = vst.msk [vmem:[#allocation4 + $0xa0] sm:$0x3] %vm22199_vm1, %v22235_v1  ;;  %v779_v7 = vadd.s32 16, %v17870_v3  ;;  %vm17881_vm5 = vmand %vm22199_vm1, %vm368_vm3  ;;  %v370_v9 = vld [vmem:[#allocation2 + $0x8] sm:$0x3]  ;;  %v410_v12 = vld [vmem:[%s17875_s8] sm:$0xff] }
  0x89   : > { %374 = vst.msk [vmem:[#allocation2 + $0x98] sm:$0xe] %vm373_vm2, %v22235_v1  ;;  %383 = vst.msk [vmem:[#allocation3 + $0x98] sm:$0xe] %vm373_vm2, %v22235_v1  ;;  %v22289_v8 = vsel %vm17881_vm5, 4294967295, %v22288_v8  ;;  %v371_v10 = vsel %vm17881_vm5, 0, %v370_v9  ;;  %vm443_vm9 = vcmp.eq.s32.totalorder %v410_v12, %v17860_v2  ;;  %vm794_vm11 = vcmp.eq.s32.totalorder %v410_v12, %v778_v5 }
  0x8a   : > { %391 = vst.msk [vmem:[#allocation4 + $0x98] sm:$0xe] %vm373_vm2, %v22235_v1  ;;  %22290 = vst [vmem:[#allocation15_spill] sm:$0xff] %v22289_v8  ;;  %vm516_vm6 = vsmask.f32 7942  ;;  %v411_v13 = vld [vmem:[%s17875_s8 + $0x8] sm:$0xff] }
  0x8b   : > { %vm843_vm7 = vsmask.f32 6416  ;;  %v394_v11 = vld [vmem:[%s17814_s23] sm:$0xf]  ;;  %vm842_vm8 = vsmask.f32 2304  ;;  %vm444_vm10 = vcmp.eq.s32.totalorder %v411_v13, %v17870_v3  ;;  %vm459_vm12 = vmpackc.low %vm443_vm9, %vm443_vm9  ;;  %vm795_vm13 = vcmp.eq.s32.totalorder %v411_v13, %v779_v7 }
  0x8c   : > { %372 = vst [vmem:[#allocation2 + $0x8] sm:$0x3] %v371_v10  ;;  %v395_v14 = vld [vmem:[%s17814_s23 + $0x4] sm:$0xf]  ;;  %v1107_v15 = vld [vmem:[#allocation2] sm:$0xf]  ;;  %vm460_vm14 = vmpackc.low %vm444_vm10, %vm444_vm10 }
  0x8d   : > { %v1108_v16 = vld [vmem:[#allocation2 + $0x4] sm:$0xf]  ;;  %v429_v17 = vadd.s32 32, %v17860_v2  ;;  %v17895_v18 = vadd.s32 32, %v17870_v3  ;;  %v475_v19 = vsel %vm459_vm12, %v394_v11, 0  ;;  %vm556_vm15 = vcmask 125955   ;;  %vm810_vm9 = vmpackc.low %vm794_vm11, %vm794_vm11 }
  0x8e   : > { %vm571_vm0 = vcmask 122880   ;;  %v476_v21 = vsel %vm460_vm14, %v395_v14, 0  ;;  %v494_v22 = vshrl.u32 %v475_v19, 16  ;;  %v497_v23 = vshll.u32 %v475_v19, 16  ;;  %vm811_vm10 = vmpackc.low %vm795_vm13, %vm795_vm13  ;;  %v17907_v32 = vld [vmem:[%s17814_s23 + $0x8] sm:$0xf] }
  0x8f   : > { %v17901_v24 = vcombine.low %v1107_v15, %v1108_v16  ;;  %v503_v25 = vshrl.u32 %v476_v21, 16  ;;  %v506_v26 = vshll.u32 %v476_v21, 16  ;;  %v826_v27 = vsel %vm810_vm9, %v394_v11, 0  ;;  %v17910_v33 = vld [vmem:[%s17875_s8 + $0x10] sm:$0xff]  ;;  %vm17914_vm13 = vmand %vm373_vm2, %vm516_vm6  ;;  %v17920_v39 = vld [vmem:[%s17875_s8 + $0x18] sm:$0xff]  ;;  %s17070_s12 = smul.u32 144, %s23443_s28 }
  0x90   : > { %vm525_vm12 = vcmask 124929   ;;  %vm526_vm1 = vsmask.f32 2310  ;;  %vm557_vm14 = vsmask.f32 7950  ;;  %v496_v28 = vrot.slane %v494_v22, 6  ;;  %vm17924_vm9 = vmor %vm368_vm3, %vm491_vm4 }
  0x91   : > { %v499_v29 = vrot.slane %v497_v23, 7  ;;  %v827_v30 = vsel %vm811_vm10, %v395_v14, 0  ;;  %v846_v31 = vshrl.u32 %v826_v27, 16  ;;  %v505_v34 = vrot.slane %v503_v25, 6  ;;  %v17928_v46 = vld [vmem:[#allocation7] sm:$0xff]   ;;  %vm17933_vm6 = vmor %vm842_vm8, %vm843_vm7 }
  0x92   : > { %v508_v35 = vrot.slane %v506_v26, 7  ;;  %v22291_v36 = vmov 0  ;;  %v1244_v37 = vshrl.u32 %v17901_v24, 16  ;;  %v849_v38 = vshll.u32 %v826_v27, 16  ;;  %v522_v49 = vld [vmem:[#allocation2 + $0x10] sm:$0x3]  ;;  %15216 = vmatprep.subr.bf16.mxu1 %v17928_v46  ;;  %vm17951_vm11 = vmand %vm556_vm15, %vm557_vm14 }
  0x93   : > { %v22292_v36 = vsel %vm17914_vm13, 4294967295, %v22291_v36  ;;  %v22294_v40 = vmov 0  ;;  %v500_v41 = vor.u32 %v499_v29, %v496_v28  ;;  %v518_v42 = vld [vmem:[#allocation2 + $0x8] sm:$0xe]  ;;  %v848_v43 = vrot.slane %v846_v31, 5  ;;  %v17991_v28 = vld [vmem:[%s17875_s8 + $0x20] sm:$0xff] }
  0x94   : > { %22293 = vst [vmem:[#allocation16_spill] sm:$0xff] %v22292_v36  ;;  %v22295_v40 = vsel %vm17924_vm9, 4294967295, %v22294_v40  ;;  %v855_v44 = vshrl.u32 %v827_v30, 16  ;;  %v858_v45 = vshll.u32 %v827_v30, 16  ;;  %v509_v47 = vor.u32 %v508_v35, %v505_v34  ;;  %v17938_v52 = vld [vmem:[%s17814_s23 + $0xc] sm:$0xf] }
  0x95   : > { %22296 = vst [vmem:[#allocation17_spill] sm:$0xff] %v22295_v40  ;;  %v1246_v48 = vshll.u32 %v17901_v24, 16  ;;  %v851_v51 = vrot.slane %v849_v38, 6  ;;  %vm445_vm3 = vcmp.eq.s32.totalorder %v17910_v33, %v429_v17  ;;  %v501_v53 = vrot.slane %v500_v41, 4  ;;  %v559_v4 = vld [vmem:[#allocation2 + $0x18] sm:$0x8] }
  0x96   : > { %v519_v54 = vsel %vm17914_vm13, %v500_v41, %v518_v42  ;;  %v857_v55 = vrot.slane %v855_v44, 5  ;;  %v860_v56 = vrot.slane %v858_v45, 6  ;;  %vm461_vm4 = vmpackc.low %vm445_vm3, %vm445_vm3  ;;  %v511_v57 = vrot.slane %v509_v47, 4  ;;  %v574_v5 = vld [vmem:[#allocation2 + $0x24] sm:$0x1]  ;;  %v4691_v8 = vld [vmem:[%s22190_s2 + $0xc8] sm:$0xff] }
  0x97   : > { %520 = vst [vmem:[#allocation2 + $0x8] sm:$0xe] %v519_v54  ;;  %v17944_v58 = vor.u32 %v851_v51, %v848_v43  ;;  %vm446_vm2 = vcmp.eq.s32.totalorder %v17920_v39, %v17895_v18  ;;  %v477_v59 = vsel %vm461_vm4, %v17907_v32, 0  ;;  %v510_v61 = vsel %vm17924_vm9, %v501_v53, %v509_v47  ;;  %v876_v11 = vld [vmem:[#allocation2 + $0x18] sm:$0x7] }
  0x98   : > { %v861_v62 = vor.u32 %v860_v56, %v857_v55  ;;  %vm462_vm3 = vmpackc.low %vm446_vm2, %vm446_vm2  ;;  %v535_v63 = vshll.u32 %v477_v59, 16  ;;  %v538_v0 = vshrl.u32 %v477_v59, 16  ;;  %vm22301_vm7 = vcmask 125952   ;;  %v565_v44 = vld [vmem:[#allocation2 + $0x20] sm:$0xf] }
  0x99   : > { %521 = vst.msk [vmem:[#allocation2 + $0xc] sm:$0xf] %vm22301_vm7, %v510_v61  ;;  %v523_v6 = vsel %vm17881_vm5, %v511_v57, %v522_v49  ;;  %v853_v7 = vrot.slane %v17944_v58, 4  ;;  %v478_v9 = vsel %vm462_vm3, %v17938_v52, 0  ;;  %vm22302_vm15 = vcmask 124928  }
  0x9a   : > { %vm17964_vm14 = vmand %vm22302_vm15, %vm842_vm8  ;;  %v22303_v10 = vmov 0  ;;  %vm22201_vm2 = vsmask.f32 256  ;;  %524 = vst [vmem:[#allocation2 + $0x10] sm:$0x3] %v523_v6  ;;  %v537_v12 = vrot.slane %v535_v63, 5 }
  0x9b   : > { %v22304_v10 = vsel %vm17964_vm14, 4294967295, %v22303_v10  ;;  %v540_v13 = vrot.slane %v538_v0, 4  ;;  %v544_v14 = vshll.u32 %v478_v9, 16  ;;  %v863_v15 = vrot.slane %v861_v62, 4  ;;  %vm17970_vm4 = vmand %vm571_vm0, %vm22201_vm2  ;;  %v18018_v56 = vld [vmem:[%s17814_s23 + $0x10] sm:$0xf] }
  0x9c   : > { %v862_v17 = vsel %vm17933_vm6, %v853_v7, %v861_v62  ;;  %v548_v18 = vshrl.u32 %v478_v9, 16  ;;  %v575_v19 = vsel %vm17970_vm4, 0, %v574_v5  ;;  %v780_v21 = vadd.s32 48, %v17860_v2  ;;  %vm17981_vm8 = vmand %vm525_vm12, %vm526_vm1 }
  0x9d   : > { %v22307_v22 = vmov 0  ;;  %vm22309_vm0 = vmmov %vm22301_vm7  ;;  %v541_v23 = vor.u32 %v540_v13, %v537_v12  ;;  %v546_v25 = vrot.slane %v544_v14, 5  ;;  %v560_v26 = vsel %vm17951_vm11, %v537_v12, %v559_v4  ;;  %576 = vst [vmem:[#allocation2 + $0x24] sm:$0x1] %v575_v19 }
  0x9e   : > { %v22308_v22 = vsel %vm17981_vm8, 4294967295, %v22307_v22  ;;  %873 = vst.msk [vmem:[#allocation2 + $0x14] sm:$0xf] %vm22309_vm0, %v862_v17  ;;  %v877_v27 = vsel %vm17964_vm14, %v863_v15, %v876_v11  ;;  %v1248_v29 = vrot.slane %v1246_v48, 1  ;;  %vm22310_vm3 = vsmask.f32 7440 }
  0x9f   : > { %vm22311_vm15 = vsmask.f32 3328  ;;  %v22312_v30 = vmov 0  ;;  %561 = vst [vmem:[#allocation2 + $0x18] sm:$0x8] %v560_v26  ;;  %v550_v31 = vrot.slane %v548_v18, 4  ;;  %vm796_vm12 = vcmp.eq.s32.totalorder %v17910_v33, %v780_v21 }
  0xa0   : > { %vm17995_vm1 = vmor %vm22311_vm15, %vm22310_vm3  ;;  %878 = vst [vmem:[#allocation2 + $0x18] sm:$0x7] %v877_v27  ;;  %v431_v34 = vadd.s32 64, %v17860_v2  ;;  %v2166_v35 = vld [vmem:[#allocation2 + $0x8] sm:$0xe]  ;;  %v542_v38 = vrot.slane %v541_v23, 4  ;;  %v1249_v57 = vor.u32 %v1248_v29, %v1244_v37 }
  0xa1   : > { %v22313_v30 = vsel %vm17995_vm1, 4294967295, %v22312_v30  ;;  %vm812_vm0 = vmpackc.low %vm796_vm12, %vm796_vm12  ;;  %v781_v41 = vadd.s32 48, %v17870_v3  ;;  %v551_v42 = vor.u32 %v550_v31, %v546_v25  ;;  %v22315_v43 = vmov 0  ;;  %v18010_v33 = vld [vmem:[#allocation2 + $0x8] sm:$0xff]   ;;  %v528_v51 = vld [vmem:[#allocation2 + $0x10] sm:$0x6] }
  0xa2   : > { %vm22314_vm2 = vmmov %vm22311_vm15  ;;  %v828_v45 = vsel %vm812_vm0, %v17907_v32, 0  ;;  %vm447_vm10 = vcmp.eq.s32.totalorder %v17991_v28, %v431_v34  ;;  %v2167_v47 = vld [vmem:[#allocation2 + $0xc] sm:$0xf]  ;;  %v547_v48 = vsel %vm17995_vm1, %v542_v38, %v546_v25  ;;  %v1251_v59 = vshll.u32 %v18010_v33, 16  ;;  %v18081_v38 = vld [vmem:[%s17814_s23 + $0x14] sm:$0xf] }
  0xa3   : > { %vm18004_vm3 = vmand %vm22301_vm7, %vm22314_vm2  ;;  %v887_v49 = vshrl.u32 %v828_v45, 16  ;;  %v18014_v53 = vcombine.low %v2166_v35, %v2167_v47  ;;  %v552_v54 = vrot.slane %v551_v42, 4  ;;  %v890_v55 = vshll.u32 %v828_v45, 16  ;;  %v599_v25 = vld [vmem:[#allocation2 + $0x2c] sm:$0xe] }
  0xa4   : > { %v22316_v43 = vsel %vm18004_vm3, 4294967295, %v22315_v43  ;;  %vm22318_vm2 = vmmov %vm22301_vm7  ;;  %v529_v61 = vsel %vm17981_vm8, 0, %v528_v51  ;;  %vm22321_vm0 = vsmask.f32 3338  ;;  %v22323_v62 = vmov 0  ;;  %v18072_v27 = vld [vmem:[%s17875_s8 + $0x28] sm:$0xff] }
  0xa5   : > { %22317 = vst [vmem:[#allocation18_spill] sm:$0xff] %v18014_v53  ;;  %562 = vst.msk [vmem:[#allocation2 + $0x1c] sm:$0xf] %vm22318_vm2, %v547_v48  ;;  %vm22322_vm2 = vcmask 125954   ;;  %v18036_v63 = vrot.slane %v887_v49, 7  ;;  %v2618_v0 = vshrl.u32 %v18014_v53, 16  ;;  %v566_v37 = vsel %vm18004_vm3, %v552_v54, %v565_v44 }
  0xa6   : > { %vm18020_vm7 = vmpackc.low %vm447_vm10, %vm447_vm10  ;;  %530 = vst [vmem:[#allocation2 + $0x10] sm:$0x6] %v529_v61  ;;  %vm22325_vm12 = vsmask.f32 7938  ;;  %vm22326_vm1 = vcmask 125952   ;;  %v22327_v4 = vmov 0 }
  0xa7   : > { %vm18032_vm15 = vmand %vm22322_vm2, %vm22321_vm0  ;;  %v1253_v5 = vrot.slane %v1251_v59, 1  ;;  %v881_v6 = vld [vmem:[#allocation2 + $0x18] sm:$0xc]  ;;  %567 = vst [vmem:[#allocation2 + $0x20] sm:$0xf] %v566_v37  ;;  %v892_v7 = vor.u32 %v890_v55, %v18036_v63  ;;  %v479_v11 = vsel %vm18020_vm7, %v18018_v56, 0  ;;  %vm22329_vm0 = vcmp.eq.s32.totalorder %v17920_v39, %v781_v41 }
  0xa8   : > { %v22324_v62 = vsel %vm18032_vm15, 4294967295, %v22323_v62  ;;  %vm18043_vm14 = vmand %vm22326_vm1, %vm22325_vm12  ;;  %v908_v9 = vld [vmem:[#allocation2 + $0x24] sm:$0xf]  ;;  %vm868_vm1 = vsmask.f32 7946  ;;  %v882_v13 = vsel %vm18032_vm15, 0, %v881_v6 }
  0xa9   : > { %v22328_v4 = vsel %vm18043_vm14, 4294967295, %v22327_v4  ;;  %vm18054_vm2 = vmpackc.low %vm22329_vm0, %vm22329_vm0  ;;  %v578_v14 = vshrl.u32 %v479_v11, 16  ;;  %vm22332_vm10 = vsmask.f32 7424  ;;  %v2621_v17 = vshll.u32 %v18014_v53, 16  ;;  %v18092_v49 = vld [vmem:[%s17875_s8 + $0x30] sm:$0xff] }
  0xaa   : > { %v1254_v15 = vsel %vm22332_vm10, %v1249_v57, %v1253_v5  ;;  %883 = vst [vmem:[#allocation2 + $0x18] sm:$0xc] %v882_v13  ;;  %v909_v39 = vsel %vm18043_vm14, %v892_v7, %v908_v9  ;;  %v581_v18 = vshll.u32 %v479_v11, 16  ;;  %v1255_v19 = vshrl.u32 %v18010_v33, 16  ;;  %v912_v32 = vld [vmem:[#allocation2 + $0x2c] sm:$0x1] }
  0xab   : > { %vm22333_vm7 = vcmask 130048   ;;  %v18066_v21 = vrot.slane %v2618_v0, 1  ;;  %910 = vst [vmem:[#allocation2 + $0x24] sm:$0xf] %v909_v39  ;;  %v580_v23 = vrot.slane %v578_v14, 6  ;;  %v829_v26 = vsel %vm18054_vm2, %v17938_v52, 0 }
  0xac   : > { %15180 = vmatprep.mubr.msk.bf16.mxu1 %vm22333_vm7, %v1254_v15  ;;  %vm22334_vm0 = vcmask 125954   ;;  %v22335_v29 = vmov 0  ;;  %v583_v31 = vrot.slane %v581_v18, 7  ;;  %v895_v34 = vshrl.u32 %v829_v26, 16 }
  0xad   : > { %vm18076_vm12 = vmand %vm22334_vm0, %vm868_vm1  ;;  %v898_v35 = vshll.u32 %v829_v26, 16  ;;  %v432_v41 = vadd.s32 64, %v17870_v3  ;;  %v782_v42 = vadd.s32 80, %v17860_v2  ;;  %v433_v52 = vadd.s32 96, %v17860_v2  ;;  %v870_v44 = vld [vmem:[#allocation2 + $0x10] sm:$0xc] }
  0xae   : > { %v22336_v29 = vsel %vm18076_vm12, 4294967295, %v22335_v29  ;;  %v18086_v45 = vrot.slane %v2621_v17, 2  ;;  %v18088_v33 = vor.u32 %v583_v31, %v580_v23  ;;  %v893_v47 = vrot.slane %v18036_v63, 4  ;;  %v568_v54 = vld [vmem:[#allocation2 + $0x20] sm:$0x8] }
  0xaf   : > { %v897_v48 = vrot.slane %v895_v34, 7  ;;  %v871_v51 = vsel %vm18076_vm12, %v17944_v58, %v870_v44  ;;  %vm22337_vm2 = vsmask.f32 4368  ;;  %vm22338_vm1 = vsmask.f32 256 }
  0xb0   : > { %vm18099_vm7 = vmor %vm22338_vm1, %vm22337_vm2  ;;  %v22339_v55 = vmov 0  ;;  %vm448_vm0 = vcmp.eq.s32.totalorder %v18072_v27, %v432_v41  ;;  %vm798_vm10 = vcmp.eq.s32.totalorder %v17991_v28, %v782_v42  ;;  %v18106_v57 = vadd.s32 80, %v17870_v3  ;;  %872 = vst [vmem:[#allocation2 + $0x10] sm:$0xc] %v871_v51  ;;  %v18133_v17 = vld [vmem:[%s17814_s23 + $0x18] sm:$0xf] }
  0xb1   : > { %v22340_v55 = vsel %vm18099_vm7, 4294967295, %v22339_v55  ;;  %v569_v59 = vsel %vm17951_vm11, 0, %v568_v54  ;;  %v600_v58 = vsel %vm17914_vm13, %v18088_v33, %v599_v25  ;;  %v900_v61 = vor.u32 %v898_v35, %v897_v48  ;;  %vm464_vm2 = vmpackc.low %vm448_vm0, %vm448_vm0  ;;  %v18113_v0 = vld [vmem:[#allocation2 + $0x18] sm:$0xff]   ;;  %v603_v51 = vld [vmem:[#allocation2 + $0x34] sm:$0x3] }
  0xb2   : > { %v902_v63 = vrot.slane %v897_v48, 4  ;;  %570 = vst [vmem:[#allocation2 + $0x20] sm:$0x8] %v569_v59  ;;  %601 = vst [vmem:[#allocation2 + $0x2c] sm:$0xe] %v600_v58  ;;  %v480_v37 = vsel %vm464_vm2, %v18081_v38, 0  ;;  %vm449_vm1 = vcmp.eq.s32.totalorder %v18092_v49, %v433_v52  ;;  %v18117_v6 = vor.u32 %v1255_v19, %v1253_v5 }
  0xb3   : > { %v17155_v7 = vld [vmem:[#allocation2 + $0x18] sm:$0xff]   ;;  %v901_v9 = vsel %vm18099_vm7, %v893_v47, %v900_v61  ;;  %v18124_v12 = vadd.s32 96, %v17870_v3  ;;  %v2635_v13 = vshrl.u32 %v18113_v0, 16  ;;  %v2638_v14 = vshll.u32 %v18113_v0, 16  ;;  %vm814_vm2 = vmpackc.low %vm798_vm10, %vm798_vm10 }
  0xb4   : > { %v913_v11 = vsel %vm17970_vm4, %v902_v63, %v912_v32  ;;  %vm22341_vm0 = vcmask 125952   ;;  %v587_v5 = vshrl.u32 %v480_v37, 16  ;;  %v590_v15 = vshll.u32 %v480_v37, 16  ;;  %vm465_vm13 = vmpackc.low %vm449_vm1, %vm449_vm1  ;;  %v18141_v25 = vld [vmem:[%s17875_s8 + $0x38] sm:$0xff] }
  0xb5   : > { %911 = vst.msk [vmem:[#allocation2 + $0x28] sm:$0xf] %vm22341_vm0, %v901_v9  ;;  %914 = vst [vmem:[#allocation2 + $0x2c] sm:$0x1] %v913_v11  ;;  %v1267_v39 = vshll.u32 %v17155_v7, 16  ;;  %v1271_v18 = vshrl.u32 %v17155_v7, 16 }
  0xb6   : > { %v585_v19 = vrot.slane %v18088_v33, 4  ;;  %v830_v23 = vsel %vm814_vm2, %v18018_v56, 0  ;;  %vm22214_vm0 = vsmask.f32 6400  ;;  %v2637_v26 = vrot.slane %v2635_v13, 1 }
  0xb7   : > { %v2640_v31 = vrot.slane %v2638_v14, 2  ;;  %v589_v28 = vrot.slane %v587_v5, 6  ;;  %v592_v34 = vrot.slane %v590_v15, 7  ;;  %vm22342_vm10 = vsmask.f32 1282  ;;  %v17150_v44 = vld [vmem:[#allocation2 + $0x10] sm:$0xff]  }
  0xb8   : > { %vm22343_vm14 = vcmask 123904   ;;  %v22344_v35 = vmov 0  ;;  %v921_v41 = vshrl.u32 %v830_v23, 16  ;;  %v924_v42 = vshll.u32 %v830_v23, 16  ;;  %v18159_v54 = vld [vmem:[#allocation2 + $0x10] sm:$0xff]  }
  0xb9   : > { %vm18145_vm7 = vmand %vm22343_vm14, %vm22342_vm10  ;;  %v18150_v56 = vsel %vm465_vm13, %v18133_v17, 0  ;;  %v18153_v52 = vadd.s32 112, %v17870_v3  ;;  %v2624_v33 = vor.u32 %v18086_v45, %v18066_v21  ;;  %v1269_v47 = vrot.slane %v1267_v39, 1  ;;  %v18161_v59 = vld [vmem:[#allocation2 + $0x20] sm:$0xff]  }
  0xba   : > { %v22345_v35 = vsel %vm18145_vm7, 4294967295, %v22344_v35  ;;  %v593_v48 = vor.u32 %v592_v34, %v589_v28  ;;  %vm799_vm14 = vcmp.eq.s32.totalorder %v18072_v27, %v18106_v57  ;;  %v2641_v32 = vor.u32 %v2640_v31, %v2637_v26  ;;  %v17158_v21 = vld [vmem:[#allocation2 + $0x20] sm:$0xff]   ;;  %v631_v27 = vld [vmem:[#allocation2 + $0x3c] sm:$0x8] }
  0xbb   : > { %v923_v58 = vrot.slane %v921_v41, 5  ;;  %v610_v61 = vshll.u32 %v18150_v56, 16  ;;  %vm450_vm13 = vcmp.eq.s32.totalorder %v18141_v25, %v18124_v12  ;;  %v1259_v63 = vshll.u32 %v17150_v44, 16  ;;  %vm18182_vm10 = vmpackc.low %vm799_vm14, %vm799_vm14  ;;  %v401_v57 = vld [vmem:[%s17814_s23 + $0x1c] sm:$0xf] }
  0xbc   : > { %v1263_v37 = vshrl.u32 %v17150_v44, 16  ;;  %v594_v45 = vsel %vm17924_vm9, %v585_v19, %v593_v48  ;;  %v595_v7 = vrot.slane %v593_v48, 4  ;;  %v2626_v9 = vshrl.u32 %v18159_v54, 16  ;;  %v917_v14 = vld [vmem:[#allocation2 + $0x2c] sm:$0x3]  ;;  %vm18197_vm14 = vmpackc.low %vm450_vm13, %vm450_vm13 }
  0xbd   : > { %v2629_v11 = vshll.u32 %v18159_v54, 16  ;;  %v1275_v13 = vshll.u32 %v18161_v59, 16  ;;  %vm22346_vm1 = vcmask 125952   ;;  %v926_v5 = vrot.slane %v924_v42, 6 }
  0xbe   : > { %602 = vst.msk [vmem:[#allocation2 + $0x30] sm:$0xf] %vm22346_vm1, %v594_v45  ;;  %v1261_v15 = vrot.slane %v1259_v63, 1  ;;  %v2644_v39 = vshrl.u32 %v17158_v21, 16  ;;  %v2647_v23 = vshll.u32 %v17158_v21, 16  ;;  %v918_v19 = vsel %vm18145_vm7, 0, %v917_v14 }
  0xbf   : > { %v2628_v26 = vrot.slane %v2626_v9, 1  ;;  %v2631_v31 = vrot.slane %v2629_v11, 2  ;;  %v1273_v28 = vor.u32 %v1271_v18, %v1269_v47  ;;  %919 = vst [vmem:[#allocation2 + $0x2c] sm:$0x3] %v918_v19  ;;  %v604_v34 = vsel %vm17881_vm5, %v595_v7, %v603_v51  ;;  %v17174_v14 = vld [vmem:[#allocation7 + $0x30] sm:$0xff]  }
  0xc0   : > { %vm22349_vm1 = vsmask.f32 7424  ;;  %v1265_v44 = vor.u32 %v1263_v37, %v1261_v15  ;;  %v2646_v48 = vrot.slane %v2644_v39, 1  ;;  %v2649_v63 = vrot.slane %v2647_v23, 2  ;;  %605 = vst [vmem:[#allocation2 + $0x34] sm:$0x3] %v604_v34 }
  0xc1   : > { %v1262_v42 = vsel %vm22349_vm1, %v18117_v6, %v1261_v15  ;;  %vm22350_vm2 = vcmask 130048   ;;  %v2632_v18 = vor.u32 %v2631_v31, %v2628_v26  ;;  %v1277_v21 = vrot.slane %v1275_v13, 1 }
  0xc2   : > { %15181 = vmatmul.mubr.msk.bf16.vlgmr.msra.gmra.mrb[0].mxu1 %vm22350_vm2, %v1262_v42  ;;  %v1279_v51 = vshrl.u32 %v18161_v59, 16  ;;  %v18190_v45 = vor.u32 %v926_v5, %v923_v58  ;;  %v1270_v37 = vsel %vm22349_vm1, %v1265_v44, %v1269_v47  ;;  %v18202_v7 = vor.u32 %v2649_v63, %v2646_v48  ;;  %vm22353_vm13 = vmmov %vm22350_vm2 }
  0xc3   : > { %15217 = vmatpush3.bf16.msra.mxu1 %v17928_v46  ;;  %v612_v9 = vrot.slane %v610_v61, 5  ;;  %v831_v59 = vsel %vm18182_vm10, %v18081_v38, 0  ;;  %v2633_v58 = vsel %vm22214_vm0, %v2624_v33, %v2632_v18  ;;  %v2642_v12 = vsel %vm22214_vm0, %v2632_v18, %v2641_v32  ;;  %15184 = vmatprep.mubr.msk.bf16.mxu1 %vm22350_vm2, %v1270_v37  ;;  %vm22354_vm10 = vmmov %vm22350_vm2 }
  0xc4   : > { %v928_v11 = vrot.slane %v18190_v45, 4  ;;  %v930_v13 = vshrl.u32 %v831_v59, 16  ;;  %15332 = vmatprep.mubr.msk.bf16.mxu0 %vm22353_vm13, %v2633_v58  ;;  %v2651_v46 = vsel %vm22214_vm0, %v2641_v32, %v18202_v7  ;;  %v933_v61 = vshll.u32 %v831_v59, 16  ;;  %v641_v59 = vld [vmem:[#allocation2 + $0x48] sm:$0x1] }
  0xc5   : > { %v632_v47 = vsel %vm17951_vm11, %v612_v9, %v631_v27  ;;  %v482_v38 = vsel %vm18197_vm14, %v401_v57, 0  ;;  %15333 = vmatmul.mubr.msk.bf16.vlgmr.msra.gmra.mrb[0].mxu0 %vm22354_vm10, %v2642_v12  ;;  %v613_v5 = vshrl.u32 %v18150_v56, 16  ;;  %v1278_v23 = vsel %vm22349_vm1, %v1273_v28, %v1277_v21  ;;  %vm22358_vm10 = vmmov %vm22350_vm2  ;;  %v946_v27 = vld [vmem:[#allocation2 + $0x3c] sm:$0x7] }
  0xc6   : > { %633 = vst [vmem:[#allocation2 + $0x3c] sm:$0x8] %v632_v47  ;;  %v932_v33 = vrot.slane %v930_v13, 5  ;;  %v619_v15 = vshll.u32 %v482_v38, 16  ;;  %v623_v39 = vshrl.u32 %v482_v38, 16  ;;  %15369 = vmatpush3.bf16.msra.mxu0 %v17897_v20  ;;  %15336 = vmatprep.mubr.msk.bf16.mxu0 %vm22350_vm2, %v2651_v46  ;;  %v17159_v32 = vld [vmem:[#allocation2 + $0x28] sm:$0xff]   ;;  %vm22355_vm14 = vcmp.eq.s32.totalorder %v18141_v25, %v18153_v52 }
  0xc7   : > { %v935_v19 = vrot.slane %v933_v61, 6  ;;  %v18224_v26 = vld [vmem:[#allocation2 + $0x28] sm:$0xff]   ;;  %v606_v31 = vld [vmem:[#allocation2 + $0x34] sm:$0x6]  ;;  %v615_v34 = vrot.slane %v613_v5, 4  ;;  %15406 = vmatprep.subr.bf16.mxu0 %v17174_v14  ;;  %v2653_v44 = vshrl.u32 %v17159_v32, 16  ;;  %vm18232_vm13 = vmpackc.low %vm22355_vm14, %vm22355_vm14  ;;  %v1281_v28 = vor.u32 %v1279_v51, %v1277_v21 }
  0xc8   : > { %v621_v41 = vrot.slane %v619_v15, 5  ;;  %v625_v42 = vrot.slane %v623_v39, 4  ;;  %v2656_v48 = vshll.u32 %v17159_v32, 16  ;;  %v607_v56 = vsel %vm17981_vm8, 0, %v606_v31  ;;  %v635_v13 = vld [vmem:[#allocation2 + $0x44] sm:$0xf] }
  0xc9   : > { %v936_v63 = vor.u32 %v935_v19, %v932_v33  ;;  %v1283_v18 = vshll.u32 %v18224_v26, 16  ;;  %608 = vst [vmem:[#allocation2 + $0x34] sm:$0x6] %v607_v56  ;;  %v616_v6 = vor.u32 %v615_v34, %v612_v9  ;;  %v2655_v58 = vrot.slane %v2653_v44, 1  ;;  %v17181_v14 = vld [vmem:[#allocation7 + $0x10] sm:$0xff]   ;;  %v418_v33 = vld [vmem:[%s17875_s8 + $0x40] sm:$0xff] }
  0xca   : > { %15185 = vmatmul.mubr.msk.bf16.gmra.mrb[4].mxu1 %vm22358_vm10, %v1278_v23  ;;  %v626_v37 = vor.u32 %v625_v42, %v621_v41  ;;  %v2658_v12 = vrot.slane %v2656_v48, 2  ;;  %vm22359_vm1 = vcmask 125952   ;;  %v833_v9 = vsel %vm18232_vm13, %v401_v57, 0  ;;  %15254 = vmatprep.subr.bf16.mxu1 %v17181_v14  ;;  %v419_v39 = vld [vmem:[%s17875_s8 + $0x48] sm:$0xff]  ;;  %v402_v31 = vld [vmem:[%s17814_s23 + $0x20] sm:$0xf] }
  0xcb   : > { %v937_v25 = vsel %vm17933_vm6, %v928_v11, %v936_v63  ;;  %v938_v52 = vrot.slane %v936_v63, 4  ;;  %v18240_v46 = vrot.slane %v1283_v18, 1  ;;  %v617_v21 = vrot.slane %v616_v6, 4  ;;  %v403_v34 = vld [vmem:[%s17814_s23 + $0x24] sm:$0xf] }
  0xcc   : > { %945 = vst.msk [vmem:[#allocation2 + $0x38] sm:$0xf] %vm22359_vm1, %v937_v25  ;;  %v627_v51 = vrot.slane %v626_v37, 4  ;;  %v18245_v47 = vor.u32 %v2658_v12, %v2655_v58  ;;  %vm22360_vm2 = vnez %v22304_v10  ;;  %v642_v11 = vsel %vm17970_vm4, 0, %v641_v59  ;;  %v976_v44 = vld [vmem:[#allocation2 + $0x50] sm:$0x1] }
  0xcd   : > { %v947_v61 = vsel %vm22360_vm2, %v938_v52, %v946_v27  ;;  %v784_v38 = vadd.s32 112, %v17860_v2  ;;  %vm22361_vm14 = vsmask.f32 7424  ;;  %vm22362_vm13 = vnez %v22313_v30  ;;  %643 = vst [vmem:[#allocation2 + $0x48] sm:$0x1] %v642_v11  ;;  %v17358_v10 = vld [vmem:[#allocation2 + $0x28] sm:$0xff]  }
  0xce   : > { %v1286_v5 = vsel %vm22361_vm14, %v1281_v28, %v18240_v46  ;;  %948 = vst [vmem:[#allocation2 + $0x3c] sm:$0x7] %v947_v61  ;;  %v622_v57 = vsel %vm22362_vm13, %v617_v21, %v621_v41  ;;  %v636_v15 = vsel %vm18004_vm3, %v627_v51, %v635_v13  ;;  %v2660_v23 = vsel %vm22214_vm0, %v18202_v7, %v18245_v47  ;;  %vm22363_vm13 = vmmov %vm22358_vm10 }
  0xcf   : > { %15188 = vmatprep.mubr.msk.bf16.mxu1 %vm22358_vm10, %v1286_v5  ;;  %634 = vst.msk [vmem:[#allocation2 + $0x40] sm:$0xf] %vm22359_vm1, %v622_v57  ;;  %637 = vst [vmem:[#allocation2 + $0x44] sm:$0xf] %v636_v15  ;;  %vm800_vm14 = vcmp.eq.s32.totalorder %v18092_v49, %v784_v38  ;;  %v961_v32 = vshrl.u32 %v833_v9, 16  ;;  %v964_v19 = vshll.u32 %v833_v9, 16  ;;  %15337 = vmatmul.mubr.msk.bf16.gmra.mrb[4].mxu0 %vm22363_vm13, %v2660_v23 }
  0xd0   : > { %vm816_vm8 = vmpackc.low %vm800_vm14, %vm800_vm14  ;;  %v435_v41 = vadd.s32 128, %v17860_v2  ;;  %v436_v42 = vadd.s32 128, %v17870_v3  ;;  %v786_v7 = vadd.s32 144, %v17860_v2  ;;  %v787_v48 = vadd.s32 144, %v17870_v3  ;;  %v942_v56 = vld [vmem:[#allocation2 + $0x34] sm:$0xc] }
  0xd1   : > { %v1287_v63 = vshrl.u32 %v18224_v26, 16  ;;  %v832_v49 = vsel %vm816_vm8, %v18133_v17, 0  ;;  %v963_v20 = vrot.slane %v961_v32, 7  ;;  %v943_v28 = vsel %vm18076_vm12, %v18190_v45, %v942_v56  ;;  %v666_v23 = vld [vmem:[#allocation2 + $0x50] sm:$0xe] }
  0xd2   : > { %v953_v18 = vshrl.u32 %v832_v49, 16  ;;  %v956_v27 = vshll.u32 %v832_v49, 16  ;;  %vm451_vm13 = vcmp.eq.s32.totalorder %v418_v33, %v435_v41  ;;  %944 = vst [vmem:[#allocation2 + $0x34] sm:$0xc] %v943_v28  ;;  %vm452_vm10 = vcmp.eq.s32.totalorder %v419_v39, %v436_v42 }
  0xd3   : > { %v968_v6 = vrot.slane %v963_v20, 4  ;;  %vm467_vm1 = vmpackc.low %vm451_vm13, %vm451_vm13  ;;  %vm802_vm14 = vcmp.eq.s32.totalorder %v418_v33, %v786_v7  ;;  %v18279_v37 = vadd.s32 160, %v17860_v2  ;;  %v966_v26 = vor.u32 %v964_v19, %v963_v20  ;;  %v18309_v7 = vld [vmem:[%s17875_s8 + $0x50] sm:$0xff] }
  0xd4   : > { %v955_v59 = vrot.slane %v953_v18, 7  ;;  %vm468_vm0 = vmpackc.low %vm452_vm10, %vm452_vm10  ;;  %v483_v17 = vsel %vm467_vm1, %v402_v31, 0  ;;  %vm803_vm8 = vcmp.eq.s32.totalorder %v419_v39, %v787_v48  ;;  %v972_v12 = vld [vmem:[#allocation2 + $0x48] sm:$0xf]  ;;  %vm22369_vm10 = vnez %v22328_v4 }
  0xd5   : > { %v949_v58 = vld [vmem:[#allocation2 + $0x3c] sm:$0xc]  ;;  %v484_v25 = vsel %vm468_vm0, %v403_v34, 0  ;;  %v645_v45 = vshrl.u32 %v483_v17, 16  ;;  %vm18281_vm12 = vmpackc.low %vm802_vm14, %vm802_vm14  ;;  %v977_v13 = vsel %vm17970_vm4, %v968_v6, %v976_v44  ;;  %v648_v33 = vshll.u32 %v483_v17, 16 }
  0xd6   : > { %v950_v14 = vsel %vm18032_vm15, 0, %v949_v58  ;;  %v638_v21 = vld [vmem:[#allocation2 + $0x44] sm:$0x8]  ;;  %v958_v51 = vor.u32 %v956_v27, %v955_v59  ;;  %v959_v9 = vrot.slane %v955_v59, 4  ;;  %978 = vst [vmem:[#allocation2 + $0x50] sm:$0x1] %v977_v13  ;;  %vm18289_vm13 = vmpackc.low %vm803_vm8, %vm803_vm8  ;;  %vm22368_vm0 = vnez %v22340_v55 }
  0xd7   : > { %951 = vst [vmem:[#allocation2 + $0x3c] sm:$0xc] %v950_v14  ;;  %v639_v11 = vsel %vm17951_vm11, 0, %v638_v21  ;;  %v647_v38 = vrot.slane %v645_v45, 6  ;;  %v654_v5 = vshrl.u32 %v484_v25, 16  ;;  %v657_v39 = vshll.u32 %v484_v25, 16 }
  0xd8   : > { %640 = vst [vmem:[#allocation2 + $0x44] sm:$0x8] %v639_v11  ;;  %v967_v57 = vsel %vm22368_vm0, %v959_v9, %v966_v26  ;;  %v973_v15 = vsel %vm22369_vm10, %v958_v51, %v972_v12  ;;  %v18301_v32 = vsel %vm18281_vm12, %v402_v31, 0  ;;  %vm22370_vm1 = vcmask 125952   ;;  %v18324_v17 = vld [vmem:[%s17875_s8 + $0x58] sm:$0xff] }
  0xd9   : > { %974 = vst [vmem:[#allocation2 + $0x48] sm:$0xf] %v973_v15  ;;  %975 = vst.msk [vmem:[#allocation2 + $0x4c] sm:$0xf] %vm22370_vm1, %v967_v57  ;;  %v650_v19 = vrot.slane %v648_v33, 7  ;;  %v656_v41 = vrot.slane %v654_v5, 6  ;;  %v1289_v56 = vor.u32 %v1287_v63, %v18240_v46  ;;  %vm22371_vm12 = vnez %v22292_v36 }
  0xda   : > { %v18306_v42 = vsel %vm18289_vm13, %v403_v34, 0  ;;  %v18312_v44 = vadd.s32 160, %v17870_v3  ;;  %v17161_v48 = vld [vmem:[#allocation2 + $0x30] sm:$0xff]   ;;  %v659_v31 = vrot.slane %v657_v39, 7  ;;  %v983_v28 = vshrl.u32 %v18301_v32, 16 }
  0xdb   : > { %v18315_v49 = vld [vmem:[#allocation2 + $0x30] sm:$0xff]   ;;  %v651_v20 = vor.u32 %v650_v19, %v647_v38  ;;  %v986_v18 = vshll.u32 %v18301_v32, 16  ;;  %v992_v27 = vshrl.u32 %v18306_v42, 16  ;;  %v1291_v34 = vshll.u32 %v17161_v48, 16  ;;  %v1008_v32 = vld [vmem:[#allocation2 + $0x60] sm:$0x7] }
  0xdc   : > { %v1295_v6 = vshrl.u32 %v17161_v48, 16  ;;  %v18320_v59 = vor.u32 %v659_v31, %v656_v41  ;;  %v995_v26 = vshll.u32 %v18306_v42, 16  ;;  %v2662_v46 = vshrl.u32 %v18315_v49, 16 }
  0xdd   : > { %v2665_v63 = vshll.u32 %v18315_v49, 16  ;;  %v652_v58 = vrot.slane %v651_v20, 4  ;;  %v667_v12 = vsel %vm22371_vm12, %v651_v20, %v666_v23  ;;  %v1293_v25 = vrot.slane %v1291_v34, 1 }
  0xde   : > { %v18330_v45 = vld [vmem:[#allocation2 + $0x38] sm:$0xff]   ;;  %668 = vst [vmem:[#allocation2 + $0x50] sm:$0xe] %v667_v12  ;;  %v2664_v52 = vrot.slane %v2662_v46, 1  ;;  %vm22372_vm13 = vsmask.f32 7424 }
  0xdf   : > { %v2667_v13 = vrot.slane %v2665_v63, 2  ;;  %v17164_v14 = vld [vmem:[#allocation2 + $0x38] sm:$0xff]   ;;  %v17165_v21 = vld [vmem:[#allocation2 + $0x40] sm:$0xff]   ;;  %v661_v51 = vsel %vm17924_vm9, %v652_v58, %v18320_v59  ;;  %v1294_v9 = vsel %vm22372_vm13, %v1289_v56, %v1293_v25  ;;  %v2671_v61 = vshrl.u32 %v18330_v45, 16 }
  0xe0   : > { %v2674_v11 = vshll.u32 %v18330_v45, 16  ;;  %v1297_v38 = vor.u32 %v1295_v6, %v1293_v25  ;;  %v18342_v33 = vld [vmem:[#allocation2 + $0x40] sm:$0xff]   ;;  %v18344_v5 = vld [vmem:[#allocation2 + $0x48] sm:$0xff]   ;;  %669 = vst.msk [vmem:[#allocation2 + $0x54] sm:$0xf] %vm22370_vm1, %v661_v51  ;;  %vm22373_vm14 = vcmask 130048  }
  0xe1   : > { %15189 = vmatmul.mubr.msk.bf16.gmra.mrb[8].mxu1 %vm22373_vm14, %v1294_v9  ;;  %v2668_v57 = vor.u32 %v2667_v13, %v2664_v52  ;;  %v1299_v15 = vshll.u32 %v17164_v14, 16  ;;  %v1303_v39 = vshrl.u32 %v17164_v14, 16  ;;  %v1307_v23 = vshll.u32 %v17165_v21, 16  ;;  %v18348_v19 = vld [vmem:[#allocation2 + $0x48] sm:$0xff]   ;;  %vm22376_vm8 = vmmov %vm22373_vm14 }
  0xe2   : > { %v2673_v41 = vrot.slane %v2671_v61, 1  ;;  %v2676_v48 = vrot.slane %v2674_v11, 2  ;;  %v2680_v56 = vshrl.u32 %v18342_v33, 16  ;;  %v2683_v31 = vshll.u32 %v18342_v33, 16  ;;  %vm22380_vm9 = vmmov %vm22376_vm8 }
  0xe3   : > { %vm22374_vm13 = vsmask.f32 6400  ;;  %v1301_v34 = vrot.slane %v1299_v15, 1  ;;  %v1309_v6 = vrot.slane %v1307_v23, 1  ;;  %v2689_v46 = vshrl.u32 %v18344_v5, 16 }
  0xe4   : > { %v2669_v20 = vsel %vm22374_vm13, %v18245_v47, %v2668_v57  ;;  %v2677_v63 = vor.u32 %v2676_v48, %v2673_v41  ;;  %v2682_v58 = vrot.slane %v2680_v56, 1  ;;  %v2685_v12 = vrot.slane %v2683_v31, 2  ;;  %v670_v47 = vld [vmem:[#allocation2 + $0x58] sm:$0x3]  ;;  %v404_v41 = vld [vmem:[%s17814_s23 + $0x28] sm:$0xf] }
  0xe5   : > { %15340 = vmatprep.mubr.msk.bf16.mxu0 %vm22373_vm14, %v2669_v20  ;;  %v2692_v25 = vshll.u32 %v18344_v5, 16  ;;  %vm22375_vm1 = vsmask.f32 7424  ;;  %v1305_v13 = vor.u32 %v1303_v39, %v1301_v34  ;;  %v2691_v14 = vrot.slane %v2689_v46, 1  ;;  %v979_v9 = vld [vmem:[#allocation2 + $0x50] sm:$0x3] }
  0xe6   : > { %v1302_v52 = vsel %vm22375_vm1, %v1297_v38, %v1301_v34  ;;  %v1311_v51 = vshrl.u32 %v17165_v21, 16  ;;  %v2678_v61 = vsel %vm22374_vm13, %v2668_v57, %v2677_v63  ;;  %v2686_v11 = vor.u32 %v2685_v12, %v2682_v58  ;;  %v18363_v48 = vld [vmem:[%s17814_s23 + $0x2c] sm:$0xf] }
  0xe7   : > { %15192 = vmatprep.mubr.msk.bf16.mxu1 %vm22376_vm8, %v1302_v52  ;;  %v2694_v15 = vrot.slane %v2692_v25, 2  ;;  %v1315_v23 = vshll.u32 %v18348_v19, 16  ;;  %vm22377_vm14 = vcmp.eq.s32.totalorder %v18309_v7, %v18279_v37  ;;  %15341 = vmatmul.mubr.msk.bf16.gmra.mrb[8].mxu0 %vm22380_vm9, %v2678_v61  ;;  %vm22381_vm13 = vsmask.f32 7424  ;;  %v698_v25 = vld [vmem:[#allocation2 + $0x60] sm:$0x8] }
  0xe8   : > { %vm18369_vm1 = vmpackc.low %vm22377_vm14, %vm22377_vm14  ;;  %v1310_v21 = vsel %vm22381_vm13, %v1305_v13, %v1309_v6  ;;  %v1313_v57 = vor.u32 %v1311_v51, %v1309_v6  ;;  %v980_v39 = vsel %vm18145_vm7, 0, %v979_v9  ;;  %v985_v56 = vrot.slane %v983_v28, 5  ;;  %v708_v52 = vld [vmem:[#allocation2 + $0x6c] sm:$0x1] }
  0xe9   : > { %vm22382_vm8 = vsmask.f32 6400  ;;  %v18380_v20 = vor.u32 %v2694_v15, %v2691_v14  ;;  %v1317_v37 = vrot.slane %v1315_v23, 1  ;;  %981 = vst [vmem:[#allocation2 + $0x50] sm:$0x3] %v980_v39  ;;  %v662_v34 = vrot.slane %v18320_v59, 4 }
  0xea   : > { %v2687_v31 = vsel %vm22382_vm8, %v2677_v63, %v2686_v11  ;;  %vm22383_vm9 = vcmp.eq.s32.totalorder %v18324_v17, %v18312_v44  ;;  %vm22386_vm13 = vcmask 130048   ;;  %v988_v28 = vrot.slane %v986_v18, 6 }
  0xeb   : > { %vm18387_vm14 = vmpackc.low %vm22383_vm9, %vm22383_vm9  ;;  %15193 = vmatmul.mubr.msk.bf16.gmra.mrb[12].mxu1 %vm22386_vm13, %v1310_v21  ;;  %v994_v46 = vrot.slane %v992_v27, 5  ;;  %v997_v59 = vrot.slane %v995_v26, 6  ;;  %v485_v44 = vsel %vm18369_vm1, %v404_v41, 0  ;;  %v2696_v63 = vsel %vm22382_vm8, %v2686_v11, %v18380_v20 }
  0xec   : > { %vm22387_vm7 = vmmov %vm22386_vm13  ;;  %vm22388_vm9 = vsmask.f32 7424  ;;  %v671_v12 = vsel %vm17881_vm5, %v662_v34, %v670_v47  ;;  %v18407_v18 = vor.u32 %v988_v28, %v985_v56  ;;  %v486_v27 = vsel %vm18387_vm14, %v18363_v48, 0 }
  0xed   : > { %15344 = vmatprep.mubr.msk.bf16.mxu0 %vm22387_vm7, %v2687_v31  ;;  %v1318_v58 = vsel %vm22388_vm9, %v1313_v57, %v1317_v37  ;;  %672 = vst [vmem:[#allocation2 + $0x58] sm:$0x3] %v671_v12  ;;  %v998_v42 = vor.u32 %v997_v59, %v994_v46  ;;  %v677_v26 = vshll.u32 %v485_v44, 16  ;;  %v680_v13 = vshrl.u32 %v485_v44, 16  ;;  %vm22389_vm13 = vmmov %vm22387_vm7  ;;  %v702_v12 = vld [vmem:[#allocation2 + $0x68] sm:$0xf] }
  0xee   : > { %15196 = vmatprep.mubr.msk.bf16.mxu1 %vm22387_vm7, %v1318_v58  ;;  %v686_v14 = vshll.u32 %v486_v27, 16  ;;  %v690_v51 = vshrl.u32 %v486_v27, 16  ;;  %v788_v9 = vadd.s32 176, %v17860_v2  ;;  %v1319_v47 = vshrl.u32 %v18348_v19, 16 }
  0xef   : > { %v990_v61 = vrot.slane %v18407_v18, 4  ;;  %v679_v11 = vrot.slane %v677_v26, 5  ;;  %v1000_v15 = vrot.slane %v998_v42, 4  ;;  %v682_v23 = vrot.slane %v680_v13, 4  ;;  %15345 = vmatmul.mubr.msk.bf16.gmra.mrb[12].mxu0 %vm22389_vm13, %v2696_v63 }
  0xf0   : > { %vm804_vm1 = vcmp.eq.s32.totalorder %v18309_v7, %v788_v9  ;;  %v18417_v38 = vld [vmem:[#allocation2 + $0x50] sm:$0xff]   ;;  %v688_v57 = vrot.slane %v686_v14, 5  ;;  %vm22390_vm14 = vcmask 125952   ;;  %v692_v7 = vrot.slane %v690_v51, 4  ;;  %v422_v14 = vld [vmem:[%s17875_s8 + $0x60] sm:$0xff] }
  0xf1   : > { %v999_v21 = vsel %vm17933_vm6, %v990_v61, %v998_v42  ;;  %v699_v39 = vsel %vm17951_vm11, %v679_v11, %v698_v25  ;;  %v1009_v19 = vsel %vm22360_vm2, %v1000_v15, %v1008_v32  ;;  %v18425_v56 = vld [vmem:[#allocation2 + $0x50] sm:$0xff]   ;;  %v683_v31 = vor.u32 %v682_v23, %v679_v11  ;;  %vm820_vm8 = vmpackc.low %vm804_vm1, %vm804_vm1 }
  0xf2   : > { %1007 = vst.msk [vmem:[#allocation2 + $0x5c] sm:$0xf] %vm22390_vm14, %v999_v21  ;;  %700 = vst [vmem:[#allocation2 + $0x60] sm:$0x8] %v699_v39  ;;  %v709_v34 = vsel %vm17970_vm4, 0, %v708_v52  ;;  %v1321_v6 = vor.u32 %v1319_v47, %v1317_v37  ;;  %v1323_v28 = vshll.u32 %v18417_v38, 16  ;;  %vm22391_vm9 = vnez %v22308_v22 }
  0xf3   : > { %1010 = vst [vmem:[#allocation2 + $0x60] sm:$0x7] %v1009_v19  ;;  %v836_v46 = vsel %vm820_vm8, %v404_v41, 0  ;;  %710 = vst [vmem:[#allocation2 + $0x6c] sm:$0x1] %v709_v34  ;;  %v2698_v59 = vshrl.u32 %v18425_v56, 16  ;;  %v693_v42 = vor.u32 %v692_v7, %v688_v57  ;;  %vm22392_vm7 = vnez %v22313_v30 }
  0xf4   : > { %v2701_v44 = vshll.u32 %v18425_v56, 16  ;;  %v673_v63 = vld [vmem:[#allocation2 + $0x58] sm:$0x6]  ;;  %v684_v58 = vrot.slane %v683_v31, 4  ;;  %v18433_v25 = vrot.slane %v1323_v28, 1  ;;  %v1015_v37 = vshrl.u32 %v836_v46, 16  ;;  %vm22394_vm13 = vmmov %vm22390_vm14 }
  0xf5   : > { %v674_v32 = vsel %vm22391_vm9, 0, %v673_v63  ;;  %v2700_v27 = vrot.slane %v2698_v59, 1  ;;  %v3060_v52 = vld [vmem:[#allocation2 + $0x8] sm:$0xc]  ;;  %v1018_v13 = vshll.u32 %v836_v46, 16  ;;  %v694_v9 = vrot.slane %v693_v42, 4 }
  0xf6   : > { %v2703_v26 = vrot.slane %v2701_v44, 2  ;;  %675 = vst [vmem:[#allocation2 + $0x58] sm:$0x6] %v674_v32  ;;  %v689_v41 = vsel %vm22392_vm7, %v684_v58, %v688_v57  ;;  %vm22393_vm1 = vsmask.f32 7424  ;;  %v18443_v47 = vrot.slane %v1015_v37, 7 }
  0xf7   : > { %v1326_v51 = vsel %vm22393_vm1, %v1321_v6, %v18433_v25  ;;  %701 = vst.msk [vmem:[#allocation2 + $0x64] sm:$0xf] %vm22394_vm13, %v689_v41  ;;  %v406_v61 = vld [vmem:[%s17814_s23 + $0x30] sm:$0xf]  ;;  %vm22395_vm14 = vcmask 130048   ;;  %v439_v15 = vadd.s32 192, %v17860_v2  ;;  %v703_v39 = vsel %vm18004_vm3, %v694_v9, %v702_v12 }
  0xf8   : > { %15197 = vmatmul.mubr.msk.bf16.gmra.mrb[16].mxu1 %vm22395_vm14, %v1326_v51  ;;  %v18447_v11 = vor.u32 %v2703_v26, %v2700_v27  ;;  %v789_v23 = vadd.s32 176, %v17870_v3  ;;  %v790_v21 = vadd.s32 208, %v17860_v2  ;;  %v1020_v19 = vor.u32 %v1018_v13, %v18443_v47  ;;  %704 = vst [vmem:[#allocation2 + $0x68] sm:$0xf] %v703_v39  ;;  %v17355_v6 = vld [vmem:[#allocation2 + $0xc] sm:$0xf] }
  0xf9   : > { %vm22396_vm8 = vsmask.f32 6400  ;;  %vm455_vm1 = vcmp.eq.s32.totalorder %v422_v14, %v439_v15  ;;  %v13878_v28 = vcombine.low %v3060_v52, %v17355_v6  ;;  %v18465_v59 = vld [vmem:[%s17814_s23 + $0x34] sm:$0xf]  ;;  %v18468_v44 = vld [vmem:[%s17875_s8 + $0x68] sm:$0xff]  ;;  %v441_v63 = vadd.s32 224, %v17860_v2 }
  0xfa   : > { %v1011_v57 = vld [vmem:[#allocation2 + $0x60] sm:$0xc]  ;;  %v2705_v31 = vsel %vm22396_vm8, %v18380_v20, %v18447_v11  ;;  %v1034_v34 = vld [vmem:[#allocation2 + $0x6c] sm:$0xf]  ;;  %vm805_vm13 = vcmp.eq.s32.totalorder %v18324_v17, %v789_v23  ;;  %vm471_vm8 = vmpackc.low %vm455_vm1, %vm455_vm1  ;;  %vm806_vm3 = vcmp.eq.s32.totalorder %v422_v14, %v790_v21  ;;  %v440_v17 = vadd.s32 192, %v17870_v3 }
  0xfb   : > { %v1012_v7 = vsel %vm18032_vm15, 0, %v1011_v57  ;;  %15348 = vmatprep.mubr.msk.bf16.mxu0 %vm22395_vm14, %v2705_v31  ;;  %v1035_v46 = vsel %vm22369_vm10, %v1020_v19, %v1034_v34  ;;  %v487_v20 = vsel %vm471_vm8, %v406_v61, 0  ;;  %vm821_vm15 = vmpackc.low %vm805_vm13, %vm805_vm13  ;;  %v18474_v37 = vld [vmem:[%s17875_s8 + $0x70] sm:$0xff]  ;;  %vm22397_vm1 = vnez %v22336_v29 }
  0xfc   : > { %1013 = vst [vmem:[#allocation2 + $0x60] sm:$0xc] %v1012_v7  ;;  %1036 = vst [vmem:[#allocation2 + $0x6c] sm:$0xf] %v1035_v46  ;;  %v712_v12 = vshrl.u32 %v487_v20, 16  ;;  %v715_v32 = vshll.u32 %v487_v20, 16  ;;  %vm457_vm8 = vcmp.eq.s32.totalorder %v18474_v37, %v441_v63 }
  0xfd   : > { %v1004_v58 = vld [vmem:[#allocation2 + $0x58] sm:$0xc]  ;;  %vm822_vm14 = vmpackc.low %vm806_vm3, %vm806_vm3  ;;  %v837_v42 = vsel %vm821_vm15, %v18363_v48, 0  ;;  %v733_v26 = vld [vmem:[#allocation2 + $0x74] sm:$0xe]  ;;  %vm22223_vm13 = vcmask 1045504   ;;  %vm456_vm3 = vcmp.eq.s32.totalorder %v18468_v44, %v440_v17 }
  0xfe   : > { %v1005_v27 = vsel %vm22397_vm1, %v18407_v18, %v1004_v58  ;;  %v838_v41 = vsel %vm822_vm14, %v406_v61, 0  ;;  %v1023_v52 = vshrl.u32 %v837_v42, 16  ;;  %v1026_v13 = vshll.u32 %v837_v42, 16  ;;  %v1038_v15 = vld [vmem:[#allocation2 + $0x74] sm:$0x1]  ;;  %vm472_vm15 = vmpackc.low %vm456_vm3, %vm456_vm3 }
  0xff   : > { %1006 = vst [vmem:[#allocation2 + $0x58] sm:$0xc] %v1005_v27  ;;  %v3068_v14 = vrot.slane %v13878_v28, 2  ;;  %v714_v51 = vrot.slane %v712_v12, 6  ;;  %v717_v9 = vrot.slane %v715_v32, 7  ;;  %v1327_v48 = vshrl.u32 %v18417_v38, 16  ;;  %vm18492_vm14 = vmpackc.low %vm457_vm8, %vm457_vm8 }
 0x100   : > { %v1021_v23 = vrot.slane %v18443_v47, 4  ;;  %v1025_v21 = vrot.slane %v1023_v52, 7  ;;  %v18483_v18 = vld [vmem:[%s17814_s23 + $0x38] sm:$0xf]  ;;  %v705_v61 = vld [vmem:[#allocation2 + $0x68] sm:$0x8] }
 0x101   : > { %v718_v57 = vor.u32 %v717_v9, %v714_v51  ;;  %v488_v39 = vsel %vm472_vm15, %v18465_v59, 0  ;;  %v1045_v19 = vshrl.u32 %v838_v41, 16  ;;  %v791_v31 = vadd.s32 208, %v17870_v3  ;;  %v737_v9 = vld [vmem:[#allocation2 + $0x7c] sm:$0x3] }
 0x102   : > { %v706_v38 = vsel %vm17951_vm11, 0, %v705_v61  ;;  %v1028_v34 = vor.u32 %v1026_v13, %v1025_v21  ;;  %v1030_v47 = vrot.slane %v1025_v21, 4  ;;  %v721_v6 = vshrl.u32 %v488_v39, 16 }
 0x103   : > { %v18488_v7 = vld [vmem:[#allocation2 + $0x60] sm:$0xff]   ;;  %v3069_v46 = vrot.slane %v18159_v54, 2  ;;  %707 = vst [vmem:[#allocation2 + $0x68] sm:$0x8] %v706_v38  ;;  %v734_v20 = vsel %vm22371_vm12, %v718_v57, %v733_v26  ;;  %v724_v17 = vshll.u32 %v488_v39, 16  ;;  %v1048_v63 = vshll.u32 %v838_v41, 16 }
 0x104   : > { %v1339_v58 = vshll.u32 %v18488_v7, 16  ;;  %v3071_v12 = vrot.slane %v18113_v0, 2  ;;  %735 = vst [vmem:[#allocation2 + $0x74] sm:$0xe] %v734_v20  ;;  %v1029_v32 = vsel %vm22368_vm0, %v1021_v23, %v1028_v34  ;;  %v1039_v42 = vsel %vm17970_vm4, %v1030_v47, %v1038_v15 }
 0x105   : > { %vm22400_vm3 = vcmask 125952   ;;  %1040 = vst [vmem:[#allocation2 + $0x74] sm:$0x1] %v1039_v42  ;;  %v719_v27 = vrot.slane %v718_v57, 4  ;;  %v723_v52 = vrot.slane %v721_v6, 6  ;;  %v726_v13 = vrot.slane %v724_v17, 7 }
 0x106   : > { %1037 = vst.msk [vmem:[#allocation2 + $0x70] sm:$0xf] %vm22400_vm3, %v1029_v32  ;;  %v18509_v26 = vsel %vm18492_vm14, %v18483_v18, 0  ;;  %v18511_v41 = vld [vmem:[#allocation2 + $0x58] sm:$0xff]   ;;  %v1329_v51 = vor.u32 %v1327_v48, %v18433_v25  ;;  %v1047_v23 = vrot.slane %v1045_v19, 5  ;;  %vm807_vm15 = vcmp.eq.s32.totalorder %v18468_v44, %v791_v31 }
 0x107   : > { %v18515_v15 = vld [vmem:[#allocation2 + $0x58] sm:$0xff]   ;;  %v1343_v21 = vshrl.u32 %v18488_v7, 16  ;;  %v727_v61 = vor.u32 %v726_v13, %v723_v52  ;;  %v1050_v57 = vrot.slane %v1048_v63, 6  ;;  %v744_v39 = vshll.u32 %v18509_v26, 16  ;;  %vm823_vm8 = vmpackc.low %vm807_vm15, %vm807_vm15  ;;  %v765_v6 = vld [vmem:[#allocation2 + $0x84] sm:$0x8] }
 0x108   : > { %v2707_v38 = vshrl.u32 %v18511_v41, 16  ;;  %v2710_v34 = vshll.u32 %v18511_v41, 16  ;;  %v1341_v47 = vrot.slane %v1339_v58, 1  ;;  %v839_v25 = vsel %vm823_vm8, %v18465_v59, 0  ;;  %v775_v52 = vld [vmem:[#allocation2 + $0x90] sm:$0x1] }
 0x109   : > { %v1331_v48 = vshll.u32 %v18515_v15, 16  ;;  %v1335_v44 = vshrl.u32 %v18515_v15, 16  ;;  %vm22401_vm14 = vnez %v22295_v40  ;;  %v729_v31 = vrot.slane %v727_v61, 4 }
 0x10a   : > { %v728_v19 = vsel %vm22401_vm14, %v719_v27, %v727_v61  ;;  %v2709_v28 = vrot.slane %v2707_v38, 1  ;;  %v2712_v20 = vrot.slane %v2710_v34, 2  ;;  %v3070_v17 = vsel %vm22223_vm13, %v3068_v14, %v3069_v46  ;;  %v18529_v63 = vld [vmem:[#allocation2 + $0x68] sm:$0xff]   ;;  %v18545_v34 = vld [vmem:[%s17875_s8 + $0x78] sm:$0xff] }
 0x10b   : > { %736 = vst.msk [vmem:[#allocation2 + $0x78] sm:$0xf] %vm22400_vm3, %v728_v19  ;;  %v18532_v59 = vrot.slane %v744_v39, 5  ;;  %v1333_v58 = vrot.slane %v1331_v48, 1  ;;  %v738_v32 = vsel %vm17881_vm5, %v729_v31, %v737_v9  ;;  %v18536_v42 = vor.u32 %v1050_v57, %v1047_v23 }
 0x10c   : > { %v1054_v27 = vshrl.u32 %v839_v25, 16  ;;  %v18538_v13 = vor.u32 %v2712_v20, %v2709_v28  ;;  %v1345_v61 = vor.u32 %v1343_v21, %v1341_v47  ;;  %v1347_v14 = vshll.u32 %v18529_v63, 16  ;;  %v1041_v38 = vld [vmem:[#allocation2 + $0x74] sm:$0x3]  ;;  %739 = vst [vmem:[#allocation2 + $0x7c] sm:$0x3] %v738_v32 }
 0x10d   : > { %v766_v39 = vsel %vm17951_vm11, %v18532_v59, %v765_v6  ;;  %vm22403_vm15 = vsmask.f32 7424  ;;  %v1337_v23 = vor.u32 %v1335_v44, %v1333_v58  ;;  %vm22404_vm8 = vnez %v22345_v35  ;;  %v18555_v6 = vld [vmem:[%s17814_s23 + $0x3c] sm:$0xf]  ;;  %s22068_s23 = scalar_lea.vmem %s22195_s7, %s17070_s12 }
 0x10e   : > { %22402 = vst [vmem:[#allocation19_spill] sm:$0xff] %v18538_v13  ;;  %v1334_v9 = vsel %vm22403_vm15, %v1329_v51, %v1333_v58  ;;  %v1042_v57 = vsel %vm22404_vm8, 0, %v1041_v38  ;;  %767 = vst [vmem:[#allocation2 + $0x84] sm:$0x8] %v766_v39  ;;  %v1056_v48 = vrot.slane %v1054_v27, 5  ;;  %vm22406_vm13 = vcmask 130048  }
 0x10f   : > { %vm22405_vm3 = vsmask.f32 6400  ;;  %15200 = vmatprep.mubr.msk.bf16.mxu1 %vm22406_vm13, %v1334_v9  ;;  %v1349_v19 = vrot.slane %v1347_v14, 1  ;;  %1043 = vst [vmem:[#allocation2 + $0x74] sm:$0x3] %v1042_v57  ;;  %v1057_v31 = vshll.u32 %v839_v25, 16  ;;  %vm22407_vm15 = vmmov %vm22406_vm13 }
 0x110   : > { %v2714_v21 = vsel %vm22405_vm3, %v18447_v11, %v18538_v13  ;;  %v442_v28 = vadd.s32 224, %v17870_v3  ;;  %vm22408_vm14 = vsmask.f32 7424  ;;  %v747_v44 = vshrl.u32 %v18509_v26, 16  ;;  %vm22409_vm3 = vmmov %vm22406_vm13  ;;  %v17356_v26 = vld [vmem:[#allocation2 + $0x20] sm:$0xff]   ;;  %v18968_v13 = vld [vmem:[#allocation2 + $0x68] sm:$0xff]  }
 0x111   : > { %15349 = vmatmul.mubr.msk.bf16.gmra.mrb[16].mxu0 %vm22407_vm15, %v2714_v21  ;;  %v1342_v51 = vsel %vm22408_vm14, %v1337_v23, %v1341_v47  ;;  %v776_v20 = vsel %vm17970_vm4, 0, %v775_v52  ;;  %v792_v11 = vadd.s32 240, %v17860_v2  ;;  %vm22410_vm13 = vmmov %vm22409_vm3  ;;  %v1052_v58 = vrot.slane %v18536_v42, 4 }
 0x112   : > { %15201 = vmatmul.mubr.msk.bf16.gmra.mrb[20].mxu1 %vm22409_vm3, %v1342_v51  ;;  %15370 = vmatprep.mubr.msk.bf16.mxu0 %vm22410_vm13, %v3070_v17  ;;  %vm22411_vm12 = vmmov %vm22408_vm14  ;;  %v1059_v32 = vrot.slane %v1057_v31, 6  ;;  %vm458_vm15 = vcmp.eq.s32.totalorder %v18545_v34, %v442_v28  ;;  %777 = vst [vmem:[#allocation2 + $0x90] sm:$0x1] %v776_v20  ;;  %v3073_v47 = vrot.slane %v17356_v26, 2  ;;  %v749_v27 = vrot.slane %v747_v44, 4 }
 0x113   : > { %v1350_v25 = vsel %vm22411_vm12, %v1345_v61, %v1349_v19  ;;  %vm22412_vm14 = vmmov %vm22409_vm3  ;;  %vm808_vm8 = vcmp.eq.s32.totalorder %v18474_v37, %v792_v11  ;;  %vm22413_vm3 = vcmask 1045504   ;;  %v1351_v17 = vshrl.u32 %v18529_v63, 16  ;;  %v1070_v61 = vld [vmem:[#allocation2 + $0x84] sm:$0x7]  ;;  %v740_v38 = vld [vmem:[#allocation2 + $0x7c] sm:$0x6] }
 0x114   : > { %15204 = vmatprep.mubr.msk.bf16.mxu1 %vm22412_vm14, %v1350_v25  ;;  %vm474_vm5 = vmpackc.low %vm458_vm15, %vm458_vm15  ;;  %v3072_v2 = vsel %vm22413_vm3, %v3069_v46, %v3071_v12  ;;  %v1060_v52 = vor.u32 %v1059_v32, %v1056_v48  ;;  %v750_v39 = vor.u32 %v749_v27, %v18532_v59  ;;  %v741_v57 = vsel %vm22391_vm9, 0, %v740_v38  ;;  %v18584_v48 = vld [vmem:[#allocation7 + $0x38] sm:$0xff]   ;;  %v769_v51 = vld [vmem:[#allocation2 + $0x8c] sm:$0xf] }
 0x115   : > { %v490_v14 = vsel %vm474_vm5, %v18555_v6, 0  ;;  %vm824_vm12 = vmpackc.low %vm808_vm8, %vm808_vm8  ;;  %742 = vst [vmem:[#allocation2 + $0x7c] sm:$0x6] %v741_v57  ;;  %vm22415_vm8 = vcmask 125952   ;;  %v1353_v11 = vor.u32 %v1351_v17, %v1349_v19  ;;  %v17357_v32 = vld [vmem:[#allocation7 + $0x30] sm:$0xff]   ;;  %v3075_v26 = vrot.slane %v17358_v10, 2 }
 0x116   : > { %v753_v9 = vshll.u32 %v490_v14, 16  ;;  %v757_v23 = vshrl.u32 %v490_v14, 16  ;;  %v840_v37 = vsel %vm824_vm12, %v18483_v18, 0  ;;  %v1061_v54 = vsel %vm17933_vm6, %v1052_v58, %v1060_v52  ;;  %v18586_v31 = vld [vmem:[#allocation2 + $0x70] sm:$0xff]   ;;  %vm22414_vm5 = vmmov %vm22413_vm3  ;;  %v1100_v57 = vld [vmem:[#allocation2 + $0x98] sm:$0x1] }
 0x117   : > { %v1062_v46 = vrot.slane %v1060_v52, 4  ;;  %v1077_v21 = vshrl.u32 %v840_v37, 16  ;;  %v3074_v59 = vsel %vm22414_vm5, %v3071_v12, %v3073_v47  ;;  %1069 = vst.msk [vmem:[#allocation2 + $0x80] sm:$0xf] %vm22415_vm8, %v1061_v54  ;;  %v751_v18 = vrot.slane %v750_v39, 4  ;;  %vm22416_vm6 = vmmov %vm22410_vm13 }
 0x118   : > { %v755_v28 = vrot.slane %v753_v9, 5  ;;  %v759_v22 = vrot.slane %v757_v23, 4  ;;  %v1080_v20 = vshll.u32 %v840_v37, 16  ;;  %v1355_v25 = vshll.u32 %v18586_v31, 16  ;;  %vm22417_vm9 = vmmov %vm22416_vm6 }
 0x119   : > { %v1071_v50 = vsel %vm22360_vm2, %v1062_v46, %v1070_v61  ;;  %v1079_v44 = vrot.slane %v1077_v21, 7  ;;  %15371 = vmatmul.mubr.msk.bf16.vlgmr.msra.gmra.mrb[0].mxu0 %vm22416_vm6, %v3072_v2  ;;  %v1096_v58 = vld [vmem:[#allocation2 + $0x90] sm:$0xf]  ;;  %vm22418_vm2 = vmmov %vm22415_vm8  ;;  %v3077_v19 = vrot.slane %v18315_v49, 2  ;;  %v793_v17 = vadd.s32 240, %v17870_v3 }
 0x11a   : > { %1072 = vst [vmem:[#allocation2 + $0x84] sm:$0x7] %v1071_v50  ;;  %v756_v0 = vsel %vm22392_vm7, %v751_v18, %v755_v28  ;;  %v760_v12 = vor.u32 %v759_v22, %v755_v28  ;;  %15407 = vmatpush3.bf16.msra.mxu0 %v17357_v32  ;;  %15374 = vmatprep.mubr.msk.bf16.mxu0 %vm22417_vm9, %v3074_v59  ;;  %v1357_v52 = vrot.slane %v1355_v25, 1  ;;  %vm22419_vm7 = vsmask.f32 7424  ;;  %vm22421_vm15 = vmmov %vm22416_vm6 }
 0x11b   : > { %768 = vst.msk [vmem:[#allocation2 + $0x88] sm:$0xf] %vm22418_vm2, %v756_v0  ;;  %v1082_v27 = vor.u32 %v1080_v20, %v1079_v44  ;;  %15444 = vmatprep.subr.bf16.mxu0 %v18584_v48  ;;  %vm22420_vm13 = vnez %v22316_v43  ;;  %vm22422_vm14 = vmmov %vm22413_vm3  ;;  %vm809_vm3 = vcmp.eq.s32.totalorder %v18545_v34, %v793_v17  ;;  %vm22425_vm8 = vnez %v22324_v62 }
 0x11c   : > { %v761_v2 = vrot.slane %v760_v12, 4  ;;  %v1358_v61 = vsel %vm22419_vm7, %v1353_v11, %v1357_v52  ;;  %v3076_v38 = vsel %vm22422_vm14, %v3073_v47, %v3075_v26  ;;  %v1066_v39 = vld [vmem:[#allocation2 + $0x7c] sm:$0xc]  ;;  %vm825_vm12 = vmpackc.low %vm809_vm3, %vm809_vm3  ;;  %v3079_v34 = vrot.slane %v18330_v45, 2 }
 0x11d   : > { %v1097_v30 = vsel %vm22369_vm10, %v1082_v27, %v1096_v58  ;;  %15205 = vmatmul.mubr.msk.bf16.gmra.mrb[24].mxu1 %vm22421_vm15, %v1358_v61  ;;  %v1067_v4 = vsel %vm22397_vm1, %v18536_v42, %v1066_v39  ;;  %vm22423_vm10 = vmmov %vm22414_vm5  ;;  %v841_v43 = vsel %vm825_vm12, %v18555_v6, 0  ;;  %v3081_v42 = vrot.slane %v18342_v33, 2 }
 0x11e   : > { %v770_v14 = vsel %vm22420_vm13, %v761_v2, %v769_v51  ;;  %1098 = vst [vmem:[#allocation2 + $0x90] sm:$0xf] %v1097_v30  ;;  %v3078_v3 = vsel %vm22423_vm10, %v3075_v26, %v3077_v19  ;;  %1068 = vst [vmem:[#allocation2 + $0x7c] sm:$0xc] %v1067_v4  ;;  %v1085_v9 = vshrl.u32 %v841_v43, 16  ;;  %v1088_v29 = vshll.u32 %v841_v43, 16 }
 0x11f   : > { %771 = vst [vmem:[#allocation2 + $0x8c] sm:$0xf] %v770_v14  ;;  %vm22424_vm5 = vmmov %vm22416_vm6  ;;  %v1083_v23 = vrot.slane %v1079_v44, 4  ;;  %v1359_v54 = vshrl.u32 %v18586_v31, 16  ;;  %v3083_v55 = vrot.slane %v18344_v5, 2  ;;  %v3085_v11 = vrot.slane %v18425_v56, 2 }
 0x120   : > { %vm22426_vm6 = vmmov %vm22424_vm5  ;;  %v1087_v37 = vrot.slane %v1085_v9, 7  ;;  %vm22439_vm12 = vnez %v22345_v35  ;;  %v17184_v9 = vld [vmem:[#allocation2 + $0x70] sm:$0xff]   ;;  %v22499_v53 = vmov 0  }
 0x121   : > { %v1073_v49 = vld [vmem:[#allocation2 + $0x84] sm:$0xc]  ;;  %15375 = vmatmul.mubr.msk.bf16.gmra.mrb[4].mxu0 %vm22424_vm5, %v3076_v38  ;;  %vm22427_vm1 = vmmov %vm22423_vm10  ;;  %v1361_v50 = vor.u32 %v1359_v54, %v1357_v52  ;;  %v3087_v38 = vrot.slane %v18511_v41, 2 }
 0x122   : > { %v1074_v47 = vsel %vm22425_vm8, 0, %v1073_v49  ;;  %15378 = vmatprep.mubr.msk.bf16.mxu0 %vm22426_vm6, %v3078_v3  ;;  %v1090_v46 = vor.u32 %v1088_v29, %v1087_v37  ;;  %v1092_v21 = vrot.slane %v1087_v37, 4  ;;  %v3080_v62 = vsel %vm22427_vm1, %v3077_v19, %v3079_v34  ;;  %vm22428_vm9 = vmmov %vm22427_vm1  ;;  %v17182_v52 = vld [vmem:[#allocation2 + $0x60] sm:$0xff]   ;;  %v18675_v37 = vld [vmem:[#allocation2 + $0x8] sm:$0xff]  }
 0x123   : > { %1075 = vst [vmem:[#allocation2 + $0x84] sm:$0xc] %v1074_v47  ;;  %v3082_v45 = vsel %vm22428_vm9, %v3079_v34, %v3081_v42  ;;  %vm22431_vm7 = vmmov %vm22424_vm5  ;;  %v3089_v39 = vrot.slane %v17182_v52, 2  ;;  %v3088_v43 = vsel %vm22428_vm9, %v3085_v11, %v3087_v38  ;;  %v17183_v47 = vld [vmem:[#allocation2 + $0x68] sm:$0xff]   ;;  %v3093_v34 = vrot.slane %v17184_v9, 2  ;;  %v18672_v29 = vld [vmem:[#allocation7 + $0x18] sm:$0xff]  }
 0x124   : > { %v1091_v33 = vsel %vm22368_vm0, %v1083_v23, %v1090_v46  ;;  %v1101_v28 = vsel %vm17970_vm4, %v1092_v21, %v1100_v57  ;;  %vm22432_vm4 = vsmask.f32 7424  ;;  %vm22433_vm0 = vmmov %vm22424_vm5  ;;  %v3091_v41 = vrot.slane %v17183_v47, 2  ;;  %v4666_v46 = vld [vmem:[%s22190_s2] sm:$0xff]  ;;  %v4671_v52 = vld [vmem:[%s22190_s2 + $0x28] sm:$0xff] }
 0x125   : > { %v18626_v18 = vld [vmem:[#allocation2 + $0x78] sm:$0xff]   ;;  %v18633_v22 = vld [vmem:[#allocation2 + $0x90] ss:$0 sps:$4 sm:$0x11]   ;;  %1099 = vst.msk [vmem:[#allocation2 + $0x94] sm:$0xf] %vm22418_vm2, %v1091_v33  ;;  %vm22434_vm13 = vmmov %vm22427_vm1 }
 0x126   : > { %v772_v6 = vld [vmem:[#allocation2 + $0x8c] sm:$0x8]  ;;  %22429 = vst [vmem:[#allocation20_spill] sm:$0xff] %v18633_v22  ;;  %1102 = vst [vmem:[#allocation2 + $0x98] sm:$0x1] %v1101_v28  ;;  %v1363_v60 = vshll.u32 %v18626_v18, 16  ;;  %v3084_v26 = vsel %vm22434_vm13, %v3081_v42, %v3083_v55 }
 0x127   : > { %v773_v59 = vsel %vm17951_vm11, 0, %v772_v6  ;;  %v1367_v44 = vshrl.u32 %v18626_v18, 16  ;;  %vm22430_vm11 = vmmov %vm22424_vm5  ;;  %v1387_v10 = vshll.u32 %v18633_v22, 16  ;;  %v17185_v23 = vld [vmem:[#allocation2 + $0x78] sm:$0xff]  }
 0x128   : > { %774 = vst [vmem:[#allocation2 + $0x8c] sm:$0x8] %v773_v59  ;;  %v1365_v16 = vrot.slane %v1363_v60, 1  ;;  %vm22435_vm15 = vmmov %vm22432_vm4  ;;  %v17361_v6 = vld [vmem:[#allocation7 + $0x10] sm:$0xff]   ;;  %v3095_v21 = vrot.slane %v17185_v23, 2  ;;  %v18786_v23 = vld [vmem:[#allocation2 + $0x20] sm:$0xff]  }
 0x129   : > { %15379 = vmatmul.mubr.msk.bf16.gmra.mrb[8].mxu0 %vm22430_vm11, %v3080_v62  ;;  %vm22436_vm14 = vmmov %vm22427_vm1  ;;  %v1389_v14 = vrot.slane %v1387_v10, 1  ;;  %v18698_v60 = vld [vmem:[#allocation2 + $0x18] sm:$0xff]  }
 0x12a   : > { %v18637_v51 = vld [vmem:[#allocation2 + $0x80] sm:$0xff]   ;;  %15382 = vmatprep.mubr.msk.bf16.mxu0 %vm22431_vm7, %v3082_v45  ;;  %v1366_v0 = vsel %vm22432_vm4, %v1361_v50, %v1365_v16  ;;  %v1369_v12 = vor.u32 %v1367_v44, %v1365_v16  ;;  %v3086_v27 = vsel %vm22436_vm14, %v3083_v55, %v3085_v11  ;;  %vm22437_vm3 = vmmov %vm22433_vm0  ;;  %v4668_v45 = vld [vmem:[%s22190_s2 + $0x10] sm:$0xff] }
 0x12b   : > { %v1371_v20 = vshll.u32 %v18637_v51, 16  ;;  %v1375_v25 = vshrl.u32 %v18637_v51, 16  ;;  %15208 = vmatprep.mubr.msk.bf16.mxu1 %vm22433_vm0, %v1366_v0  ;;  %vm22438_vm10 = vmmov %vm22433_vm0  ;;  %v17186_v54 = vld [vmem:[#allocation2 + $0x80] sm:$0xff]   ;;  %v4667_v16 = vld [vmem:[%s22190_s2 + $0x8] sm:$0xff] }
 0x12c   : > { %vm22440_vm5 = vmmov %vm22433_vm0  ;;  %v3097_v62 = vrot.slane %v17186_v54, 2  ;;  %v17188_v50 = vld [vmem:[#allocation2 + $0x90] sm:$0xff]   ;;  %v4670_v11 = vld [vmem:[%s22190_s2 + $0x20] sm:$0xff] }
 0x12d   : > { %v1373_v58 = vrot.slane %v1371_v20, 1  ;;  %v1103_v30 = vld [vmem:[#allocation2 + $0x98] sm:$0x3]  ;;  %vm22441_vm8 = vmmov %vm22432_vm4 }
 0x12e   : > { %v1104_v17 = vsel %vm22439_vm12, 0, %v1103_v30  ;;  %vm22442_vm6 = vmmov %vm22433_vm0  ;;  %v4669_v20 = vld [vmem:[%s22190_s2 + $0x18] sm:$0xff]  ;;  %v18742_v30 = vld [vmem:[#allocation2 + $0x28] sm:$0xff]  }
 0x12f   : > { %v18648_v32 = vld [vmem:[#allocation2 + $0x88] sm:$0xff]   ;;  %v1374_v5 = vsel %vm22435_vm15, %v1369_v12, %v1373_v58  ;;  %v1377_v56 = vor.u32 %v1375_v25, %v1373_v58  ;;  %1105 = vst [vmem:[#allocation2 + $0x98] sm:$0x3] %v1104_v17  ;;  %vm22443_vm1 = vmmov %vm22432_vm4  ;;  %v18715_v25 = vld [vmem:[#allocation2 + $0x20] sm:$0xff]   ;;  %v3101_v58 = vrot.slane %v17188_v50, 2 }
 0x130   : > { %15209 = vmatmul.mubr.msk.bf16.gmra.mrb[28].mxu1 %vm22437_vm3, %v1374_v5  ;;  %v1379_v19 = vshll.u32 %v18648_v32, 16  ;;  %v1383_v2 = vshrl.u32 %v18648_v32, 16  ;;  %vm22444_vm2 = vmmov %vm22428_vm9  ;;  %v17187_v28 = vld [vmem:[#allocation2 + $0x88] sm:$0xff]   ;;  %v3378_v5 = vld [vmem:[#allocation2 + $0x10] sm:$0xc] }
 0x131   : > { %15383 = vmatmul.mubr.msk.bf16.gmra.mrb[12].mxu0 %vm22438_vm10, %v3084_v26  ;;  %v3090_v35 = vsel %vm22444_vm2, %v3087_v38, %v3089_v39  ;;  %vm22445_vm11 = vmmov %vm22433_vm0  ;;  %v3099_v12 = vrot.slane %v17187_v28, 2  ;;  %v4672_v38 = vld [vmem:[%s22190_s2 + $0x30] sm:$0xff]  ;;  %v18791_v54 = vld [vmem:[#allocation2 + $0x38] sm:$0xff]  }
 0x132   : > { %v1381_v61 = vrot.slane %v1379_v19, 1  ;;  %15386 = vmatprep.mubr.msk.bf16.mxu0 %vm22440_vm5, %v3086_v27  ;;  %vm22446_vm7 = vmmov %vm22433_vm0  ;;  %vm4702_vm5 = vcmp.gt.f32.partialorder %v4666_v46, 0.0  ;;  %v18732_v27 = vld [vmem:[#allocation2 + $0x14] sm:$0xf] }
 0x133   : > { %vm22447_vm4 = vmmov %vm22433_vm0  ;;  %v18691_v59 = vsel %vm4702_vm5, 1, %v22235_v1  ;;  %22460 = vst [vmem:[#allocation21_spill] sm:$0xff] %v18732_v27  ;;  %vm4708_vm5 = vcmp.gt.f32.partialorder %v4672_v38, 0.0  ;;  %v4680_v38 = vld [vmem:[%s22190_s2 + $0x70] sm:$0xff] }
 0x134   : > { %v1382_v4 = vsel %vm22441_vm8, %v1377_v56, %v1381_v61  ;;  %v1385_v3 = vor.u32 %v1383_v2, %v1381_v61  ;;  %vm22448_vm13 = vmmov %vm22444_vm2  ;;  %4775 = vperm.xlu0 %17144, %v18691_v59   ;;  %v18739_v2 = vld [vmem:[#allocation2 + $0x18] sm:$0xff]   ;;  %v18748_v61 = vcombine.low %v3378_v5, %v18732_v27  ;;  %v4692_v27 = vld [vmem:[%s22190_s2 + $0xd0] sm:$0xff] }
 0x135   : > { %15212 = vmatprep.mubr.msk.bf16.mxu1 %vm22442_vm6, %v1382_v4  ;;  %v3092_v42 = vsel %vm22448_vm13, %v3089_v39, %v3091_v41  ;;  %vm22449_vm15 = vmmov %vm22433_vm0  ;;  %vm4704_vm6 = vcmp.gt.f32.partialorder %v4668_v45, 0.0  ;;  %vm4706_vm13 = vcmp.gt.f32.partialorder %v4670_v11, 0.0  ;;  %v4673_v39 = vld [vmem:[%s22190_s2 + $0x38] sm:$0xff]  ;;  %v4674_v4 = vld [vmem:[%s22190_s2 + $0x40] sm:$0xff]  ;;  %v3512_v9 = vrot.slane %v18739_v2, 2 }
 0x136   : > { %v1390_v49 = vsel %vm22443_vm1, %v1385_v3, %v1389_v14  ;;  %vm22450_vm14 = vmmov %vm22444_vm2  ;;  %v18704_v55 = vsel %vm4704_vm6, 1, %v22235_v1  ;;  %v18730_v26 = vsel %vm4706_vm13, 1, %v22235_v1  ;;  %v17189_v19 = vld [vmem:[#allocation2 + $0x98] ss:$0 sps:$4 sm:$0x33]   ;;  %v18762_v3 = vld [vmem:[#allocation2 + $0x30] sm:$0xff]  }
 0x137   : > { %v3094_v57 = vsel %vm22450_vm14, %v3091_v41, %v3093_v34  ;;  %vm22451_vm3 = vmmov %vm22433_vm0  ;;  %4781 = vperm.xlu1 %17145, %v18704_v55   ;;  %vm4707_vm14 = vcmp.gt.f32.partialorder %v4671_v52, 0.0  ;;  %vm4710_vm6 = vcmp.gt.f32.partialorder %v4674_v4, 0.0  ;;  %v3511_v47 = vrot.slane %v18748_v61, 2  ;;  %v4678_v45 = vld [vmem:[%s22190_s2 + $0x60] sm:$0xff]  ;;  %v4679_v11 = vld [vmem:[%s22190_s2 + $0x68] sm:$0xff] }
 0x138   : > { %15213 = vmatmul.mubr.msk.bf16.gmra.mrb[32].mxu1 %vm22445_vm11, %v1390_v49  ;;  %vm22452_vm10 = vmmov %vm22433_vm0  ;;  %vm4703_vm11 = vcmp.gt.f32.partialorder %v4667_v16, 0.0  ;;  %v18751_v14 = vsel %vm4707_vm14, 1, %v22235_v1  ;;  %v18769_v49 = vsel %vm4708_vm5, 1, %v22235_v1  ;;  %v18779_v41 = vsel %vm4710_vm6, 1, %v22235_v1  ;;  %v18834_v5 = vld [vmem:[#allocation2 + $0x38] sm:$0xff]   ;;  %v18836_v52 = vld [vmem:[#allocation7 + $0x40] sm:$0xff]  }
 0x139   : > { %15218 = vmatprep.mubr.msk.bf16.mxu1 %vm22446_vm7, %v17901_v24  ;;  %15387 = vmatmul.mubr.msk.bf16.gmra.mrb[16].mxu0 %vm22447_vm4, %v3088_v43  ;;  %v18680_v24 = vld [vmem:[#allocation2 + $0x10] sm:$0xff]   ;;  %vm22453_vm12 = vmmov %vm22433_vm0  ;;  %v18722_v0 = vsel %vm4703_vm11, 1, %v22235_v1  ;;  %vm4714_vm14 = vcmp.gt.f32.partialorder %v4678_v45, 0.0  ;;  %vm4715_vm5 = vcmp.gt.f32.partialorder %v4679_v11, 0.0  ;;  %v4682_v4 = vld [vmem:[%s22190_s2 + $0x80] sm:$0xff] }
 0x13a   : > { %15390 = vmatprep.mubr.msk.bf16.mxu0 %vm22433_vm0, %v3090_v35  ;;  %vm22454_vm8 = vmmov %vm22444_vm2  ;;  %4778 = vperm.xlu0 %17144, %v18722_v0   ;;  %v3103_v35 = vrot.slane %v17189_v19, 2  ;;  %v18884_v45 = vld [vmem:[#allocation2 + $0x48] sm:$0xff]  }
 0x13b   : > { %v3096_v33 = vsel %vm22454_vm8, %v3093_v34, %v3095_v21  ;;  %vm22455_vm1 = vmmov %vm22433_vm0  ;;  %v4675_v34 = vld [vmem:[%s22190_s2 + $0x48] sm:$0xff] }
 0x13c   : > { %vm22456_vm9 = vmmov %vm22444_vm2  ;;  %vm4711_vm11 = vcmp.gt.f32.partialorder %v4675_v34, 0.0 }
 0x13d   : > { %v3098_v44 = vsel %vm22456_vm9, %v3095_v21, %v3097_v62  ;;  %vm22457_vm2 = vmmov %vm22433_vm0  ;;  %v18797_v46 = vsel %vm4711_vm11, 1, %v22235_v1  ;;  %v4676_v21 = vld [vmem:[%s22190_s2 + $0x50] sm:$0xff] }
 0x13e   : > { %vm22458_vm7 = vmmov %vm22433_vm0  ;;  %4787 = vperm.xlu0 %17144, %v18730_v26   ;;  %vm4712_vm13 = vcmp.gt.f32.partialorder %v4676_v21, 0.0  ;;  %v4683_v21 = vld [vmem:[%s22190_s2 + $0x88] sm:$0xff] }
 0x13f   : > { %vm22459_vm4 = vmmov %vm22433_vm0  ;;  %vm4705_vm0 = vcmp.gt.f32.partialorder %v4669_v20, 0.0  ;;  %v18815_v28 = vsel %vm4712_vm13, 1, %v22235_v1  ;;  %v18825_v20 = vsel %vm4714_vm14, 1, %v22235_v1  ;;  %vm4719_vm13 = vcmp.gt.f32.partialorder %v4683_v21, 0.0 }
 0x140   : > { %15219 = vmatmul.mubr.msk.bf16.vlgmr.msra.gmra.mrb[0].mxu1 %vm22449_vm15, %v18675_v37  ;;  %v18727_v10 = vsel %vm4705_vm0, 1, %v22235_v1  ;;  %vm22461_vm15 = vmmov %vm22454_vm8  ;;  %v18891_v11 = vsel %vm4719_vm13, 1, %v22235_v1 }
 0x141   : > { %15222 = vmatprep.mubr.msk.bf16.mxu1 %vm22451_vm3, %v18680_v24  ;;  %15255 = vmatpush3.bf16.msra.mxu1 %v17361_v6  ;;  %v3100_v56 = vsel %vm22461_vm15, %v3097_v62, %v3099_v12  ;;  %vm22462_vm3 = vmmov %vm22455_vm1  ;;  %v4677_v62 = vld [vmem:[%s22190_s2 + $0x58] sm:$0xff] }
 0x142   : > { %15391 = vmatmul.mubr.msk.bf16.gmra.mrb[20].mxu0 %vm22452_vm10, %v3092_v42  ;;  %15292 = vmatprep.subr.bf16.mxu1 %v18672_v29  ;;  %vm22463_vm10 = vmmov %vm22454_vm8  ;;  %vm4709_vm8 = vcmp.gt.f32.partialorder %v4673_v39, 0.0  ;;  %vm4713_vm15 = vcmp.gt.f32.partialorder %v4677_v62, 0.0  ;;  %v4681_v39 = vld [vmem:[%s22190_s2 + $0x78] sm:$0xff]  ;;  %v18882_v62 = vld [vmem:[#allocation2 + $0x40] sm:$0xff]  }
 0x143   : > { %15394 = vmatprep.mubr.msk.bf16.mxu0 %vm22453_vm12, %v3094_v57  ;;  %4784 = vperm.xlu1 %17145, %v18727_v10   ;;  %v3102_v17 = vsel %vm22463_vm10, %v3099_v12, %v3101_v58  ;;  %vm22464_vm12 = vmmov %vm22455_vm1  ;;  %v18772_v43 = vsel %vm4709_vm8, 1, %v22235_v1  ;;  %v18788_v57 = vld [vmem:[#allocation2 + $0x28] sm:$0xff]   ;;  %v18818_v50 = vsel %vm4713_vm15, 1, %v22235_v1 }
 0x144   : > { %vm22465_vm9 = vmmov %vm22455_vm1  ;;  %4793 = vperm.xlu0 %17144, %v18769_v49   ;;  %v3516_v16 = vrot.slane %v18788_v57, 2 }
 0x145   : > { %vm22469_vm0 = vmmov %vm22455_vm1 }
 0x146   : > { %vm22473_vm8 = vmmov %vm22469_vm0 }
 0x147   : > { %4790 = vperm.xlu1 %17145, %v18751_v14   ;;  %vm22476_vm11 = vmmov %vm22469_vm0 }
 0x148   : > { %15223 = vmatmul.mubr.msk.bf16.gmra.mrb[4].mxu1 %vm22455_vm1, %v18698_v60  ;;  %4799 = vperm.xlu0 %17144, %v18779_v41  }
 0x149   : > { %15226 = vmatprep.mubr.msk.bf16.mxu1 %vm22457_vm2, %v18715_v25  ;;  %vm22466_vm2 = vmmov %vm22463_vm10 }
 0x14a   : > { %15395 = vmatmul.mubr.msk.bf16.gmra.mrb[24].mxu0 %vm22458_vm7, %v3096_v33  ;;  %v3104_v42 = vsel %vm22466_vm2, %v3101_v58, %v3103_v35  ;;  %vm22467_vm7 = vmmov %vm22455_vm1  ;;  %v18808_v33 = vld [vmem:[#allocation2 + $0x40] sm:$0xff]   ;;  %v18832_v58 = vld [vmem:[#allocation2 + $0x30] sm:$0xff]  }
 0x14b   : > { %15398 = vmatprep.mubr.msk.bf16.mxu0 %vm22459_vm4, %v3098_v44  ;;  %4796 = vperm.xlu1 %17145, %v18772_v43   ;;  %vm22468_vm4 = vmmov %vm22466_vm2  ;;  %v3514_v44 = vrot.slane %v18786_v23, 2  ;;  %v18856_v35 = vld [vmem:[#allocation2 + $0x50] sm:$0xff]   ;;  %v3518_v34 = vrot.slane %v18832_v58, 2 }
 0x14c   : > { %v3513_v6 = vsel %vm22468_vm4, %v3511_v47, %v3512_v9  ;;  %vm22471_vm10 = vmmov %vm22469_vm0  ;;  %4805 = vperm.xlu0 %17144, %v18815_v28  }
 0x14d   : > { %vm22474_vm6 = vmmov %vm22466_vm2 }
 0x14e   : > { %v3517_v19 = vsel %vm22474_vm6, %v3514_v44, %v3516_v16  ;;  %vm22477_vm4 = vmmov %vm22469_vm0 }
 0x14f   : > { %4802 = vperm.xlu1 %17145, %v18797_v46  }
 0x150   : > { %15227 = vmatmul.mubr.msk.bf16.gmra.mrb[8].mxu1 %vm22462_vm3, %v18742_v30  ;;  %vm22470_vm3 = vmmov %vm22469_vm0  ;;  %4811 = vperm.xlu0 %17144, %v18825_v20  }
 0x151   : > { %15230 = vmatprep.mubr.msk.bf16.mxu1 %vm22464_vm12, %v18762_v3  ;;  %vm22472_vm12 = vmmov %vm22466_vm2  ;;  %vm4717_vm2 = vcmp.gt.f32.partialorder %v4681_v39, 0.0  ;;  %v3522_v39 = vrot.slane %v18882_v62, 2 }
 0x152   : > { %15399 = vmatmul.mubr.msk.bf16.gmra.mrb[28].mxu0 %vm22455_vm1, %v3100_v56  ;;  %v3515_v12 = vsel %vm22472_vm12, %v3512_v9, %v3514_v44  ;;  %v18839_v56 = vld [vmem:[#allocation2 + $0x48] sm:$0xff]   ;;  %vm22475_vm1 = vmmov %vm22469_vm0  ;;  %v18866_v9 = vsel %vm4717_vm2, 1, %v22235_v1 }
 0x153   : > { %15402 = vmatprep.mubr.msk.bf16.mxu0 %vm22465_vm9, %v3102_v17  ;;  %4808 = vperm.xlu1 %17145, %v18818_v50   ;;  %v18845_v17 = vsel %vm4715_vm5, 1, %v22235_v1  ;;  %vm4716_vm9 = vcmp.gt.f32.partialorder %v4680_v38, 0.0  ;;  %vm22479_vm15 = vmmov %vm22475_vm1 }
 0x154   : > { %v18863_v47 = vsel %vm4716_vm9, 1, %v22235_v1  ;;  %vm22482_vm5 = vmmov %vm22475_vm1 }
 0x155   : > { %4817 = vperm.xlu0 %17144, %v18863_v47  }
 0x157   : > { %4814 = vperm.xlu1 %17145, %v18845_v17  }
 0x158   : > { %15231 = vmatmul.mubr.msk.bf16.gmra.mrb[12].mxu1 %vm22467_vm7, %v18791_v54  ;;  %vm4718_vm7 = vcmp.gt.f32.partialorder %v4682_v4, 0.0  ;;  %v3524_v4 = vrot.slane %v18884_v45, 2 }
 0x159   : > { %15234 = vmatprep.mubr.msk.bf16.mxu1 %vm22469_vm0, %v18808_v33  ;;  %vm22478_vm0 = vmmov %vm22474_vm6 }
 0x15a   : > { %15403 = vmatmul.mubr.msk.bf16.gmra.mrb[32].mxu0 %vm22470_vm3, %v3104_v42  ;;  %v3520_v42 = vrot.slane %v18834_v5, 2  ;;  %vm22480_vm14 = vmmov %vm22478_vm0 }
 0x15b   : > { %15408 = vmatprep.mubr.msk.bf16.mxu0 %vm22471_vm10, %v3513_v6  ;;  %4820 = vperm.xlu1 %17145, %v18866_v9   ;;  %v18876_v6 = vsel %vm4718_vm7, 1, %v22235_v1  ;;  %vm22481_vm3 = vmmov %vm22475_vm1 }
 0x15c   : > { %v3521_v44 = vsel %vm22480_vm14, %v3518_v34, %v3520_v42  ;;  %4823 = vperm.xlu0 %17144, %v18876_v6   ;;  %vm22483_vm6 = vmmov %vm22475_vm1 }
 0x15d   : > { %vm22485_vm2 = vmmov %vm22481_vm3 }
 0x15e   : > { %vm22487_vm7 = vmmov %vm22485_vm2 }
 0x15f   : > { %4826 = vperm.xlu1 %17145, %v18891_v11   ;;  %vm22488_vm13 = vmmov %vm22485_vm2 }
 0x160   : > { %15235 = vmatmul.mubr.msk.bf16.gmra.mrb[16].mxu1 %vm22473_vm8, %v18839_v56  ;;  %vm22491_vm14 = vmmov %vm22485_vm2 }
 0x161   : > { %15238 = vmatprep.mubr.msk.bf16.mxu1 %vm22475_vm1, %v18856_v35  ;;  %vm22484_vm1 = vmmov %vm22478_vm0 }
 0x162   : > { %15409 = vmatmul.mubr.msk.bf16.vlgmr.msra.gmra.mrb[0].mxu0 %vm22476_vm11, %v3515_v12  ;;  %v4684_v12 = vld [vmem:[%s22190_s2 + $0x90] sm:$0xff]  ;;  %v3523_v21 = vsel %vm22484_vm1, %v3520_v42, %v3522_v39  ;;  %vm22486_vm11 = vmmov %vm22478_vm0  ;;  %v4689_v42 = vld [vmem:[%s22190_s2 + $0xb8] sm:$0xff] }
 0x163   : > { %15445 = vmatpush3.bf16.msra.mxu0 %v18584_v48  ;;  %15412 = vmatprep.mubr.msk.bf16.mxu0 %vm22477_vm4, %v3517_v19  ;;  %v3519_v48 = vsel %vm22478_vm0, %v3516_v16, %v3518_v34  ;;  %v4685_v16 = vld [vmem:[%s22190_s2 + $0x98] sm:$0xff]  ;;  %v4686_v19 = vld [vmem:[%s22190_s2 + $0xa0] sm:$0xff]  ;;  %vm4720_vm10 = vcmp.gt.f32.partialorder %v4684_v12, 0.0  ;;  %v4687_v34 = vld [vmem:[%s22190_s2 + $0xa8] sm:$0xff]  ;;  %v3525_v12 = vsel %vm22486_vm11, %v3522_v39, %v3524_v4  ;;  %vm4725_vm0 = vcmp.gt.f32.partialorder %v4689_v42, 0.0 }
 0x164   : > { %15482 = vmatprep.subr.bf16.mxu0 %v18836_v52  ;;  %vm4721_vm12 = vcmp.gt.f32.partialorder %v4685_v16, 0.0  ;;  %vm4722_vm8 = vcmp.gt.f32.partialorder %v4686_v19, 0.0  ;;  %vm4723_vm9 = vcmp.gt.f32.partialorder %v4687_v34, 0.0  ;;  %v4688_v19 = vld [vmem:[%s22190_s2 + $0xb0] sm:$0xff]  ;;  %v4690_v34 = vld [vmem:[%s22190_s2 + $0xc0] sm:$0xff]  ;;  %v18952_v40 = vsel %vm4725_vm0, 1, %v22235_v1 }
 0x165   : > { %v18910_v38 = vsel %vm4721_vm12, 1, %v22235_v1  ;;  %v18933_v16 = vsel %vm4723_vm9, 1, %v22235_v1  ;;  %vm4724_vm4 = vcmp.gt.f32.partialorder %v4688_v19, 0.0  ;;  %22490 = vst [vmem:[#allocation23_spill] sm:$0xff] %v18952_v40  ;;  %v17370_v19 = vld [vmem:[#allocation2 + $0x4] sm:$0xf]  ;;  %vm22494_vm12 = vmmov %vm22485_vm2 }
 0x166   : > { %4832 = vperm.xlu1 %17145, %v18910_v38   ;;  %v18949_v39 = vsel %vm4724_vm4, 1, %v22235_v1  ;;  %vm22498_vm9 = vmmov %vm22485_vm2  ;;  %vm1855_vm11 = vcmask 1046528  }
 0x167   : > { %22489 = vst [vmem:[#allocation22_spill] sm:$0xff] %v18949_v39 }
 0x168   : > { %15239 = vmatmul.mubr.msk.bf16.gmra.mrb[20].mxu1 %vm22479_vm15, %v18515_v15  ;;  %v18907_v15 = vsel %vm4720_vm10, 1, %v22235_v1  ;;  %vm4726_vm15 = vcmp.gt.f32.partialorder %v4690_v34, 0.0  ;;  %vm4727_vm10 = vcmp.gt.f32.partialorder %v4691_v8, 0.0  ;;  %v4694_v8 = vld [vmem:[%s22190_s2 + $0xe0] sm:$0xff] }
 0x169   : > { %15242 = vmatprep.mubr.msk.bf16.mxu1 %vm22481_vm3, %v18488_v7  ;;  %4829 = vperm.xlu0 %17144, %v18907_v15   ;;  %v18918_v7 = vsel %vm4722_vm8, 1, %v22235_v1  ;;  %vm22493_vm3 = vmmov %vm22484_vm1 }
 0x16a   : > { %15413 = vmatmul.mubr.msk.bf16.gmra.mrb[4].mxu0 %vm22482_vm5, %v3519_v48  ;;  %v18924_v48 = vld [vmem:[#allocation2 + $0x50] sm:$0xff]   ;;  %4838 = vperm.xlu1 %17145, %v18933_v16   ;;  %vm22495_vm5 = vmmov %vm22484_vm1 }
 0x16b   : > { %15416 = vmatprep.mubr.msk.bf16.mxu0 %vm22483_vm6, %v3521_v44  ;;  %v18926_v44 = vld [vmem:[#allocation2 + $0x58] sm:$0xff]   ;;  %v3526_v36 = vrot.slane %v18924_v48, 2  ;;  %vm22497_vm8 = vmmov %vm22485_vm2  ;;  %vm4728_vm6 = vcmp.gt.f32.partialorder %v4692_v27, 0.0 }
 0x16c   : > { %vm22503_vm4 = vmmov %vm22493_vm3 }
 0x16d   : > { %4835 = vperm.xlu0 %17144, %v18918_v7   ;;  %v3527_v34 = vsel %vm22493_vm3, %v3524_v4, %v3526_v36  ;;  %v4693_v4 = vld [vmem:[%s22190_s2 + $0xd8] sm:$0xff] }
 0x16e   : > { %4844 = vperm.xlu1 %17145, %v18952_v40   ;;  %vm4729_vm1 = vcmp.gt.f32.partialorder %v4693_v4, 0.0 }
 0x16f   : > { %v18995_v22 = vsel %vm4729_vm1, 1, %v22499_v53 }
 0x170   : > { %15243 = vmatmul.mubr.msk.bf16.gmra.mrb[24].mxu1 %vm22485_vm2, %v18529_v63  ;;  %v1848_v63 = vld [vmem:[#allocation2] sm:$0xe]  ;;  %22501 = vst [vmem:[#allocation27_spill] sm:$0xff] %v18995_v22  ;;  %vm4730_vm2 = vcmp.gt.f32.partialorder %v4694_v8, 0.0  ;;  %v19012_v8 = vld [vmem:[#allocation2 + $0x78] sm:$0xff]  }
 0x171   : > { %15246 = vmatprep.mubr.msk.bf16.mxu1 %vm22487_vm7, %v18586_v31  ;;  %v3528_v31 = vrot.slane %v18926_v44, 2  ;;  %4841 = vperm.xlu0 %17144, %v18949_v39   ;;  %v13800_v42 = vcombine.low %v1848_v63, %v17370_v19  ;;  %v18975_v19 = vsel %vm4727_vm10, 1, %v22235_v1 }
 0x172   : > { %15417 = vmatmul.mubr.msk.bf16.gmra.mrb[8].mxu0 %vm22488_vm13, %v3523_v21  ;;  %v18960_v21 = vsel %vm4726_vm15, 1, %v22235_v1  ;;  %22496 = vst [vmem:[#allocation25_spill] sm:$0xff] %v18975_v19  ;;  %4850 = vperm.xlu1 %17145, %v18975_v19   ;;  %v1857_v1 = vrot.slane %v18675_v37, 1  ;;  %v3532_v19 = vrot.slane %v18968_v13, 2  ;;  %v19003_v37 = vsel %vm4730_vm2, 1, %v22499_v53  ;;  %vm22504_vm13 = vmmov %vm22487_vm7 }
 0x173   : > { %15420 = vmatprep.mubr.msk.bf16.mxu0 %vm22491_vm14, %v3525_v12  ;;  %22492 = vst [vmem:[#allocation24_spill] sm:$0xff] %v18960_v21  ;;  %v18966_v12 = vld [vmem:[#allocation2 + $0x60] sm:$0xff]   ;;  %v3529_v63 = vsel %vm22495_vm5, %v3526_v36, %v3528_v31  ;;  %v1856_v36 = vrot.slane %v13800_v42, 1  ;;  %22502 = vst [vmem:[#allocation28_spill] sm:$0xff] %v19003_v37 }
 0x174   : > { %v3530_v42 = vrot.slane %v18966_v12, 2  ;;  %vm22505_vm15 = vmmov %vm22493_vm3 }
 0x175   : > { %4847 = vperm.xlu0 %17144, %v18960_v21   ;;  %v18992_v21 = vsel %vm4728_vm6, 1, %v22499_v53  ;;  %v1858_v27 = vsel %vm1855_vm11, %v1856_v36, %v1857_v1  ;;  %vm22506_vm14 = vmmov %vm22487_vm7 }
 0x176   : > { %22500 = vst [vmem:[#allocation26_spill] sm:$0xff] %v18992_v21  ;;  %4856 = vperm.xlu1 %17145, %v18995_v22   ;;  %v3531_v4 = vsel %vm22503_vm4, %v3528_v31, %v3530_v42  ;;  %v3533_v22 = vsel %vm22505_vm15, %v3530_v42, %v3532_v19  ;;  %v4697_v31 = vld [vmem:[%s22190_s2 + $0xf8] sm:$0xff]  ;;  %v1859_v42 = vrot.slane %v18680_v24, 1  ;;  %v3536_v24 = vrot.slane %v19012_v8, 2  ;;  %vm22512_vm6 = vmmov %vm22503_vm4 }
 0x177   : > { %vm4733_vm10 = vcmp.gt.f32.partialorder %v4697_v31, 0.0  ;;  %v4699_v31 = vld [vmem:[%s22190_s2 + $0x108] sm:$0xff]  ;;  %vm22514_vm2 = vmmov %vm22503_vm4 }
 0x178   : > { %15247 = vmatmul.mubr.msk.bf16.gmra.mrb[28].mxu1 %vm22494_vm12, %v18626_v18  ;;  %vm22507_vm12 = vmmov %vm22487_vm7  ;;  %v19039_v39 = vsel %vm4733_vm10, 1, %v22499_v53  ;;  %vm4735_vm1 = vcmp.gt.f32.partialorder %v4699_v31, 0.0  ;;  %v19076_v31 = vld [vmem:[#allocation7 + $0x20] sm:$0xff]  }
 0x179   : > { %15250 = vmatprep.mubr.msk.bf16.mxu1 %vm22497_vm8, %v18637_v51  ;;  %4853 = vperm.xlu0 %17144, %v18992_v21   ;;  %v4696_v21 = vld [vmem:[%s22190_s2 + $0xf0] sm:$0xff]  ;;  %22509 = vst [vmem:[#allocation30_spill] sm:$0xff] %v19039_v39  ;;  %vm22510_vm8 = vmmov %vm22487_vm7 }
 0x17a   : > { %15421 = vmatmul.mubr.msk.bf16.gmra.mrb[12].mxu0 %vm22498_vm9, %v3527_v34  ;;  %v4695_v34 = vld [vmem:[%s22190_s2 + $0xe8] sm:$0xff]  ;;  %vm4732_vm3 = vcmp.gt.f32.partialorder %v4696_v21, 0.0  ;;  %v1860_v21 = vsel %vm1855_vm11, %v1857_v1, %v1859_v42  ;;  %vm22513_vm9 = vmmov %vm22487_vm7 }
 0x17b   : > { %15424 = vmatprep.mubr.msk.bf16.mxu0 %vm22487_vm7, %v3529_v63  ;;  %v19010_v63 = vld [vmem:[#allocation2 + $0x70] sm:$0xff]   ;;  %vm4731_vm0 = vcmp.gt.f32.partialorder %v4695_v34, 0.0  ;;  %v4698_v34 = vld [vmem:[%s22190_s2 + $0x100] sm:$0xff]  ;;  %v19036_v40 = vsel %vm4732_vm3, 1, %v22499_v53  ;;  %vm22518_vm15 = vmmov %vm22487_vm7 }
 0x17c   : > { %v19019_v36 = vsel %vm4731_vm0, 1, %v22499_v53  ;;  %22508 = vst [vmem:[#allocation29_spill] sm:$0xff] %v19036_v40  ;;  %vm4734_vm5 = vcmp.gt.f32.partialorder %v4698_v34, 0.0  ;;  %v19055_v34 = vld [vmem:[#allocation2 + $0x80] sm:$0xff]   ;;  %vm22521_vm3 = vmmov %vm22487_vm7 }
 0x17d   : > { %4859 = vperm.xlu0 %17144, %v19003_v37   ;;  %4862 = vperm.xlu1 %17145, %v19019_v36   ;;  %v1861_v37 = vrot.slane %v18698_v60, 1  ;;  %v19048_v60 = vsel %vm4734_vm5, 1, %v22499_v53  ;;  %vm22522_vm10 = vmmov %vm22514_vm2 }
 0x17e   : > { %22511 = vst [vmem:[#allocation31_spill] sm:$0xff] %v19048_v60  ;;  %vm22525_vm5 = vmmov %vm22521_vm3 }
 0x180   : > { %15251 = vmatmul.mubr.msk.bf16.gmra.mrb[32].mxu1 %vm22504_vm13, %v18648_v32  ;;  %vm22516_vm13 = vmmov %vm22487_vm7 }
 0x181   : > { %15256 = vmatprep.mubr.msk.bf16.mxu1 %vm22506_vm14, %v1858_v27  ;;  %v3534_v27 = vrot.slane %v19010_v63, 2  ;;  %4865 = vperm.xlu0 %17144, %v19036_v40   ;;  %v19059_v40 = vld [vmem:[#allocation2 + $0x88] sm:$0xff]   ;;  %vm22520_vm14 = vmmov %vm22514_vm2 }
 0x182   : > { %15425 = vmatmul.mubr.msk.bf16.gmra.mrb[16].mxu0 %vm22507_vm12, %v3531_v4  ;;  %4868 = vperm.xlu1 %17145, %v19039_v39   ;;  %v1862_v4 = vsel %vm1855_vm11, %v1859_v42, %v1861_v37  ;;  %v19063_v39 = vsel %vm4735_vm1, 1, %v22499_v53  ;;  %v4700_v42 = vld [vmem:[%s22190_s2 + $0x110] sm:$0xff]  ;;  %vm22524_vm12 = vmmov %vm22521_vm3 }
 0x183   : > { %15428 = vmatprep.mubr.msk.bf16.mxu0 %vm22510_vm8, %v3533_v22  ;;  %v3535_v22 = vsel %vm22512_vm6, %v3532_v19, %v3534_v27  ;;  %v3537_v1 = vsel %vm22514_vm2, %v3534_v27, %v3536_v24  ;;  %22515 = vst [vmem:[#allocation32_spill] sm:$0xff] %v19063_v39  ;;  %v4701_v19 = vld [vmem:[%s22190_s2 + $0x118] sm:$0xff]  ;;  %vm4736_vm4 = vcmp.gt.f32.partialorder %v4700_v42, 0.0  ;;  %v1865_v27 = vrot.slane %v18742_v30, 1  ;;  %vm22526_vm8 = vmmov %vm22521_vm3 }
 0x184   : > { %vm4737_vm0 = vcmp.gt.f32.partialorder %v4701_v19, 0.0  ;;  %v19093_v19 = vld [vmem:[#allocation2 + $0x90] sm:$0xff]   ;;  %vm22527_vm6 = vmmov %vm22514_vm2 }
 0x185   : > { %4871 = vperm.xlu0 %17144, %v19048_v60   ;;  %v19080_v60 = vsel %vm4736_vm4, 1, %v22499_v53  ;;  %vm22528_vm1 = vmmov %vm22521_vm3 }
 0x186   : > { %22517 = vst [vmem:[#allocation33_spill] sm:$0xff] %v19080_v60  ;;  %4874 = vperm.xlu1 %17145, %v19063_v39   ;;  %v19098_v39 = vld [vmem:[#allocation2 + $0x98] sm:$0xff]   ;;  %vm22532_vm4 = vmmov %vm22528_vm1 }
 0x187   : > { %22523 = vst [vmem:[#allocation35_spill] sm:$0xff] %v19098_v39 }
 0x188   : > { %15257 = vmatmul.mubr.msk.bf16.vlgmr.msra.gmra.mrb[0].mxu1 %vm22513_vm9, %v1860_v21  ;;  %v1863_v21 = vrot.slane %v18715_v25, 1  ;;  %v19088_v25 = vsel %vm4737_vm0, 1, %v22499_v53  ;;  %v1867_v53 = vrot.slane %v18762_v3, 1  ;;  %v3841_v3 = vshll.u32 %v18739_v2, 16  ;;  %vm22529_vm9 = vmmov %vm22514_vm2 }
 0x189   : > { %15260 = vmatprep.mubr.msk.bf16.mxu1 %vm22487_vm7, %v1862_v4  ;;  %15293 = vmatpush3.bf16.msra.mxu1 %v18672_v29  ;;  %v3538_v4 = vrot.slane %v19055_v34, 2  ;;  %v3540_v29 = vrot.slane %v19059_v40, 2  ;;  %22519 = vst [vmem:[#allocation34_spill] sm:$0xff] %v19088_v25  ;;  %vm22530_vm2 = vmmov %vm22528_vm1  ;;  %vm3828_vm0 = vsmask.f32 5376 }
 0x18a   : > { %15429 = vmatmul.mubr.msk.bf16.gmra.mrb[20].mxu0 %vm22516_vm13, %v3535_v22  ;;  %16204 = vmatprep.subr.bf16.mxu1 %v19076_v31  ;;  %v1864_v30 = vsel %vm1855_vm11, %v1861_v37, %v1863_v21  ;;  %v1866_v22 = vsel %vm1855_vm11, %v1863_v21, %v1865_v27  ;;  %v1869_v37 = vrot.slane %v18791_v54, 1  ;;  %v3830_v21 = vshrl.u32 %v18748_v61, 16  ;;  %vm22531_vm7 = vmmov %vm22528_vm1 }
 0x18b   : > { %15432 = vmatprep.mubr.msk.bf16.mxu0 %vm22518_vm15, %v3537_v1  ;;  %4877 = vperm.xlu0 %17144, %v19080_v60   ;;  %v3539_v42 = vsel %vm22520_vm14, %v3536_v24, %v3538_v4  ;;  %v3541_v1 = vsel %vm22522_vm10, %v3538_v4, %v3540_v29  ;;  %v3542_v24 = vrot.slane %v19093_v19, 2  ;;  %v3544_v4 = vrot.slane %v19098_v39, 2  ;;  %vm22533_vm13 = vmmov %vm22527_vm6 }
 0x18c   : > { %4880 = vperm.xlu1 %17145, %v19088_v25   ;;  %v1868_v54 = vsel %vm1855_vm11, %v1865_v27, %v1867_v53  ;;  %v3832_v25 = vrot.slane %v3830_v21, 2  ;;  %v3843_v39 = vrot.slane %v3841_v3, 3  ;;  %v1873_v27 = vrot.slane %v18839_v56, 1  ;;  %vm22534_vm15 = vmmov %vm22528_vm1 }
 0x18d   : > { %vm22535_vm14 = vmmov %vm22528_vm1 }
 0x18e   : > { %vm22537_vm10 = vmmov %vm22528_vm1 }
 0x18f   : > { %9161 = vperm.xlu0 %17144, %v18691_v59   ;;  %v3833_v59 = vshll.u32 %v18748_v61, 16 }
 0x190   : > { %15261 = vmatmul.mubr.msk.bf16.gmra.mrb[4].mxu1 %vm22521_vm3, %v1864_v30  ;;  %9164 = vperm.xlu1 %17145, %v18722_v0   ;;  %v3838_v30 = vshrl.u32 %v18739_v2, 16  ;;  %v3545_v0 = vsel %vm22529_vm9, %v3542_v24, %v3544_v4  ;;  %vm22536_vm3 = vmmov %vm22528_vm1 }
 0x191   : > { %15264 = vmatprep.mubr.msk.bf16.mxu1 %vm22524_vm12, %v1866_v22  ;;  %v1870_v22 = vsel %vm1855_vm11, %v1867_v53, %v1869_v37  ;;  %v3835_v61 = vrot.slane %v3833_v59, 3  ;;  %v3850_v53 = vshll.u32 %v18786_v23, 16  ;;  %v3859_v59 = vshll.u32 %v18788_v57, 16  ;;  %vm22538_vm12 = vmmov %vm22528_vm1 }
 0x192   : > { %15433 = vmatmul.mubr.msk.bf16.gmra.mrb[24].mxu0 %vm22525_vm5, %v3539_v42  ;;  %v3543_v42 = vsel %vm22527_vm6, %v3540_v29, %v3542_v24  ;;  %v3840_v60 = vrot.slane %v3838_v30, 2  ;;  %v3847_v29 = vshrl.u32 %v18786_v23, 16  ;;  %vm22539_vm5 = vmmov %vm22528_vm1 }
 0x193   : > { %15436 = vmatprep.mubr.msk.bf16.mxu0 %vm22526_vm8, %v3541_v1  ;;  %9167 = vperm.xlu0 %17144, %v18704_v55   ;;  %v17210_v1 = vld [vmem:[#allocation2 + $0xa0] ss:$0 sps:$4 sm:$0x33]   ;;  %v1871_v55 = vrot.slane %v18808_v33, 1  ;;  %v3836_v24 = vor.u32 %v3835_v61, %v3832_v25  ;;  %v17372_v25 = vld [vmem:[#allocation2 + $0x58] sm:$0xff]   ;;  %vm22540_vm8 = vmmov %vm22528_vm1 }
 0x194   : > { %9170 = vperm.xlu1 %17145, %v18727_v10   ;;  %v3546_v10 = vrot.slane %v17210_v1, 2  ;;  %v3844_v21 = vor.u32 %v3843_v39, %v3840_v60  ;;  %v3849_v3 = vrot.slane %v3847_v29, 2  ;;  %v3861_v60 = vrot.slane %v3859_v59, 3  ;;  %vm22541_vm6 = vmmov %vm22528_vm1 }
 0x195   : > { %v1872_v33 = vsel %vm1855_vm11, %v1869_v37, %v1871_v55  ;;  %v1874_v56 = vsel %vm1855_vm11, %v1871_v55, %v1873_v27  ;;  %v1877_v37 = vrot.slane %v17372_v25, 1  ;;  %v3877_v1 = vshll.u32 %v18834_v5, 16  ;;  %vm22542_vm9 = vmmov %vm22528_vm1 }
 0x196   : > { %v3547_v30 = vsel %vm22533_vm13, %v3544_v4, %v3546_v10  ;;  %v3886_v59 = vshll.u32 %v18882_v62, 16  ;;  %v1885_v25 = vrot.slane %v18626_v18, 1  ;;  %vm22546_vm13 = vmmov %vm22528_vm1 }
 0x197   : > { %9173 = vperm.xlu0 %17144, %v18730_v26   ;;  %v3856_v26 = vshrl.u32 %v18788_v57, 16 }
 0x198   : > { %15265 = vmatmul.mubr.msk.bf16.gmra.mrb[8].mxu1 %vm22528_vm1, %v1868_v54  ;;  %9176 = vperm.xlu1 %17145, %v18751_v14   ;;  %v3852_v54 = vrot.slane %v3850_v53, 3  ;;  %v3845_v14 = vsel %vm3828_vm0, %v3836_v24, %v3844_v21  ;;  %v3879_v53 = vrot.slane %v3877_v1, 3  ;;  %v17374_v24 = vld [vmem:[#allocation2 + $0x68] sm:$0xff]  }
 0x199   : > { %15268 = vmatprep.mubr.msk.bf16.mxu1 %vm22530_vm2, %v1870_v22  ;;  %v3858_v39 = vrot.slane %v3856_v26, 2  ;;  %v3868_v22 = vshll.u32 %v18832_v58, 16  ;;  %v3883_v26 = vshrl.u32 %v18882_v62, 16  ;;  %vm22543_vm2 = vmmov %vm22528_vm1 }
 0x19a   : > { %15437 = vmatmul.mubr.msk.bf16.gmra.mrb[28].mxu0 %vm22531_vm7, %v3543_v42  ;;  %v3853_v4 = vor.u32 %v3852_v54, %v3849_v3  ;;  %vm22544_vm7 = vmmov %vm22528_vm1 }
 0x19b   : > { %15440 = vmatprep.mubr.msk.bf16.mxu0 %vm22532_vm4, %v3545_v0  ;;  %9179 = vperm.xlu0 %17144, %v18769_v49   ;;  %v1875_v49 = vrot.slane %v18856_v35, 1  ;;  %v3862_v42 = vor.u32 %v3861_v60, %v3858_v39  ;;  %v3870_v10 = vrot.slane %v3868_v22, 3  ;;  %v3885_v54 = vrot.slane %v3883_v26, 2  ;;  %vm22545_vm4 = vmmov %vm22528_vm1 }
 0x19c   : > { %9182 = vperm.xlu1 %17145, %v18772_v43   ;;  %v3865_v43 = vshrl.u32 %v18832_v58, 16  ;;  %v3854_v61 = vsel %vm3828_vm0, %v3844_v21, %v3853_v4  ;;  %v1881_v21 = vrot.slane %v17374_v24, 1 }
 0x19d   : > { %v1876_v35 = vsel %vm1855_vm11, %v1873_v27, %v1875_v49  ;;  %v1878_v0 = vsel %vm1855_vm11, %v1875_v49, %v1877_v37 }
 0x19e   : > { %v3867_v55 = vrot.slane %v3865_v43, 2  ;;  %v3904_v43 = vshll.u32 %v18924_v48, 16 }
 0x19f   : > { %9185 = vperm.xlu0 %17144, %v18779_v41   ;;  %v3874_v41 = vshrl.u32 %v18834_v5, 16 }
 0x1a0   : > { %15269 = vmatmul.mubr.msk.bf16.gmra.mrb[12].mxu1 %vm22534_vm15, %v1872_v33  ;;  %9188 = vperm.xlu1 %17145, %v18797_v46   ;;  %v3863_v46 = vsel %vm3828_vm0, %v3853_v4, %v3862_v42  ;;  %v3901_v4 = vshrl.u32 %v18924_v48, 16  ;;  %vm22547_vm15 = vmmov %vm22528_vm1 }
 0x1a1   : > { %15272 = vmatprep.mubr.msk.bf16.mxu1 %vm22535_vm14, %v1874_v56  ;;  %v3876_v29 = vrot.slane %v3874_v41, 2  ;;  %v3895_v56 = vshll.u32 %v18884_v45, 16  ;;  %vm22548_vm14 = vmmov %vm22528_vm1 }
 0x1a2   : > { %15441 = vmatmul.mubr.msk.bf16.gmra.mrb[32].mxu0 %vm22536_vm3, %v3547_v30  ;;  %v3903_v1 = vrot.slane %v3901_v4, 2  ;;  %vm22550_vm3 = vmmov %vm22528_vm1  ;;  %v22559_v4 = vld [vmem:[#allocation26_spill] sm:$0xff] }
 0x1a3   : > { %15446 = vmatprep.mubr.msk.bf16.mxu0 %vm22537_vm10, %v3845_v14  ;;  %9191 = vperm.xlu0 %17144, %v18815_v28   ;;  %v17373_v28 = vld [vmem:[#allocation2 + $0x60] sm:$0xff]   ;;  %v3880_v33 = vor.u32 %v3879_v53, %v3876_v29  ;;  %v3888_v14 = vrot.slane %v3886_v59, 3  ;;  %v3897_v49 = vrot.slane %v3895_v56, 3  ;;  %v3922_v29 = vshll.u32 %v18966_v12, 16  ;;  %vm22552_vm10 = vmmov %vm22528_vm1 }
 0x1a4   : > { %9194 = vperm.xlu1 %17145, %v18818_v50   ;;  %v1879_v27 = vrot.slane %v17373_v28, 1  ;;  %v3871_v50 = vor.u32 %v3870_v10, %v3867_v55  ;;  %v3931_v28 = vshll.u32 %v18968_v13, 16  ;;  %v22554_v56 = vld [vmem:[#allocation24_spill] sm:$0xff] }
 0x1a6   : > { %v1880_v30 = vsel %vm1855_vm11, %v1877_v37, %v1879_v27  ;;  %v3872_v3 = vsel %vm3828_vm0, %v3862_v42, %v3871_v50  ;;  %v3881_v39 = vsel %vm3828_vm0, %v3871_v50, %v3880_v33  ;;  %v3889_v37 = vor.u32 %v3888_v14, %v3885_v54 }
 0x1a7   : > { %9197 = vperm.xlu0 %17144, %v18825_v20   ;;  %v3892_v20 = vshrl.u32 %v18884_v45, 16  ;;  %v3913_v42 = vshll.u32 %v18926_v44, 16  ;;  %v3933_v59 = vrot.slane %v3931_v28, 3 }
 0x1a8   : > { %15273 = vmatmul.mubr.msk.bf16.gmra.mrb[16].mxu1 %vm22538_vm12, %v1876_v35  ;;  %9200 = vperm.xlu1 %17145, %v18845_v17   ;;  %v17375_v17 = vld [vmem:[#allocation2 + $0x70] sm:$0xff]   ;;  %v3890_v41 = vsel %vm3828_vm0, %v3880_v33, %v3889_v37  ;;  %v3906_v35 = vrot.slane %v3904_v43, 3  ;;  %v22551_v33 = vld [vmem:[#allocation23_spill] sm:$0xff]  ;;  %vm22555_vm12 = vmmov %vm22528_vm1 }
 0x1a9   : > { %15276 = vmatprep.mubr.msk.bf16.mxu1 %vm22539_vm5, %v1878_v0  ;;  %v3894_v60 = vrot.slane %v3892_v20, 2  ;;  %v3915_v55 = vrot.slane %v3913_v42, 3  ;;  %vm22557_vm5 = vmmov %vm22528_vm1 }
 0x1aa   : > { %15447 = vmatmul.mubr.msk.bf16.vlgmr.msra.gmra.mrb[0].mxu0 %vm22540_vm8, %v3854_v61  ;;  %v3907_v10 = vor.u32 %v3906_v35, %v3903_v1  ;;  %vm22560_vm8 = vmmov %vm22528_vm1  ;;  %v22561_v1 = vld [vmem:[#allocation27_spill] sm:$0xff] }
 0x1ab   : > { %15483 = vmatpush3.bf16.msra.mxu0 %v18836_v52  ;;  %15450 = vmatprep.mubr.msk.bf16.mxu0 %vm22541_vm6, %v3863_v46  ;;  %v1882_v52 = vsel %vm1855_vm11, %v1879_v27, %v1881_v21  ;;  %v3898_v22 = vor.u32 %v3897_v49, %v3894_v60  ;;  %v3919_v46 = vshrl.u32 %v18966_v12, 16  ;;  %v3940_v60 = vshll.u32 %v19010_v63, 16  ;;  %vm22562_vm6 = vmmov %vm22528_vm1  ;;  %v17377_v35 = vld [vmem:[#allocation2 + $0x18] sm:$0xff]  }
 0x1ac   : > { %9203 = vperm.xlu0 %17144, %v18863_v47   ;;  %9206 = vperm.xlu1 %17145, %v18866_v9   ;;  %v1883_v47 = vrot.slane %v17375_v17, 1  ;;  %v3910_v9 = vshrl.u32 %v18926_v44, 16  ;;  %v3946_v17 = vshrl.u32 %v19012_v8, 16 }
 0x1ad   : > { %v3899_v0 = vsel %vm3828_vm0, %v3889_v37, %v3898_v22  ;;  %v3908_v27 = vsel %vm3828_vm0, %v3898_v22, %v3907_v10  ;;  %v3921_v24 = vrot.slane %v3919_v46, 2  ;;  %v3942_v42 = vrot.slane %v3940_v60, 3 }
 0x1ae   : > { %v1886_v18 = vsel %vm1855_vm11, %v1883_v47, %v1885_v25  ;;  %v3912_v61 = vrot.slane %v3910_v9, 2  ;;  %v3958_v46 = vshll.u32 %v19055_v34, 16 }
 0x1b0   : > { %15277 = vmatmul.mubr.msk.bf16.gmra.mrb[20].mxu1 %vm22528_vm1, %v1880_v30  ;;  %9209 = vperm.xlu0 %17144, %v18876_v6   ;;  %v1884_v6 = vsel %vm1855_vm11, %v1881_v21, %v1883_v47  ;;  %v3916_v53 = vor.u32 %v3915_v55, %v3912_v61  ;;  %v3924_v21 = vrot.slane %v3922_v29, 3  ;;  %v22556_v30 = vld [vmem:[#allocation18_spill] sm:$0xff]  ;;  %v3949_v47 = vshll.u32 %v19012_v8, 16  ;;  %v22563_v61 = vld [vmem:[#allocation28_spill] sm:$0xff] }
 0x1b1   : > { %15280 = vmatprep.mubr.msk.bf16.mxu1 %vm22542_vm9, %v1882_v52  ;;  %9212 = vperm.xlu1 %17145, %v18891_v11   ;;  %v1887_v11 = vrot.slane %v18637_v51, 1  ;;  %v2299_v52 = vrot.slane %v22556_v30, 1  ;;  %v17378_v55 = vld [vmem:[#allocation2 + $0x20] sm:$0xff]   ;;  %vm22564_vm9 = vmmov %vm22528_vm1 }
 0x1b2   : > { %15451 = vmatmul.mubr.msk.bf16.gmra.mrb[4].mxu0 %vm22543_vm2, %v3872_v3  ;;  %v3917_v50 = vsel %vm3828_vm0, %v3907_v10, %v3916_v53  ;;  %v17376_v3 = vld [vmem:[#allocation2 + $0x10] sm:$0xff]   ;;  %v3925_v14 = vor.u32 %v3924_v21, %v3921_v24  ;;  %v3955_v10 = vshrl.u32 %v19055_v34, 16  ;;  %v3960_v24 = vrot.slane %v3958_v46, 3  ;;  %vm22566_vm2 = vmmov %vm22528_vm1 }
 0x1b3   : > { %15454 = vmatprep.mubr.msk.bf16.mxu0 %vm22544_vm7, %v3881_v39  ;;  %v1888_v51 = vsel %vm1855_vm11, %v1885_v25, %v1887_v11  ;;  %v2300_v54 = vrot.slane %v17376_v3, 1  ;;  %v3937_v39 = vshrl.u32 %v19010_v63, 16  ;;  %v22558_v25 = vld [vmem:[#allocation25_spill] sm:$0xff]  ;;  %vm22568_vm7 = vmmov %vm22528_vm1  ;;  %v3976_v3 = vshll.u32 %v19093_v19, 16 }
 0x1b4   : > { %9215 = vperm.xlu0 %17144, %v18907_v15   ;;  %v1889_v15 = vrot.slane %v18648_v32, 1  ;;  %v3926_v22 = vsel %vm3828_vm0, %v3916_v53, %v3925_v14  ;;  %v3964_v53 = vshrl.u32 %v19059_v40, 16 }
 0x1b5   : > { %9218 = vperm.xlu1 %17145, %v18910_v38   ;;  %v3928_v38 = vshrl.u32 %v18968_v13, 16  ;;  %v2301_v43 = vsel %vm1855_vm11, %v2299_v52, %v2300_v54  ;;  %v3939_v9 = vrot.slane %v3937_v39, 2  ;;  %v3973_v52 = vshrl.u32 %v19093_v19, 16 }
 0x1b6   : > { %v1890_v32 = vsel %vm1855_vm11, %v1887_v11, %v1889_v15  ;;  %v2304_v11 = vrot.slane %v17378_v55, 1 }
 0x1b7   : > { %v3930_v26 = vrot.slane %v3928_v38, 2  ;;  %v3967_v38 = vshll.u32 %v19059_v40, 16 }
 0x1b8   : > { %15281 = vmatmul.mubr.msk.bf16.gmra.mrb[24].mxu1 %vm22545_vm4, %v1884_v6  ;;  %9221 = vperm.xlu0 %17144, %v18918_v7   ;;  %v22549_v7 = vld [vmem:[#allocation22_spill] sm:$0xff]  ;;  %vm22569_vm4 = vmmov %vm22528_vm1 }
 0x1b9   : > { %15284 = vmatprep.mubr.msk.bf16.mxu1 %vm22546_vm13, %v1886_v18  ;;  %9224 = vperm.xlu1 %17145, %v18933_v16   ;;  %v22553_v16 = vld [vmem:[#allocation20_spill] sm:$0xff]  ;;  %v3934_v49 = vor.u32 %v3933_v59, %v3930_v26  ;;  %v3948_v18 = vrot.slane %v3946_v17, 2  ;;  %v3969_v26 = vrot.slane %v3967_v38, 3  ;;  %v22567_v59 = vld [vmem:[#allocation30_spill] sm:$0xff]  ;;  %vm22571_vm13 = vmmov %vm22528_vm1 }
 0x1ba   : > { %15455 = vmatmul.mubr.msk.bf16.gmra.mrb[8].mxu0 %vm22547_vm15, %v3890_v41  ;;  %v1891_v20 = vrot.slane %v22553_v16, 1  ;;  %v3951_v41 = vrot.slane %v3949_v47, 3  ;;  %v17380_v16 = vld [vmem:[#allocation2 + $0x30] sm:$0xff]   ;;  %vm22575_vm15 = vmmov %vm22528_vm1 }
 0x1bb   : > { %15458 = vmatprep.mubr.msk.bf16.mxu0 %vm22548_vm14, %v3899_v0  ;;  %v3935_v6 = vsel %vm3828_vm0, %v3925_v14, %v3934_v49  ;;  %v2302_v0 = vrot.slane %v17377_v35, 1  ;;  %v22572_v14 = vld [vmem:[#allocation35_spill] sm:$0xff]  ;;  %v22574_v47 = vld [vmem:[#allocation33_spill] sm:$0xff]  ;;  %vm22577_vm14 = vmmov %vm22528_vm1 }
 0x1bc   : > { %9227 = vperm.xlu0 %17144, %v22549_v7   ;;  %v1892_v37 = vsel %vm1855_vm11, %v1889_v15, %v1891_v20  ;;  %v3943_v15 = vor.u32 %v3942_v42, %v3939_v9  ;;  %v3952_v29 = vor.u32 %v3951_v41, %v3948_v18  ;;  %v2308_v20 = vrot.slane %v17380_v16, 1  ;;  %v17381_v18 = vld [vmem:[#allocation2 + $0x38] sm:$0xff]  }
 0x1bd   : > { %9230 = vperm.xlu1 %17145, %v22551_v33   ;;  %v2303_v28 = vsel %vm1855_vm11, %v2300_v54, %v2302_v0  ;;  %v2305_v7 = vsel %vm1855_vm11, %v2302_v0, %v2304_v11  ;;  %v3982_v39 = vshrl.u32 %v22572_v14, 16  ;;  %v3985_v60 = vshll.u32 %v22572_v14, 16 }
 0x1be   : > { %v3953_v21 = vsel %vm3828_vm0, %v3943_v15, %v3952_v29  ;;  %v2310_v41 = vrot.slane %v17381_v18, 1 }
 0x1bf   : > { %v3984_v9 = vrot.slane %v3982_v39, 2  ;;  %v3987_v42 = vrot.slane %v3985_v60, 3 }
 0x1c0   : > { %15285 = vmatmul.mubr.msk.bf16.gmra.mrb[28].mxu1 %vm22550_vm3, %v1888_v51  ;;  %9233 = vperm.xlu0 %17144, %v22554_v56   ;;  %v22565_v51 = vld [vmem:[#allocation29_spill] sm:$0xff]  ;;  %v22570_v56 = vld [vmem:[#allocation31_spill] sm:$0xff]  ;;  %vm22578_vm3 = vmmov %vm22528_vm1 }
 0x1c1   : > { %15288 = vmatprep.mubr.msk.bf16.mxu1 %vm22552_vm10, %v1890_v32  ;;  %9236 = vperm.xlu1 %17145, %v22558_v25   ;;  %v3944_v32 = vsel %vm3828_vm0, %v3934_v49, %v3943_v15  ;;  %v22573_v49 = vld [vmem:[#allocation32_spill] sm:$0xff]  ;;  %vm22579_vm10 = vmmov %vm22528_vm1  ;;  %v2311_v15 = vsel %vm1855_vm11, %v2308_v20, %v2310_v41 }
 0x1c2   : > { %15459 = vmatmul.mubr.msk.bf16.gmra.mrb[12].mxu0 %vm22555_vm12, %v3908_v27  ;;  %v3957_v27 = vrot.slane %v3955_v10, 2  ;;  %v4272_v10 = vld [vmem:[#allocation2 + $0x10] sm:$0x8]  ;;  %vm22580_vm12 = vmmov %vm22528_vm1 }
 0x1c3   : > { %15462 = vmatprep.mubr.msk.bf16.mxu0 %vm22557_vm5, %v3917_v50  ;;  %v3966_v50 = vrot.slane %v3964_v53, 2  ;;  %vm22582_vm5 = vmmov %vm22528_vm1 }
 0x1c4   : > { %9239 = vperm.xlu0 %17144, %v22559_v4   ;;  %v3961_v30 = vor.u32 %v3960_v24, %v3957_v27  ;;  %v3978_v4 = vrot.slane %v3976_v3, 3  ;;  %v17384_v24 = vld [vmem:[#allocation2 + $0x50] sm:$0xff]  }
 0x1c5   : > { %9242 = vperm.xlu1 %17145, %v22561_v1   ;;  %v3970_v54 = vor.u32 %v3969_v26, %v3966_v50  ;;  %v17382_v1 = vld [vmem:[#allocation2 + $0x40] sm:$0xff]  }
 0x1c6   : > { %v3962_v25 = vsel %vm3828_vm0, %v3952_v29, %v3961_v30  ;;  %v2312_v35 = vrot.slane %v17382_v1, 1  ;;  %v4293_v1 = vrot.slane %v18884_v45, 3 }
 0x1c8   : > { %15289 = vmatmul.mubr.msk.bf16.gmra.mrb[32].mxu1 %vm22560_vm8, %v1892_v37  ;;  %9245 = vperm.xlu0 %17144, %v22563_v61   ;;  %v3975_v37 = vrot.slane %v3973_v52, 2  ;;  %v2313_v46 = vsel %vm1855_vm11, %v2310_v41, %v2312_v35  ;;  %vm22583_vm8 = vmmov %vm22528_vm1  ;;  %v17386_v52 = vld [vmem:[#allocation2 + $0x60] sm:$0xff]   ;;  %v4291_v41 = vrot.slane %v18882_v62, 3  ;;  %v19321_v62 = vld [vmem:[#allocation2 + $0x90] sm:$0xff]  }
 0x1c9   : > { %15294 = vmatprep.mubr.msk.bf16.mxu1 %vm22562_vm6, %v2301_v43  ;;  %9248 = vperm.xlu1 %17145, %v19019_v36   ;;  %v17379_v36 = vld [vmem:[#allocation2 + $0x28] sm:$0xff]   ;;  %v19255_v43 = vld [vmem:[#allocation2 + $0xa0] ss:$0 sps:$4 sm:$0x77]   ;;  %vm22584_vm6 = vmmov %vm22528_vm1  ;;  %v2320_v3 = vrot.slane %v17386_v52, 1  ;;  %v2332_v45 = vrot.slane %v19321_v62, 1 }
 0x1ca   : > { %15463 = vmatmul.mubr.msk.bf16.gmra.mrb[16].mxu0 %vm22528_vm1, %v3926_v22  ;;  %v2306_v33 = vrot.slane %v17379_v36, 1  ;;  %v3971_v22 = vsel %vm3828_vm0, %v3961_v30, %v3970_v54  ;;  %v3979_v0 = vor.u32 %v3978_v4, %v3975_v37  ;;  %v3991_v61 = vshrl.u32 %v19255_v43, 16 }
 0x1cb   : > { %15466 = vmatprep.mubr.msk.bf16.mxu0 %vm22564_vm9, %v3935_v6  ;;  %v22576_v6 = vld [vmem:[#allocation34_spill] sm:$0xff]  ;;  %v3994_v55 = vshll.u32 %v19255_v43, 16  ;;  %vm4279_vm1 = vcmask 1044480   ;;  %vm22585_vm9 = vmmov %vm22566_vm2  ;;  %v4289_v37 = vrot.slane %v18834_v5, 3 }
 0x1cc   : > { %9251 = vperm.xlu0 %17144, %v22565_v51   ;;  %v2309_v17 = vsel %vm1855_vm11, %v2306_v33, %v2308_v20  ;;  %v3980_v29 = vsel %vm3828_vm0, %v3970_v54, %v3979_v0  ;;  %v3993_v53 = vrot.slane %v3991_v61, 2  ;;  %v22581_v51 = vld [vmem:[#allocation21_spill] sm:$0xff]  ;;  %v4285_v54 = vrot.slane %v18788_v57, 3 }
 0x1cd   : > { %9254 = vperm.xlu1 %17145, %v22567_v59   ;;  %v3996_v38 = vrot.slane %v3994_v55, 3  ;;  %v4281_v59 = vrot.slane %v18739_v2, 3  ;;  %v4283_v2 = vrot.slane %v18786_v23, 3  ;;  %v4287_v57 = vrot.slane %v18832_v58, 3  ;;  %v19305_v58 = vld [vmem:[#allocation2 + $0x80] sm:$0xff]  }
 0x1ce   : > { %v2328_v5 = vrot.slane %v19305_v58, 1  ;;  %v4292_v61 = vsel %vm4279_vm1, %v4289_v37, %v4291_v41  ;;  %v4294_v55 = vsel %vm4279_vm1, %v4291_v41, %v4293_v1  ;;  %v2773_v41 = vshll.u32 %v19321_v62, 16 }
 0x1cf   : > { %v3997_v50 = vor.u32 %v3996_v38, %v3993_v53  ;;  %v4297_v53 = vrot.slane %v18926_v44, 3 }
 0x1d0   : > { %15295 = vmatmul.mubr.msk.bf16.vlgmr.msra.gmra.mrb[0].mxu1 %vm22566_vm2, %v2303_v28  ;;  %9257 = vperm.xlu0 %17144, %v22570_v56   ;;  %v17385_v56 = vld [vmem:[#allocation2 + $0x58] sm:$0xff]  }
 0x1d1   : > { %15298 = vmatprep.mubr.msk.bf16.mxu1 %vm22568_vm7, %v2305_v7  ;;  %16205 = vmatpush3.bf16.msra.mxu1 %v19076_v31  ;;  %v2307_v31 = vsel %vm1855_vm11, %v2304_v11, %v2306_v33  ;;  %v3988_v11 = vor.u32 %v3987_v42, %v3984_v9  ;;  %v13956_v7 = vcombine.low %v4272_v10, %v22581_v51  ;;  %v2318_v30 = vrot.slane %v17385_v56, 1  ;;  %vm22586_vm7 = vmmov %vm22566_vm2 }
 0x1d2   : > { %15467 = vmatmul.mubr.msk.bf16.gmra.mrb[20].mxu0 %vm22569_vm4, %v3944_v32  ;;  %9260 = vperm.xlu1 %17145, %v22573_v49   ;;  %v17383_v32 = vld [vmem:[#allocation2 + $0x48] sm:$0xff]   ;;  %vm22587_vm4 = vmmov %vm22566_vm2  ;;  %v4284_v49 = vsel %vm4279_vm1, %v4281_v59, %v4283_v2  ;;  %v4288_v9 = vsel %vm4279_vm1, %v4285_v54, %v4287_v57  ;;  %v4290_v42 = vsel %vm4279_vm1, %v4287_v57, %v4289_v37  ;;  %v2716_v10 = vshrl.u32 %v17386_v52, 16 }
 0x1d3   : > { %15470 = vmatprep.mubr.msk.bf16.mxu0 %vm22571_vm13, %v3953_v21  ;;  %v3989_v28 = vsel %vm3828_vm0, %v3979_v0, %v3988_v11  ;;  %v2314_v27 = vrot.slane %v17383_v32, 1  ;;  %v2316_v21 = vrot.slane %v17384_v24, 1  ;;  %v4280_v26 = vrot.slane %v13956_v7, 3  ;;  %vm22588_vm13 = vmmov %vm22566_vm2 }
 0x1d4   : > { %9263 = vperm.xlu0 %17144, %v22574_v47   ;;  %v3998_v16 = vsel %vm3828_vm0, %v3988_v11, %v3997_v50  ;;  %v2321_v60 = vsel %vm1855_vm11, %v2318_v30, %v2320_v3  ;;  %v19317_v11 = vld [vmem:[#allocation2 + $0x88] sm:$0xff]   ;;  %v2718_v7 = vrot.slane %v2716_v10, 1 }
 0x1d5   : > { %v2315_v36 = vsel %vm1855_vm11, %v2312_v35, %v2314_v27  ;;  %v2317_v33 = vsel %vm1855_vm11, %v2314_v27, %v2316_v21  ;;  %v4282_v20 = vsel %vm4279_vm1, %v4280_v26, %v4281_v59  ;;  %v2319_v39 = vsel %vm1855_vm11, %v2316_v21, %v2318_v30  ;;  %v22603_v30 = vld [vmem:[#allocation19_spill] sm:$0xff] }
 0x1d6   : > { %9266 = vperm.xlu1 %17145, %v22576_v6   ;;  %v19301_v6 = vld [vmem:[#allocation2 + $0x78] sm:$0xff]  }
 0x1d7   : > { %v2326_v18 = vrot.slane %v19301_v6, 1 }
 0x1d8   : > { %15299 = vmatmul.mubr.msk.bf16.gmra.mrb[4].mxu1 %vm22575_vm15, %v2307_v31  ;;  %v4286_v31 = vsel %vm4279_vm1, %v4283_v2, %v4285_v54  ;;  %vm22589_vm15 = vmmov %vm22566_vm2 }
 0x1d9   : > { %15302 = vmatprep.mubr.msk.bf16.mxu1 %vm22577_vm14, %v2309_v17  ;;  %v17387_v17 = vld [vmem:[#allocation2 + $0x68] sm:$0xff]   ;;  %vm22590_vm14 = vmmov %vm22566_vm2  ;;  %v2329_v0 = vsel %vm1855_vm11, %v2326_v18, %v2328_v5 }
 0x1da   : > { %15471 = vmatmul.mubr.msk.bf16.gmra.mrb[24].mxu0 %vm22578_vm3, %v3962_v25  ;;  %v2322_v47 = vrot.slane %v17387_v17, 1  ;;  %v17388_v25 = vld [vmem:[#allocation2 + $0x70] sm:$0xff]   ;;  %vm22591_vm3 = vmmov %vm22566_vm2  ;;  %v2725_v50 = vshrl.u32 %v17387_v17, 16 }
 0x1db   : > { %15474 = vmatprep.mubr.msk.bf16.mxu0 %vm22579_vm10, %v3971_v22  ;;  %v2324_v23 = vrot.slane %v17388_v25, 1  ;;  %vm22592_vm10 = vmmov %vm22566_vm2  ;;  %v2734_v26 = vshrl.u32 %v17388_v25, 16  ;;  %v2737_v59 = vshll.u32 %v17388_v25, 16  ;;  %v4305_v25 = vrot.slane %v19012_v8, 3 }
 0x1dc   : > { %v2323_v4 = vsel %vm1855_vm11, %v2320_v3, %v2322_v47  ;;  %v2764_v8 = vshll.u32 %v19317_v11, 16 }
 0x1dd   : > { %v2325_v22 = vsel %vm1855_vm11, %v2322_v47, %v2324_v23  ;;  %v2327_v35 = vsel %vm1855_vm11, %v2324_v23, %v2326_v18  ;;  %v2736_v3 = vrot.slane %v2734_v26, 1  ;;  %v2739_v2 = vrot.slane %v2737_v59, 2  ;;  %v22627_v26 = vld [vmem:[#allocation15_spill] sm:$0xff] }
 0x1de   : > { %v4303_v47 = vrot.slane %v19010_v63, 3  ;;  %v2761_v63 = vshrl.u32 %v19317_v11, 16 }
 0x1e0   : > { %15303 = vmatmul.mubr.msk.bf16.gmra.mrb[8].mxu1 %vm22580_vm12, %v2311_v15  ;;  %vm22593_vm12 = vmmov %vm22566_vm2  ;;  %v2330_v15 = vrot.slane %v19317_v11, 1 }
 0x1e1   : > { %15306 = vmatprep.mubr.msk.bf16.mxu1 %vm22582_vm5, %v2313_v46  ;;  %vm22594_vm5 = vmmov %vm22566_vm2  ;;  %v2719_v46 = vshll.u32 %v17386_v52, 16 }
 0x1e2   : > { %15475 = vmatmul.mubr.msk.bf16.gmra.mrb[28].mxu0 %vm22583_vm8, %v3980_v29  ;;  %vm22595_vm8 = vmmov %vm22566_vm2  ;;  %v4295_v29 = vrot.slane %v18924_v48, 3  ;;  %v2331_v38 = vsel %vm1855_vm11, %v2328_v5, %v2330_v15  ;;  %v2333_v51 = vsel %vm1855_vm11, %v2330_v15, %v2332_v45  ;;  %v2728_v48 = vshll.u32 %v17387_v17, 16 }
 0x1e3   : > { %15478 = vmatprep.mubr.msk.bf16.mxu0 %vm22584_vm6, %v3989_v28  ;;  %vm22596_vm6 = vmmov %vm22566_vm2  ;;  %v17214_v28 = vld [vmem:[#allocation2 + $0x98] ss:$0 sps:$4 sm:$0x11]   ;;  %v2721_v32 = vrot.slane %v2719_v46, 2  ;;  %v2755_v17 = vshll.u32 %v19305_v58, 16  ;;  %v2770_v5 = vshrl.u32 %v19321_v62, 16 }
 0x1e4   : > { %v4296_v27 = vsel %vm4279_vm1, %v4293_v1, %v4295_v29  ;;  %v4298_v24 = vsel %vm4279_vm1, %v4295_v29, %v4297_v53  ;;  %v2334_v21 = vrot.slane %v17214_v28, 1  ;;  %v2730_v56 = vrot.slane %v2728_v48, 2 }
 0x1e5   : > { %v2722_v44 = vor.u32 %v2721_v32, %v2718_v7  ;;  %v4307_v1 = vrot.slane %v19055_v34, 3  ;;  %v2772_v11 = vrot.slane %v2770_v5, 1  ;;  %v17393_v34 = vld [vmem:[#allocation2 + $0x98] ss:$0 sps:$4 sm:$0x33]   ;;  %v4313_v28 = vrot.slane %v22572_v14, 3 }
 0x1e6   : > { %v2779_v29 = vshrl.u32 %v17393_v34, 16 }
 0x1e7   : > { %v4308_v10 = vsel %vm4279_vm1, %v4305_v25, %v4307_v1 }
 0x1e8   : > { %15307 = vmatmul.mubr.msk.bf16.gmra.mrb[12].mxu1 %vm22585_vm9, %v2315_v36  ;;  %vm22597_vm9 = vmmov %vm22566_vm2  ;;  %v4299_v36 = vrot.slane %v18966_v12, 3  ;;  %v2781_v7 = vrot.slane %v2779_v29, 1 }
 0x1e9   : > { %15310 = vmatprep.mubr.msk.bf16.mxu1 %vm22566_vm2, %v2317_v33  ;;  %v4301_v33 = vrot.slane %v18968_v13, 3  ;;  %v2743_v13 = vshrl.u32 %v19301_v6, 16 }
 0x1ea   : > { %15479 = vmatmul.mubr.msk.bf16.gmra.mrb[32].mxu0 %vm22586_vm7, %v3998_v16  ;;  %vm22598_vm7 = vmmov %vm22566_vm2  ;;  %v2335_v16 = vsel %vm1855_vm11, %v2332_v45, %v2334_v21  ;;  %v4300_v54 = vsel %vm4279_vm1, %v4297_v53, %v4299_v36  ;;  %v2775_v45 = vrot.slane %v2773_v41, 2 }
 0x1eb   : > { %15484 = vmatprep.mubr.msk.bf16.mxu0 %vm22587_vm4, %v4282_v20  ;;  %vm22599_vm4 = vmmov %vm22566_vm2  ;;  %v2727_v20 = vrot.slane %v2725_v50, 1  ;;  %v2745_v57 = vrot.slane %v2743_v13, 1  ;;  %v4776_v13 = vpop.permute.xlu0 %4775 }
 0x1ec   : > { %v2776_v53 = vor.u32 %v2775_v45, %v2772_v11 }
 0x1ed   : > { %v2731_v12 = vor.u32 %v2730_v56, %v2727_v20 }
 0x1f0   : > { %15311 = vmatmul.mubr.msk.bf16.gmra.mrb[16].mxu1 %vm22588_vm13, %v2319_v39  ;;  %vm22600_vm13 = vmmov %vm22566_vm2  ;;  %v4302_v39 = vsel %vm4279_vm1, %v4299_v36, %v4301_v33  ;;  %v17215_v36 = vld [vmem:[#allocation9 + $0x8] sm:$0xff]  }
 0x1f1   : > { %15314 = vmatprep.mubr.msk.bf16.mxu1 %vm22589_vm15, %v2321_v60  ;;  %vm22601_vm15 = vmmov %vm22566_vm2  ;;  %v2746_v60 = vshll.u32 %v19301_v6, 16  ;;  %v4306_v6 = vsel %vm4279_vm1, %v4303_v47, %v4305_v25  ;;  %15520 = vmatprep.subr.bf16.mxu1 %v17215_v36 }
 0x1f2   : > { %15485 = vmatmul.mubr.msk.bf16.vlgmr.msra.gmra.mrb[0].mxu0 %vm22590_vm14, %v4284_v49  ;;  %vm22602_vm14 = vmmov %vm22566_vm2  ;;  %v2740_v49 = vor.u32 %v2739_v2, %v2736_v3 }
 0x1f3   : > { %15488 = vmatprep.mubr.msk.bf16.mxu0 %vm22591_vm3, %v4286_v31  ;;  %vm22604_vm3 = vsmask.f32 6400  ;;  %v2752_v31 = vshrl.u32 %v19305_v58, 16  ;;  %v2748_v37 = vrot.slane %v2746_v60, 2 }
 0x1f4   : > { %v2723_v52 = vsel %vm22604_vm3, %v22603_v30, %v2722_v44 }
 0x1f5   : > { %v2749_v18 = vor.u32 %v2748_v37, %v2745_v57  ;;  %v5500_v57 = vld [vmem:[#allocation3] sm:$0xf]  ;;  %v5501_v37 = vld [vmem:[#allocation3 + $0x4] sm:$0xf] }
 0x1f8   : > { %15315 = vmatmul.mubr.msk.bf16.gmra.mrb[20].mxu1 %vm22592_vm10, %v2323_v4  ;;  %vm22605_vm10 = vmmov %vm22566_vm2 }
 0x1f9   : > { %15318 = vmatprep.mubr.msk.bf16.mxu1 %vm22593_vm12, %v2325_v22  ;;  %vm22606_vm12 = vmmov %vm22566_vm2  ;;  %v2754_v22 = vrot.slane %v2752_v31, 1 }
 0x1fa   : > { %15489 = vmatmul.mubr.msk.bf16.gmra.mrb[4].mxu0 %vm22594_vm5, %v4288_v9  ;;  %vm22607_vm5 = vmmov %vm22566_vm2  ;;  %v2757_v9 = vrot.slane %v2755_v17, 2  ;;  %v4779_v17 = vpop.permute.xlu0 %4778 }
 0x1fb   : > { %15492 = vmatprep.mubr.msk.bf16.mxu0 %vm22595_vm8, %v4290_v42  ;;  %vm22608_vm8 = vmmov %vm22566_vm2  ;;  %v4304_v42 = vsel %vm4279_vm1, %v4301_v33, %v4303_v47  ;;  %v19391_v33 = vld [vmem:[#allocation9] sm:$0xff]  }
 0x1fc   : > { %v2758_v58 = vor.u32 %v2757_v9, %v2754_v22  ;;  %v19418_v9 = vcombine.low %v5500_v57, %v5501_v37 }
 0x1fe   : > { %v19416_v22 = vpop.permute.xlu0 %4787  ;;  %v5636_v29 = vshrl.u32 %v19418_v9, 16 }
 0x200   : > { %15319 = vmatmul.mubr.msk.bf16.gmra.mrb[24].mxu1 %vm22596_vm6, %v2327_v35  ;;  %vm22609_vm6 = vmmov %vm22604_vm3  ;;  %v4309_v35 = vrot.slane %v19059_v40, 3  ;;  %v2782_v40 = vshll.u32 %v17393_v34, 16 }
 0x201   : > { %15322 = vmatprep.mubr.msk.bf16.mxu1 %vm22597_vm9, %v2329_v0  ;;  %v2732_v23 = vsel %vm22609_vm6, %v2722_v44, %v2731_v12  ;;  %vm22610_vm9 = vmmov %vm22604_vm3  ;;  %v380_v44 = vld [vmem:[#allocation3 + $0x8] sm:$0x3] }
 0x202   : > { %15493 = vmatmul.mubr.msk.bf16.gmra.mrb[8].mxu0 %vm22566_vm2, %v4292_v61  ;;  %v2741_v4 = vsel %vm22610_vm9, %v2731_v12, %v2740_v49  ;;  %v2763_v61 = vrot.slane %v2761_v63, 1  ;;  %v4310_v62 = vsel %vm4279_vm1, %v4307_v1, %v4309_v35  ;;  %v2784_v32 = vrot.slane %v2782_v40, 2  ;;  %vm22621_vm9 = vmmov %vm22566_vm2  ;;  %v19429_v63 = vld [vmem:[%s22194_s6] ss:$0 sm:$0xff] }
 0x203   : > { %15496 = vmatprep.mubr.msk.bf16.mxu0 %vm22598_vm7, %v4294_v55  ;;  %vm22611_vm7 = vmmov %vm22566_vm2  ;;  %v2766_v55 = vrot.slane %v2764_v8, 2  ;;  %v5638_v1 = vshll.u32 %v19418_v9, 16 }
 0x204   : > { %v2785_v50 = vor.u32 %v2784_v32, %v2781_v7 }
 0x205   : > { %v2767_v46 = vor.u32 %v2766_v55, %v2763_v61  ;;  %v19436_v55 = vpop.permute.xlu0 %4793  ;;  %v5640_v40 = vrot.slane %v5638_v1, 1 }
 0x208   : > { %15323 = vmatmul.mubr.msk.bf16.gmra.mrb[28].mxu1 %vm22599_vm4, %v2331_v38  ;;  %vm22612_vm4 = vmmov %vm22566_vm2  ;;  %v4311_v38 = vrot.slane %v19093_v19, 3  ;;  %v4315_v19 = vrot.slane %v19255_v43, 3 }
 0x209   : > { %15326 = vmatprep.mubr.msk.bf16.mxu1 %vm22600_vm13, %v2333_v51  ;;  %vm22613_vm13 = vmmov %vm22566_vm2 }
 0x20a   : > { %15497 = vmatmul.mubr.msk.bf16.gmra.mrb[12].mxu0 %vm22601_vm15, %v4296_v27  ;;  %vm22614_vm15 = vmmov %vm22604_vm3  ;;  %v2777_v27 = vsel %vm22609_vm6, %v2767_v46, %v2776_v53  ;;  %v4314_v21 = vsel %vm4279_vm1, %v4311_v38, %v4313_v28  ;;  %v4316_v48 = vsel %vm4279_vm1, %v4313_v28, %v4315_v19 }
 0x20b   : > { %15500 = vmatprep.mubr.msk.bf16.mxu0 %vm22602_vm14, %v4298_v24  ;;  %v2750_v0 = vsel %vm22614_vm15, %v2740_v49, %v2749_v18  ;;  %vm22615_vm14 = vmmov %vm22604_vm3  ;;  %v4312_v24 = vsel %vm4279_vm1, %v4309_v35, %v4311_v38  ;;  %v4782_v49 = vpop.permute.xlu1 %4781 }
 0x20c   : > { %v2759_v15 = vsel %vm22615_vm14, %v2749_v18, %v2758_v58  ;;  %vm22616_vm3 = vmmov %vm22566_vm2 }
 0x20d   : > { %vm22625_vm15 = vmmov %vm22566_vm2 }
 0x20e   : > { %vm22626_vm14 = vmmov %vm22566_vm2 }
 0x210   : > { %15327 = vmatmul.mubr.msk.bf16.gmra.mrb[32].mxu1 %vm22605_vm10, %v2335_v16  ;;  %vm22617_vm10 = vmmov %vm22566_vm2 }
 0x211   : > { %15352 = vmatprep.mubr.msk.bf16.mxu1 %vm22606_vm12, %v2723_v52  ;;  %vm22618_vm12 = vmmov %vm22566_vm2 }
 0x212   : > { %15501 = vmatmul.mubr.msk.bf16.gmra.mrb[16].mxu0 %vm22607_vm5, %v4300_v54  ;;  %vm22619_vm5 = vmmov %vm22566_vm2 }
 0x213   : > { %15504 = vmatprep.mubr.msk.bf16.mxu0 %vm22608_vm8, %v4302_v39  ;;  %vm22620_vm8 = vmmov %vm22609_vm6 }
 0x214   : > { %v2768_v51 = vsel %vm22620_vm8, %v2758_v58, %v2767_v46  ;;  %vm4883_vm8 = vcmp.eq.s32.totalorder %v4779_v17, 1 }
 0x218   : > { %15353 = vmatmul.mubr.msk.bf16.vlgmr.msra.gmra.mrb[20].mxu1 %vm22566_vm2, %v2732_v23 }
 0x219   : > { %15356 = vmatprep.mubr.msk.bf16.mxu1 %vm22611_vm7, %v2741_v4  ;;  %vm22622_vm7 = vmmov %vm22566_vm2  ;;  %15521 = vmatpush3.bf16.msra.mxu1 %v17215_v36  ;;  %v4785_v4 = vpop.permute.xlu1 %4784 }
 0x21a   : > { %15505 = vmatmul.mubr.msk.bf16.gmra.mrb[20].mxu0 %vm22612_vm4, %v4304_v42  ;;  %vm22623_vm4 = vmmov %vm22566_vm2  ;;  %15558 = vmatprep.subr.bf16.mxu1 %v19391_v33 }
 0x21b   : > { %15508 = vmatprep.mubr.msk.bf16.mxu0 %vm22613_vm13, %v4306_v6  ;;  %vm22624_vm13 = vmmov %vm22609_vm6  ;;  %vm4888_vm6 = vcmp.eq.s32.totalorder %v19436_v55, 1 }
 0x21c   : > { %v2786_v14 = vsel %vm22624_vm13, %v2776_v53, %v2785_v50  ;;  %v19446_v50 = vpop.permute.xlu0 %4799 }
 0x21d   : > { %v19434_v35 = vpop.permute.xlu1 %4790 }
 0x220   : > { %15357 = vmatmul.mubr.msk.bf16.gmra.mrb[24].mxu1 %vm22616_vm3, %v2750_v0  ;;  %vm22628_vm3 = vnez %v22627_v26 }
 0x221   : > { %15360 = vmatprep.mubr.msk.bf16.mxu1 %vm22617_vm10, %v2759_v15  ;;  %v381_v59 = vsel %vm22628_vm3, 0, %v380_v44  ;;  %vm4884_vm10 = vcmp.eq.s32.totalorder %v4782_v49, 1  ;;  %v19444_v7 = vpop.permute.xlu1 %4796 }
 0x222   : > { %15509 = vmatmul.mubr.msk.bf16.gmra.mrb[24].mxu0 %vm22618_vm12, %v4308_v10  ;;  %382 = vst [vmem:[#allocation3 + $0x8] sm:$0x3] %v381_v59  ;;  %vm4885_vm12 = vcmp.eq.s32.totalorder %v4785_v4, 1  ;;  %v19448_v59 = vor.u32 %v5640_v40, %v5636_v29 }
 0x223   : > { %15512 = vmatprep.mubr.msk.bf16.mxu0 %vm22619_vm5, %v4310_v62  ;;  %vm4882_vm5 = vcmp.eq.s32.totalorder %v4776_v13, 1 }
 0x228   : > { %15361 = vmatmul.mubr.msk.bf16.gmra.mrb[28].mxu1 %vm22621_vm9, %v2768_v51  ;;  %vm4886_vm9 = vcmp.eq.s32.totalorder %v19416_v22, 1 }
 0x229   : > { %15364 = vmatprep.mubr.msk.bf16.mxu1 %vm22566_vm2, %v2777_v27  ;;  %vm4889_vm2 = vcmp.eq.s32.totalorder %v19444_v7, 1 }
 0x22a   : > { %15513 = vmatmul.mubr.msk.bf16.gmra.mrb[28].mxu0 %vm22622_vm7, %v4312_v24  ;;  %vm4887_vm7 = vcmp.eq.s32.totalorder %v19434_v35, 1 }
 0x22b   : > { %15516 = vmatprep.mubr.msk.bf16.mxu0 %vm22623_vm4, %v4314_v21 }
 0x230   : > { %15365 = vmatmul.mubr.msk.bf16.gmra.mrb[32].mxu1 %vm22625_vm15, %v2786_v14 }
 0x232   : > { %15517 = vmatmul.mubr.msk.bf16.gmra.mrb[32].mxu0 %vm22626_vm14, %v4316_v48  ;;  %vm4890_vm14 = vcmp.eq.s32.totalorder %v19446_v50, 1 }
 0x2a3   : > { %v15296_v43 = vpop.f32.mrb[0].mxu1 }
 0x2a4   : > { %v2430_v16 = vpop.f32.mrb[1].mxu1 }
 0x2a5   : > { %v15297_v20 = vpop.f32.mrb[2].mxu1 }
 0x2a6   : > { %v2433_v56 = vpop.f32.mrb[3].mxu1 }
 0x2ab   : > { %v15300_v30 = vpop.f32.mrb[4].mxu1 }
 0x2ac   : > { %v19394_v52 = vpop.f32.mrb[5].mxu1 }
 0x2ad   : > { %v19396_v3 = vpop.f32.mrb[6].mxu1 }
 0x2ae   : > { %v19398_v2 = vpop.f32.mrb[7].mxu1 }
 0x2b3   : > { %v19400_v54 = vpop.f32.mrb[8].mxu1 }
 0x2b4   : > { %v19402_v39 = vpop.f32.mrb[9].mxu1 }
 0x2b5   : > { %v19404_v12 = vpop.f32.mrb[10].mxu1 }
 0x2b6   : > { %v19406_v60 = vpop.f32.mrb[11].mxu1 }
 0x2bb   : > { %v19408_v31 = vpop.f32.mrb[12].mxu1 }
 0x2bc   : > { %v19410_v47 = vpop.f32.mrb[13].mxu1 }
 0x2bd   : > { %v19412_v25 = vpop.f32.mrb[14].mxu1 }
 0x2be   : > { %v19414_v23 = vpop.f32.mrb[15].mxu1 }
 0x2c3   : > { %v19420_v42 = vpop.f32.mrb[16].mxu1 }
 0x2c4   : > { %v19422_v6 = vpop.f32.mrb[17].mxu1 }
 0x2c5   : > { %v19424_v18 = vpop.f32.mrb[18].mxu1  ;;  %v15486_v8 = vpop.f32.mrb[0].mxu0 }
 0x2c6   : > { %v19431_v58 = vpop.f32.mrb[19].mxu1  ;;  %v16206_v5 = vadd.f32 %v15486_v8, %v15296_v43  ;;  %v4411_v41 = vpop.f32.mrb[1].mxu0 }
 0x2c7   : > { %v16207_v0 = vadd.f32 %v4411_v41, %v2430_v16  ;;  %v15487_v61 = vpop.f32.mrb[2].mxu0 }
 0x2c8   : > { %v4596_v15 = vadd.f32 %v16206_v5, %v19429_v63  ;;  %v16208_v11 = vadd.f32 %v15487_v61, %v15297_v20  ;;  %v4414_v45 = vpop.f32.mrb[3].mxu0 }
 0x2c9   : > { %v4594_v10 = vadd.f32 %v16207_v0, %v19429_v63  ;;  %v16209_v62 = vadd.f32 %v4414_v45, %v2433_v56  ;;  %v5458_v45 = vld [vmem:[#allocation3 + $0x8] sm:$0xe] }
 0x2ca   : > { %v4632_v46 = vmax.f32 %v4596_v15, 0.0  ;;  %v4597_v34 = vadd.f32 %v16208_v11, %v19429_v63  ;;  %v19454_v15 = vpop.permute.xlu1 %4802 }
 0x2cb   : > { %v4630_v53 = vmax.f32 %v4594_v10, 0.0  ;;  %v4595_v38 = vadd.f32 %v16209_v62, %v19429_v63 }
 0x2cc   : > { %v4920_v28 = vsel %vm4884_vm10, %v4632_v46, 0.0  ;;  %v4633_v51 = vmax.f32 %v4597_v34, 0.0  ;;  %v19456_v34 = vpop.permute.xlu0 %4805  ;;  %vm22633_vm10 = vcmask 125952  }
 0x2cd   : > { %v14559_v32 = vpack.c.bf16 %v4920_v28, %v4920_v28  ;;  %v4918_v27 = vsel %vm4882_vm5, %v4630_v53, 0.0  ;;  %v4631_v24 = vmax.f32 %v4595_v38, 0.0  ;;  %v15490_v21 = vpop.f32.mrb[4].mxu0  ;;  %vm4892_vm4 = vcmp.eq.s32.totalorder %v19456_v34, 1  ;;  %vm22635_vm5 = vmmov %vm22633_vm10 }
 0x2ce   : > { %v14557_v19 = vpack.c.bf16 %v4918_v27, %v4918_v27  ;;  %v4921_v14 = vsel %vm4885_vm12, %v4633_v51, 0.0  ;;  %v16210_v48 = vadd.f32 %v15490_v21, %v15300_v30  ;;  %v4427_v44 = vpop.f32.mrb[5].mxu0  ;;  %vm22634_vm12 = vmmov %vm22633_vm10 }
 0x2cf   : > { %v5082_v36 = vshrl.u32 %v14559_v32, 16  ;;  %v5085_v43 = vshll.u32 %v14559_v32, 16  ;;  %v14560_v16 = vpack.c.bf16 %v4921_v14, %v4921_v14  ;;  %v4919_v20 = vsel %vm4883_vm8, %v4631_v24, 0.0  ;;  %v15491_v56 = vpop.f32.mrb[6].mxu0 }
 0x2d0   : > { %v5063_v13 = vshrl.u32 %v14557_v19, 16  ;;  %v5066_v49 = vshll.u32 %v14557_v19, 16  ;;  %v14558_v57 = vpack.c.bf16 %v4919_v20, %v4919_v20  ;;  %v4600_v37 = vadd.f32 %v16210_v48, %v19429_v63  ;;  %v4430_v4 = vpop.f32.mrb[7].mxu0  ;;  %v22629_v19 = vld [vmem:[#allocation16_spill] sm:$0xff] }
 0x2d1   : > { %v5084_v8 = vrot.slane %v5082_v36, 6  ;;  %v5087_v5 = vrot.slane %v5085_v43, 7  ;;  %v5092_v41 = vshrl.u32 %v14560_v16, 16  ;;  %v5095_v1 = vshll.u32 %v14560_v16, 16 }
 0x2d2   : > { %v5065_v30 = vrot.slane %v5063_v13, 6  ;;  %v5068_v0 = vrot.slane %v5066_v49, 7  ;;  %v5072_v61 = vshrl.u32 %v14558_v57, 16  ;;  %v5075_v17 = vshll.u32 %v14558_v57, 16 }
 0x2d3   : > { %v5088_v11 = vor.u32 %v5087_v5, %v5084_v8  ;;  %v5094_v10 = vrot.slane %v5092_v41, 6  ;;  %v5097_v62 = vrot.slane %v5095_v1, 7  ;;  %v4636_v46 = vmax.f32 %v4600_v37, 0.0  ;;  %v19478_v8 = vpop.permute.xlu1 %4808 }
 0x2d4   : > { %v5069_v29 = vor.u32 %v5068_v0, %v5065_v30  ;;  %v5074_v40 = vrot.slane %v5072_v61, 6  ;;  %v5077_v53 = vrot.slane %v5075_v17, 7  ;;  %v16211_v38 = vadd.f32 %v4427_v44, %v19394_v52  ;;  %v22631_v44 = vld [vmem:[#allocation17_spill] sm:$0xff]  ;;  %v19483_v0 = vpop.permute.xlu0 %4811 }
 0x2d5   : > { %v5090_v28 = vrot.slane %v5088_v11, 4  ;;  %v19459_v51 = vor.u32 %v5097_v62, %v5094_v10  ;;  %v4924_v32 = vsel %vm4888_vm6, %v4636_v46, 0.0  ;;  %v16212_v27 = vadd.f32 %v15491_v56, %v19396_v3  ;;  %v15494_v24 = vpop.f32.mrb[8].mxu0 }
 0x2d6   : > { %v5070_v21 = vrot.slane %v5069_v29, 4  ;;  %vm22630_vm13 = vnez %v22629_v19  ;;  %v5078_v48 = vor.u32 %v5077_v53, %v5074_v40  ;;  %v14563_v36 = vpack.c.bf16 %v4924_v32, %v4924_v32  ;;  %v4443_v52 = vpop.f32.mrb[9].mxu0 }
 0x2d7   : > { %v5459_v14 = vsel %vm22630_vm13, %v5069_v29, %v5458_v45  ;;  %vm22632_vm15 = vnez %v22631_v44  ;;  %v5100_v43 = vrot.slane %v19459_v51, 4  ;;  %v4598_v3 = vadd.f32 %v16211_v38, %v19429_v63  ;;  %v15495_v20 = vpop.f32.mrb[10].mxu0 }
 0x2d8   : > { %5460 = vst [vmem:[#allocation3 + $0x8] sm:$0xe] %v5459_v14  ;;  %v5099_v55 = vsel %vm22632_vm15, %v5090_v28, %v19459_v51  ;;  %v4601_v16 = vadd.f32 %v16212_v27, %v19429_v63  ;;  %v5079_v56 = vsel %vm22632_vm15, %v5070_v21, %v5078_v48  ;;  %v5080_v13 = vrot.slane %v5078_v48, 4  ;;  %v4446_v37 = vpop.f32.mrb[11].mxu0  ;;  %v19504_v14 = vpop.permute.xlu1 %4814 }
 0x2d9   : > { %5463 = vst.msk [vmem:[#allocation3 + $0x14] sm:$0xf] %vm22633_vm10, %v5099_v55  ;;  %v5122_v49 = vshrl.u32 %v14563_v36, 16  ;;  %v5125_v57 = vshll.u32 %v14563_v36, 16  ;;  %v4634_v5 = vmax.f32 %v4598_v3, 0.0  ;;  %v16213_v1 = vadd.f32 %v4430_v4, %v19398_v2 }
 0x2da   : > { %5461 = vst.msk [vmem:[#allocation3 + $0xc] sm:$0xf] %vm22634_vm12, %v5079_v56  ;;  %v4637_v41 = vmax.f32 %v4601_v16, 0.0  ;;  %v16214_v30 = vadd.f32 %v15494_v24, %v19400_v54  ;;  %v5089_v61 = vsel %vm22632_vm15, %v5080_v13, %v5088_v11  ;;  %v16215_v10 = vadd.f32 %v4443_v52, %v19402_v39 }
 0x2db   : > { %v5124_v17 = vrot.slane %v5122_v49, 6  ;;  %v5127_v45 = vrot.slane %v5125_v57, 7  ;;  %5462 = vst.msk [vmem:[#allocation3 + $0x10] sm:$0xf] %vm22635_vm5, %v5089_v61  ;;  %v4922_v62 = vsel %vm4886_vm9, %v4634_v5, 0.0  ;;  %v4599_v2 = vadd.f32 %v16213_v1, %v19429_v63 }
 0x2dc   : > { %v4925_v46 = vsel %vm4889_vm2, %v4637_v41, 0.0  ;;  %v4604_v54 = vadd.f32 %v16214_v30, %v19429_v63  ;;  %v14561_v29 = vpack.c.bf16 %v4922_v62, %v4922_v62  ;;  %v4602_v40 = vadd.f32 %v16215_v10, %v19429_v63  ;;  %vm22636_vm2 = vmmov %vm22635_vm5 }
 0x2dd   : > { %v19495_v4 = vor.u32 %v5127_v45, %v5124_v17  ;;  %v14564_v11 = vpack.c.bf16 %v4925_v46, %v4925_v46  ;;  %vm4893_vm8 = vcmp.eq.s32.totalorder %v19478_v8, 1  ;;  %v4635_v39 = vmax.f32 %v4599_v2, 0.0  ;;  %v15498_v7 = vpop.f32.mrb[12].mxu0  ;;  %v19525_v2 = vpop.permute.xlu1 %4820  ;;  %vm22638_vm10 = vmmov %vm22636_vm2 }
 0x2de   : > { %v4640_v53 = vmax.f32 %v4604_v54, 0.0  ;;  %v16216_v22 = vadd.f32 %v15495_v20, %v19404_v12  ;;  %v16217_v38 = vadd.f32 %v4446_v37, %v19406_v60  ;;  %v5102_v32 = vshrl.u32 %v14561_v29, 16  ;;  %v19502_v21 = vpop.f32.mrb[13].mxu0  ;;  %v19512_v60 = vpop.permute.xlu0 %4817  ;;  %vm22639_vm12 = vmmov %vm22636_vm2 }
 0x2df   : > { %v5130_v28 = vrot.slane %v19495_v4, 4  ;;  %v5105_v27 = vshll.u32 %v14561_v29, 16  ;;  %v5132_v24 = vshrl.u32 %v14564_v11, 16  ;;  %v5135_v48 = vshll.u32 %v14564_v11, 16  ;;  %v19510_v55 = vpop.f32.mrb[14].mxu0 }
 0x2e0   : > { %v4923_v36 = vsel %vm4887_vm7, %v4635_v39, 0.0  ;;  %v4928_v52 = vsel %vm4892_vm4, %v4640_v53, 0.0  ;;  %v4638_v12 = vmax.f32 %v4602_v40, 0.0  ;;  %v5104_v3 = vrot.slane %v5102_v32, 6  ;;  %v19514_v13 = vpop.f32.mrb[15].mxu0  ;;  %vm22637_vm7 = vmmov %vm22636_vm2 }
 0x2e1   : > { %v5107_v16 = vrot.slane %v5105_v27, 7  ;;  %v5134_v20 = vrot.slane %v5132_v24, 6  ;;  %v14562_v56 = vpack.c.bf16 %v4923_v36, %v4923_v36  ;;  %v5137_v49 = vrot.slane %v5135_v48, 7 }
 0x2e2   : > { %v14567_v57 = vpack.c.bf16 %v4928_v52, %v4928_v52  ;;  %v4926_v35 = vsel %vm4890_vm14, %v4638_v12, 0.0  ;;  %v4605_v37 = vadd.f32 %v16216_v22, %v19429_v63  ;;  %vm4891_vm6 = vcmp.eq.s32.totalorder %v19454_v15, 1  ;;  %v19530_v51 = vpop.permute.xlu0 %4823 }
 0x2e3   : > { %v5108_v34 = vor.u32 %v5107_v16, %v5104_v3  ;;  %v5112_v5 = vshrl.u32 %v14562_v56, 16  ;;  %v5115_v41 = vshll.u32 %v14562_v56, 16  ;;  %v14565_v1 = vpack.c.bf16 %v4926_v35, %v4926_v35 }
 0x2e4   : > { %v5138_v30 = vor.u32 %v5137_v49, %v5134_v20  ;;  %v5162_v61 = vshrl.u32 %v14567_v57, 16  ;;  %v5165_v17 = vshll.u32 %v14567_v57, 16  ;;  %v4641_v45 = vmax.f32 %v4605_v37, 0.0 }
 0x2e5   : > { %v5109_v10 = vsel %vm22632_vm15, %v5100_v43, %v5108_v34  ;;  %v5110_v62 = vrot.slane %v5108_v34, 4  ;;  %v5114_v50 = vrot.slane %v5112_v5, 6  ;;  %v5117_v46 = vrot.slane %v5115_v41, 7  ;;  %v15502_v39 = vpop.f32.mrb[16].mxu0  ;;  %v19557_v34 = vpop.permute.xlu1 %4826 }
 0x2e6   : > { %vm4896_vm9 = vcmp.eq.s32.totalorder %v19512_v60, 1  ;;  %5464 = vst.msk [vmem:[#allocation3 + $0x18] sm:$0xf] %vm22636_vm2, %v5109_v10  ;;  %v5139_v54 = vsel %vm22632_vm15, %v5130_v28, %v5138_v30  ;;  %v5140_v29 = vrot.slane %v5138_v30, 4  ;;  %v5164_v11 = vrot.slane %v5162_v61, 6  ;;  %v19535_v27 = vpop.f32.mrb[17].mxu0 }
 0x2e7   : > { %v5167_v40 = vrot.slane %v5165_v17, 7  ;;  %5467 = vst.msk [vmem:[#allocation3 + $0x24] sm:$0xf] %vm22637_vm7, %v5139_v54  ;;  %v5118_v43 = vor.u32 %v5117_v46, %v5114_v50  ;;  %v5142_v53 = vshrl.u32 %v14565_v1, 16  ;;  %v5145_v22 = vshll.u32 %v14565_v1, 16  ;;  %v19541_v52 = vpop.f32.mrb[18].mxu0 }
 0x2e8   : > { %v4929_v32 = vsel %vm4893_vm8, %v4641_v45, 0.0  ;;  %v4603_v28 = vadd.f32 %v16217_v38, %v19429_v63  ;;  %v16218_v36 = vadd.f32 %v15498_v7, %v19408_v31  ;;  %vm4894_vm4 = vcmp.eq.s32.totalorder %v19483_v0, 1  ;;  %v19546_v20 = vpop.f32.mrb[19].mxu0  ;;  %vm22640_vm8 = vmmov %vm22636_vm2 }
 0x2e9   : > { %v19537_v24 = vor.u32 %v5167_v40, %v5164_v11  ;;  %v14568_v48 = vpack.c.bf16 %v4929_v32, %v4929_v32  ;;  %v5119_v12 = vsel %vm22632_vm15, %v5110_v62, %v5118_v43  ;;  %v5120_v3 = vrot.slane %v5118_v43, 4 }
 0x2ea   : > { %v5144_v16 = vrot.slane %v5142_v53, 6  ;;  %v5147_v8 = vrot.slane %v5145_v22, 7  ;;  %vm4897_vm14 = vcmp.eq.s32.totalorder %v19525_v2, 1  ;;  %5465 = vst.msk [vmem:[#allocation3 + $0x1c] sm:$0xf] %vm22638_vm10, %v5119_v12  ;;  %v4639_v7 = vmax.f32 %v4603_v28, 0.0 }
 0x2eb   : > { %v5170_v38 = vrot.slane %v19537_v24, 4  ;;  %v5172_v56 = vshrl.u32 %v14568_v48, 16  ;;  %v5175_v31 = vshll.u32 %v14568_v48, 16  ;;  %v5129_v49 = vsel %vm22632_vm15, %v5120_v3, %v19495_v4  ;;  %v19564_v61 = vpop.f32.mrb[20].mxu1  ;;  %v19567_v4 = vpop.permute.xlu0 %4829 }
 0x2ec   : > { %v5148_v57 = vor.u32 %v5147_v8, %v5144_v16  ;;  %v4608_v35 = vadd.f32 %v16218_v36, %v19429_v63  ;;  %v16219_v37 = vadd.f32 %v19502_v21, %v19410_v47  ;;  %5466 = vst.msk [vmem:[#allocation3 + $0x20] sm:$0xf] %vm22639_vm12, %v5129_v49  ;;  %v4927_v1 = vsel %vm4891_vm6, %v4639_v7, 0.0  ;;  %v19571_v10 = vpop.f32.mrb[21].mxu1  ;;  %vm22643_vm12 = vmmov %vm22636_vm2 }
 0x2ed   : > { %v5174_v5 = vrot.slane %v5172_v56, 6  ;;  %v5177_v41 = vrot.slane %v5175_v31, 7  ;;  %v16220_v30 = vadd.f32 %v19510_v55, %v19412_v25  ;;  %vm4895_vm5 = vcmp.eq.s32.totalorder %v19504_v14, 1  ;;  %v19580_v50 = vpop.f32.mrb[22].mxu1  ;;  %v19582_v46 = vpop.f32.mrb[20].mxu0 }
 0x2ee   : > { %v5149_v47 = vsel %vm22632_vm15, %v5140_v29, %v5148_v57  ;;  %v5150_v21 = vrot.slane %v5148_v57, 4  ;;  %v14566_v17 = vpack.c.bf16 %v4927_v1, %v4927_v1  ;;  %v4644_v45 = vmax.f32 %v4608_v35, 0.0  ;;  %v19587_v40 = vpop.f32.mrb[23].mxu1  ;;  %v19590_v53 = vpop.f32.mrb[21].mxu0 }
 0x2ef   : > { %5468 = vst.msk [vmem:[#allocation3 + $0x28] sm:$0xf] %vm22640_vm8, %v5149_v47  ;;  %v19574_v15 = vor.u32 %v5177_v41, %v5174_v5  ;;  %v4606_v25 = vadd.f32 %v16219_v37, %v19429_v63  ;;  %v4609_v55 = vadd.f32 %v16220_v30, %v19429_v63  ;;  %v16221_v62 = vadd.f32 %v19514_v13, %v19414_v23  ;;  %v19596_v48 = vpop.f32.mrb[22].mxu0  ;;  %v19609_v41 = vpop.permute.xlu1 %4832 }
 0x2f0   : > { %vm4900_vm6 = vcmp.eq.s32.totalorder %v19567_v4, 1  ;;  %v5152_v54 = vshrl.u32 %v14566_v17, 16  ;;  %v5155_v29 = vshll.u32 %v14566_v17, 16  ;;  %v4932_v11 = vsel %vm4896_vm9, %v4644_v45, 0.0  ;;  %vm22641_vm9 = vmmov %vm22636_vm2 }
 0x2f1   : > { %v16222_v43 = vadd.f32 %v15502_v39, %v19420_v42  ;;  %v5179_v23 = vsel %vm22632_vm15, %v5170_v38, %v19574_v15  ;;  %v5180_v13 = vrot.slane %v19574_v15, 4  ;;  %v14571_v22 = vpack.c.bf16 %v4932_v11, %v4932_v11  ;;  %v19600_v42 = vpop.f32.mrb[23].mxu0 }
 0x2f2   : > { %v4642_v32 = vmax.f32 %v4606_v25, 0.0  ;;  %5471 = vst.msk [vmem:[#allocation3 + $0x34] sm:$0xf] %vm22636_vm2, %v5179_v23  ;;  %v5154_v60 = vrot.slane %v5152_v54, 6  ;;  %v5157_v28 = vrot.slane %v5155_v29, 7  ;;  %v4645_v36 = vmax.f32 %v4609_v55, 0.0 }
 0x2f3   : > { %v4607_v12 = vadd.f32 %v16221_v62, %v19429_v63  ;;  %v5202_v39 = vshrl.u32 %v14571_v22, 16  ;;  %v5205_v3 = vshll.u32 %v14571_v22, 16  ;;  %v4612_v8 = vadd.f32 %v16222_v43, %v19429_v63  ;;  %v19607_v5 = vpop.f32.mrb[24].mxu1 }
 0x2f4   : > { %v4930_v16 = vsel %vm4894_vm4, %v4642_v32, 0.0  ;;  %v5158_v38 = vor.u32 %v5157_v28, %v5154_v60  ;;  %v4933_v31 = vsel %vm4897_vm14, %v4645_v36, 0.0  ;;  %v19613_v17 = vpop.f32.mrb[25].mxu1  ;;  %vm4898_vm7 = vcmp.eq.s32.totalorder %v19530_v51, 1  ;;  %vm22642_vm14 = vmmov %vm22636_vm2  ;;  %v19640_v36 = vpop.permute.xlu0 %4835 }
 0x2f5   : > { %v14569_v56 = vpack.c.bf16 %v4930_v16, %v4930_v16  ;;  %v4643_v7 = vmax.f32 %v4607_v12, 0.0  ;;  %v5204_v49 = vrot.slane %v5202_v39, 6  ;;  %v5207_v57 = vrot.slane %v5205_v3, 7  ;;  %v19620_v62 = vpop.f32.mrb[26].mxu1  ;;  %v19622_v54 = vpop.f32.mrb[24].mxu0 }
 0x2f6   : > { %v14572_v35 = vpack.c.bf16 %v4933_v31, %v4933_v31  ;;  %v4648_v37 = vmax.f32 %v4612_v8, 0.0  ;;  %v5159_v0 = vsel %vm22632_vm15, %v5150_v21, %v5158_v38  ;;  %v5160_v1 = vrot.slane %v5158_v38, 4  ;;  %v19627_v23 = vpop.f32.mrb[27].mxu1  ;;  %v19629_v22 = vpop.f32.mrb[25].mxu0 }
 0x2f7   : > { %v5182_v30 = vshrl.u32 %v14569_v56, 16  ;;  %v5185_v47 = vshll.u32 %v14569_v56, 16  ;;  %5469 = vst.msk [vmem:[#allocation3 + $0x2c] sm:$0xf] %vm22641_vm9, %v5159_v0  ;;  %v19616_v2 = vor.u32 %v5207_v57, %v5204_v49  ;;  %v4931_v55 = vsel %vm4895_vm5, %v4643_v7, 0.0  ;;  %v19637_v28 = vpop.f32.mrb[26].mxu0  ;;  %vm22644_vm5 = vmmov %vm22636_vm2 }
 0x2f8   : > { %v5212_v45 = vshrl.u32 %v14572_v35, 16  ;;  %v5215_v25 = vshll.u32 %v14572_v35, 16  ;;  %v5169_v21 = vsel %vm22632_vm15, %v5160_v1, %v19537_v24  ;;  %v14570_v43 = vpack.c.bf16 %v4931_v55, %v4931_v55  ;;  %v19642_v8 = vpop.f32.mrb[27].mxu0  ;;  %v17217_v7 = vld [vmem:[#allocation3 + $0x8] sm:$0xff]   ;;  %v19656_v0 = vld [vmem:[#allocation3 + $0x10] sm:$0xff]  }
 0x2f9   : > { %v5184_v29 = vrot.slane %v5182_v30, 6  ;;  %v5187_v11 = vrot.slane %v5185_v47, 7  ;;  %vm4901_vm4 = vcmp.eq.s32.totalorder %v19609_v41, 1  ;;  %5470 = vst.msk [vmem:[#allocation3 + $0x30] sm:$0xf] %vm22642_vm14, %v5169_v21  ;;  %v5210_v14 = vrot.slane %v19616_v2, 4 }
 0x2fa   : > { %v5214_v32 = vrot.slane %v5212_v45, 6  ;;  %v5217_v60 = vrot.slane %v5215_v25, 7  ;;  %v4936_v24 = vsel %vm4900_vm6, %v4648_v37, 0.0  ;;  %vm4899_vm10 = vcmp.eq.s32.totalorder %v19557_v34, 1  ;;  %vm22645_vm6 = vmmov %vm22636_vm2  ;;  %v17236_v34 = vld [vmem:[#allocation9 + $0x10] sm:$0xff]  }
 0x2fb   : > { %v5188_v12 = vor.u32 %v5187_v11, %v5184_v29  ;;  %v5192_v39 = vshrl.u32 %v14570_v43, 16  ;;  %v5195_v3 = vshll.u32 %v14570_v43, 16  ;;  %v14575_v16 = vpack.c.bf16 %v4936_v24, %v4936_v24  ;;  %v19677_v43 = vpop.permute.xlu0 %4841 }
 0x2fc   : > { %v19644_v38 = vor.u32 %v5217_v60, %v5214_v32  ;;  %v16223_v56 = vadd.f32 %v19535_v27, %v19422_v6  ;;  %v16224_v4 = vadd.f32 %v19541_v52, %v19424_v18  ;;  %v16225_v31 = vadd.f32 %v19546_v20, %v19431_v58  ;;  %v19663_v52 = vpop.f32.mrb[28].mxu1  ;;  %v19665_v20 = vpop.permute.xlu1 %4838 }
 0x2fd   : > { %v5189_v49 = vsel %vm22632_vm15, %v5180_v13, %v5188_v12  ;;  %v5190_v57 = vrot.slane %v5188_v12, 4  ;;  %v5194_v35 = vrot.slane %v5192_v39, 6  ;;  %v5197_v37 = vrot.slane %v5195_v3, 7  ;;  %v19671_v47 = vpop.f32.mrb[29].mxu1  ;;  %v19675_v11 = vpop.f32.mrb[28].mxu0 }
 0x2fe   : > { %5472 = vst.msk [vmem:[#allocation3 + $0x38] sm:$0xf] %vm22643_vm12, %v5189_v49  ;;  %v5219_v6 = vsel %vm22632_vm15, %v5210_v14, %v19644_v38  ;;  %v5220_v18 = vrot.slane %v19644_v38, 4  ;;  %v5242_v58 = vshrl.u32 %v14575_v16, 16  ;;  %v5245_v27 = vshll.u32 %v14575_v16, 16  ;;  %v19673_v29 = vpop.f32.mrb[30].mxu1 }
 0x2ff   : > { %5475 = vst.msk [vmem:[#allocation3 + $0x44] sm:$0xf] %vm22644_vm5, %v5219_v6  ;;  %v5198_v15 = vor.u32 %v5197_v37, %v5194_v35  ;;  %v4610_v13 = vadd.f32 %v16223_v56, %v19429_v63  ;;  %v4613_v1 = vadd.f32 %v16224_v4, %v19429_v63  ;;  %v4611_v30 = vadd.f32 %v16225_v31, %v19429_v63  ;;  %v19681_v12 = vpop.f32.mrb[31].mxu1  ;;  %v19688_v4 = vpop.f32.mrb[29].mxu0 }
 0x300   : > { %v5244_v45 = vrot.slane %v5242_v58, 6  ;;  %v5247_v25 = vrot.slane %v5245_v27, 7  ;;  %v5643_v55 = vshll.u32 %v17217_v7, 16  ;;  %v5647_v21 = vshrl.u32 %v17217_v7, 16  ;;  %v19699_v35 = vpop.f32.mrb[30].mxu0 }
 0x301   : > { %v5199_v14 = vsel %vm22632_vm15, %v5190_v57, %v5198_v15  ;;  %v5200_v32 = vrot.slane %v5198_v15, 4  ;;  %v4646_v60 = vmax.f32 %v4610_v13, 0.0  ;;  %v4649_v24 = vmax.f32 %v4613_v1, 0.0  ;;  %v19705_v27 = vpop.f32.mrb[31].mxu0 }
 0x302   : > { %vm4904_vm8 = vcmp.eq.s32.totalorder %v19677_v43, 1  ;;  %5473 = vst.msk [vmem:[#allocation3 + $0x3c] sm:$0xf] %vm22645_vm6, %v5199_v14  ;;  %v19685_v39 = vor.u32 %v5247_v25, %v5244_v45  ;;  %v4647_v3 = vmax.f32 %v4611_v30, 0.0  ;;  %v5645_v16 = vrot.slane %v5643_v55, 1  ;;  %v19713_v25 = vpop.permute.xlu1 %4844  ;;  %vm22651_vm6 = vmmov %vm22636_vm2 }
 0x303   : > { %v5651_v56 = vshll.u32 %v19656_v0, 16  ;;  %v5209_v31 = vsel %vm22632_vm15, %v5200_v32, %v19616_v2  ;;  %v4934_v7 = vsel %vm4898_vm7, %v4646_v60, 0.0  ;;  %v4937_v49 = vsel %vm4901_vm4, %v4649_v24, 0.0  ;;  %v19711_v45 = vpop.f32.mrb[32].mxu1 }
 0x304   : > { %v16226_v57 = vadd.f32 %v19582_v46, %v19564_v61  ;;  %5474 = vst.msk [vmem:[#allocation3 + $0x40] sm:$0xf] %vm22636_vm2, %v5209_v31  ;;  %v5250_v37 = vrot.slane %v19685_v39, 4  ;;  %v14573_v6 = vpack.c.bf16 %v4934_v7, %v4934_v7  ;;  %v14576_v58 = vpack.c.bf16 %v4937_v49, %v4937_v49 }
 0x305   : > { %v4935_v2 = vsel %vm4899_vm10, %v4647_v3, 0.0  ;;  %vm22646_vm9 = vsmask.f32 7424  ;;  %v5649_v15 = vor.u32 %v5647_v21, %v5645_v16  ;;  %v5653_v13 = vrot.slane %v5651_v56, 1  ;;  %v19717_v21 = vpop.f32.mrb[33].mxu1  ;;  %v19722_v31 = vpop.f32.mrb[32].mxu0 }
 0x306   : > { %v14574_v51 = vpack.c.bf16 %v4935_v2, %v4935_v2  ;;  %v5646_v41 = vsel %vm22646_vm9, %v19448_v59, %v5645_v16  ;;  %vm4902_vm7 = vcmp.eq.s32.totalorder %v19640_v36, 1  ;;  %v5222_v61 = vshrl.u32 %v14573_v6, 16  ;;  %vm22648_vm14 = vmmov %vm22646_vm9  ;;  %v19720_v56 = vpop.f32.mrb[34].mxu1 }
 0x307   : > { %v5225_v46 = vshll.u32 %v14573_v6, 16  ;;  %v5252_v1 = vshrl.u32 %v14576_v58, 16  ;;  %v5255_v30 = vshll.u32 %v14576_v58, 16  ;;  %vm22647_vm4 = vcmask 130048   ;;  %v19729_v58 = vpop.f32.mrb[35].mxu1  ;;  %vm22652_vm9 = vmmov %vm22636_vm2 }
 0x308   : > { %15522 = vmatprep.mubr.msk.bf16.mxu1 %vm22647_vm4, %v5646_v41  ;;  %v5232_v55 = vshrl.u32 %v14574_v51, 16  ;;  %v5235_v14 = vshll.u32 %v14574_v51, 16  ;;  %v5654_v32 = vsel %vm22648_vm14, %v5649_v15, %v5653_v13  ;;  %v4616_v59 = vadd.f32 %v16226_v57, %v19429_v63  ;;  %vm22649_vm10 = vmmov %vm22647_vm4 }
 0x309   : > { %v5224_v60 = vrot.slane %v5222_v61, 6  ;;  %v5227_v24 = vrot.slane %v5225_v46, 7  ;;  %v5254_v3 = vrot.slane %v5252_v1, 6  ;;  %v5257_v16 = vrot.slane %v5255_v30, 7  ;;  %15523 = vmatmul.mubr.msk.bf16.vlgmr.msra.gmra.mrb[36].mxu1 %vm22649_vm10, %v5654_v32  ;;  %v17220_v61 = vld [vmem:[#allocation3 + $0x18] sm:$0xff]   ;;  %v19737_v46 = vpop.f32.mrb[33].mxu0  ;;  %vm22653_vm4 = vmmov %vm22648_vm14 }
 0x30a   : > { %vm4903_vm12 = vcmp.eq.s32.totalorder %v19665_v20, 1  ;;  %vm4905_vm5 = vcmp.eq.s32.totalorder %v19713_v25, 1  ;;  %v5234_v7 = vrot.slane %v5232_v55, 6  ;;  %v5237_v49 = vrot.slane %v5235_v14, 7  ;;  %15559 = vmatpush3.bf16.msra.mxu1 %v19391_v33  ;;  %v19743_v30 = vpop.f32.mrb[34].mxu0  ;;  %v19745_v55 = vpop.permute.xlu0 %4847  ;;  %v19760_v32 = vld [vmem:[#allocation3 + $0x20] sm:$0xff]  }
 0x30b   : > { %v4652_v57 = vmax.f32 %v4616_v59, 0.0  ;;  %v16227_v6 = vadd.f32 %v19590_v53, %v19571_v10  ;;  %v5228_v2 = vor.u32 %v5227_v24, %v5224_v60  ;;  %v19731_v51 = vor.u32 %v5257_v16, %v5254_v3  ;;  %15596 = vmatprep.subr.bf16.mxu1 %v17236_v34  ;;  %v19755_v43 = vpop.f32.mrb[35].mxu0  ;;  %v19765_v24 = vpop.permute.xlu1 %4850 }
 0x30c   : > { %v16228_v41 = vadd.f32 %v19596_v48, %v19580_v50  ;;  %v16229_v15 = vadd.f32 %v19600_v42, %v19587_v40  ;;  %v5238_v33 = vor.u32 %v5237_v49, %v5234_v7  ;;  %v5655_v53 = vshrl.u32 %v19656_v0, 16 }
 0x30d   : > { %v4940_v1 = vsel %vm4904_vm8, %v4652_v57, 0.0  ;;  %v4614_v10 = vadd.f32 %v16227_v6, %v19429_v63  ;;  %v5229_v50 = vsel %vm22632_vm15, %v5220_v18, %v5228_v2  ;;  %v5230_v40 = vrot.slane %v5228_v2, 4  ;;  %vm22650_vm8 = vmmov %vm22636_vm2 }
 0x30e   : > { %v5259_v48 = vsel %vm22632_vm15, %v5250_v37, %v19731_v51  ;;  %v5260_v42 = vrot.slane %v19731_v51, 4  ;;  %5476 = vst.msk [vmem:[#allocation3 + $0x48] sm:$0xf] %vm22650_vm8, %v5229_v50  ;;  %v5240_v0 = vrot.slane %v5238_v33, 4  ;;  %v14579_v34 = vpack.c.bf16 %v4940_v1, %v4940_v1  ;;  %v4854_v1 = vpop.permute.xlu0 %4853 }
 0x30f   : > { %5479 = vst.msk [vmem:[#allocation3 + $0x54] sm:$0xf] %vm22651_vm6, %v5259_v48  ;;  %v4650_v14 = vmax.f32 %v4614_v10, 0.0  ;;  %v4617_v38 = vadd.f32 %v16228_v41, %v19429_v63  ;;  %v5239_v18 = vsel %vm22632_vm15, %v5230_v40, %v5238_v33  ;;  %v4615_v37 = vadd.f32 %v16229_v15, %v19429_v63  ;;  %vm22655_vm6 = vmmov %vm22649_vm10 }
 0x310   : > { %v5657_v59 = vor.u32 %v5655_v53, %v5653_v13  ;;  %v5659_v60 = vshll.u32 %v17220_v61, 16  ;;  %v5249_v3 = vsel %vm22632_vm15, %v5240_v0, %v19685_v39  ;;  %5477 = vst.msk [vmem:[#allocation3 + $0x4c] sm:$0xf] %vm22636_vm2, %v5239_v18  ;;  %v5282_v16 = vshrl.u32 %v14579_v34, 16  ;;  %v4857_v18 = vpop.permute.xlu1 %4856 }
 0x311   : > { %v5285_v7 = vshll.u32 %v14579_v34, 16  ;;  %v4938_v49 = vsel %vm4902_vm7, %v4650_v14, 0.0  ;;  %5478 = vst.msk [vmem:[#allocation3 + $0x50] sm:$0xf] %vm22652_vm9, %v5249_v3  ;;  %v4653_v6 = vmax.f32 %v4617_v38, 0.0  ;;  %v4651_v2 = vmax.f32 %v4615_v37, 0.0  ;;  %vm22656_vm9 = vmmov %vm22636_vm2 }
 0x312   : > { %v14577_v57 = vpack.c.bf16 %v4938_v49, %v4938_v49  ;;  %v5661_v13 = vrot.slane %v5659_v60, 1  ;;  %v5284_v51 = vrot.slane %v5282_v16, 6  ;;  %v5663_v15 = vshrl.u32 %v17220_v61, 16  ;;  %v19785_v49 = vld [vmem:[#allocation3 + $0x28] sm:$0xff]  }
 0x313   : > { %v5287_v41 = vrot.slane %v5285_v7, 7  ;;  %v5667_v33 = vshll.u32 %v19760_v32, 16  ;;  %v4941_v53 = vsel %vm4905_vm5, %v4653_v6, 0.0  ;;  %v4939_v36 = vsel %vm4903_vm12, %v4651_v2, 0.0  ;;  %vm22654_vm5 = vmmov %vm22653_vm4 }
 0x314   : > { %v5262_v39 = vshrl.u32 %v14577_v57, 16  ;;  %v5265_v10 = vshll.u32 %v14577_v57, 16  ;;  %vm4908_vm7 = vcmp.eq.s32.totalorder %v4854_v1, 1  ;;  %v14580_v40 = vpack.c.bf16 %v4941_v53, %v4941_v53 }
 0x315   : > { %v5288_v50 = vor.u32 %v5287_v41, %v5284_v51  ;;  %v14578_v48 = vpack.c.bf16 %v4939_v36, %v4939_v36  ;;  %v5662_v0 = vsel %vm22653_vm4, %v5657_v59, %v5661_v13  ;;  %vm4906_vm14 = vcmp.eq.s32.totalorder %v19745_v55, 1  ;;  %vm22657_vm4 = vmmov %vm22636_vm2 }
 0x316   : > { %v5264_v61 = vrot.slane %v5262_v39, 6  ;;  %v5267_v34 = vrot.slane %v5265_v10, 7  ;;  %15526 = vmatprep.mubr.msk.bf16.mxu1 %vm22649_vm10, %v5662_v0  ;;  %v5665_v14 = vor.u32 %v5663_v15, %v5661_v13  ;;  %v5669_v38 = vrot.slane %v5667_v33, 1 }
 0x317   : > { %v5290_v25 = vrot.slane %v5288_v50, 4  ;;  %v5292_v37 = vshrl.u32 %v14580_v40, 16  ;;  %v5295_v60 = vshll.u32 %v14580_v40, 16  ;;  %v5272_v20 = vshrl.u32 %v14578_v48, 16 }
 0x318   : > { %vm4909_vm12 = vcmp.eq.s32.totalorder %v4857_v18, 1  ;;  %v5268_v3 = vor.u32 %v5267_v34, %v5264_v61  ;;  %v5275_v16 = vshll.u32 %v14578_v48, 16  ;;  %v5670_v7 = vsel %vm22654_vm5, %v5665_v14, %v5669_v38  ;;  %v19818_v61 = vld [vmem:[%s22194_s6] ss:$0 sm:$0xff] }
 0x319   : > { %v16230_v59 = vadd.f32 %v19622_v54, %v19607_v5  ;;  %vm4907_vm8 = vcmp.eq.s32.totalorder %v19765_v24, 1  ;;  %v5294_v57 = vrot.slane %v5292_v37, 6  ;;  %v5297_v6 = vrot.slane %v5295_v60, 7  ;;  %15527 = vmatmul.mubr.msk.bf16.gmra.mrb[40].mxu1 %vm22655_vm6, %v5670_v7  ;;  %v19824_v60 = vpop.permute.xlu1 %4862 }
 0x31a   : > { %v5274_v2 = vrot.slane %v5272_v20, 6  ;;  %v16231_v13 = vadd.f32 %v19629_v22, %v19613_v17  ;;  %v5269_v51 = vsel %vm22632_vm15, %v5260_v42, %v5268_v3  ;;  %v5270_v41 = vrot.slane %v5268_v3, 4  ;;  %v19802_v17 = vpop.permute.xlu0 %4859 }
 0x31b   : > { %v5277_v15 = vrot.slane %v5275_v16, 7  ;;  %v4620_v33 = vadd.f32 %v16230_v59, %v19429_v63  ;;  %5480 = vst.msk [vmem:[#allocation3 + $0x58] sm:$0xf] %vm22636_vm2, %v5269_v51  ;;  %v19795_v5 = vor.u32 %v5297_v6, %v5294_v57  ;;  %v16232_v39 = vadd.f32 %v19637_v28, %v19620_v62 }
 0x31c   : > { %v4618_v54 = vadd.f32 %v16231_v13, %v19429_v63  ;;  %v16233_v10 = vadd.f32 %v19642_v8, %v19627_v23  ;;  %v5671_v53 = vshrl.u32 %v19760_v32, 16  ;;  %v5675_v36 = vshll.u32 %v19785_v49, 16 }
 0x31d   : > { %v5278_v22 = vor.u32 %v5277_v15, %v5274_v2  ;;  %v4656_v42 = vmax.f32 %v4620_v33, 0.0  ;;  %v5299_v40 = vsel %vm22632_vm15, %v5290_v25, %v19795_v5  ;;  %v5300_v48 = vrot.slane %v19795_v5, 4  ;;  %v4869_v24 = vpop.permute.xlu1 %4868 }
 0x31e   : > { %v4654_v0 = vmax.f32 %v4618_v54, 0.0  ;;  %v4621_v62 = vadd.f32 %v16232_v39, %v19429_v63  ;;  %5483 = vst.msk [vmem:[#allocation3 + $0x64] sm:$0xf] %vm22656_vm9, %v5299_v40  ;;  %v4619_v34 = vadd.f32 %v19818_v61, %v16233_v10  ;;  %v5673_v37 = vor.u32 %v5671_v53, %v5669_v38  ;;  %v4866_v55 = vpop.permute.xlu0 %4865 }
 0x31f   : > { %v5279_v23 = vsel %vm22632_vm15, %v5270_v41, %v5278_v22  ;;  %v5280_v28 = vrot.slane %v5278_v22, 4  ;;  %v4944_v8 = vsel %vm4908_vm7, %v4656_v42, 0.0  ;;  %v5677_v16 = vrot.slane %v5675_v36, 1  ;;  %vm22658_vm7 = vmmov %vm22636_vm2  ;;  %v19833_v41 = vld [vmem:[#allocation3 + $0x30] sm:$0xff]  }
 0x320   : > { %5481 = vst.msk [vmem:[#allocation3 + $0x5c] sm:$0xf] %vm22657_vm4, %v5279_v23  ;;  %v14583_v14 = vpack.c.bf16 %v4944_v8, %v4944_v8  ;;  %v4942_v63 = vsel %vm4906_vm14, %v4654_v0, 0.0  ;;  %v4657_v25 = vmax.f32 %v4621_v62, 0.0  ;;  %v4655_v3 = vmax.f32 %v4619_v34, 0.0  ;;  %vm22659_vm14 = vmmov %vm22654_vm5 }
 0x321   : > { %v5289_v1 = vsel %vm22632_vm15, %v5280_v28, %v5288_v50  ;;  %v14581_v20 = vpack.c.bf16 %v4942_v63, %v4942_v63  ;;  %v5679_v6 = vshrl.u32 %v19785_v49, 16  ;;  %v5678_v5 = vsel %vm22659_vm14, %v5673_v37, %v5677_v16  ;;  %vm22661_vm9 = vmmov %vm22659_vm14 }
 0x322   : > { %5482 = vst.msk [vmem:[#allocation3 + $0x60] sm:$0xf] %vm22658_vm7, %v5289_v1  ;;  %v5322_v7 = vshrl.u32 %v14583_v14, 16  ;;  %v5325_v59 = vshll.u32 %v14583_v14, 16  ;;  %v4945_v57 = vsel %vm4909_vm12, %v4657_v25, 0.0  ;;  %v4943_v51 = vsel %vm4907_vm8, %v4655_v3, 0.0  ;;  %vm22660_vm12 = vmmov %vm22655_vm6  ;;  %v19842_v63 = vpop.permute.xlu0 %4871 }
 0x323   : > { %v5302_v2 = vshrl.u32 %v14581_v20, 16  ;;  %v5305_v13 = vshll.u32 %v14581_v20, 16  ;;  %v14584_v38 = vpack.c.bf16 %v4945_v57, %v4945_v57  ;;  %v14582_v33 = vpack.c.bf16 %v4943_v51, %v4943_v51  ;;  %15530 = vmatprep.mubr.msk.bf16.mxu1 %vm22660_vm12, %v5678_v5  ;;  %v19848_v3 = vld [vmem:[#allocation3 + $0x38] sm:$0xff]   ;;  %vm22662_vm4 = vmmov %vm22636_vm2  ;;  %v19879_v5 = vpop.permute.xlu1 %4874 }
 0x324   : > { %v5324_v50 = vrot.slane %v5322_v7, 6  ;;  %v5327_v15 = vrot.slane %v5325_v59, 7  ;;  %vm4912_vm10 = vcmp.eq.s32.totalorder %v4866_v55, 1  ;;  %v5681_v36 = vor.u32 %v5679_v6, %v5677_v16  ;;  %vm22663_vm7 = vmmov %vm22660_vm12 }
 0x325   : > { %v5304_v54 = vrot.slane %v5302_v2, 6  ;;  %v5307_v18 = vrot.slane %v5305_v13, 7  ;;  %v5332_v39 = vshrl.u32 %v14584_v38, 16  ;;  %v5335_v10 = vshll.u32 %v14584_v38, 16  ;;  %vm22664_vm14 = vmmov %vm22636_vm2 }
 0x326   : > { %v5328_v22 = vor.u32 %v5327_v15, %v5324_v50  ;;  %v5312_v42 = vshrl.u32 %v14582_v33, 16  ;;  %v5315_v53 = vshll.u32 %v14582_v33, 16  ;;  %vm4910_vm5 = vcmp.eq.s32.totalorder %v19802_v17, 1  ;;  %vm22665_vm12 = vmmov %vm22636_vm2 }
 0x327   : > { %v5308_v40 = vor.u32 %v5307_v18, %v5304_v54  ;;  %v5334_v0 = vrot.slane %v5332_v39, 6  ;;  %v5337_v62 = vrot.slane %v5335_v10, 7  ;;  %v5683_v23 = vshll.u32 %v19833_v41, 16  ;;  %v4878_v54 = vpop.permute.xlu0 %4877 }
 0x328   : > { %vm4913_vm8 = vcmp.eq.s32.totalorder %v4869_v24, 1  ;;  %v5330_v28 = vrot.slane %v5328_v22, 4  ;;  %v5314_v8 = vrot.slane %v5312_v42, 6  ;;  %v5317_v34 = vrot.slane %v5315_v53, 7 }
 0x329   : > { %v16234_v14 = vadd.f32 %v19675_v11, %v19663_v52  ;;  %vm4911_vm6 = vcmp.eq.s32.totalorder %v19824_v60, 1  ;;  %v5309_v25 = vsel %vm22632_vm15, %v5300_v48, %v5308_v40  ;;  %v5310_v37 = vrot.slane %v5308_v40, 4 }
 0x32a   : > { %v19846_v1 = vor.u32 %v5337_v62, %v5334_v0  ;;  %v5685_v20 = vrot.slane %v5683_v23, 1  ;;  %5484 = vst.msk [vmem:[#allocation3 + $0x68] sm:$0xf] %vm22636_vm2, %v5309_v25  ;;  %v5318_v16 = vor.u32 %v5317_v34, %v5314_v8  ;;  %v16235_v52 = vadd.f32 %v19688_v4, %v19671_v47 }
 0x32b   : > { %v4624_v7 = vadd.f32 %v19818_v61, %v16234_v14  ;;  %v16236_v11 = vadd.f32 %v19699_v35, %v19673_v29  ;;  %v16237_v6 = vadd.f32 %v19705_v27, %v19681_v12  ;;  %v19868_v35 = vld [vmem:[#allocation3 + $0x40] sm:$0xff]   ;;  %v5687_v12 = vshrl.u32 %v19833_v41, 16 }
 0x32c   : > { %v5339_v48 = vsel %vm22632_vm15, %v5330_v28, %v19846_v1  ;;  %v5340_v59 = vrot.slane %v19846_v1, 4  ;;  %v5686_v57 = vsel %vm22661_vm9, %v5681_v36, %v5685_v20  ;;  %v5319_v2 = vsel %vm22632_vm15, %v5310_v37, %v5318_v16  ;;  %v19913_v1 = vld [vmem:[#allocation3 + $0x48] sm:$0xff]  }
 0x32d   : > { %5487 = vst.msk [vmem:[#allocation3 + $0x74] sm:$0xf] %vm22662_vm4, %v5339_v48  ;;  %v5320_v47 = vrot.slane %v5318_v16, 4  ;;  %15531 = vmatmul.mubr.msk.bf16.gmra.mrb[44].mxu1 %vm22663_vm7, %v5686_v57  ;;  %v4660_v29 = vmax.f32 %v4624_v7, 0.0  ;;  %v4622_v4 = vadd.f32 %v19818_v61, %v16235_v52  ;;  %v4625_v13 = vadd.f32 %v19818_v61, %v16236_v11  ;;  %v4881_v52 = vpop.permute.xlu1 %4880 }
 0x32e   : > { %5485 = vst.msk [vmem:[#allocation3 + $0x6c] sm:$0xf] %vm22664_vm14, %v5319_v2  ;;  %v4623_v38 = vadd.f32 %v19818_v61, %v16237_v6  ;;  %v5691_v27 = vshll.u32 %v19848_v3, 16  ;;  %v5695_v33 = vshrl.u32 %v19848_v3, 16  ;;  %v5689_v42 = vor.u32 %v5687_v12, %v5685_v20  ;;  %vm22669_vm14 = vmmov %vm22665_vm12 }
 0x32f   : > { %v5329_v51 = vsel %vm22632_vm15, %v5320_v47, %v5328_v22  ;;  %v4948_v50 = vsel %vm4912_vm10, %v4660_v29, 0.0  ;;  %v4658_v15 = vmax.f32 %v4622_v4, 0.0  ;;  %v4661_v39 = vmax.f32 %v4625_v13, 0.0  ;;  %vm22666_vm10 = vmmov %vm22661_vm9 }
 0x330   : > { %5486 = vst.msk [vmem:[#allocation3 + $0x70] sm:$0xf] %vm22665_vm12, %v5329_v51  ;;  %v14587_v18 = vpack.c.bf16 %v4948_v50, %v4948_v50  ;;  %v4659_v10 = vmax.f32 %v4623_v38, 0.0  ;;  %vm4916_vm2 = vcmp.eq.s32.totalorder %v4878_v54, 1  ;;  %v5693_v36 = vrot.slane %v5691_v27, 1 }
 0x331   : > { %v4946_v53 = vsel %vm4910_vm5, %v4658_v15, 0.0  ;;  %v5699_v55 = vshll.u32 %v19868_v35, 16  ;;  %v16238_v22 = vadd.f32 %v19722_v31, %v19711_v45  ;;  %v4949_v23 = vsel %vm4913_vm8, %v4661_v39, 0.0  ;;  %vm22667_vm5 = vmmov %vm22663_vm7 }
 0x332   : > { %v5362_v40 = vshrl.u32 %v14587_v18, 16  ;;  %v5365_v0 = vshll.u32 %v14587_v18, 16  ;;  %v14585_v62 = vpack.c.bf16 %v4946_v53, %v4946_v53  ;;  %v14588_v28 = vpack.c.bf16 %v4949_v23, %v4949_v23  ;;  %vm22668_vm7 = vmmov %vm22667_vm5 }
 0x333   : > { %v4947_v8 = vsel %vm4911_vm6, %v4659_v10, 0.0  ;;  %v5694_v34 = vsel %vm22666_vm10, %v5689_v42, %v5693_v36  ;;  %v5697_v14 = vor.u32 %v5695_v33, %v5693_v36  ;;  %v5701_v7 = vrot.slane %v5699_v55, 1 }
 0x334   : > { %v5364_v17 = vrot.slane %v5362_v40, 6  ;;  %v5367_v25 = vrot.slane %v5365_v0, 7  ;;  %v5342_v37 = vshrl.u32 %v14585_v62, 16  ;;  %v5345_v20 = vshll.u32 %v14585_v62, 16  ;;  %15534 = vmatprep.mubr.msk.bf16.mxu1 %vm22667_vm5, %v5694_v34  ;;  %vm22672_vm5 = vmmov %vm22661_vm9 }
 0x335   : > { %v5372_v16 = vshrl.u32 %v14588_v28, 16  ;;  %v5375_v45 = vshll.u32 %v14588_v28, 16  ;;  %v14586_v31 = vpack.c.bf16 %v4947_v8, %v4947_v8  ;;  %v4628_v60 = vadd.f32 %v19818_v61, %v16238_v22  ;;  %v19925_v28 = vld [vmem:[#allocation3 + $0x50] sm:$0xff]   ;;  %v19927_v8 = vld [vmem:[#allocation3 + $0x58] sm:$0xff]  }
 0x336   : > { %v5368_v24 = vor.u32 %v5367_v25, %v5364_v17  ;;  %v5344_v11 = vrot.slane %v5342_v37, 6  ;;  %v5347_v48 = vrot.slane %v5345_v20, 7  ;;  %vm4914_vm8 = vcmp.eq.s32.totalorder %v19842_v63, 1 }
 0x337   : > { %vm4917_vm6 = vcmp.eq.s32.totalorder %v4881_v52, 1  ;;  %v5374_v57 = vrot.slane %v5372_v16, 6  ;;  %v5377_v6 = vrot.slane %v5375_v45, 7  ;;  %v5352_v2 = vshrl.u32 %v14586_v31, 16 }
 0x338   : > { %v5355_v47 = vshll.u32 %v14586_v31, 16  ;;  %v5370_v29 = vrot.slane %v5368_v24, 4  ;;  %v5348_v4 = vor.u32 %v5347_v48, %v5344_v11  ;;  %v5702_v13 = vsel %vm22661_vm9, %v5697_v14, %v5701_v7  ;;  %vm22675_vm9 = vmmov %vm22668_vm7 }
 0x339   : > { %v4664_v38 = vmax.f32 %v4628_v60, 0.0  ;;  %vm4915_vm4 = vcmp.eq.s32.totalorder %v19879_v5, 1  ;;  %v19896_v12 = vor.u32 %v5377_v6, %v5374_v57  ;;  %v5354_v27 = vrot.slane %v5352_v2, 6  ;;  %15535 = vmatmul.mubr.msk.bf16.gmra.mrb[48].mxu1 %vm22668_vm7, %v5702_v13 }
 0x33a   : > { %v5357_v51 = vrot.slane %v5355_v47, 7  ;;  %v16239_v50 = vadd.f32 %v19737_v46, %v19717_v21  ;;  %v5349_v15 = vsel %vm22632_vm15, %v5340_v59, %v5348_v4  ;;  %v5350_v33 = vrot.slane %v5348_v4, 4  ;;  %v19943_v4 = vld [vmem:[#allocation3 + $0x60] sm:$0xff]  }
 0x33b   : > { %v4952_v18 = vsel %vm4916_vm2, %v4664_v38, 0.0  ;;  %v16240_v39 = vadd.f32 %v19743_v30, %v19720_v56  ;;  %5488 = vst.msk [vmem:[#allocation3 + $0x78] sm:$0xf] %vm22669_vm14, %v5349_v15  ;;  %v5379_v10 = vsel %vm22632_vm15, %v5370_v29, %v19896_v12  ;;  %v5380_v42 = vrot.slane %v19896_v12, 4  ;;  %vm22670_vm2 = vmmov %vm22665_vm12 }
 0x33c   : > { %v5358_v21 = vor.u32 %v5357_v51, %v5354_v27  ;;  %v14591_v46 = vpack.c.bf16 %v4952_v18, %v4952_v18  ;;  %5491 = vst.msk [vmem:[#allocation3 + $0x84] sm:$0xf] %vm22665_vm12, %v5379_v10  ;;  %v4626_v59 = vadd.f32 %v19818_v61, %v16239_v50  ;;  %v16241_v56 = vadd.f32 %v19755_v43, %v19729_v58  ;;  %vm22671_vm10 = vmmov %vm22670_vm2 }
 0x33d   : > { %v4629_v54 = vadd.f32 %v19818_v61, %v16240_v39  ;;  %v5703_v30 = vshrl.u32 %v19868_v35, 16  ;;  %v5707_v14 = vshll.u32 %v19913_v1, 16  ;;  %v5711_v37 = vshrl.u32 %v19913_v1, 16  ;;  %v5496_v39 = vld [vmem:[#allocation3 + $0x98] sm:$0x3]  ;;  %vm22679_vm12 = vmmov %vm22670_vm2 }
 0x33e   : > { %v5359_v53 = vsel %vm22632_vm15, %v5350_v33, %v5358_v21  ;;  %v5360_v36 = vrot.slane %v5358_v21, 4  ;;  %v5402_v55 = vshrl.u32 %v14591_v46, 16  ;;  %v5405_v22 = vshll.u32 %v14591_v46, 16 }
 0x33f   : > { %5489 = vst.msk [vmem:[#allocation3 + $0x7c] sm:$0xf] %vm22670_vm2, %v5359_v53  ;;  %v4662_v40 = vmax.f32 %v4626_v59, 0.0  ;;  %v4665_v0 = vmax.f32 %v4629_v54, 0.0  ;;  %v4627_v62 = vadd.f32 %v19818_v61, %v16241_v56  ;;  %v5705_v23 = vor.u32 %v5703_v30, %v5701_v7  ;;  %v19948_v59 = vld [vmem:[#allocation3 + $0x68] sm:$0xff]  }
 0x340   : > { %v5369_v58 = vsel %vm22632_vm15, %v5360_v36, %v5368_v24  ;;  %v5404_v43 = vrot.slane %v5402_v55, 6  ;;  %v5407_v34 = vrot.slane %v5405_v22, 7  ;;  %v5709_v31 = vrot.slane %v5707_v14, 1  ;;  %v19952_v36 = vld [vmem:[#allocation3 + $0x70] sm:$0xff]  }
 0x341   : > { %5490 = vst.msk [vmem:[#allocation3 + $0x80] sm:$0xf] %vm22671_vm10, %v5369_v58  ;;  %v4950_v17 = vsel %vm4914_vm8, %v4662_v40, 0.0  ;;  %v4953_v25 = vsel %vm4917_vm6, %v4665_v0, 0.0  ;;  %v4663_v61 = vmax.f32 %v4627_v62, 0.0  ;;  %v5715_v24 = vshll.u32 %v19925_v28, 16  ;;  %vm22673_vm8 = vmmov %vm22668_vm7 }
 0x342   : > { %v5408_v20 = vor.u32 %v5407_v34, %v5404_v43  ;;  %v14589_v16 = vpack.c.bf16 %v4950_v17, %v4950_v17  ;;  %v14592_v45 = vpack.c.bf16 %v4953_v25, %v4953_v25  ;;  %v5719_v11 = vshrl.u32 %v19925_v28, 16  ;;  %vm22674_vm6 = vmmov %vm22672_vm5 }
 0x343   : > { %v4951_v7 = vsel %vm4915_vm4, %v4663_v61, 0.0  ;;  %v5723_v48 = vshll.u32 %v19927_v8, 16  ;;  %v5710_v47 = vsel %vm22672_vm5, %v5705_v23, %v5709_v31  ;;  %v5713_v29 = vor.u32 %v5711_v37, %v5709_v31  ;;  %vm22676_vm4 = vmmov %vm22672_vm5 }
 0x344   : > { %v5410_v63 = vrot.slane %v5408_v20, 4  ;;  %v5382_v60 = vshrl.u32 %v14589_v16, 16  ;;  %v5385_v52 = vshll.u32 %v14589_v16, 16  ;;  %v5412_v57 = vshrl.u32 %v14592_v45, 16  ;;  %15538 = vmatprep.mubr.msk.bf16.mxu1 %vm22673_vm8, %v5710_v47  ;;  %vm22677_vm7 = vmmov %vm22670_vm2 }
 0x345   : > { %v5415_v6 = vshll.u32 %v14592_v45, 16  ;;  %v14590_v2 = vpack.c.bf16 %v4951_v7, %v4951_v7  ;;  %v5717_v27 = vrot.slane %v5715_v24, 1  ;;  %v5725_v33 = vrot.slane %v5723_v48, 1  ;;  %vm22678_vm14 = vmmov %vm22673_vm8 }
 0x346   : > { %v5384_v13 = vrot.slane %v5382_v60, 6  ;;  %v5387_v5 = vrot.slane %v5385_v52, 7  ;;  %v5414_v38 = vrot.slane %v5412_v57, 6  ;;  %v5727_v46 = vshrl.u32 %v19927_v8, 16  ;;  %v19959_v62 = vld [vmem:[#allocation3 + $0x78] sm:$0xff]   ;;  %vm22680_vm10 = vmmov %vm22676_vm4 }
 0x347   : > { %v5417_v51 = vrot.slane %v5415_v6, 7  ;;  %v5392_v50 = vshrl.u32 %v14590_v2, 16  ;;  %v5395_v15 = vshll.u32 %v14590_v2, 16  ;;  %v5718_v10 = vsel %vm22674_vm6, %v5713_v29, %v5717_v27  ;;  %vm22681_vm5 = vmmov %vm22670_vm2 }
 0x348   : > { %v5388_v18 = vor.u32 %v5387_v5, %v5384_v13  ;;  %v5721_v21 = vor.u32 %v5719_v11, %v5717_v27  ;;  %15539 = vmatmul.mubr.msk.bf16.gmra.mrb[52].mxu1 %vm22675_vm9, %v5718_v10  ;;  %v5731_v53 = vshll.u32 %v19943_v4, 16  ;;  %v5729_v0 = vor.u32 %v5727_v46, %v5725_v33  ;;  %vm22682_vm8 = vmmov %vm22676_vm4 }
 0x349   : > { %v5418_v54 = vor.u32 %v5417_v51, %v5414_v38  ;;  %v5394_v56 = vrot.slane %v5392_v50, 6  ;;  %v5397_v30 = vrot.slane %v5395_v15, 7  ;;  %v5735_v12 = vshrl.u32 %v19943_v4, 16  ;;  %vm22683_vm6 = vmmov %vm22675_vm9 }
 0x34a   : > { %v5389_v55 = vsel %vm22632_vm15, %v5380_v42, %v5388_v18  ;;  %v5390_v22 = vrot.slane %v5388_v18, 4  ;;  %v5726_v40 = vsel %vm22676_vm4, %v5721_v21, %v5725_v33  ;;  %v5733_v34 = vrot.slane %v5731_v53, 1  ;;  %vm22684_vm9 = vmmov %vm22683_vm6  ;;  %v20001_v21 = vld [vmem:[#allocation3 + $0xc] sm:$0xf] }
 0x34b   : > { %5492 = vst.msk [vmem:[#allocation3 + $0x88] sm:$0xf] %vm22677_vm7, %v5389_v55  ;;  %v5419_v23 = vsel %vm22632_vm15, %v5410_v63, %v5418_v54  ;;  %v5420_v58 = vrot.slane %v5418_v54, 4  ;;  %v5398_v43 = vor.u32 %v5397_v30, %v5394_v56  ;;  %15542 = vmatprep.mubr.msk.bf16.mxu1 %vm22678_vm14, %v5726_v40  ;;  %v5739_v42 = vshll.u32 %v19948_v59, 16  ;;  %v19982_v63 = vld [vmem:[#allocation3 + $0x80] sm:$0xff]   ;;  %vm22685_vm7 = vmmov %vm22676_vm4  ;;  %v20009_v55 = vld [vmem:[#allocation3 + $0x10] sm:$0xff]  }
 0x34c   : > { %5495 = vst.msk [vmem:[#allocation3 + $0x94] sm:$0xf] %vm22679_vm12, %v5419_v23  ;;  %v5747_v61 = vshll.u32 %v19952_v36, 16  ;;  %v5734_v37 = vsel %vm22680_vm10, %v5729_v0, %v5733_v34  ;;  %v5737_v16 = vor.u32 %v5735_v12, %v5733_v34  ;;  %v5755_v7 = vshll.u32 %v19959_v62, 16  ;;  %vm22686_vm14 = vmmov %vm22683_vm6  ;;  %v6556_v54 = vld [vmem:[#allocation3 + $0x8] sm:$0xe] }
 0x34d   : > { %v5497_v14 = vsel %vm22628_vm3, %v5420_v58, %v5496_v39  ;;  %v5399_v17 = vsel %vm22632_vm15, %v5390_v22, %v5398_v43  ;;  %v5400_v25 = vrot.slane %v5398_v43, 4  ;;  %v5741_v45 = vrot.slane %v5739_v42, 1  ;;  %vm22687_vm12 = vmmov %vm22683_vm6  ;;  %v20011_v22 = vld [vmem:[#allocation3 + $0x18] sm:$0xff]   ;;  %v20014_v0 = vld [vmem:[#allocation3 + $0x20] sm:$0xff]  }
 0x34e   : > { %5498 = vst [vmem:[#allocation3 + $0x98] sm:$0x3] %v5497_v14  ;;  %5493 = vst.msk [vmem:[#allocation3 + $0x8c] sm:$0xf] %vm22670_vm2, %v5399_v17  ;;  %v5743_v11 = vshrl.u32 %v19948_v59, 16  ;;  %v5749_v48 = vrot.slane %v5747_v61, 1  ;;  %v20007_v53 = vcombine.low %v6556_v54, %v20001_v21 }
 0x34f   : > { %v5409_v31 = vsel %vm22632_vm15, %v5400_v25, %v5408_v20  ;;  %v5742_v24 = vsel %vm22682_vm8, %v5737_v16, %v5741_v45  ;;  %v5751_v52 = vshrl.u32 %v19952_v36, 16  ;;  %v5757_v57 = vrot.slane %v5755_v7, 1  ;;  %vm22688_vm2 = vmmov %vm22676_vm4  ;;  %v20016_v23 = vld [vmem:[#allocation3 + $0x28] sm:$0xff]   ;;  %v20020_v34 = vld [vmem:[#allocation3 + $0x30] sm:$0xff]  }
 0x350   : > { %5494 = vst.msk [vmem:[#allocation3 + $0x90] sm:$0xf] %vm22681_vm5, %v5409_v31  ;;  %15543 = vmatmul.mubr.msk.bf16.gmra.mrb[56].mxu1 %vm22683_vm6, %v5734_v37  ;;  %v5745_v60 = vor.u32 %v5743_v11, %v5741_v45  ;;  %v5763_v6 = vshll.u32 %v19982_v63, 16  ;;  %v5759_v5 = vshrl.u32 %v19959_v62, 16  ;;  %v5767_v50 = vshrl.u32 %v19982_v63, 16  ;;  %vm22689_vm10 = vmmov %vm22688_vm2  ;;  %v20029_v31 = vld [vmem:[#allocation3 + $0x38] sm:$0xff]  }
 0x351   : > { %15546 = vmatprep.mubr.msk.bf16.mxu1 %vm22684_vm9, %v5742_v24  ;;  %v5753_v20 = vor.u32 %v5751_v52, %v5749_v48  ;;  %vm22690_vm5 = vmmov %vm22683_vm6  ;;  %v7007_v58 = vshrl.u32 %v20007_v53, 16  ;;  %v7010_v43 = vshll.u32 %v20007_v53, 16  ;;  %v7015_v12 = vshrl.u32 %v20009_v55, 16  ;;  %v20048_v54 = vld [vmem:[#allocation9 + $0x18] sm:$0xff]  }
 0x352   : > { %v5750_v47 = vsel %vm22676_vm4, %v5745_v60, %v5749_v48  ;;  %v5765_v38 = vrot.slane %v5763_v6, 1  ;;  %v5761_v27 = vor.u32 %v5759_v5, %v5757_v57  ;;  %vm22691_vm8 = vmmov %vm22690_vm5  ;;  %v7018_v42 = vshll.u32 %v20009_v55, 16  ;;  %v20034_v60 = vld [vmem:[#allocation3 + $0x40] sm:$0xff]   ;;  %v20039_v5 = vld [vmem:[#allocation3 + $0x48] sm:$0xff]  }
 0x353   : > { %v5758_v29 = vsel %vm22685_vm7, %v5753_v20, %v5757_v57  ;;  %vm22692_vm6 = vmmov %vm22688_vm2  ;;  %v7024_v14 = vshrl.u32 %v20011_v22, 16  ;;  %v7009_v17 = vrot.slane %v7007_v58, 1  ;;  %v7012_v25 = vrot.slane %v7010_v43, 2 }
 0x354   : > { %v5769_v33 = vor.u32 %v5767_v50, %v5765_v38  ;;  %v5766_v18 = vsel %vm22688_vm2, %v5761_v27, %v5765_v38  ;;  %vm22693_vm9 = vmmov %vm22690_vm5  ;;  %v7017_v61 = vrot.slane %v7015_v12, 1  ;;  %v7020_v37 = vrot.slane %v7018_v42, 2 }
 0x355   : > { %v19987_v2 = vld [vmem:[#allocation3 + $0x88] sm:$0xff]   ;;  %v7026_v16 = vrot.slane %v7024_v14, 1  ;;  %v7027_v45 = vshll.u32 %v20011_v22, 16  ;;  %vm22694_vm4 = vmmov %vm22690_vm5  ;;  %v7013_v7 = vor.u32 %v7012_v25, %v7009_v17  ;;  %v7033_v24 = vshrl.u32 %v20014_v0, 16 }
 0x356   : > { %v5771_v13 = vshll.u32 %v19987_v2, 16  ;;  %v5775_v46 = vshrl.u32 %v19987_v2, 16  ;;  %v7036_v11 = vshll.u32 %v20014_v0, 16  ;;  %v7042_v48 = vshrl.u32 %v20016_v23, 16  ;;  %v20060_v25 = vld [vmem:[#allocation3 + $0x8] sm:$0xff]   ;;  %vm22701_vm2 = vmmov %vm22694_vm4 }
 0x357   : > { %v19995_v51 = vld [vmem:[#allocation3 + $0x90] ss:$0 sps:$4 sm:$0x11]   ;;  %v7021_v52 = vor.u32 %v7020_v37, %v7017_v61  ;;  %v7029_v57 = vrot.slane %v7027_v45, 2  ;;  %v7045_v20 = vshll.u32 %v20016_v23, 16  ;;  %v7051_v6 = vshrl.u32 %v20020_v34, 16 }
 0x358   : > { %15547 = vmatmul.mubr.msk.bf16.gmra.mrb[60].mxu1 %vm22686_vm14, %v5750_v47  ;;  %v5773_v15 = vrot.slane %v5771_v13, 1  ;;  %v5779_v39 = vshll.u32 %v19995_v51, 16  ;;  %v7035_v47 = vrot.slane %v7033_v24, 1  ;;  %v7054_v13 = vshll.u32 %v20020_v34, 16  ;;  %v20064_v61 = vld [vmem:[#allocation3 + $0x60] sm:$0xff]   ;;  %v17396_v24 = vld [vmem:[#allocation9 + $0x10] sm:$0xff]  }
 0x359   : > { %15550 = vmatprep.mubr.msk.bf16.mxu1 %vm22687_vm12, %v5758_v29  ;;  %v7038_v29 = vrot.slane %v7036_v11, 2  ;;  %vm22695_vm7 = vsmask.f32 6400  ;;  %v7030_v27 = vor.u32 %v7029_v57, %v7026_v16  ;;  %v7047_v50 = vrot.slane %v7045_v20, 2  ;;  %v20070_v11 = vld [vmem:[#allocation3 + $0x10] sm:$0xff]  }
 0x35a   : > { %v5774_v10 = vsel %vm22689_vm10, %v5769_v33, %v5773_v15  ;;  %v5777_v56 = vor.u32 %v5775_v46, %v5773_v15  ;;  %v5781_v30 = vrot.slane %v5779_v39, 1  ;;  %v20042_v38 = vsel %vm22695_vm7, %v7013_v7, %v7021_v52  ;;  %v20044_v33 = vld [vmem:[#allocation3 + $0x50] sm:$0xff]   ;;  %vm22697_vm14 = vmmov %vm22695_vm7 }
 0x35b   : > { %22696 = vst [vmem:[#allocation22_spill] sm:$0xff] %v20042_v38  ;;  %v7053_v15 = vrot.slane %v7051_v6, 1  ;;  %v7056_v39 = vrot.slane %v7054_v13, 2  ;;  %v7063_v46 = vshll.u32 %v20029_v31, 16  ;;  %v7069_v58 = vshrl.u32 %v20034_v60, 16  ;;  %vm22699_vm12 = vmmov %vm22695_vm7 }
 0x35c   : > { %v5782_v40 = vsel %vm22692_vm6, %v5777_v56, %v5781_v30  ;;  %v20050_v56 = vld [vmem:[#allocation3 + $0x58] sm:$0xff]   ;;  %v20053_v30 = vsel %vm22697_vm14, %v7021_v52, %v7030_v27  ;;  %v7072_v43 = vshll.u32 %v20034_v60, 16  ;;  %vm22702_vm10 = vmmov %vm22695_vm7  ;;  %v7078_v7 = vshrl.u32 %v20039_v5, 16 }
 0x35d   : > { %22698 = vst [vmem:[#allocation23_spill] sm:$0xff] %v20053_v30  ;;  %v7057_v42 = vor.u32 %v7056_v39, %v7053_v15  ;;  %v7065_v17 = vrot.slane %v7063_v46, 2  ;;  %v7071_v16 = vrot.slane %v7069_v58, 1  ;;  %v7081_v20 = vshll.u32 %v20039_v5, 16  ;;  %vm22709_vm6 = vmmov %vm22695_vm7 }
 0x35e   : > { %v7074_v45 = vrot.slane %v7072_v43, 2  ;;  %v7087_v6 = vshrl.u32 %v20044_v33, 16  ;;  %v7090_v13 = vshll.u32 %v20044_v33, 16  ;;  %v7099_v39 = vshll.u32 %v20050_v56, 16  ;;  %v20094_v43 = vld [vmem:[#allocation3 + $0x78] sm:$0xff]  }
 0x35f   : > { %v7083_v15 = vrot.slane %v7081_v20, 2  ;;  %v7105_v58 = vshrl.u32 %v20064_v61, 16  ;;  %22713 = vst [vmem:[#allocation29_spill] sm:$0xff] %v20094_v43 }
 0x360   : > { %15551 = vmatmul.mubr.msk.bf16.gmra.mrb[64].mxu1 %vm22690_vm5, %v5766_v18  ;;  %v7039_v18 = vor.u32 %v7038_v29, %v7035_v47  ;;  %vm22704_vm5 = vmmov %vm22701_vm2  ;;  %v20082_v47 = vld [vmem:[#allocation3 + $0x70] sm:$0xff]   ;;  %v7075_v29 = vor.u32 %v7074_v45, %v7071_v16  ;;  %v7092_v46 = vrot.slane %v7090_v13, 2  ;;  %v7108_v16 = vshll.u32 %v20064_v61, 16  ;;  %v20098_v45 = vld [vmem:[#allocation3 + $0x80] sm:$0xff]  }
 0x361   : > { %15554 = vmatprep.mubr.msk.bf16.mxu1 %vm22691_vm8, %v5774_v10  ;;  %v7060_v10 = vshrl.u32 %v20029_v31, 16  ;;  %vm22706_vm8 = vmmov %vm22695_vm7  ;;  %22708 = vst [vmem:[#allocation26_spill] sm:$0xff] %v20082_v47  ;;  %v7126_v44 = vshll.u32 %v20082_v47, 16 }
 0x362   : > { %v20058_v12 = vsel %vm22699_vm12, %v7030_v27, %v7039_v18  ;;  %v7096_v27 = vshrl.u32 %v20050_v56, 16  ;;  %22714 = vst [vmem:[#allocation30_spill] sm:$0xff] %v20098_v45  ;;  %vm22718_vm7 = vmmov %vm22701_vm2 }
 0x363   : > { %22700 = vst [vmem:[#allocation20_spill] sm:$0xff] %v20058_v12  ;;  %v7062_v14 = vrot.slane %v7060_v10, 1  ;;  %vm22721_vm12 = vmmov %vm22701_vm2  ;;  %v20320_v12 = vld [vmem:[#allocation3 + $0x80] sm:$0xff]  }
 0x365   : > { %v7066_v57 = vor.u32 %v7065_v17, %v7062_v14  ;;  %v7101_v17 = vrot.slane %v7099_v39, 2  ;;  %v20107_v39 = vld [vmem:[#allocation3 + $0x18] sm:$0xff]  }
 0x368   : > { %15555 = vmatmul.mubr.msk.bf16.gmra.mrb[68].mxu1 %vm22693_vm9, %v5782_v40  ;;  %vm22711_vm9 = vmmov %vm22709_vm6 }
 0x369   : > { %15560 = vmatprep.mubr.msk.bf16.mxu1 %vm22694_vm4, %v19418_v9  ;;  %v7044_v9 = vrot.slane %v7042_v48, 1  ;;  %v20074_v48 = vld [vmem:[#allocation3 + $0x68] sm:$0xff]   ;;  %v20091_v10 = vsel %vm22711_vm9, %v7066_v57, %v7075_v29  ;;  %vm22716_vm4 = vmmov %vm22709_vm6 }
 0x36a   : > { %22705 = vst [vmem:[#allocation18_spill] sm:$0xff] %v20074_v48  ;;  %22712 = vst [vmem:[#allocation28_spill] sm:$0xff] %v20091_v10  ;;  %v7117_v20 = vshll.u32 %v20074_v48, 16 }
 0x36b   : > { %v7048_v40 = vor.u32 %v7047_v50, %v7044_v9  ;;  %v7080_v9 = vrot.slane %v7078_v7, 1  ;;  %v20087_v50 = vsel %vm22709_vm6, %v7057_v42, %v7066_v57  ;;  %v7123_v57 = vshrl.u32 %v20082_v47, 16  ;;  %vm22719_vm14 = vmmov %vm22716_vm4 }
 0x36c   : > { %22710 = vst [vmem:[#allocation27_spill] sm:$0xff] %v20087_v50  ;;  %vm22733_vm9 = vmmov %vm22718_vm7 }
 0x36d   : > { %v20067_v37 = vsel %vm22702_vm10, %v7039_v18, %v7048_v40  ;;  %v20077_v52 = vsel %vm22706_vm8, %v7048_v40, %v7057_v42  ;;  %v7089_v18 = vrot.slane %v7087_v6, 1  ;;  %v7098_v40 = vrot.slane %v7096_v27, 1  ;;  %v20102_v6 = vld [vmem:[#allocation3 + $0x88] sm:$0xff]  }
 0x36e   : > { %22703 = vst [vmem:[#allocation24_spill] sm:$0xff] %v20067_v37  ;;  %22707 = vst [vmem:[#allocation25_spill] sm:$0xff] %v20077_v52  ;;  %v7084_v14 = vor.u32 %v7083_v15, %v7080_v9  ;;  %v7114_v42 = vshrl.u32 %v20074_v48, 16  ;;  %v7110_v9 = vrot.slane %v7108_v16, 2  ;;  %v7132_v16 = vshrl.u32 %v20094_v43, 16 }
 0x36f   : > { %v7093_v7 = vor.u32 %v7092_v46, %v7089_v18  ;;  %22715 = vst [vmem:[#allocation31_spill] sm:$0xff] %v20102_v6  ;;  %v7102_v27 = vor.u32 %v7101_v17, %v7098_v40  ;;  %v7119_v46 = vrot.slane %v7117_v20, 2  ;;  %v7141_v20 = vshrl.u32 %v20098_v45, 16 }
 0x370   : > { %15561 = vmatmul.mubr.msk.bf16.vlgmr.msra.gmra.mrb[36].mxu1 %vm22701_vm2, %v20060_v25  ;;  %v20105_v13 = vsel %vm22716_vm4, %v7075_v29, %v7084_v14  ;;  %v7116_v15 = vrot.slane %v7114_v42, 1  ;;  %v20117_v29 = vld [vmem:[#allocation3 + $0x90] sm:$0xff]   ;;  %vm22723_vm2 = vmmov %vm22716_vm4  ;;  %v7135_v42 = vshll.u32 %v20094_v43, 16 }
 0x371   : > { %15597 = vmatpush3.bf16.msra.mxu1 %v17396_v24  ;;  %15564 = vmatprep.mubr.msk.bf16.mxu1 %vm22704_vm5, %v20070_v11  ;;  %v7107_v24 = vrot.slane %v7105_v58, 1  ;;  %22717 = vst [vmem:[#allocation35_spill] sm:$0xff] %v20105_v13  ;;  %v20112_v18 = vsel %vm22719_vm14, %v7084_v14, %v7093_v7  ;;  %v7125_v58 = vrot.slane %v7123_v57, 1  ;;  %22722 = vst [vmem:[#allocation33_spill] sm:$0xff] %v20117_v29  ;;  %v7128_v14 = vrot.slane %v7126_v44, 2 }
 0x372   : > { %15634 = vmatprep.subr.bf16.mxu1 %v20048_v54  ;;  %22720 = vst [vmem:[#allocation32_spill] sm:$0xff] %v20112_v18  ;;  %v20120_v40 = vsel %vm22723_vm2, %v7093_v7, %v7102_v27  ;;  %v7120_v19 = vor.u32 %v7119_v46, %v7116_v15  ;;  %v7144_v57 = vshll.u32 %v20098_v45, 16  ;;  %vm22725_vm10 = vmmov %vm22723_vm2  ;;  %v7137_v18 = vrot.slane %v7135_v42, 2 }
 0x373   : > { %22724 = vst [vmem:[#allocation34_spill] sm:$0xff] %v20120_v40  ;;  %v7111_v17 = vor.u32 %v7110_v9, %v7107_v24  ;;  %v7150_v13 = vshrl.u32 %v20102_v6, 16  ;;  %vm22727_vm5 = vmmov %vm22723_vm2  ;;  %v7129_v24 = vor.u32 %v7128_v14, %v7125_v58  ;;  %v7143_v9 = vrot.slane %v7141_v20, 1  ;;  %v7449_v58 = vld [vmem:[#allocation3 + $0x8] sm:$0xc] }
 0x374   : > { %v7146_v40 = vrot.slane %v7144_v57, 2  ;;  %v7153_v44 = vshll.u32 %v20102_v6, 16  ;;  %v7159_v46 = vshrl.u32 %v20117_v29, 16  ;;  %vm22729_vm8 = vmmov %vm22723_vm2  ;;  %v14148_v14 = vcombine.low %v7449_v58, %v20001_v21 }
 0x375   : > { %v20127_v26 = vsel %vm22725_vm10, %v7102_v27, %v7111_v17  ;;  %v20131_v7 = vsel %vm22727_vm5, %v7111_v17, %v7120_v19  ;;  %v7152_v15 = vrot.slane %v7150_v13, 1  ;;  %v20136_v50 = vsel %vm22729_vm8, %v7120_v19, %v7129_v24  ;;  %vm22731_vm6 = vmmov %vm22723_vm2 }
 0x376   : > { %22726 = vst [vmem:[#allocation21_spill] sm:$0xff] %v20127_v26  ;;  %22728 = vst [vmem:[#allocation19_spill] sm:$0xff] %v20131_v7  ;;  %v7147_v27 = vor.u32 %v7146_v40, %v7143_v9  ;;  %v7155_v17 = vrot.slane %v7153_v44, 2  ;;  %v7161_v7 = vrot.slane %v7159_v46, 1  ;;  %v7457_v40 = vrot.slane %v20009_v55, 2 }
 0x377   : > { %22730 = vst [vmem:[#allocation36_spill] sm:$0xff] %v20136_v50  ;;  %vm22734_vm4 = vmmov %vm22723_vm2  ;;  %v7459_v20 = vrot.slane %v20011_v22, 2  ;;  %v20176_v46 = vld [vmem:[#allocation3 + $0x98] ss:$0 sps:$4 sm:$0x33]   ;;  %v7471_v58 = vrot.slane %v20039_v5, 2 }
 0x378   : > { %15565 = vmatmul.mubr.msk.bf16.gmra.mrb[40].mxu1 %vm22718_vm7, %v20107_v39  ;;  %v7156_v19 = vor.u32 %v7155_v17, %v7152_v15  ;;  %vm22737_vm14 = vmmov %vm22723_vm2  ;;  %22748 = vst [vmem:[#allocation46_spill] sm:$0xff] %v20176_v46  ;;  %v7469_v17 = vrot.slane %v20034_v60, 2 }
 0x379   : > { %15568 = vmatprep.mubr.msk.bf16.mxu1 %vm22721_vm12, %v19760_v32  ;;  %v7134_v32 = vrot.slane %v7132_v16, 1  ;;  %v7162_v16 = vshll.u32 %v20117_v29, 16  ;;  %vm22739_vm12 = vcmask 1045504  }
 0x37a   : > { %v20160_v21 = vsel %vm22739_vm12, %v7457_v40, %v7459_v20  ;;  %vm22742_vm10 = vmmov %vm22739_vm12 }
 0x37b   : > { %v7138_v10 = vor.u32 %v7137_v18, %v7134_v32  ;;  %v7164_v18 = vrot.slane %v7162_v16, 2  ;;  %v7456_v32 = vrot.slane %v14148_v14, 2  ;;  %22740 = vst [vmem:[#allocation41_spill] sm:$0xff] %v20160_v21  ;;  %vm22744_vm5 = vmmov %vm22742_vm10  ;;  %v7467_v16 = vrot.slane %v20029_v31, 2 }
 0x37c   : > { %vm22746_vm8 = vmmov %vm22744_vm5  ;;  %v7475_v14 = vrot.slane %v20050_v56, 2 }
 0x37d   : > { %v20140_v42 = vsel %vm22731_vm6, %v7129_v24, %v7138_v10  ;;  %v20145_v13 = vsel %vm22734_vm4, %v7138_v10, %v7147_v27  ;;  %v20152_v57 = vor.u32 %v7164_v18, %v7161_v7  ;;  %v7461_v24 = vrot.slane %v20014_v0, 2  ;;  %vm22749_vm6 = vmmov %vm22744_vm5 }
 0x37e   : > { %22732 = vst [vmem:[#allocation37_spill] sm:$0xff] %v20140_v42  ;;  %22735 = vst [vmem:[#allocation38_spill] sm:$0xff] %v20145_v13  ;;  %v20157_v10 = vsel %vm22737_vm14, %v7147_v27, %v7156_v19  ;;  %v20168_v7 = vsel %vm22742_vm10, %v7456_v32, %v7457_v40  ;;  %v7473_v18 = vrot.slane %v20044_v33, 2  ;;  %v7479_v32 = vrot.slane %v20074_v48, 2  ;;  %v8659_v48 = vld [vmem:[#allocation3 + $0x10] sm:$0x8] }
 0x37f   : > { %22736 = vst [vmem:[#allocation39_spill] sm:$0xff] %v20152_v57  ;;  %22738 = vst [vmem:[#allocation40_spill] sm:$0xff] %v20157_v10  ;;  %v20165_v9 = vsel %vm22723_vm2, %v7156_v19, %v20152_v57  ;;  %v20171_v15 = vsel %vm22744_vm5, %v7459_v20, %v7461_v24  ;;  %v7477_v19 = vrot.slane %v20064_v61, 2 }
 0x380   : > { %15569 = vmatmul.mubr.msk.bf16.gmra.mrb[44].mxu1 %vm22733_vm9, %v19785_v49  ;;  %v7463_v49 = vrot.slane %v20016_v23, 2  ;;  %22741 = vst [vmem:[#allocation42_spill] sm:$0xff] %v20165_v9  ;;  %22743 = vst [vmem:[#allocation43_spill] sm:$0xff] %v20168_v7 }
 0x381   : > { %15572 = vmatprep.mubr.msk.bf16.mxu1 %vm22718_vm7, %v19833_v41  ;;  %v7465_v41 = vrot.slane %v20020_v34, 2  ;;  %22745 = vst [vmem:[#allocation44_spill] sm:$0xff] %v20171_v15  ;;  %vm22751_vm9 = vmmov %vm22744_vm5 }
 0x382   : > { %v20174_v44 = vsel %vm22746_vm8, %v7461_v24, %v7463_v49  ;;  %vm22753_vm4 = vmmov %vm22744_vm5  ;;  %v7481_v24 = vrot.slane %v20082_v47, 2 }
 0x383   : > { %22747 = vst [vmem:[#allocation45_spill] sm:$0xff] %v20174_v44  ;;  %v20179_v27 = vsel %vm22749_vm6, %v7463_v49, %v7465_v41  ;;  %v20188_v40 = vsel %vm22751_vm9, %v7465_v41, %v7467_v16  ;;  %v20191_v20 = vsel %vm22753_vm4, %v7467_v16, %v7469_v17  ;;  %vm22755_vm14 = vmmov %vm22753_vm4 }
 0x384   : > { %22750 = vst [vmem:[#allocation47_spill] sm:$0xff] %v20179_v27  ;;  %22752 = vst [vmem:[#allocation48_spill] sm:$0xff] %v20188_v40  ;;  %v20198_v49 = vsel %vm22755_vm14, %v7469_v17, %v7471_v58  ;;  %v7483_v17 = vrot.slane %v20094_v43, 2 }
 0x385   : > { %22754 = vst [vmem:[#allocation49_spill] sm:$0xff] %v20191_v20  ;;  %22756 = vst [vmem:[#allocation50_spill] sm:$0xff] %v20198_v49  ;;  %v20239_v49 = vld [vmem:[#allocation3 + $0x14] sm:$0xf] }
 0x386   : > { %vm22757_vm12 = vmmov %vm22753_vm4 }
 0x387   : > { %v20201_v27 = vsel %vm22757_vm12, %v7471_v58, %v7473_v18  ;;  %vm22759_vm2 = vmmov %vm22753_vm4  ;;  %v7485_v58 = vrot.slane %v20098_v45, 2 }
 0x388   : > { %15573 = vmatmul.mubr.msk.bf16.gmra.mrb[48].mxu1 %vm22718_vm7, %v19848_v3  ;;  %22758 = vst [vmem:[#allocation51_spill] sm:$0xff] %v20201_v27  ;;  %v20204_v44 = vsel %vm22759_vm2, %v7473_v18, %v7475_v14  ;;  %vm22761_vm10 = vmmov %vm22759_vm2  ;;  %v7487_v27 = vrot.slane %v20102_v6, 2  ;;  %v7489_v18 = vrot.slane %v20117_v29, 2 }
 0x389   : > { %22760 = vst [vmem:[#allocation52_spill] sm:$0xff] %v20204_v44  ;;  %v20207_v41 = vsel %vm22761_vm10, %v7475_v14, %v7477_v19  ;;  %vm22763_vm5 = vmmov %vm22718_vm7  ;;  %v7491_v14 = vrot.slane %v20176_v46, 2  ;;  %v7766_v44 = vld [vmem:[#allocation3 + $0x10] sm:$0xc] }
 0x38a   : > { %22762 = vst [vmem:[#allocation53_spill] sm:$0xff] %v20207_v41  ;;  %15576 = vmatprep.mubr.msk.bf16.mxu1 %vm22763_vm5, %v19868_v35  ;;  %vm22764_vm8 = vmmov %vm22759_vm2 }
 0x38b   : > { %v20212_v16 = vsel %vm22764_vm8, %v7477_v19, %v7479_v32  ;;  %vm22766_vm6 = vmmov %vm22759_vm2 }
 0x38c   : > { %22765 = vst [vmem:[#allocation54_spill] sm:$0xff] %v20212_v16  ;;  %v20215_v3 = vsel %vm22766_vm6, %v7479_v32, %v7481_v24  ;;  %vm22768_vm9 = vmmov %vm22759_vm2  ;;  %v6239_v16 = vld [vmem:[#allocation3] sm:$0xe] }
 0x38d   : > { %22767 = vst [vmem:[#allocation55_spill] sm:$0xff] %v20215_v3  ;;  %v20223_v41 = vsel %vm22768_vm9, %v7481_v24, %v7483_v17  ;;  %vm22770_vm4 = vmmov %vm22759_vm2  ;;  %v17399_v24 = vld [vmem:[#allocation3 + $0x4] sm:$0xf] }
 0x38e   : > { %22769 = vst [vmem:[#allocation56_spill] sm:$0xff] %v20223_v41  ;;  %v20226_v35 = vsel %vm22770_vm4, %v7483_v17, %v7485_v58  ;;  %vm22772_vm7 = vmmov %vm22759_vm2  ;;  %v14070_v17 = vcombine.low %v6239_v16, %v17399_v24 }
 0x38f   : > { %22771 = vst [vmem:[#allocation57_spill] sm:$0xff] %v20226_v35  ;;  %v20229_v19 = vsel %vm22772_vm7, %v7485_v58, %v7487_v27  ;;  %vm22774_vm14 = vmmov %vm22759_vm2  ;;  %v20244_v58 = vcombine.low %v7766_v44, %v20239_v49  ;;  %v20260_v44 = vld [vmem:[#allocation3 + $0x38] sm:$0xff]  }
 0x390   : > { %22773 = vst [vmem:[#allocation58_spill] sm:$0xff] %v20229_v19  ;;  %v20232_v32 = vsel %vm22774_vm14, %v7487_v27, %v7489_v18  ;;  %vm22776_vm12 = vmmov %vm22759_vm2  ;;  %v20246_v27 = vld [vmem:[#allocation3 + $0x18] sm:$0xff]   ;;  %v8264_v50 = vshll.u32 %v20260_v44, 16 }
 0x391   : > { %22775 = vst [vmem:[#allocation59_spill] sm:$0xff] %v20232_v32  ;;  %v20235_v3 = vsel %vm22776_vm12, %v7489_v18, %v7491_v14  ;;  %vm22778_vm2 = vmmov %vm22763_vm5  ;;  %v20248_v32 = vld [vmem:[#allocation3 + $0x20] sm:$0xff]   ;;  %v20250_v18 = vld [vmem:[#allocation3 + $0x28] sm:$0xff]   ;;  %v20252_v14 = vrot.slane %v14070_v17, 1  ;;  %v8220_v19 = vshll.u32 %v20244_v58, 16  ;;  %v8228_v24 = vshll.u32 %v20246_v27, 16 }
 0x392   : > { %22777 = vst [vmem:[#allocation60_spill] sm:$0xff] %v20235_v3  ;;  %15577 = vmatmul.mubr.msk.bf16.gmra.mrb[52].mxu1 %vm22778_vm2, %v19913_v1  ;;  %vm22779_vm10 = vmmov %vm22778_vm2  ;;  %v20254_v3 = vld [vmem:[#allocation3 + $0x30] sm:$0xff]   ;;  %v8217_v1 = vshrl.u32 %v20244_v58, 16  ;;  %v8234_v35 = vshrl.u32 %v20248_v32, 16  ;;  %v8237_v41 = vshll.u32 %v20248_v32, 16  ;;  %v20265_v17 = vld [vmem:[#allocation3 + $0x40] sm:$0xff]  }
 0x393   : > { %15580 = vmatprep.mubr.msk.bf16.mxu1 %vm22779_vm10, %v19925_v28  ;;  %22780 = vst [vmem:[#allocation61_spill] sm:$0xff] %v20244_v58  ;;  %v8225_v28 = vshrl.u32 %v20246_v27, 16  ;;  %v8222_v40 = vrot.slane %v8220_v19, 3  ;;  %v8243_v21 = vshrl.u32 %v20250_v18, 16  ;;  %vm22781_vm5 = vmmov %vm22778_vm2  ;;  %v8230_v58 = vrot.slane %v8228_v24, 3 }
 0x394   : > { %v8219_v20 = vrot.slane %v8217_v1, 2  ;;  %v8236_v16 = vrot.slane %v8234_v35, 2  ;;  %v8239_v7 = vrot.slane %v8237_v41, 3  ;;  %v8246_v57 = vshll.u32 %v20250_v18, 16  ;;  %vm22782_vm8 = vmmov %vm22778_vm2  ;;  %v20275_v1 = vld [vmem:[#allocation3 + $0x48] sm:$0xff]  }
 0x395   : > { %v8227_v15 = vrot.slane %v8225_v28, 2  ;;  %v8245_v10 = vrot.slane %v8243_v21, 2  ;;  %v8252_v46 = vshrl.u32 %v20254_v3, 16  ;;  %v8255_v19 = vshll.u32 %v20254_v3, 16  ;;  %v20277_v28 = vld [vmem:[#allocation3 + $0x50] sm:$0xff]   ;;  %v20282_v21 = vld [vmem:[#allocation3 + $0x58] sm:$0xff]   ;;  %vm22787_vm6 = vmmov %vm22778_vm2 }
 0x396   : > { %v8223_v9 = vor.u32 %v8222_v40, %v8219_v20  ;;  %v8248_v24 = vrot.slane %v8246_v57, 3  ;;  %v8261_v41 = vshrl.u32 %v20260_v44, 16  ;;  %v8270_v40 = vshrl.u32 %v20265_v17, 16  ;;  %vm22788_vm9 = vmmov %vm22778_vm2 }
 0x397   : > { %v8231_v13 = vor.u32 %v8230_v58, %v8227_v15  ;;  %v8254_v35 = vrot.slane %v8252_v46, 2  ;;  %v8257_v42 = vrot.slane %v8255_v19, 3  ;;  %v8266_v57 = vrot.slane %v8264_v50, 3  ;;  %vm22794_vm4 = vmmov %vm22778_vm2 }
 0x398   : > { %v8249_v52 = vor.u32 %v8248_v24, %v8245_v10  ;;  %v8263_v15 = vrot.slane %v8261_v41, 2  ;;  %v8272_v58 = vrot.slane %v8270_v40, 2  ;;  %v8273_v46 = vshll.u32 %v20265_v17, 16  ;;  %vm22796_vm7 = vmmov %vm22778_vm2 }
 0x399   : > { %v20285_v20 = vsel %vm3828_vm0, %v8223_v9, %v8231_v13  ;;  %v8279_v37 = vshrl.u32 %v20275_v1, 16  ;;  %v8282_v9 = vshll.u32 %v20275_v1, 16  ;;  %v8291_v24 = vshll.u32 %v20277_v28, 16  ;;  %vm22798_vm14 = vmmov %vm22778_vm2 }
 0x39a   : > { %15581 = vmatmul.mubr.msk.bf16.gmra.mrb[56].mxu1 %vm22781_vm5, %v19927_v8  ;;  %v8240_v8 = vor.u32 %v8239_v7, %v8236_v16  ;;  %22783 = vst [vmem:[#allocation62_spill] sm:$0xff] %v20285_v20  ;;  %v8258_v7 = vor.u32 %v8257_v42, %v8254_v35  ;;  %v20291_v16 = vld [vmem:[#allocation3 + $0x60] sm:$0xff]   ;;  %v8288_v20 = vshrl.u32 %v20277_v28, 16  ;;  %v8267_v50 = vor.u32 %v8266_v57, %v8263_v15  ;;  %vm22800_vm12 = vmmov %vm22778_vm2 }
 0x39b   : > { %15584 = vmatprep.mubr.msk.bf16.mxu1 %vm22782_vm8, %v19943_v4  ;;  %v8275_v42 = vrot.slane %v8273_v46, 3  ;;  %v8284_v41 = vrot.slane %v8282_v9, 3  ;;  %v8297_v40 = vshrl.u32 %v20282_v21, 16  ;;  %v8293_v57 = vrot.slane %v8291_v24, 3  ;;  %vm22811_vm10 = vmmov %vm22778_vm2 }
 0x39c   : > { %v20288_v26 = vsel %vm3828_vm0, %v8231_v13, %v8240_v8  ;;  %v20294_v19 = vsel %vm3828_vm0, %v8240_v8, %v8249_v52  ;;  %v20299_v13 = vld [vmem:[#allocation3 + $0x68] sm:$0xff]   ;;  %v20302_v10 = vsel %vm3828_vm0, %v8249_v52, %v8258_v7  ;;  %v8281_v8 = vrot.slane %v8279_v37, 2  ;;  %vm22815_vm5 = vmmov %vm22778_vm2 }
 0x39d   : > { %22784 = vst [vmem:[#allocation63_spill] sm:$0xff] %v20288_v26  ;;  %22785 = vst [vmem:[#allocation64_spill] sm:$0xff] %v20294_v19  ;;  %v8290_v35 = vrot.slane %v8288_v20, 2  ;;  %v20310_v19 = vld [vmem:[#allocation3 + $0x70] sm:$0xff]   ;;  %v20313_v52 = vsel %vm3828_vm0, %v8258_v7, %v8267_v50  ;;  %v8276_v15 = vor.u32 %v8275_v42, %v8272_v58  ;;  %v8300_v46 = vshll.u32 %v20282_v21, 16 }
 0x39e   : > { %22786 = vst [vmem:[#allocation65_spill] sm:$0xff] %v20302_v10  ;;  %22789 = vst [vmem:[#allocation66_spill] sm:$0xff] %v20313_v52  ;;  %v20316_v10 = vld [vmem:[#allocation3 + $0x78] sm:$0xff]   ;;  %v8285_v26 = vor.u32 %v8284_v41, %v8281_v8  ;;  %v8299_v37 = vrot.slane %v8297_v40, 2  ;;  %v8306_v20 = vshrl.u32 %v20291_v16, 16  ;;  %v8309_v9 = vshll.u32 %v20291_v16, 16 }
 0x39f   : > { %v20323_v30 = vsel %vm3828_vm0, %v8267_v50, %v8276_v15  ;;  %v8294_v38 = vor.u32 %v8293_v57, %v8290_v35  ;;  %v8302_v7 = vrot.slane %v8300_v46, 3  ;;  %v8315_v58 = vshrl.u32 %v20299_v13, 16  ;;  %v20330_v41 = vld [vmem:[#allocation3 + $0x88] sm:$0xff]   ;;  %v20336_v35 = vld [vmem:[#allocation3 + $0x90] sm:$0xff]   ;;  %vm22816_vm8 = vmmov %vm22778_vm2 }
 0x3a0   : > { %22790 = vst [vmem:[#allocation67_spill] sm:$0xff] %v20323_v30  ;;  %v20327_v42 = vsel %vm3828_vm0, %v8276_v15, %v8285_v26  ;;  %v8308_v24 = vrot.slane %v8306_v20, 2  ;;  %v8311_v52 = vrot.slane %v8309_v9, 3  ;;  %v8318_v8 = vshll.u32 %v20299_v13, 16 }
 0x3a1   : > { %22791 = vst [vmem:[#allocation68_spill] sm:$0xff] %v20327_v42  ;;  %v20333_v40 = vsel %vm3828_vm0, %v8285_v26, %v8294_v38  ;;  %v8303_v29 = vor.u32 %v8302_v7, %v8299_v37  ;;  %v8317_v6 = vrot.slane %v8315_v58, 2  ;;  %v8324_v50 = vshrl.u32 %v20310_v19, 16  ;;  %v20347_v37 = vld [vmem:[#allocation3 + $0x98] sm:$0xff]  }
 0x3a2   : > { %15585 = vmatmul.mubr.msk.bf16.gmra.mrb[60].mxu1 %vm22787_vm6, %v19948_v59  ;;  %22792 = vst [vmem:[#allocation69_spill] sm:$0xff] %v20333_v40  ;;  %v8312_v57 = vor.u32 %v8311_v52, %v8308_v24  ;;  %v8320_v46 = vrot.slane %v8318_v8, 3  ;;  %v8327_v15 = vshll.u32 %v20310_v19, 16  ;;  %v8333_v20 = vshrl.u32 %v20316_v10, 16  ;;  %vm22817_vm6 = vmmov %vm22778_vm2 }
 0x3a3   : > { %15588 = vmatprep.mubr.msk.bf16.mxu1 %vm22788_vm9, %v19952_v36  ;;  %v20341_v9 = vsel %vm3828_vm0, %v8294_v38, %v8303_v29  ;;  %v8326_v42 = vrot.slane %v8324_v50, 2  ;;  %v8336_v30 = vshll.u32 %v20316_v10, 16  ;;  %v8342_v26 = vshrl.u32 %v20320_v12, 16  ;;  %vm22818_vm9 = vmmov %vm22778_vm2 }
 0x3a4   : > { %22793 = vst [vmem:[#allocation70_spill] sm:$0xff] %v20341_v9  ;;  %v20350_v52 = vsel %vm3828_vm0, %v8303_v29, %v8312_v57  ;;  %v8321_v7 = vor.u32 %v8320_v46, %v8317_v6  ;;  %v8329_v58 = vrot.slane %v8327_v15, 3  ;;  %v8335_v24 = vrot.slane %v8333_v20, 2 }
 0x3a5   : > { %22795 = vst [vmem:[#allocation71_spill] sm:$0xff] %v20350_v52  ;;  %v8338_v38 = vrot.slane %v8336_v30, 3  ;;  %v8344_v8 = vrot.slane %v8342_v26, 2  ;;  %v8345_v50 = vshll.u32 %v20320_v12, 16  ;;  %v8351_v9 = vshrl.u32 %v20330_v41, 16 }
 0x3a6   : > { %v20357_v40 = vsel %vm3828_vm0, %v8312_v57, %v8321_v7  ;;  %v8330_v45 = vor.u32 %v8329_v58, %v8326_v42  ;;  %v8354_v43 = vshll.u32 %v20330_v41, 16  ;;  %v8360_v29 = vshrl.u32 %v20336_v35, 16 }
 0x3a7   : > { %22797 = vst [vmem:[#allocation72_spill] sm:$0xff] %v20357_v40  ;;  %v8339_v6 = vor.u32 %v8338_v38, %v8335_v24  ;;  %v8347_v46 = vrot.slane %v8345_v50, 3  ;;  %v8353_v15 = vrot.slane %v8351_v9, 2  ;;  %v8363_v20 = vshll.u32 %v20336_v35, 16 }
 0x3a8   : > { %v20363_v30 = vsel %vm3828_vm0, %v8321_v7, %v8330_v45  ;;  %v8356_v26 = vrot.slane %v8354_v43, 3  ;;  %v8362_v52 = vrot.slane %v8360_v29, 2  ;;  %v8369_v47 = vshrl.u32 %v20347_v37, 16 }
 0x3a9   : > { %v20367_v57 = vsel %vm3828_vm0, %v8330_v45, %v8339_v6  ;;  %v8348_v42 = vor.u32 %v8347_v46, %v8344_v8  ;;  %v8365_v58 = vrot.slane %v8363_v20, 3  ;;  %v8372_v40 = vshll.u32 %v20347_v37, 16 }
 0x3aa   : > { %15589 = vmatmul.mubr.msk.bf16.gmra.mrb[64].mxu1 %vm22794_vm4, %v19959_v62  ;;  %v6249_v24 = vrot.slane %v20070_v11, 1  ;;  %v8357_v9 = vor.u32 %v8356_v26, %v8353_v15  ;;  %v8371_v38 = vrot.slane %v8369_v47, 2  ;;  %v14226_v29 = vcombine.low %v8659_v48, %v20239_v49  ;;  %vm22819_vm4 = vmmov %vm22778_vm2 }
 0x3ab   : > { %15592 = vmatprep.mubr.msk.bf16.mxu1 %vm22796_vm7, %v19982_v63  ;;  %v20372_v50 = vsel %vm3828_vm0, %v8339_v6, %v8348_v42  ;;  %v8366_v7 = vor.u32 %v8365_v58, %v8362_v52  ;;  %v8374_v43 = vrot.slane %v8372_v40, 3  ;;  %v22799_v45 = vrot.slane %v20060_v25, 1  ;;  %vm22820_vm7 = vmmov %vm22778_vm2 }
 0x3ac   : > { %v6251_v46 = vrot.slane %v20107_v39, 1  ;;  %v20383_v11 = vsel %vm3828_vm0, %v8348_v42, %v8357_v9  ;;  %v8667_v47 = vrot.slane %v20246_v27, 3  ;;  %v8666_v49 = vrot.slane %v14226_v29, 3 }
 0x3ad   : > { %v6248_v8 = vsel %vm1855_vm11, %v20252_v14, %v22799_v45  ;;  %v20388_v40 = vsel %vm3828_vm0, %v8357_v9, %v8366_v7  ;;  %v20390_v48 = vor.u32 %v8374_v43, %v8371_v38  ;;  %v8669_v52 = vrot.slane %v20248_v32, 3 }
 0x3ae   : > { %v22801_v6 = vmov %v22799_v45  ;;  %v8671_v39 = vrot.slane %v20250_v18, 3  ;;  %v8673_v15 = vrot.slane %v20254_v3, 3  ;;  %v8675_v20 = vrot.slane %v20260_v44, 3 }
 0x3af   : > { %v6250_v14 = vsel %vm1855_vm11, %v22801_v6, %v6249_v24  ;;  %v20401_v26 = vsel %vm3828_vm0, %v8366_v7, %v20390_v48  ;;  %v20404_v42 = vsel %vm4279_vm1, %v8666_v49, %v8667_v47  ;;  %v20407_v58 = vsel %vm4279_vm1, %v8667_v47, %v8669_v52  ;;  %v20420_v7 = vld [vmem:[#allocation3 + $0xa0] ss:$0 sps:$4 sm:$0x77]  }
 0x3b0   : > { %22802 = vst [vmem:[#allocation73_spill] sm:$0xff] %v20404_v42  ;;  %22803 = vst [vmem:[#allocation74_spill] sm:$0xff] %v20407_v58  ;;  %v8677_v25 = vrot.slane %v20265_v17, 3  ;;  %v6252_v9 = vsel %vm1855_vm11, %v6249_v24, %v6251_v46  ;;  %v20412_v38 = vsel %vm4279_vm1, %v8669_v52, %v8671_v39  ;;  %v20415_v43 = vsel %vm4279_vm1, %v8671_v39, %v8673_v15  ;;  %v20428_v49 = vld [vmem:[#allocation9 + $0x20] sm:$0xff]  }
 0x3b1   : > { %22804 = vst [vmem:[#allocation75_spill] sm:$0xff] %v20412_v38  ;;  %22805 = vst [vmem:[#allocation76_spill] sm:$0xff] %v20415_v43  ;;  %v20418_v29 = vsel %vm4279_vm1, %v8673_v15, %v8675_v20  ;;  %v8681_v47 = vrot.slane %v20277_v28, 3  ;;  %v8683_v24 = vrot.slane %v20282_v21, 3  ;;  %v8685_v52 = vrot.slane %v20291_v16, 3 }
 0x3b2   : > { %15593 = vmatmul.mubr.msk.bf16.gmra.mrb[68].mxu1 %vm22798_vm14, %v19987_v2  ;;  %22806 = vst [vmem:[#allocation77_spill] sm:$0xff] %v20418_v29  ;;  %v20423_v45 = vsel %vm4279_vm1, %v8675_v20, %v8677_v25  ;;  %v8687_v6 = vrot.slane %v20299_v13, 3  ;;  %v8689_v39 = vrot.slane %v20310_v19, 3  ;;  %v8691_v15 = vrot.slane %v20316_v10, 3  ;;  %vm22821_vm14 = vmmov %vm22778_vm2 }
 0x3b3   : > { %15598 = vmatprep.mubr.msk.bf16.mxu1 %vm22800_vm12, %v6248_v8  ;;  %22807 = vst [vmem:[#allocation78_spill] sm:$0xff] %v20423_v45  ;;  %v8679_v8 = vrot.slane %v20275_v1, 3  ;;  %v20441_v45 = vsel %vm4279_vm1, %v8681_v47, %v8683_v24  ;;  %v8693_v43 = vrot.slane %v20320_v12, 3  ;;  %v20446_v38 = vsel %vm4279_vm1, %v8683_v24, %v8685_v52  ;;  %vm22822_vm12 = vmmov %vm22778_vm2 }
 0x3b4   : > { %v20449_v58 = vsel %vm4279_vm1, %v8685_v52, %v8687_v6  ;;  %v20452_v42 = vsel %vm4279_vm1, %v8687_v6, %v8689_v39  ;;  %v8699_v24 = vrot.slane %v20347_v37, 3  ;;  %v8701_v52 = vrot.slane %v20420_v7, 3  ;;  %v17400_v6 = vld [vmem:[#allocation3 + $0x20] sm:$0xff]  }
 0x3b5   : > { %v20435_v29 = vsel %vm4279_vm1, %v8677_v25, %v8679_v8  ;;  %v20438_v20 = vsel %vm4279_vm1, %v8679_v8, %v8681_v47  ;;  %22808 = vst [vmem:[#allocation79_spill] sm:$0xff] %v20449_v58  ;;  %22809 = vst [vmem:[#allocation80_spill] sm:$0xff] %v20452_v42  ;;  %v20455_v25 = vsel %vm4279_vm1, %v8689_v39, %v8691_v15  ;;  %v8697_v47 = vrot.slane %v20336_v35, 3 }
 0x3b6   : > { %22810 = vst [vmem:[#allocation81_spill] sm:$0xff] %v20455_v25  ;;  %v20460_v8 = vsel %vm4279_vm1, %v8691_v15, %v8693_v43  ;;  %v6253_v39 = vrot.slane %v17400_v6, 1  ;;  %v17401_v15 = vld [vmem:[#allocation3 + $0x28] sm:$0xff]   ;;  %v20477_v42 = vsel %vm4279_vm1, %v8699_v24, %v8701_v52 }
 0x3b7   : > { %22812 = vst [vmem:[#allocation82_spill] sm:$0xff] %v20460_v8  ;;  %v6255_v8 = vrot.slane %v17401_v15, 1  ;;  %v17405_v52 = vld [vmem:[#allocation3 + $0x48] sm:$0xff]  }
 0x3b8   : > { %v6254_v58 = vsel %vm1855_vm11, %v6251_v46, %v6253_v39 }
 0x3b9   : > { %v6256_v6 = vsel %vm1855_vm11, %v6253_v39, %v6255_v8 }
 0x3ba   : > { %15599 = vmatmul.mubr.msk.bf16.vlgmr.msra.gmra.mrb[36].mxu1 %vm22778_vm2, %v6250_v14  ;;  %v8695_v14 = vrot.slane %v20330_v41, 3 }
 0x3bb   : > { %15635 = vmatpush3.bf16.msra.mxu1 %v20048_v54  ;;  %15602 = vmatprep.mubr.msk.bf16.mxu1 %vm22811_vm10, %v6252_v9  ;;  %v20474_v9 = vsel %vm4279_vm1, %v8697_v47, %v8699_v24  ;;  %v17404_v24 = vld [vmem:[#allocation3 + $0x40] sm:$0xff]   ;;  %vm22823_vm10 = vmmov %vm22778_vm2 }
 0x3bc   : > { %15672 = vmatprep.subr.bf16.mxu1 %v20428_v49  ;;  %v20468_v25 = vsel %vm4279_vm1, %v8693_v43, %v8695_v14  ;;  %v20471_v54 = vsel %vm4279_vm1, %v8695_v14, %v8697_v47  ;;  %v17402_v43 = vld [vmem:[#allocation3 + $0x30] sm:$0xff]   ;;  %v17403_v14 = vld [vmem:[#allocation3 + $0x38] sm:$0xff]   ;;  %v6261_v46 = vrot.slane %v17404_v24, 1  ;;  %v6271_v24 = vrot.slane %v19948_v59, 1 }
 0x3bd   : > { %22813 = vst [vmem:[#allocation83_spill] sm:$0xff] %v20468_v25  ;;  %22814 = vst [vmem:[#allocation84_spill] sm:$0xff] %v20471_v54  ;;  %v6257_v25 = vrot.slane %v17402_v43, 1  ;;  %v6259_v54 = vrot.slane %v17403_v14, 1  ;;  %v17406_v43 = vld [vmem:[#allocation3 + $0x50] sm:$0xff]   ;;  %v17407_v14 = vld [vmem:[#allocation3 + $0x58] sm:$0xff]  }
 0x3be   : > { %v6277_v59 = vrot.slane %v19982_v63, 1 }
 0x3bf   : > { %v6258_v47 = vsel %vm1855_vm11, %v6255_v8, %v6257_v25  ;;  %v6260_v15 = vsel %vm1855_vm11, %v6257_v25, %v6259_v54  ;;  %v6262_v39 = vsel %vm1855_vm11, %v6259_v54, %v6261_v46  ;;  %v6265_v8 = vrot.slane %v17406_v43, 1 }
 0x3c0   : > { %v6269_v54 = vrot.slane %v19943_v4, 1  ;;  %v6279_v43 = vrot.slane %v19987_v2, 1  ;;  %v6692_v2 = vrot.slane %v20011_v22, 1 }
 0x3c2   : > { %15603 = vmatmul.mubr.msk.bf16.gmra.mrb[40].mxu1 %vm22815_vm5, %v6254_v58  ;;  %v6263_v58 = vrot.slane %v17405_v52, 1  ;;  %v6272_v52 = vsel %vm1855_vm11, %v6269_v54, %v6271_v24  ;;  %vm22824_vm5 = vmmov %vm22778_vm2 }
 0x3c3   : > { %15606 = vmatprep.mubr.msk.bf16.mxu1 %vm22816_vm8, %v6256_v6  ;;  %vm22825_vm8 = vmmov %vm22778_vm2 }
 0x3c4   : > { %v6264_v6 = vsel %vm1855_vm11, %v6261_v46, %v6263_v58  ;;  %v6266_v25 = vsel %vm1855_vm11, %v6263_v58, %v6265_v8  ;;  %v6273_v58 = vrot.slane %v19952_v36, 1  ;;  %v6280_v36 = vsel %vm1855_vm11, %v6277_v59, %v6279_v43 }
 0x3ca   : > { %15607 = vmatmul.mubr.msk.bf16.gmra.mrb[44].mxu1 %vm22817_vm6, %v6258_v47  ;;  %v6267_v47 = vrot.slane %v17407_v14, 1  ;;  %vm22826_vm6 = vmmov %vm22778_vm2  ;;  %v6689_v14 = vrot.slane %v20007_v53, 1  ;;  %v6696_v53 = vrot.slane %v20016_v23, 1 }
 0x3cb   : > { %15610 = vmatprep.mubr.msk.bf16.mxu1 %vm22818_vm9, %v6260_v15  ;;  %vm22827_vm9 = vmmov %vm22778_vm2 }
 0x3cc   : > { %v6268_v15 = vsel %vm1855_vm11, %v6265_v8, %v6267_v47  ;;  %v6270_v46 = vsel %vm1855_vm11, %v6267_v47, %v6269_v54  ;;  %v6690_v47 = vrot.slane %v20009_v55, 1  ;;  %v17258_v54 = vld [vmem:[#allocation9 + $0x28] sm:$0xff]   ;;  %v6698_v55 = vrot.slane %v20020_v34, 1 }
 0x3cd   : > { %v6704_v34 = vrot.slane %v20039_v5, 1 }
 0x3ce   : > { %v6691_v63 = vsel %vm1855_vm11, %v6689_v14, %v6690_v47  ;;  %v22844_v14 = vld [vmem:[#allocation30_spill] sm:$0xff] }
 0x3d2   : > { %15611 = vmatmul.mubr.msk.bf16.gmra.mrb[48].mxu1 %vm22819_vm4, %v6262_v39  ;;  %v6275_v39 = vrot.slane %v19959_v62, 1  ;;  %v6281_v62 = vrot.slane %v19995_v51, 1  ;;  %vm22828_vm4 = vmmov %vm22778_vm2 }
 0x3d3   : > { %15614 = vmatprep.mubr.msk.bf16.mxu1 %vm22820_vm7, %v6264_v6  ;;  %v6274_v6 = vsel %vm1855_vm11, %v6271_v24, %v6273_v58  ;;  %vm22829_vm7 = vmmov %vm22778_vm2  ;;  %v6693_v24 = vsel %vm1855_vm11, %v6690_v47, %v6692_v2  ;;  %v6718_v47 = vrot.slane %v22844_v14, 1 }
 0x3d4   : > { %v6276_v4 = vsel %vm1855_vm11, %v6273_v58, %v6275_v39  ;;  %v6278_v8 = vsel %vm1855_vm11, %v6275_v39, %v6277_v59  ;;  %v6706_v58 = vrot.slane %v20044_v33, 1  ;;  %v22839_v33 = vld [vmem:[#allocation18_spill] sm:$0xff] }
 0x3d5   : > { %v6712_v59 = vrot.slane %v22839_v33, 1  ;;  %v22872_v33 = vld [vmem:[#allocation19_spill] sm:$0xff] }
 0x3da   : > { %15615 = vmatmul.mubr.msk.bf16.gmra.mrb[52].mxu1 %vm22821_vm14, %v6266_v25  ;;  %v6282_v25 = vsel %vm1855_vm11, %v6279_v43, %v6281_v62  ;;  %vm22830_vm14 = vmmov %vm22778_vm2  ;;  %v22840_v43 = vld [vmem:[#allocation26_spill] sm:$0xff] }
 0x3db   : > { %15618 = vmatprep.mubr.msk.bf16.mxu1 %vm22822_vm12, %v6268_v15  ;;  %v6694_v15 = vrot.slane %v20014_v0, 1  ;;  %vm22831_vm12 = vmmov %vm22778_vm2  ;;  %v6699_v0 = vsel %vm1855_vm11, %v6696_v53, %v6698_v55 }
 0x3dd   : > { %v6695_v51 = vsel %vm1855_vm11, %v6692_v2, %v6694_v15  ;;  %v6697_v22 = vsel %vm1855_vm11, %v6694_v15, %v6696_v53  ;;  %v22846_v2 = vld [vmem:[#allocation31_spill] sm:$0xff] }
 0x3de   : > { %v6720_v15 = vrot.slane %v22846_v2, 1  ;;  %v22884_v2 = vld [vmem:[#allocation39_spill] sm:$0xff] }
 0x3e0   : > { %v6721_v53 = vsel %vm1855_vm11, %v6718_v47, %v6720_v15 }
 0x3e2   : > { %15619 = vmatmul.mubr.msk.bf16.gmra.mrb[56].mxu1 %vm22778_vm2, %v6270_v46  ;;  %v6700_v46 = vrot.slane %v20029_v31, 1  ;;  %v6707_v31 = vsel %vm1855_vm11, %v6704_v34, %v6706_v58 }
 0x3e3   : > { %15622 = vmatprep.mubr.msk.bf16.mxu1 %vm22823_vm10, %v6272_v52  ;;  %vm22832_vm10 = vmmov %vm22778_vm2  ;;  %v6702_v52 = vrot.slane %v20034_v60, 1  ;;  %v6708_v60 = vrot.slane %v20050_v56, 1 }
 0x3e5   : > { %v6703_v23 = vsel %vm1855_vm11, %v6700_v46, %v6702_v52  ;;  %v6705_v39 = vsel %vm1855_vm11, %v6702_v52, %v6704_v34  ;;  %v22851_v52 = vld [vmem:[#allocation22_spill] sm:$0xff]  ;;  %v22855_v34 = vld [vmem:[#allocation20_spill] sm:$0xff] }
 0x3ea   : > { %15623 = vmatmul.mubr.msk.bf16.gmra.mrb[60].mxu1 %vm22824_vm5, %v6274_v6  ;;  %vm22833_vm5 = vmmov %vm22778_vm2  ;;  %v6710_v6 = vrot.slane %v20064_v61, 1  ;;  %v22843_v61 = vld [vmem:[#allocation29_spill] sm:$0xff] }
 0x3eb   : > { %15626 = vmatprep.mubr.msk.bf16.mxu1 %vm22825_vm8, %v6276_v4  ;;  %vm22834_vm8 = vmmov %vm22778_vm2  ;;  %v6709_v4 = vsel %vm1855_vm11, %v6706_v58, %v6708_v60  ;;  %v6716_v62 = vrot.slane %v22843_v61, 1  ;;  %v22857_v58 = vld [vmem:[#allocation24_spill] sm:$0xff] }
 0x3ec   : > { %v6711_v5 = vsel %vm1855_vm11, %v6708_v60, %v6710_v6  ;;  %v22862_v60 = vld [vmem:[#allocation28_spill] sm:$0xff] }
 0x3f2   : > { %15627 = vmatmul.mubr.msk.bf16.gmra.mrb[64].mxu1 %vm22826_vm6, %v6278_v8  ;;  %vm22835_vm6 = vmmov %vm22778_vm2  ;;  %v6714_v8 = vrot.slane %v22840_v43, 1  ;;  %v22876_v43 = vld [vmem:[#allocation37_spill] sm:$0xff] }
 0x3f3   : > { %15630 = vmatprep.mubr.msk.bf16.mxu1 %vm22827_vm9, %v6280_v36  ;;  %vm22836_vm9 = vmmov %vm22778_vm2  ;;  %v6713_v36 = vsel %vm1855_vm11, %v6710_v6, %v6712_v59  ;;  %v22864_v6 = vld [vmem:[#allocation35_spill] sm:$0xff] }
 0x3f4   : > { %v6715_v56 = vsel %vm1855_vm11, %v6712_v59, %v6714_v8  ;;  %v22874_v59 = vld [vmem:[#allocation36_spill] sm:$0xff] }
 0x3fa   : > { %15631 = vmatmul.mubr.msk.bf16.gmra.mrb[68].mxu1 %vm22828_vm4, %v6282_v25  ;;  %vm22837_vm4 = vmmov %vm22778_vm2  ;;  %v6717_v25 = vsel %vm1855_vm11, %v6714_v8, %v6716_v62  ;;  %v22878_v8 = vld [vmem:[#allocation38_spill] sm:$0xff] }
 0x3fb   : > { %15636 = vmatprep.mubr.msk.bf16.mxu1 %vm22829_vm7, %v6691_v63  ;;  %vm22838_vm7 = vmmov %vm22778_vm2  ;;  %v6719_v63 = vsel %vm1855_vm11, %v6716_v62, %v6718_v47  ;;  %v22881_v47 = vld [vmem:[#allocation40_spill] sm:$0xff] }
 0x402   : > { %15637 = vmatmul.mubr.msk.bf16.vlgmr.msra.gmra.mrb[36].mxu1 %vm22830_vm14, %v6693_v24  ;;  %vm22841_vm14 = vmmov %vm22778_vm2  ;;  %v22847_v24 = vld [vmem:[#allocation33_spill] sm:$0xff] }
 0x403   : > { %15673 = vmatpush3.bf16.msra.mxu1 %v20428_v49  ;;  %15640 = vmatprep.mubr.msk.bf16.mxu1 %vm22831_vm12, %v6695_v51  ;;  %v6701_v49 = vsel %vm1855_vm11, %v6698_v55, %v6700_v46  ;;  %vm22842_vm12 = vmmov %vm22778_vm2  ;;  %v6722_v51 = vrot.slane %v22847_v24, 1  ;;  %v17257_v55 = vld [vmem:[#allocation3 + $0x98] ss:$0 sps:$4 sm:$0x11]   ;;  %v22887_v24 = vld [vmem:[#allocation43_spill] sm:$0xff] }
 0x404   : > { %15710 = vmatprep.subr.bf16.mxu1 %v17258_v54 }
 0x40a   : > { %15641 = vmatmul.mubr.msk.bf16.gmra.mrb[40].mxu1 %vm22778_vm2, %v6697_v22  ;;  %v6723_v22 = vsel %vm1855_vm11, %v6720_v15, %v6722_v51 }
 0x40b   : > { %15644 = vmatprep.mubr.msk.bf16.mxu1 %vm22832_vm10, %v6699_v0  ;;  %vm22845_vm10 = vmmov %vm22778_vm2  ;;  %v6724_v0 = vrot.slane %v17257_v55, 1  ;;  %v22891_v55 = vld [vmem:[#allocation44_spill] sm:$0xff] }
 0x40d   : > { %v6725_v46 = vsel %vm1855_vm11, %v6722_v51, %v6724_v0  ;;  %v17264_v51 = vld [vmem:[#allocation9 + $0x38] sm:$0xff]   ;;  %v22895_v0 = vld [vmem:[#allocation47_spill] sm:$0xff] }
 0x412   : > { %15645 = vmatmul.mubr.msk.bf16.gmra.mrb[44].mxu1 %vm22833_vm5, %v6701_v49  ;;  %vm22848_vm5 = vmmov %vm22778_vm2  ;;  %v17261_v49 = vld [vmem:[#allocation9 + $0x30] sm:$0xff]  }
 0x413   : > { %15648 = vmatprep.mubr.msk.bf16.mxu1 %vm22834_vm8, %v6703_v23  ;;  %vm22849_vm8 = vmmov %vm22778_vm2  ;;  %v22853_v23 = vld [vmem:[#allocation23_spill] sm:$0xff] }
 0x41a   : > { %15649 = vmatmul.mubr.msk.bf16.gmra.mrb[48].mxu1 %vm22835_vm6, %v6705_v39  ;;  %vm22850_vm6 = vmmov %vm22778_vm2  ;;  %v22859_v39 = vld [vmem:[#allocation25_spill] sm:$0xff] }
 0x41b   : > { %15652 = vmatprep.mubr.msk.bf16.mxu1 %vm22836_vm9, %v6707_v31  ;;  %vm22852_vm9 = vmmov %vm22778_vm2  ;;  %v22861_v31 = vld [vmem:[#allocation27_spill] sm:$0xff] }
 0x422   : > { %15653 = vmatmul.mubr.msk.bf16.gmra.mrb[52].mxu1 %vm22837_vm4, %v6709_v4  ;;  %vm22854_vm4 = vmmov %vm22778_vm2  ;;  %v22868_v4 = vld [vmem:[#allocation34_spill] sm:$0xff] }
 0x423   : > { %15656 = vmatprep.mubr.msk.bf16.mxu1 %vm22838_vm7, %v6711_v5  ;;  %vm22856_vm7 = vmmov %vm22778_vm2  ;;  %v22870_v5 = vld [vmem:[#allocation21_spill] sm:$0xff] }
 0x42a   : > { %15657 = vmatmul.mubr.msk.bf16.gmra.mrb[56].mxu1 %vm22841_vm14, %v6713_v36  ;;  %vm22858_vm14 = vmmov %vm22778_vm2  ;;  %v22880_v36 = vld [vmem:[#allocation46_spill] sm:$0xff] }
 0x42b   : > { %15660 = vmatprep.mubr.msk.bf16.mxu1 %vm22842_vm12, %v6715_v56  ;;  %vm22860_vm12 = vmmov %vm22778_vm2  ;;  %v7168_v56 = vshrl.u32 %v22880_v36, 16  ;;  %v7171_v61 = vshll.u32 %v22880_v36, 16  ;;  %v7902_v36 = vrot.slane %v20248_v32, 2 }
 0x42d   : > { %v7170_v62 = vrot.slane %v7168_v56, 1  ;;  %v7173_v14 = vrot.slane %v7171_v61, 2  ;;  %v7904_v56 = vrot.slane %v20250_v18, 2  ;;  %v17282_v61 = vld [vmem:[#allocation9 + $0x40] sm:$0xff]   ;;  %v7910_v18 = vrot.slane %v20265_v17, 2 }
 0x432   : > { %15661 = vmatmul.mubr.msk.bf16.gmra.mrb[60].mxu1 %vm22778_vm2, %v6717_v25  ;;  %v22882_v25 = vld [vmem:[#allocation42_spill] sm:$0xff] }
 0x433   : > { %15664 = vmatprep.mubr.msk.bf16.mxu1 %vm22845_vm10, %v6719_v63  ;;  %vm22863_vm10 = vmmov %vm22778_vm2  ;;  %v7174_v63 = vor.u32 %v7173_v14, %v7170_v62  ;;  %v7906_v14 = vrot.slane %v20254_v3, 2 }
 0x43a   : > { %15665 = vmatmul.mubr.msk.bf16.gmra.mrb[64].mxu1 %vm22848_vm5, %v6721_v53  ;;  %vm22865_vm5 = vmmov %vm22778_vm2  ;;  %v22889_v53 = vld [vmem:[#allocation41_spill] sm:$0xff] }
 0x43b   : > { %15668 = vmatprep.mubr.msk.bf16.mxu1 %vm22849_vm8, %v6723_v22  ;;  %vm22867_vm8 = vmmov %vm22778_vm2  ;;  %v22893_v22 = vld [vmem:[#allocation45_spill] sm:$0xff] }
 0x442   : > { %15669 = vmatmul.mubr.msk.bf16.gmra.mrb[68].mxu1 %vm22850_vm6, %v6725_v46  ;;  %vm22869_vm6 = vmmov %vm22778_vm2  ;;  %v22897_v46 = vld [vmem:[#allocation48_spill] sm:$0xff] }
 0x443   : > { %15674 = vmatprep.mubr.msk.bf16.mxu1 %vm22852_vm9, %v22851_v52  ;;  %vm22871_vm9 = vmmov %vm22778_vm2  ;;  %v22899_v52 = vld [vmem:[#allocation49_spill] sm:$0xff] }
 0x44a   : > { %15675 = vmatmul.mubr.msk.bf16.vlgmr.msra.gmra.mrb[36].mxu1 %vm22854_vm4, %v22853_v23  ;;  %vm22873_vm4 = vmmov %vm22778_vm2  ;;  %v22900_v23 = vld [vmem:[#allocation50_spill] sm:$0xff] }
 0x44b   : > { %15711 = vmatpush3.bf16.msra.mxu1 %v17258_v54  ;;  %15678 = vmatprep.mubr.msk.bf16.mxu1 %vm22856_vm7, %v22855_v34  ;;  %v22866_v54 = vld [vmem:[#allocation32_spill] sm:$0xff]  ;;  %vm22875_vm7 = vmmov %vm22778_vm2 }
 0x44c   : > { %15748 = vmatprep.subr.bf16.mxu1 %v17261_v49  ;;  %v22904_v34 = vld [vmem:[#allocation52_spill] sm:$0xff] }
 0x452   : > { %15679 = vmatmul.mubr.msk.bf16.gmra.mrb[40].mxu1 %vm22858_vm14, %v22857_v58  ;;  %vm22877_vm14 = vmmov %vm22778_vm2  ;;  %v22906_v58 = vld [vmem:[#allocation53_spill] sm:$0xff] }
 0x453   : > { %15682 = vmatprep.mubr.msk.bf16.mxu1 %vm22860_vm12, %v22859_v39  ;;  %vm22879_vm12 = vmmov %vm22778_vm2  ;;  %v22908_v39 = vld [vmem:[#allocation54_spill] sm:$0xff] }
 0x45a   : > { %15683 = vmatmul.mubr.msk.bf16.gmra.mrb[44].mxu1 %vm22778_vm2, %v22861_v31  ;;  %v22910_v31 = vld [vmem:[#allocation55_spill] sm:$0xff] }
 0x45b   : > { %15686 = vmatprep.mubr.msk.bf16.mxu1 %vm22863_vm10, %v22862_v60  ;;  %vm22883_vm10 = vmmov %vm22778_vm2  ;;  %v22912_v60 = vld [vmem:[#allocation56_spill] sm:$0xff] }
 0x462   : > { %15687 = vmatmul.mubr.msk.bf16.gmra.mrb[48].mxu1 %vm22865_vm5, %v22864_v6  ;;  %vm22885_vm5 = vsmask.f32 6400  ;;  %v22914_v6 = vld [vmem:[#allocation57_spill] sm:$0xff] }
 0x463   : > { %15690 = vmatprep.mubr.msk.bf16.mxu1 %vm22867_vm8, %v22866_v54  ;;  %v7175_v15 = vsel %vm22885_vm5, %v22884_v2, %v7174_v63  ;;  %vm22886_vm8 = vmmov %vm22778_vm2  ;;  %v22916_v54 = vld [vmem:[#allocation58_spill] sm:$0xff]  ;;  %v7912_v63 = vrot.slane %v20275_v1, 2  ;;  %v7918_v1 = vrot.slane %v20291_v16, 2 }
 0x464   : > { %vm22903_vm5 = vmmov %vm22778_vm2 }
 0x46a   : > { %15691 = vmatmul.mubr.msk.bf16.gmra.mrb[52].mxu1 %vm22869_vm6, %v22868_v4  ;;  %vm22888_vm6 = vmmov %vm22778_vm2  ;;  %v22918_v4 = vld [vmem:[#allocation59_spill] sm:$0xff] }
 0x46b   : > { %15694 = vmatprep.mubr.msk.bf16.mxu1 %vm22871_vm9, %v22870_v5  ;;  %vm22890_vm9 = vmmov %vm22778_vm2  ;;  %v7900_v5 = vrot.slane %v20246_v27, 2 }
 0x472   : > { %15695 = vmatmul.mubr.msk.bf16.gmra.mrb[56].mxu1 %vm22873_vm4, %v22872_v33  ;;  %vm22892_vm4 = vmmov %vm22778_vm2  ;;  %v22919_v33 = vld [vmem:[#allocation61_spill] sm:$0xff] }
 0x473   : > { %15698 = vmatprep.mubr.msk.bf16.mxu1 %vm22875_vm7, %v22874_v59  ;;  %vm22894_vm7 = vmmov %vm22778_vm2  ;;  %v7899_v59 = vrot.slane %v22919_v33, 2  ;;  %v22971_v33 = vld [vmem:[#allocation71_spill] sm:$0xff] }
 0x47a   : > { %15699 = vmatmul.mubr.msk.bf16.gmra.mrb[60].mxu1 %vm22877_vm14, %v22876_v43  ;;  %vm22896_vm14 = vmmov %vm22778_vm2  ;;  %v22920_v43 = vld [vmem:[#allocation60_spill] sm:$0xff] }
 0x47b   : > { %15702 = vmatprep.mubr.msk.bf16.mxu1 %vm22879_vm12, %v22878_v8  ;;  %vm22898_vm12 = vmmov %vm22778_vm2 }
 0x482   : > { %15703 = vmatmul.mubr.msk.bf16.gmra.mrb[64].mxu1 %vm22778_vm2, %v22881_v47  ;;  %v7908_v47 = vrot.slane %v20260_v44, 2  ;;  %v7914_v44 = vrot.slane %v20277_v28, 2 }
 0x483   : > { %15706 = vmatprep.mubr.msk.bf16.mxu1 %vm22883_vm10, %v22882_v25  ;;  %vm22901_vm10 = vmmov %vm22778_vm2 }
 0x48a   : > { %15707 = vmatmul.mubr.msk.bf16.gmra.mrb[68].mxu1 %vm22886_vm8, %v7175_v15  ;;  %vm22905_vm8 = vmmov %vm22778_vm2  ;;  %v7916_v15 = vrot.slane %v20282_v21, 2  ;;  %v7922_v21 = vrot.slane %v20310_v19, 2 }
 0x48b   : > { %15712 = vmatprep.mubr.msk.bf16.mxu1 %vm22888_vm6, %v22887_v24  ;;  %vm22907_vm6 = vmmov %vm22778_vm2 }
 0x492   : > { %15713 = vmatmul.mubr.msk.bf16.vlgmr.msra.gmra.mrb[36].mxu1 %vm22890_vm9, %v22889_v53  ;;  %vm22909_vm9 = vmmov %vm22778_vm2 }
 0x493   : > { %15749 = vmatpush3.bf16.msra.mxu1 %v17261_v49  ;;  %15716 = vmatprep.mubr.msk.bf16.mxu1 %vm22892_vm4, %v22891_v55  ;;  %v22902_v49 = vld [vmem:[#allocation51_spill] sm:$0xff]  ;;  %vm22911_vm4 = vmmov %vm22778_vm2  ;;  %v7924_v55 = vrot.slane %v20316_v10, 2  ;;  %v7930_v10 = vrot.slane %v20336_v35, 2 }
 0x494   : > { %15786 = vmatprep.subr.bf16.mxu1 %v17264_v51  ;;  %v22955_v35 = vld [vmem:[#allocation63_spill] sm:$0xff] }
 0x49a   : > { %15717 = vmatmul.mubr.msk.bf16.gmra.mrb[40].mxu1 %vm22894_vm7, %v22893_v22  ;;  %vm22913_vm7 = vmmov %vm22778_vm2 }
 0x49b   : > { %15720 = vmatprep.mubr.msk.bf16.mxu1 %vm22896_vm14, %v22895_v0  ;;  %vm22915_vm14 = vmmov %vm22778_vm2  ;;  %v7928_v0 = vrot.slane %v20330_v41, 2 }
 0x4a2   : > { %15721 = vmatmul.mubr.msk.bf16.gmra.mrb[44].mxu1 %vm22898_vm12, %v22897_v46  ;;  %vm22917_vm12 = vmmov %vm22778_vm2 }
 0x4a3   : > { %15724 = vmatprep.mubr.msk.bf16.mxu1 %vm22778_vm2, %v22899_v52  ;;  %v7932_v52 = vrot.slane %v20347_v37, 2  ;;  %v22957_v37 = vld [vmem:[#allocation64_spill] sm:$0xff] }
 0x4aa   : > { %15725 = vmatmul.mubr.msk.bf16.gmra.mrb[48].mxu1 %vm22901_vm10, %v22900_v23  ;;  %vm22921_vm10 = vmmov %vm22778_vm2 }
 0x4ab   : > { %15728 = vmatprep.mubr.msk.bf16.mxu1 %vm22903_vm5, %v22902_v49  ;;  %vm22922_vm5 = vcmask 1045504   ;;  %v17281_v49 = vld [vmem:[#allocation3 + $0xa0] ss:$0 sps:$4 sm:$0x33]  }
 0x4ac   : > { %v7901_v8 = vsel %vm22922_vm5, %v7899_v59, %v7900_v5  ;;  %v7934_v41 = vrot.slane %v17281_v49, 2  ;;  %v22973_v59 = vld [vmem:[#allocation72_spill] sm:$0xff] }
 0x4b2   : > { %15729 = vmatmul.mubr.msk.bf16.gmra.mrb[52].mxu1 %vm22905_vm8, %v22904_v34  ;;  %vm22923_vm8 = vmmov %vm22778_vm2 }
 0x4b3   : > { %15732 = vmatprep.mubr.msk.bf16.mxu1 %vm22907_vm6, %v22906_v58  ;;  %vm22924_vm6 = vmmov %vm22922_vm5  ;;  %v22953_v58 = vld [vmem:[#allocation62_spill] sm:$0xff] }
 0x4b4   : > { %v7903_v62 = vsel %vm22924_vm6, %v7900_v5, %v7902_v36  ;;  %v22969_v5 = vld [vmem:[#allocation70_spill] sm:$0xff] }
 0x4ba   : > { %15733 = vmatmul.mubr.msk.bf16.gmra.mrb[56].mxu1 %vm22909_vm9, %v22908_v39  ;;  %vm22925_vm9 = vmmov %vm22778_vm2  ;;  %v22959_v39 = vld [vmem:[#allocation65_spill] sm:$0xff] }
 0x4bb   : > { %15736 = vmatprep.mubr.msk.bf16.mxu1 %vm22911_vm4, %v22910_v31  ;;  %vm22926_vm4 = vmmov %vm22922_vm5  ;;  %v17285_v31 = vld [vmem:[#allocation10 + $0x8] sm:$0xff]  }
 0x4bc   : > { %v7905_v27 = vsel %vm22926_vm4, %v7902_v36, %v7904_v56  ;;  %15862 = vmatprep.subr.bf16.mxu0 %v17285_v31 }
 0x4bd   : > { %15863 = vmatpush3.bf16.msra.mxu0 %v17285_v31 }
 0x4c2   : > { %15737 = vmatmul.mubr.msk.bf16.gmra.mrb[60].mxu1 %vm22913_vm7, %v22912_v60  ;;  %vm22927_vm7 = vmmov %vm22778_vm2  ;;  %v22961_v60 = vld [vmem:[#allocation66_spill] sm:$0xff] }
 0x4c3   : > { %15740 = vmatprep.mubr.msk.bf16.mxu1 %vm22915_vm14, %v22914_v6  ;;  %vm22928_vm14 = vmmov %vm22926_vm4  ;;  %v22963_v6 = vld [vmem:[#allocation67_spill] sm:$0xff] }
 0x4c4   : > { %v7907_v25 = vsel %vm22928_vm14, %v7904_v56, %v7906_v14 }
 0x4ca   : > { %15741 = vmatmul.mubr.msk.bf16.gmra.mrb[64].mxu1 %vm22917_vm12, %v22916_v54  ;;  %vm22929_vm12 = vmmov %vm22778_vm2  ;;  %v22965_v54 = vld [vmem:[#allocation68_spill] sm:$0xff] }
 0x4cb   : > { %15744 = vmatprep.mubr.msk.bf16.mxu1 %vm22778_vm2, %v22918_v4  ;;  %vm22930_vm2 = vmmov %vm22926_vm4  ;;  %v22967_v4 = vld [vmem:[#allocation69_spill] sm:$0xff] }
 0x4cc   : > { %v7909_v32 = vsel %vm22930_vm2, %v7906_v14, %v7908_v47  ;;  %vm22932_vm5 = vmmov %vm22930_vm2  ;;  %v7919_v53 = vsel %vm22930_vm2, %v7916_v15, %v7918_v1  ;;  %v23002_v14 = vld [vmem:[#allocation82_spill] sm:$0xff] }
 0x4cd   : > { %v7911_v2 = vsel %vm22932_vm5, %v7908_v47, %v7910_v18  ;;  %vm22934_vm6 = vmmov %vm22930_vm2 }
 0x4ce   : > { %v7913_v3 = vsel %vm22934_vm6, %v7910_v18, %v7912_v63  ;;  %vm22936_vm4 = vmmov %vm22930_vm2 }
 0x4cf   : > { %v7915_v24 = vsel %vm22936_vm4, %v7912_v63, %v7914_v44  ;;  %vm22937_vm14 = vmmov %vm22930_vm2  ;;  %v9165_v63 = vpop.permute.xlu1 %9164 }
 0x4d0   : > { %v7917_v17 = vsel %vm22937_vm14, %v7914_v44, %v7916_v15  ;;  %vm22940_vm5 = vmmov %vm22930_vm2 }
 0x4d1   : > { %vm22942_vm6 = vmmov %vm22930_vm2 }
 0x4d2   : > { %15745 = vmatmul.mubr.msk.bf16.gmra.mrb[68].mxu1 %vm22921_vm10, %v22920_v43  ;;  %vm22931_vm10 = vmmov %vm22927_vm7  ;;  %v8378_v43 = vshrl.u32 %v20420_v7, 16 }
 0x4d3   : > { %15750 = vmatprep.mubr.msk.bf16.mxu1 %vm22923_vm8, %v7901_v8  ;;  %vm22933_vm8 = vmmov %vm22927_vm7  ;;  %v8381_v8 = vshll.u32 %v20420_v7, 16  ;;  %v22985_v7 = vld [vmem:[#allocation75_spill] sm:$0xff] }
 0x4d4   : > { %vm22944_vm4 = vmmov %vm22930_vm2  ;;  %v8380_v36 = vrot.slane %v8378_v43, 2 }
 0x4d5   : > { %v7925_v16 = vsel %vm22944_vm4, %v7922_v21, %v7924_v55  ;;  %vm22945_vm14 = vmmov %vm22930_vm2  ;;  %v8383_v56 = vrot.slane %v8381_v8, 3 }
 0x4d6   : > { %vm22952_vm4 = vmmov %vm22930_vm2 }
 0x4d7   : > { %v7935_v34 = vsel %vm22952_vm4, %v7932_v52, %v7934_v41 }
 0x4da   : > { %15751 = vmatmul.mubr.msk.bf16.vlgmr.msra.gmra.mrb[36].mxu1 %vm22925_vm9, %v7903_v62  ;;  %vm22935_vm9 = vmmov %vm22927_vm7  ;;  %v22998_v62 = vld [vmem:[#allocation80_spill] sm:$0xff] }
 0x4db   : > { %15787 = vmatpush3.bf16.msra.mxu1 %v17264_v51  ;;  %15754 = vmatprep.mubr.msk.bf16.mxu1 %vm22927_vm7, %v7905_v27  ;;  %v7920_v51 = vrot.slane %v20299_v13, 2  ;;  %v7926_v13 = vrot.slane %v20320_v12, 2  ;;  %v23000_v27 = vld [vmem:[#allocation81_spill] sm:$0xff] }
 0x4dc   : > { %15824 = vmatprep.subr.bf16.mxu1 %v17282_v61 }
 0x4dd   : > { %v7921_v28 = vsel %vm22940_vm5, %v7918_v1, %v7920_v51  ;;  %v7923_v22 = vsel %vm22942_vm6, %v7920_v51, %v7922_v21  ;;  %v7927_v46 = vsel %vm22945_vm14, %v7924_v55, %v7926_v13  ;;  %v7929_v19 = vsel %vm22930_vm2, %v7926_v13, %v7928_v0  ;;  %vm22948_vm5 = vmmov %vm22930_vm2 }
 0x4de   : > { %v7931_v23 = vsel %vm22948_vm5, %v7928_v0, %v7930_v10  ;;  %vm22950_vm6 = vmmov %vm22930_vm2 }
 0x4df   : > { %v7933_v12 = vsel %vm22950_vm6, %v7930_v10, %v7932_v52  ;;  %vm22954_vm14 = vmmov %vm22927_vm7 }
 0x4e0   : > { %vm22958_vm2 = vmmov %vm22927_vm7 }
 0x4e1   : > { %vm22962_vm5 = vmmov %vm22958_vm2 }
 0x4e2   : > { %15755 = vmatmul.mubr.msk.bf16.gmra.mrb[40].mxu1 %vm22929_vm12, %v7907_v25  ;;  %vm22938_vm12 = vmmov %vm22927_vm7  ;;  %v20777_v25 = vld [vmem:[#allocation10] sm:$0xff]  }
 0x4e3   : > { %15758 = vmatprep.mubr.msk.bf16.mxu1 %vm22931_vm10, %v7909_v32  ;;  %vm22939_vm10 = vmmov %vm22927_vm7  ;;  %15900 = vmatprep.subr.bf16.mxu0 %v20777_v25  ;;  %v9162_v32 = vpop.permute.xlu0 %9161 }
 0x4e4   : > { %vm22966_vm6 = vmmov %vm22958_vm2 }
 0x4e5   : > { %vm22970_vm4 = vmmov %vm22958_vm2 }
 0x4e7   : > { %v9168_v18 = vpop.permute.xlu0 %9167 }
 0x4ea   : > { %15759 = vmatmul.mubr.msk.bf16.gmra.mrb[44].mxu1 %vm22933_vm8, %v7911_v2  ;;  %vm22941_vm8 = vmmov %vm22927_vm7  ;;  %v9886_v2 = vld [vmem:[#allocation4] sm:$0xf] }
 0x4eb   : > { %15762 = vmatprep.mubr.msk.bf16.mxu1 %vm22935_vm9, %v7913_v3  ;;  %vm22943_vm9 = vmmov %vm22927_vm7  ;;  %v9887_v3 = vld [vmem:[#allocation4 + $0x4] sm:$0xf]  ;;  %v20780_v44 = vpop.permute.xlu0 %9173 }
 0x4ec   : > { %v20782_v15 = vcombine.low %v9886_v2, %v9887_v3 }
 0x4ee   : > { %v10022_v0 = vshrl.u32 %v20782_v15, 16 }
 0x4f2   : > { %15763 = vmatmul.mubr.msk.bf16.gmra.mrb[48].mxu1 %vm22927_vm7, %v7915_v24  ;;  %v20789_v24 = vpop.permute.xlu0 %9179 }
 0x4f3   : > { %15766 = vmatprep.mubr.msk.bf16.mxu1 %vm22938_vm12, %v7917_v17  ;;  %vm22946_vm12 = vmmov %vm22927_vm7  ;;  %v10024_v17 = vshll.u32 %v20782_v15, 16 }
 0x4f6   : > { %v20799_v52 = vpop.permute.xlu0 %9185 }
 0x4fa   : > { %15767 = vmatmul.mubr.msk.bf16.gmra.mrb[52].mxu1 %vm22939_vm10, %v7919_v53  ;;  %vm22947_vm10 = vmmov %vm22927_vm7 }
 0x4fb   : > { %15770 = vmatprep.mubr.msk.bf16.mxu1 %vm22941_vm8, %v7921_v28  ;;  %vm22949_vm8 = vmmov %vm22927_vm7 }
 0x502   : > { %15771 = vmatmul.mubr.msk.bf16.gmra.mrb[56].mxu1 %vm22943_vm9, %v7923_v22  ;;  %vm22951_vm9 = vmmov %vm22927_vm7 }
 0x503   : > { %15774 = vmatprep.mubr.msk.bf16.mxu1 %vm22927_vm7, %v7925_v16 }
 0x50a   : > { %15775 = vmatmul.mubr.msk.bf16.gmra.mrb[60].mxu1 %vm22946_vm12, %v7927_v46  ;;  %vm22956_vm12 = vmmov %vm22927_vm7  ;;  %v10026_v46 = vrot.slane %v10024_v17, 1 }
 0x50b   : > { %15778 = vmatprep.mubr.msk.bf16.mxu1 %vm22947_vm10, %v7929_v19  ;;  %vm22960_vm10 = vmmov %vm22958_vm2 }
 0x512   : > { %15779 = vmatmul.mubr.msk.bf16.gmra.mrb[64].mxu1 %vm22949_vm8, %v7931_v23  ;;  %vm22964_vm8 = vmmov %vm22958_vm2 }
 0x513   : > { %15782 = vmatprep.mubr.msk.bf16.mxu1 %vm22951_vm9, %v7933_v12  ;;  %vm22968_vm9 = vmmov %vm22958_vm2 }
 0x51a   : > { %15783 = vmatmul.mubr.msk.bf16.gmra.mrb[68].mxu1 %vm22927_vm7, %v7935_v34  ;;  %vm22972_vm7 = vmmov %vm22958_vm2 }
 0x51b   : > { %15788 = vmatprep.mubr.msk.bf16.mxu1 %vm22954_vm14, %v22953_v58  ;;  %vm22974_vm14 = vmmov %vm22958_vm2 }
 0x522   : > { %15789 = vmatmul.mubr.msk.bf16.vlgmr.msra.gmra.mrb[36].mxu1 %vm22956_vm12, %v22955_v35  ;;  %vm22975_vm12 = vmmov %vm22958_vm2 }
 0x523   : > { %15825 = vmatpush3.bf16.msra.mxu1 %v17282_v61  ;;  %15792 = vmatprep.mubr.msk.bf16.mxu1 %vm22958_vm2, %v22957_v37  ;;  %v22987_v61 = vld [vmem:[#allocation76_spill] sm:$0xff] }
 0x52a   : > { %15793 = vmatmul.mubr.msk.bf16.gmra.mrb[40].mxu1 %vm22960_vm10, %v22959_v39  ;;  %vm22976_vm10 = vmmov %vm22958_vm2  ;;  %v20804_v39 = vor.u32 %v10026_v46, %v10022_v0 }
 0x52b   : > { %15796 = vmatprep.mubr.msk.bf16.mxu1 %vm22962_vm5, %v22961_v60  ;;  %vm22977_vm5 = vmmov %vm22958_vm2 }
 0x532   : > { %15797 = vmatmul.mubr.msk.bf16.gmra.mrb[44].mxu1 %vm22964_vm8, %v22963_v6  ;;  %vm22978_vm8 = vmmov %vm22958_vm2 }
 0x533   : > { %15800 = vmatprep.mubr.msk.bf16.mxu1 %vm22966_vm6, %v22965_v54  ;;  %vm22979_vm6 = vmmov %vm22958_vm2 }
 0x53a   : > { %15801 = vmatmul.mubr.msk.bf16.gmra.mrb[48].mxu1 %vm22968_vm9, %v22967_v4  ;;  %vm22980_vm9 = vmmov %vm22958_vm2 }
 0x53b   : > { %15804 = vmatprep.mubr.msk.bf16.mxu1 %vm22970_vm4, %v22969_v5  ;;  %vm22982_vm4 = vmmov %vm22958_vm2 }
 0x542   : > { %15805 = vmatmul.mubr.msk.bf16.gmra.mrb[52].mxu1 %vm22972_vm7, %v22971_v33  ;;  %vm22984_vm7 = vmmov %vm22958_vm2 }
 0x543   : > { %15808 = vmatprep.mubr.msk.bf16.mxu1 %vm22974_vm14, %v22973_v59  ;;  %vm22986_vm14 = vmmov %vm22958_vm2 }
 0x54a   : > { %15809 = vmatmul.mubr.msk.bf16.gmra.mrb[56].mxu1 %vm22975_vm12, %v20363_v30  ;;  %v8384_v30 = vor.u32 %v8383_v56, %v8380_v36  ;;  %vm22988_vm12 = vmmov %vm22958_vm2 }
 0x54b   : > { %15812 = vmatprep.mubr.msk.bf16.mxu1 %vm22958_vm2, %v20367_v57 }
 0x54c   : > { %v8385_v57 = vsel %vm3828_vm0, %v20390_v48, %v8384_v30  ;;  %v22996_v48 = vld [vmem:[#allocation79_spill] sm:$0xff] }
 0x552   : > { %15813 = vmatmul.mubr.msk.bf16.gmra.mrb[60].mxu1 %vm22976_vm10, %v20372_v50  ;;  %v22981_v50 = vld [vmem:[#allocation73_spill] sm:$0xff]  ;;  %vm22991_vm10 = vmmov %vm22958_vm2 }
 0x553   : > { %15816 = vmatprep.mubr.msk.bf16.mxu1 %vm22977_vm5, %v20383_v11  ;;  %v22983_v11 = vld [vmem:[#allocation74_spill] sm:$0xff]  ;;  %vm22992_vm5 = vmmov %vm22958_vm2 }
 0x55a   : > { %15817 = vmatmul.mubr.msk.bf16.gmra.mrb[64].mxu1 %vm22978_vm8, %v20388_v40  ;;  %v22989_v40 = vld [vmem:[#allocation77_spill] sm:$0xff]  ;;  %vm22993_vm8 = vmmov %vm22958_vm2 }
 0x55b   : > { %15820 = vmatprep.mubr.msk.bf16.mxu1 %vm22979_vm6, %v20401_v26  ;;  %v22990_v26 = vld [vmem:[#allocation78_spill] sm:$0xff]  ;;  %vm22994_vm6 = vmmov %vm22958_vm2 }
 0x562   : > { %15821 = vmatmul.mubr.msk.bf16.gmra.mrb[68].mxu1 %vm22980_vm9, %v8385_v57  ;;  %vm22995_vm9 = vmmov %vm22958_vm2 }
 0x563   : > { %15826 = vmatprep.mubr.msk.bf16.mxu1 %vm22982_vm4, %v22981_v50  ;;  %vm22997_vm4 = vmmov %vm22958_vm2 }
 0x56a   : > { %15827 = vmatmul.mubr.msk.bf16.vlgmr.msra.gmra.mrb[36].mxu1 %vm22984_vm7, %v22983_v11  ;;  %vm22999_vm7 = vmmov %vm22958_vm2  ;;  %v20810_v11 = vpop.permute.xlu0 %9191 }
 0x56b   : > { %15830 = vmatprep.mubr.msk.bf16.mxu1 %vm22986_vm14, %v22985_v7  ;;  %vm23001_vm14 = vmmov %vm22958_vm2 }
 0x572   : > { %15831 = vmatmul.mubr.msk.bf16.gmra.mrb[40].mxu1 %vm22988_vm12, %v22987_v61  ;;  %vm23003_vm12 = vmmov %vm22958_vm2 }
 0x573   : > { %15834 = vmatprep.mubr.msk.bf16.mxu1 %vm22958_vm2, %v22989_v40 }
 0x57a   : > { %15835 = vmatmul.mubr.msk.bf16.gmra.mrb[44].mxu1 %vm22991_vm10, %v22990_v26  ;;  %vm23006_vm10 = vmmov %vm22958_vm2 }
 0x57b   : > { %15838 = vmatprep.mubr.msk.bf16.mxu1 %vm22992_vm5, %v20435_v29  ;;  %v23004_v29 = vld [vmem:[#allocation83_spill] sm:$0xff]  ;;  %vm23007_vm5 = vmmov %vm22958_vm2 }
 0x582   : > { %15839 = vmatmul.mubr.msk.bf16.gmra.mrb[48].mxu1 %vm22993_vm8, %v20438_v20  ;;  %v23005_v20 = vld [vmem:[#allocation84_spill] sm:$0xff]  ;;  %vm23008_vm8 = vmmov %vm22958_vm2 }
 0x583   : > { %15842 = vmatprep.mubr.msk.bf16.mxu1 %vm22994_vm6, %v20441_v45  ;;  %vm9270_vm6 = vcmp.eq.s32.totalorder %v9168_v18, 1 }
 0x58a   : > { %15843 = vmatmul.mubr.msk.bf16.gmra.mrb[52].mxu1 %vm22995_vm9, %v20446_v38  ;;  %v388_v38 = vld [vmem:[#allocation4 + $0x8] sm:$0x3]  ;;  %vm9268_vm9 = vcmp.eq.s32.totalorder %v9162_v32, 1 }
 0x58b   : > { %15846 = vmatprep.mubr.msk.bf16.mxu1 %vm22997_vm4, %v22996_v48  ;;  %v389_v47 = vsel %vm22628_vm3, 0, %v388_v38  ;;  %vm9269_vm4 = vcmp.eq.s32.totalorder %v9165_v63, 1 }
 0x58c   : > { %390 = vst [vmem:[#allocation4 + $0x8] sm:$0x3] %v389_v47 }
 0x592   : > { %15847 = vmatmul.mubr.msk.bf16.gmra.mrb[56].mxu1 %vm22999_vm7, %v22998_v62 }
 0x593   : > { %15850 = vmatprep.mubr.msk.bf16.mxu1 %vm23001_vm14, %v23000_v27  ;;  %vm9274_vm14 = vcmp.eq.s32.totalorder %v20789_v24, 1  ;;  %v9844_v27 = vld [vmem:[#allocation4 + $0x8] sm:$0xe]  ;;  %v20829_v24 = vpop.permute.xlu0 %9197 }
 0x59a   : > { %15851 = vmatmul.mubr.msk.bf16.gmra.mrb[60].mxu1 %vm23003_vm12, %v23002_v14  ;;  %vm9272_vm12 = vcmp.eq.s32.totalorder %v20780_v44, 1 }
 0x59b   : > { %15854 = vmatprep.mubr.msk.bf16.mxu1 %vm22958_vm2, %v23004_v29 }
 0x5a2   : > { %15855 = vmatmul.mubr.msk.bf16.gmra.mrb[64].mxu1 %vm23006_vm10, %v23005_v20 }
 0x5a3   : > { %15858 = vmatprep.mubr.msk.bf16.mxu1 %vm23007_vm5, %v20474_v9  ;;  %v9171_v9 = vpop.permute.xlu1 %9170  ;;  %vm9278_vm5 = vcmp.eq.s32.totalorder %v20810_v11, 1 }
 0x5a4   : > { %vm9271_vm7 = vcmp.eq.s32.totalorder %v9171_v9, 1 }
 0x5a7   : > { %v20792_v51 = vpop.permute.xlu1 %9176 }
 0x5a8   : > { %vm9273_vm10 = vcmp.eq.s32.totalorder %v20792_v51, 1 }
 0x5aa   : > { %15859 = vmatmul.mubr.msk.bf16.gmra.mrb[68].mxu1 %vm23008_vm8, %v20477_v42  ;;  %v20787_v42 = vld [vmem:[%s22194_s6 + $0x1] ss:$0 sm:$0xff]  ;;  %vm9276_vm8 = vcmp.eq.s32.totalorder %v20799_v52, 1 }
 0x5ab   : > { %v20802_v58 = vpop.permute.xlu1 %9182 }
 0x5ac   : > { %vm9275_vm2 = vcmp.eq.s32.totalorder %v20802_v58, 1 }
 0x5af   : > { %v20813_v38 = vpop.permute.xlu1 %9188 }
 0x63d   : > { %v15828_v1 = vpop.f32.mrb[36].mxu1 }
 0x63e   : > { %v8982_v53 = vadd.f32 %v15828_v1, %v20787_v42  ;;  %v8797_v28 = vpop.f32.mrb[37].mxu1 }
 0x63f   : > { %v8980_v21 = vadd.f32 %v20787_v42, %v8797_v28  ;;  %v15829_v55 = vpop.f32.mrb[38].mxu1 }
 0x640   : > { %v9018_v22 = vmax.f32 %v8982_v53, 0.0  ;;  %v8983_v16 = vadd.f32 %v15829_v55, %v20787_v42  ;;  %v8800_v13 = vpop.f32.mrb[39].mxu1 }
 0x641   : > { %v9016_v19 = vmax.f32 %v8980_v21, 0.0  ;;  %v8981_v10 = vadd.f32 %v20787_v42, %v8800_v13 }
 0x642   : > { %v9306_v23 = vsel %vm9270_vm6, %v9018_v22, 0.0  ;;  %v9019_v49 = vmax.f32 %v8983_v16, 0.0  ;;  %vm23012_vm6 = vcmask 125952  }
 0x643   : > { %v14595_v12 = vpack.c.bf16 %v9306_v23, %v9306_v23  ;;  %v9304_v41 = vsel %vm9268_vm9, %v9016_v19, 0.0  ;;  %v9017_v34 = vmax.f32 %v8981_v10, 0.0 }
 0x644   : > { %v14593_v35 = vpack.c.bf16 %v9304_v41, %v9304_v41  ;;  %v9307_v37 = vsel %vm9271_vm7, %v9019_v49, 0.0  ;;  %vm9277_vm7 = vcmp.eq.s32.totalorder %v20813_v38, 1 }
 0x645   : > { %v9468_v31 = vshrl.u32 %v14595_v12, 16  ;;  %v9471_v60 = vshll.u32 %v14595_v12, 16  ;;  %v14596_v6 = vpack.c.bf16 %v9307_v37, %v9307_v37  ;;  %v9305_v54 = vsel %vm9269_vm4, %v9017_v34, 0.0  ;;  %v15832_v4 = vpop.f32.mrb[40].mxu1  ;;  %vm23014_vm4 = vmmov %vm23012_vm6 }
 0x646   : > { %v9449_v5 = vshrl.u32 %v14593_v35, 16  ;;  %v9452_v33 = vshll.u32 %v14593_v35, 16  ;;  %v14594_v59 = vpack.c.bf16 %v9305_v54, %v9305_v54  ;;  %v8986_v43 = vadd.f32 %v15832_v4, %v20787_v42  ;;  %v8813_v8 = vpop.f32.mrb[41].mxu1 }
 0x647   : > { %v9470_v36 = vrot.slane %v9468_v31, 6  ;;  %v9473_v56 = vrot.slane %v9471_v60, 7  ;;  %v9478_v30 = vshrl.u32 %v14596_v6, 16  ;;  %v9481_v57 = vshll.u32 %v14596_v6, 16  ;;  %v15833_v50 = vpop.f32.mrb[42].mxu1  ;;  %v9195_v6 = vpop.permute.xlu1 %9194 }
 0x648   : > { %v9451_v7 = vrot.slane %v9449_v5, 6  ;;  %v9454_v61 = vrot.slane %v9452_v33, 7  ;;  %v9458_v40 = vshrl.u32 %v14594_v59, 16  ;;  %v9461_v26 = vshll.u32 %v14594_v59, 16  ;;  %v8816_v48 = vpop.f32.mrb[43].mxu1 }
 0x649   : > { %v9474_v62 = vor.u32 %v9473_v56, %v9470_v36  ;;  %v9480_v14 = vrot.slane %v9478_v30, 6  ;;  %v9483_v29 = vrot.slane %v9481_v57, 7  ;;  %v9022_v20 = vmax.f32 %v8986_v43, 0.0 }
 0x64a   : > { %v9455_v47 = vor.u32 %v9454_v61, %v9451_v7  ;;  %v9460_v32 = vrot.slane %v9458_v40, 6  ;;  %v9463_v18 = vrot.slane %v9461_v26, 7  ;;  %v8984_v63 = vadd.f32 %v20787_v42, %v8813_v8  ;;  %v20852_v26 = vpop.permute.xlu0 %9203 }
 0x64b   : > { %v9476_v2 = vrot.slane %v9474_v62, 4  ;;  %v20817_v3 = vor.u32 %v9483_v29, %v9480_v14  ;;  %v9310_v9 = vsel %vm9274_vm14, %v9022_v20, 0.0  ;;  %v8987_v17 = vadd.f32 %v15833_v50, %v20787_v42 }
 0x64c   : > { %v9456_v1 = vrot.slane %v9455_v47, 4  ;;  %v9845_v28 = vsel %vm22630_vm13, %v9455_v47, %v9844_v27  ;;  %v9464_v21 = vor.u32 %v9463_v18, %v9460_v32  ;;  %v14599_v55 = vpack.c.bf16 %v9310_v9, %v9310_v9  ;;  %vm23013_vm13 = vmmov %vm23012_vm6 }
 0x64d   : > { %9846 = vst [vmem:[#allocation4 + $0x8] sm:$0xe] %v9845_v28  ;;  %v9485_v16 = vsel %vm22632_vm15, %v9476_v2, %v20817_v3  ;;  %v9486_v13 = vrot.slane %v20817_v3, 4  ;;  %v9020_v0 = vmax.f32 %v8984_v63, 0.0  ;;  %v9023_v46 = vmax.f32 %v8987_v17, 0.0  ;;  %v15836_v19 = vpop.f32.mrb[44].mxu1  ;;  %v20856_v63 = vpop.permute.xlu1 %9200 }
 0x64e   : > { %9849 = vst.msk [vmem:[#allocation4 + $0x14] sm:$0xf] %vm23012_vm6, %v9485_v16  ;;  %v9465_v10 = vsel %vm22632_vm15, %v9456_v1, %v9464_v21  ;;  %v9466_v23 = vrot.slane %v9464_v21, 4  ;;  %v9508_v49 = vshrl.u32 %v14599_v55, 16  ;;  %v9511_v12 = vshll.u32 %v14599_v55, 16  ;;  %v8829_v41 = vpop.f32.mrb[45].mxu1 }
 0x64f   : > { %9847 = vst.msk [vmem:[#allocation4 + $0xc] sm:$0xf] %vm23013_vm13, %v9465_v10  ;;  %v9308_v34 = vsel %vm9272_vm12, %v9020_v0, 0.0  ;;  %v9311_v35 = vsel %vm9275_vm2, %v9023_v46, 0.0  ;;  %v8985_v37 = vadd.f32 %v20787_v42, %v8816_v48  ;;  %v8990_v31 = vadd.f32 %v15836_v19, %v20787_v42  ;;  %v15837_v60 = vpop.f32.mrb[46].mxu1  ;;  %vm23015_vm2 = vmmov %vm23014_vm4 }
 0x650   : > { %v9475_v54 = vsel %vm22632_vm15, %v9466_v23, %v9474_v62  ;;  %v9510_v4 = vrot.slane %v9508_v49, 6  ;;  %v9513_v5 = vrot.slane %v9511_v12, 7  ;;  %v14597_v33 = vpack.c.bf16 %v9308_v34, %v9308_v34  ;;  %v8832_v59 = vpop.f32.mrb[47].mxu1  ;;  %vm23018_vm13 = vmmov %vm23015_vm2 }
 0x651   : > { %vm9279_vm9 = vcmp.eq.s32.totalorder %v9195_v6, 1  ;;  %9848 = vst.msk [vmem:[#allocation4 + $0x10] sm:$0xf] %vm23014_vm4, %v9475_v54  ;;  %v14600_v44 = vpack.c.bf16 %v9311_v35, %v9311_v35  ;;  %v9021_v43 = vmax.f32 %v8985_v37, 0.0  ;;  %v9026_v58 = vmax.f32 %v8990_v31, 0.0  ;;  %vm23019_vm4 = vmmov %vm23015_vm2 }
 0x652   : > { %v8988_v8 = vadd.f32 %v20787_v42, %v8829_v41  ;;  %v20845_v36 = vor.u32 %v9513_v5, %v9510_v4  ;;  %v9488_v56 = vshrl.u32 %v14597_v33, 16  ;;  %v9491_v30 = vshll.u32 %v14597_v33, 16  ;;  %v20873_v41 = vpop.permute.xlu0 %9209  ;;  %v9207_v4 = vpop.permute.xlu1 %9206 }
 0x653   : > { %v8991_v57 = vadd.f32 %v15837_v60, %v20787_v42  ;;  %v9518_v50 = vshrl.u32 %v14600_v44, 16  ;;  %v9521_v7 = vshll.u32 %v14600_v44, 16  ;;  %v9309_v61 = vsel %vm9273_vm10, %v9021_v43, 0.0  ;;  %vm23016_vm10 = vmmov %vm23015_vm2 }
 0x654   : > { %v9314_v40 = vsel %vm9278_vm5, %v9026_v58, 0.0  ;;  %v9516_v48 = vrot.slane %v20845_v36, 4  ;;  %v9490_v62 = vrot.slane %v9488_v56, 6  ;;  %v9493_v27 = vrot.slane %v9491_v30, 7 }
 0x655   : > { %v14598_v14 = vpack.c.bf16 %v9309_v61, %v9309_v61  ;;  %v9520_v29 = vrot.slane %v9518_v50, 6  ;;  %v9523_v20 = vrot.slane %v9521_v7, 7  ;;  %v14603_v47 = vpack.c.bf16 %v9314_v40, %v9314_v40  ;;  %v15840_v18 = vpop.f32.mrb[48].mxu1 }
 0x656   : > { %v9024_v32 = vmax.f32 %v8988_v8, 0.0  ;;  %v9494_v51 = vor.u32 %v9493_v27, %v9490_v62  ;;  %v9027_v9 = vmax.f32 %v8991_v57, 0.0  ;;  %v8845_v17 = vpop.f32.mrb[49].mxu1  ;;  %vm9282_vm14 = vcmp.eq.s32.totalorder %v20852_v26, 1  ;;  %v20907_v26 = vpop.permute.xlu1 %9212 }
 0x657   : > { %v9498_v2 = vshrl.u32 %v14598_v14, 16  ;;  %v9501_v11 = vshll.u32 %v14598_v14, 16  ;;  %v20859_v1 = vor.u32 %v9523_v20, %v9520_v29  ;;  %v9548_v53 = vshrl.u32 %v14603_v47, 16  ;;  %v15841_v55 = vpop.f32.mrb[50].mxu1  ;;  %v9216_v29 = vpop.permute.xlu0 %9215 }
 0x658   : > { %v9551_v28 = vshll.u32 %v14603_v47, 16  ;;  %v9312_v21 = vsel %vm9276_vm8, %v9024_v32, 0.0  ;;  %vm9280_vm12 = vcmp.eq.s32.totalorder %v20829_v24, 1  ;;  %v9495_v16 = vsel %vm22632_vm15, %v9486_v13, %v9494_v51  ;;  %v8848_v10 = vpop.f32.mrb[51].mxu1  ;;  %vm23017_vm8 = vmmov %vm23015_vm2 }
 0x659   : > { %v9496_v0 = vrot.slane %v9494_v51, 4  ;;  %v9500_v46 = vrot.slane %v9498_v2, 6  ;;  %v9503_v19 = vrot.slane %v9501_v11, 7  ;;  %9850 = vst.msk [vmem:[#allocation4 + $0x18] sm:$0xf] %vm23015_vm2, %v9495_v16  ;;  %v9525_v23 = vsel %vm22632_vm15, %v9516_v48, %v20859_v1 }
 0x65a   : > { %v9526_v52 = vrot.slane %v20859_v1, 4  ;;  %v9550_v49 = vrot.slane %v9548_v53, 6  ;;  %v9553_v12 = vrot.slane %v9551_v28, 7  ;;  %9853 = vst.msk [vmem:[#allocation4 + $0x24] sm:$0xf] %vm23016_vm10, %v9525_v23  ;;  %v14601_v13 = vpack.c.bf16 %v9312_v21, %v9312_v21  ;;  %vm23022_vm10 = vmmov %vm23019_vm4 }
 0x65b   : > { %v9504_v3 = vor.u32 %v9503_v19, %v9500_v46  ;;  %v9315_v34 = vsel %vm9279_vm9, %v9027_v9, 0.0  ;;  %v8989_v35 = vadd.f32 %v20787_v42, %v8832_v59  ;;  %v8994_v60 = vadd.f32 %v15840_v18, %v20787_v42 }
 0x65c   : > { %v20878_v37 = vor.u32 %v9553_v12, %v9550_v49  ;;  %v14604_v31 = vpack.c.bf16 %v9315_v34, %v9315_v34  ;;  %v8992_v54 = vadd.f32 %v20787_v42, %v8845_v17  ;;  %v9528_v44 = vshrl.u32 %v14601_v13, 16 }
 0x65d   : > { %v9505_v5 = vsel %vm22632_vm15, %v9496_v0, %v9504_v3  ;;  %v9506_v33 = vrot.slane %v9504_v3, 4  ;;  %v9531_v43 = vshll.u32 %v14601_v13, 16  ;;  %vm9283_vm5 = vcmp.eq.s32.totalorder %v9207_v4, 1  ;;  %v15844_v56 = vpop.f32.mrb[52].mxu1 }
 0x65e   : > { %9851 = vst.msk [vmem:[#allocation4 + $0x1c] sm:$0xf] %vm23017_vm8, %v9505_v5  ;;  %v9556_v6 = vrot.slane %v20878_v37, 4  ;;  %v9558_v59 = vshrl.u32 %v14604_v31, 16  ;;  %v9561_v58 = vshll.u32 %v14604_v31, 16  ;;  %v9025_v8 = vmax.f32 %v8989_v35, 0.0 }
 0x65f   : > { %vm9281_vm6 = vcmp.eq.s32.totalorder %v20856_v63, 1  ;;  %v9515_v30 = vsel %vm22632_vm15, %v9506_v33, %v20845_v36  ;;  %v9530_v57 = vrot.slane %v9528_v44, 6  ;;  %v9533_v50 = vrot.slane %v9531_v43, 7  ;;  %v20890_v61 = vpop.f32.mrb[53].mxu1  ;;  %v20926_v43 = vpop.permute.xlu0 %9221 }
 0x660   : > { %v9030_v7 = vmax.f32 %v8994_v60, 0.0  ;;  %9852 = vst.msk [vmem:[#allocation4 + $0x20] sm:$0xf] %vm23018_vm13, %v9515_v30  ;;  %v9560_v40 = vrot.slane %v9558_v59, 6  ;;  %v9563_v48 = vrot.slane %v9561_v58, 7  ;;  %v9313_v62 = vsel %vm9277_vm7, %v9025_v8, 0.0  ;;  %vm23020_vm7 = vmmov %vm23015_vm2 }
 0x661   : > { %v9028_v27 = vmax.f32 %v8992_v54, 0.0  ;;  %v20895_v14 = vpop.f32.mrb[54].mxu1  ;;  %v9534_v20 = vor.u32 %v9533_v50, %v9530_v57  ;;  %v14602_v47 = vpack.c.bf16 %v9313_v62, %v9313_v62  ;;  %v8995_v32 = vadd.f32 %v15841_v55, %v20787_v42  ;;  %vm23024_vm13 = vmmov %vm23019_vm4 }
 0x662   : > { %v9318_v36 = vsel %vm9282_vm14, %v9030_v7, 0.0  ;;  %v20900_v18 = vpop.f32.mrb[55].mxu1  ;;  %vm9286_vm9 = vcmp.eq.s32.totalorder %v9216_v29, 1  ;;  %v9564_v51 = vor.u32 %v9563_v48, %v9560_v40  ;;  %v8993_v11 = vadd.f32 %v20787_v42, %v8848_v10  ;;  %v17287_v7 = vld [vmem:[#allocation4 + $0x8] sm:$0xff]  }
 0x663   : > { %v14607_v2 = vpack.c.bf16 %v9318_v36, %v9318_v36  ;;  %v9316_v38 = vsel %vm9280_vm12, %v9028_v27, 0.0  ;;  %v9535_v9 = vsel %vm22632_vm15, %v9526_v52, %v9534_v20  ;;  %v9536_v17 = vrot.slane %v9534_v20, 4  ;;  %vm23021_vm12 = vmmov %vm23015_vm2 }
 0x664   : > { %v9538_v1 = vshrl.u32 %v14602_v47, 16  ;;  %v9541_v53 = vshll.u32 %v14602_v47, 16  ;;  %9854 = vst.msk [vmem:[#allocation4 + $0x28] sm:$0xf] %vm23019_vm4, %v9535_v9  ;;  %v9565_v28 = vsel %vm22632_vm15, %v9556_v6, %v9564_v51  ;;  %v9566_v21 = vrot.slane %v9564_v51, 4 }
 0x665   : > { %v9588_v55 = vshrl.u32 %v14607_v2, 16  ;;  %v9591_v16 = vshll.u32 %v14607_v2, 16  ;;  %9857 = vst.msk [vmem:[#allocation4 + $0x34] sm:$0xf] %vm23020_vm7, %v9565_v28  ;;  %v14605_v46 = vpack.c.bf16 %v9316_v38, %v9316_v38  ;;  %v9031_v19 = vmax.f32 %v8995_v32, 0.0  ;;  %v20915_v12 = vpop.f32.mrb[56].mxu1 }
 0x666   : > { %v9540_v24 = vrot.slane %v9538_v1, 6  ;;  %v9543_v0 = vrot.slane %v9541_v53, 7  ;;  %vm9284_vm14 = vcmp.eq.s32.totalorder %v20873_v41, 1  ;;  %v9029_v52 = vmax.f32 %v8993_v11, 0.0  ;;  %v20918_v31 = vpop.f32.mrb[57].mxu1  ;;  %v20951_v1 = vpop.permute.xlu0 %9227 }
 0x667   : > { %v9590_v10 = vrot.slane %v9588_v55, 6  ;;  %v9593_v23 = vrot.slane %v9591_v16, 7  ;;  %v8998_v49 = vadd.f32 %v15844_v56, %v20787_v42  ;;  %v9568_v13 = vshrl.u32 %v14605_v46, 16  ;;  %v20924_v44 = vpop.f32.mrb[58].mxu1  ;;  %v20932_v56 = vpop.permute.xlu1 %9218 }
 0x668   : > { %v9544_v3 = vor.u32 %v9543_v0, %v9540_v24  ;;  %v9571_v34 = vshll.u32 %v14605_v46, 16  ;;  %v9319_v35 = vsel %vm9283_vm5, %v9031_v19, 0.0  ;;  %v9317_v5 = vsel %vm9281_vm6, %v9029_v52, 0.0  ;;  %v20930_v8 = vpop.f32.mrb[59].mxu1  ;;  %vm23023_vm5 = vmmov %vm23019_vm4 }
 0x669   : > { %v20920_v60 = vor.u32 %v9593_v23, %v9590_v10  ;;  %v14608_v54 = vpack.c.bf16 %v9319_v35, %v9319_v35  ;;  %v9034_v33 = vmax.f32 %v8998_v49, 0.0  ;;  %v9570_v58 = vrot.slane %v9568_v13, 6  ;;  %v17289_v13 = vld [vmem:[#allocation4 + $0x10] sm:$0xff]  }
 0x66a   : > { %v9545_v6 = vsel %vm22632_vm15, %v9536_v17, %v9544_v3  ;;  %v9546_v59 = vrot.slane %v9544_v3, 4  ;;  %v9573_v4 = vrot.slane %v9571_v34, 7  ;;  %v14606_v50 = vpack.c.bf16 %v9317_v5, %v9317_v5 }
 0x66b   : > { %9855 = vst.msk [vmem:[#allocation4 + $0x2c] sm:$0xf] %vm23021_vm12, %v9545_v6  ;;  %v9596_v63 = vrot.slane %v20920_v60, 4  ;;  %v9598_v30 = vshrl.u32 %v14608_v54, 16  ;;  %v9601_v57 = vshll.u32 %v14608_v54, 16  ;;  %v9322_v62 = vsel %vm9286_vm9, %v9034_v33, 0.0  ;;  %v20958_v24 = vpop.permute.xlu1 %9224  ;;  %vm23027_vm12 = vmmov %vm23019_vm4 }
 0x66c   : > { %v9555_v40 = vsel %vm22632_vm15, %v9546_v59, %v20878_v37  ;;  %v9574_v48 = vor.u32 %v9573_v4, %v9570_v58  ;;  %v8996_v27 = vadd.f32 %v20787_v42, %v20890_v61  ;;  %vm9287_vm2 = vcmp.eq.s32.totalorder %v20932_v56, 1  ;;  %v20980_v4 = vld [vmem:[#allocation4 + $0x18] sm:$0xff]  }
 0x66d   : > { %9856 = vst.msk [vmem:[#allocation4 + $0x30] sm:$0xf] %vm23022_vm10, %v9555_v40  ;;  %v9600_v20 = vrot.slane %v9598_v30, 6  ;;  %v9603_v47 = vrot.slane %v9601_v57, 7  ;;  %v9578_v36 = vshrl.u32 %v14606_v50, 16  ;;  %v9581_v32 = vshll.u32 %v14606_v50, 16 }
 0x66e   : > { %v9575_v51 = vsel %vm22632_vm15, %v9566_v21, %v9574_v48  ;;  %v9576_v2 = vrot.slane %v9574_v48, 4  ;;  %v14611_v38 = vpack.c.bf16 %v9322_v62, %v9322_v62  ;;  %v9032_v37 = vmax.f32 %v8996_v27, 0.0  ;;  %v20949_v17 = vpop.f32.mrb[60].mxu1 }
 0x66f   : > { %9858 = vst.msk [vmem:[#allocation4 + $0x38] sm:$0xf] %vm23023_vm5, %v9575_v51  ;;  %v20947_v29 = vor.u32 %v9603_v47, %v9600_v20  ;;  %v9580_v11 = vrot.slane %v9578_v36, 6  ;;  %v9583_v61 = vrot.slane %v9581_v32, 7  ;;  %v10029_v9 = vshll.u32 %v17287_v7, 16  ;;  %v20955_v16 = vpop.f32.mrb[61].mxu1  ;;  %v9231_v62 = vpop.permute.xlu1 %9230 }
 0x670   : > { %v9628_v53 = vshrl.u32 %v14611_v38, 16  ;;  %v9631_v28 = vshll.u32 %v14611_v38, 16  ;;  %v9320_v55 = vsel %vm9284_vm14, %v9032_v37, 0.0  ;;  %v10033_v21 = vshrl.u32 %v17287_v7, 16  ;;  %v20965_v23 = vpop.f32.mrb[62].mxu1  ;;  %v21003_v38 = vld [vmem:[#allocation10 + $0x10] sm:$0xff]  }
 0x671   : > { %vm9285_vm8 = vcmp.eq.s32.totalorder %v20907_v26, 1  ;;  %vm9290_vm6 = vcmp.eq.s32.totalorder %v20951_v1, 1  ;;  %v9605_v0 = vsel %vm22632_vm15, %v9596_v63, %v20947_v29  ;;  %v9606_v46 = vrot.slane %v20947_v29, 4  ;;  %v20973_v33 = vpop.f32.mrb[63].mxu1 }
 0x672   : > { %v9584_v19 = vor.u32 %v9583_v61, %v9580_v11  ;;  %v14609_v10 = vpack.c.bf16 %v9320_v55, %v9320_v55  ;;  %9861 = vst.msk [vmem:[#allocation4 + $0x44] sm:$0xf] %vm23024_vm13, %v9605_v0  ;;  %v9630_v41 = vrot.slane %v9628_v53, 6  ;;  %v9633_v52 = vrot.slane %v9631_v28, 7 }
 0x673   : > { %v10031_v49 = vrot.slane %v10029_v9, 1  ;;  %v8999_v3 = vadd.f32 %v20895_v14, %v20787_v42  ;;  %vm9288_vm9 = vcmp.eq.s32.totalorder %v20926_v43, 1  ;;  %vm23025_vm7 = vsmask.f32 7424 }
 0x674   : > { %v9585_v34 = vsel %vm22632_vm15, %v9576_v2, %v9584_v19  ;;  %v9586_v35 = vrot.slane %v9584_v19, 4  ;;  %v9608_v54 = vshrl.u32 %v14609_v10, 16  ;;  %v9611_v5 = vshll.u32 %v14609_v10, 16  ;;  %vm23029_vm5 = vmmov %vm23025_vm7 }
 0x675   : > { %9859 = vst.msk [vmem:[#allocation4 + $0x3c] sm:$0xf] %vm23019_vm4, %v9585_v34  ;;  %v20976_v6 = vor.u32 %v9633_v52, %v9630_v41  ;;  %v10032_v59 = vsel %vm23025_vm7, %v20804_v39, %v10031_v49  ;;  %v10035_v58 = vor.u32 %v10033_v21, %v10031_v49  ;;  %v9035_v14 = vmax.f32 %v8999_v3, 0.0 }
 0x676   : > { %v9595_v63 = vsel %vm22632_vm15, %v9586_v35, %v20920_v60  ;;  %v9610_v30 = vrot.slane %v9608_v54, 6  ;;  %v9613_v57 = vrot.slane %v9611_v5, 7  ;;  %vm23026_vm14 = vcmask 130048   ;;  %v21029_v35 = vpop.permute.xlu1 %9236 }
 0x677   : > { %15864 = vmatprep.mubr.msk.bf16.mxu0 %vm23026_vm14, %v10032_v59  ;;  %v8997_v50 = vadd.f32 %v20787_v42, %v20900_v18  ;;  %9860 = vst.msk [vmem:[#allocation4 + $0x40] sm:$0xf] %vm23027_vm12, %v9595_v63  ;;  %v9636_v7 = vrot.slane %v20976_v6, 4  ;;  %v9323_v39 = vsel %vm9287_vm2, %v9035_v14, 0.0  ;;  %v10037_v40 = vshll.u32 %v17289_v13, 16  ;;  %v20998_v18 = vpop.f32.mrb[64].mxu1  ;;  %vm23028_vm2 = vmmov %vm23019_vm4 }
 0x678   : > { %v9002_v48 = vadd.f32 %v20915_v12, %v20787_v42  ;;  %v20994_v60 = vor.u32 %v9613_v57, %v9610_v30  ;;  %v14612_v27 = vpack.c.bf16 %v9323_v39, %v9323_v39  ;;  %v9000_v47 = vadd.f32 %v20787_v42, %v20918_v31  ;;  %v21001_v2 = vpop.f32.mrb[65].mxu1  ;;  %v21005_v12 = vpop.permute.xlu0 %9233  ;;  %vm23030_vm13 = vmmov %vm23026_vm14 }
 0x679   : > { %v9033_v20 = vmax.f32 %v8997_v50, 0.0  ;;  %vm9291_vm10 = vcmp.eq.s32.totalorder %v9231_v62, 1  ;;  %v10039_v36 = vrot.slane %v10037_v40, 1  ;;  %v10041_v51 = vshrl.u32 %v17289_v13, 16  ;;  %v21011_v61 = vpop.f32.mrb[66].mxu1  ;;  %vm23033_vm7 = vmmov %vm23028_vm2 }
 0x67a   : > { %v9038_v32 = vmax.f32 %v9002_v48, 0.0  ;;  %v10045_v56 = vshll.u32 %v20980_v4, 16  ;;  %v9615_v37 = vsel %vm22632_vm15, %v9606_v46, %v20994_v60  ;;  %v9616_v31 = vrot.slane %v20994_v60, 4  ;;  %v21019_v21 = vpop.f32.mrb[67].mxu1  ;;  %vm23034_vm12 = vmmov %vm23028_vm2 }
 0x67b   : > { %v9638_v29 = vshrl.u32 %v14612_v27, 16  ;;  %v9641_v11 = vshll.u32 %v14612_v27, 16  ;;  %9862 = vst.msk [vmem:[#allocation4 + $0x48] sm:$0xf] %vm23028_vm2, %v9615_v37  ;;  %v9321_v9 = vsel %vm9285_vm8, %v9033_v20, 0.0  ;;  %v10040_v53 = vsel %vm23029_vm5, %v10035_v58, %v10039_v36  ;;  %vm23031_vm8 = vmmov %vm23029_vm5  ;;  %v21043_v20 = vld [vmem:[#allocation4 + $0x20] sm:$0xff]  }
 0x67c   : > { %v9326_v28 = vsel %vm9290_vm6, %v9038_v32, 0.0  ;;  %v9036_v55 = vmax.f32 %v9000_v47, 0.0  ;;  %v14610_v19 = vpack.c.bf16 %v9321_v9, %v9321_v9  ;;  %15865 = vmatmul.mubr.msk.bf16.vlgmr.msra.gmra.mrb[36].mxu0 %vm23030_vm13, %v10040_v53  ;;  %vm9289_vm4 = vcmp.eq.s32.totalorder %v20958_v24, 1  ;;  %v9240_v43 = vpop.permute.xlu0 %9239  ;;  %vm23032_vm6 = vmmov %vm23030_vm13  ;;  %v9243_v53 = vpop.permute.xlu1 %9242 }
 0x67d   : > { %v9640_v0 = vrot.slane %v9638_v29, 6  ;;  %v9643_v46 = vrot.slane %v9641_v11, 7  ;;  %v14615_v10 = vpack.c.bf16 %v9326_v28, %v9326_v28  ;;  %15901 = vmatpush3.bf16.msra.mxu0 %v20777_v25  ;;  %v10043_v41 = vor.u32 %v10041_v51, %v10039_v36  ;;  %v21035_v30 = vpop.f32.mrb[68].mxu1  ;;  %vm23035_vm5 = vmmov %vm23028_vm2 }
 0x67e   : > { %v9324_v26 = vsel %vm9288_vm9, %v9036_v55, 0.0  ;;  %v10047_v52 = vrot.slane %v10045_v56, 1  ;;  %v9003_v1 = vadd.f32 %v20924_v44, %v20787_v42  ;;  %v9618_v3 = vshrl.u32 %v14610_v19, 16  ;;  %15938 = vmatprep.subr.bf16.mxu0 %v21003_v38  ;;  %v21038_v48 = vpop.f32.mrb[69].mxu1 }
 0x67f   : > { %v9644_v49 = vor.u32 %v9643_v46, %v9640_v0  ;;  %v9621_v13 = vshll.u32 %v14610_v19, 16  ;;  %v9668_v34 = vshrl.u32 %v14615_v10, 16  ;;  %v9671_v54 = vshll.u32 %v14615_v10, 16  ;;  %v21046_v36 = vpop.f32.mrb[70].mxu1  ;;  %v21057_v46 = vld [vmem:[#allocation4 + $0x28] sm:$0xff]  }
 0x680   : > { %v14613_v5 = vpack.c.bf16 %v9324_v26, %v9324_v26  ;;  %v10048_v25 = vsel %vm23031_vm8, %v10043_v41, %v10047_v52  ;;  %v9039_v59 = vmax.f32 %v9003_v1, 0.0  ;;  %v9620_v63 = vrot.slane %v9618_v3, 6  ;;  %v21050_v29 = vpop.f32.mrb[71].mxu1  ;;  %v21070_v3 = vpop.permute.xlu0 %9245 }
 0x681   : > { %v9645_v58 = vsel %vm22632_vm15, %v9636_v7, %v9644_v49  ;;  %v9646_v14 = vrot.slane %v9644_v49, 4  ;;  %v9623_v44 = vrot.slane %v9621_v13, 7  ;;  %15868 = vmatprep.mubr.msk.bf16.mxu0 %vm23032_vm6, %v10048_v25  ;;  %vm9294_vm9 = vcmp.eq.s32.totalorder %v9240_v43, 1 }
 0x682   : > { %9865 = vst.msk [vmem:[#allocation4 + $0x54] sm:$0xf] %vm23033_vm7, %v9645_v58  ;;  %v9670_v57 = vrot.slane %v9668_v34, 6  ;;  %v9673_v50 = vrot.slane %v9671_v54, 7  ;;  %v9648_v39 = vshrl.u32 %v14613_v5, 16  ;;  %v9651_v40 = vshll.u32 %v14613_v5, 16 }
 0x683   : > { %v9624_v60 = vor.u32 %v9623_v44, %v9620_v63  ;;  %v9327_v27 = vsel %vm9291_vm10, %v9039_v59, 0.0  ;;  %v9001_v7 = vadd.f32 %v20787_v42, %v20930_v8  ;;  %v10049_v47 = vshrl.u32 %v20980_v4, 16 }
 0x684   : > { %v21048_v32 = vor.u32 %v9673_v50, %v9670_v57  ;;  %v9650_v51 = vrot.slane %v9648_v39, 6  ;;  %v9653_v56 = vrot.slane %v9651_v40, 7  ;;  %v14616_v37 = vpack.c.bf16 %v9327_v27, %v9327_v27  ;;  %v21089_v39 = vpop.permute.xlu1 %9248 }
 0x685   : > { %vm9292_vm14 = vcmp.eq.s32.totalorder %v21005_v12, 1  ;;  %v9625_v62 = vsel %vm22632_vm15, %v9616_v31, %v9624_v60  ;;  %v9626_v11 = vrot.slane %v9624_v60, 4  ;;  %v9037_v8 = vmax.f32 %v9001_v7, 0.0 }
 0x686   : > { %v10051_v9 = vor.u32 %v10049_v47, %v10047_v52  ;;  %9863 = vst.msk [vmem:[#allocation4 + $0x4c] sm:$0xf] %vm23034_vm12, %v9625_v62  ;;  %v9676_v4 = vrot.slane %v21048_v32, 4  ;;  %v9654_v28 = vor.u32 %v9653_v56, %v9650_v51  ;;  %v9678_v55 = vshrl.u32 %v14616_v37, 16  ;;  %v21094_v56 = vpop.permute.xlu0 %9251 }
 0x687   : > { %v9681_v0 = vshll.u32 %v14616_v37, 16  ;;  %vm9295_vm10 = vcmp.eq.s32.totalorder %v9243_v53, 1  ;;  %v9635_v19 = vsel %vm22632_vm15, %v9626_v11, %v20976_v6  ;;  %v9325_v31 = vsel %vm9289_vm4, %v9037_v8, 0.0  ;;  %vm23036_vm4 = vmmov %vm23031_vm8 }
 0x688   : > { %v10053_v10 = vshll.u32 %v21043_v20, 16  ;;  %v9006_v26 = vadd.f32 %v20949_v17, %v20787_v42  ;;  %9864 = vst.msk [vmem:[#allocation4 + $0x50] sm:$0xf] %vm23028_vm2, %v9635_v19  ;;  %v9655_v41 = vsel %vm22632_vm15, %v9646_v14, %v9654_v28  ;;  %v9656_v52 = vrot.slane %v9654_v28, 4  ;;  %vm23037_vm8 = vmmov %vm23032_vm6 }
 0x689   : > { %v9680_v1 = vrot.slane %v9678_v55, 6  ;;  %v9683_v49 = vrot.slane %v9681_v0, 7  ;;  %9866 = vst.msk [vmem:[#allocation4 + $0x58] sm:$0xf] %vm23035_vm5, %v9655_v41  ;;  %v14614_v6 = vpack.c.bf16 %v9325_v31, %v9325_v31  ;;  %v9004_v34 = vadd.f32 %v20787_v42, %v20955_v16  ;;  %vm23038_vm6 = vmmov %vm23028_vm2  ;;  %v21111_v41 = vpop.permute.xlu1 %9254 }
 0x68a   : > { %v10055_v24 = vrot.slane %v10053_v10, 1  ;;  %v9042_v13 = vmax.f32 %v9006_v26, 0.0  ;;  %v10057_v17 = vshrl.u32 %v21043_v20, 16  ;;  %v10061_v5 = vshll.u32 %v21057_v46, 16  ;;  %vm23040_vm7 = vmmov %vm23037_vm8 }
 0x68b   : > { %v21075_v54 = vor.u32 %v9683_v49, %v9680_v1  ;;  %v9007_v25 = vadd.f32 %v20965_v23, %v20787_v42  ;;  %vm9293_vm13 = vcmp.eq.s32.totalorder %v21029_v35, 1  ;;  %v9658_v59 = vshrl.u32 %v14614_v6, 16 }
 0x68c   : > { %v9661_v58 = vshll.u32 %v14614_v6, 16  ;;  %v10056_v14 = vsel %vm23036_vm4, %v10051_v9, %v10055_v24  ;;  %v9330_v63 = vsel %vm9294_vm9, %v9042_v13, 0.0  ;;  %v9040_v50 = vmax.f32 %v9004_v34, 0.0  ;;  %vm23039_vm9 = vmmov %vm23036_vm4  ;;  %v21099_v9 = vld [vmem:[#allocation4 + $0x30] sm:$0xff]  }
 0x68d   : > { %v9685_v16 = vsel %vm22632_vm15, %v9676_v4, %v21075_v54  ;;  %v9686_v44 = vrot.slane %v21075_v54, 4  ;;  %15869 = vmatmul.mubr.msk.bf16.gmra.mrb[40].mxu0 %vm23037_vm8, %v10056_v14  ;;  %v14619_v57 = vpack.c.bf16 %v9330_v63, %v9330_v63  ;;  %v9660_v23 = vrot.slane %v9658_v59, 6  ;;  %v21130_v14 = vld [vmem:[#allocation4 + $0x38] sm:$0xff]   ;;  %vm23042_vm4 = vmmov %vm23028_vm2 }
 0x68e   : > { %9869 = vst.msk [vmem:[#allocation4 + $0x64] sm:$0xf] %vm23038_vm6, %v9685_v16  ;;  %v9663_v40 = vrot.slane %v9661_v58, 7  ;;  %v10059_v60 = vor.u32 %v10057_v17, %v10055_v24  ;;  %v10063_v27 = vrot.slane %v10061_v5, 1  ;;  %v9328_v47 = vsel %vm9292_vm14, %v9040_v50, 0.0  ;;  %v21121_v17 = vpop.permute.xlu0 %9257  ;;  %vm23043_vm8 = vmmov %vm23039_vm9 }
 0x68f   : > { %v9708_v43 = vshrl.u32 %v14619_v57, 16  ;;  %v9711_v7 = vshll.u32 %v14619_v57, 16  ;;  %v9043_v51 = vmax.f32 %v9007_v25, 0.0  ;;  %v14617_v62 = vpack.c.bf16 %v9328_v47, %v9328_v47  ;;  %v21145_v47 = vpop.permute.xlu1 %9260  ;;  %vm23044_vm6 = vmmov %vm23040_vm7 }
 0x690   : > { %v9664_v37 = vor.u32 %v9663_v40, %v9660_v23  ;;  %v10064_v11 = vsel %vm23039_vm9, %v10059_v60, %v10063_v27  ;;  %v9005_v8 = vadd.f32 %v20787_v42, %v20973_v33  ;;  %v10065_v12 = vshrl.u32 %v21057_v46, 16  ;;  %vm23045_vm9 = vmmov %vm23028_vm2 }
 0x691   : > { %v9710_v4 = vrot.slane %v9708_v43, 6  ;;  %v9713_v28 = vrot.slane %v9711_v7, 7  ;;  %15872 = vmatprep.mubr.msk.bf16.mxu0 %vm23040_vm7, %v10064_v11  ;;  %v9331_v55 = vsel %vm9295_vm10, %v9043_v51, 0.0  ;;  %vm9296_vm14 = vcmp.eq.s32.totalorder %v21070_v3, 1  ;;  %vm23041_vm10 = vmmov %vm23028_vm2  ;;  %v21143_v7 = vld [vmem:[#allocation4 + $0x40] sm:$0xff]  }
 0x692   : > { %vm9298_vm12 = vcmp.eq.s32.totalorder %v21094_v56, 1  ;;  %v9665_v0 = vsel %vm22632_vm15, %v9656_v52, %v9664_v37  ;;  %v9666_v19 = vrot.slane %v9664_v37, 4  ;;  %v9688_v31 = vshrl.u32 %v14617_v62, 16 }
 0x693   : > { %v9691_v42 = vshll.u32 %v14617_v62, 16  ;;  %9867 = vst.msk [vmem:[#allocation4 + $0x5c] sm:$0xf] %vm23028_vm2, %v9665_v0  ;;  %v21109_v33 = vor.u32 %v9713_v28, %v9710_v4  ;;  %v14620_v10 = vpack.c.bf16 %v9331_v55, %v9331_v55  ;;  %v9041_v26 = vmax.f32 %v9005_v8, 0.0  ;;  %v9264_v55 = vpop.permute.xlu0 %9263 }
 0x694   : > { %v10067_v53 = vor.u32 %v10065_v12, %v10063_v27  ;;  %v9675_v1 = vsel %vm22632_vm15, %v9666_v19, %v21048_v32  ;;  %v9690_v49 = vrot.slane %v9688_v31, 6  ;;  %v10069_v52 = vshll.u32 %v21099_v9, 16  ;;  %v21126_v32 = vld [vmem:[%s22194_s6 + $0x1] ss:$0 sm:$0xff] }
 0x695   : > { %v9693_v6 = vrot.slane %v9691_v42, 7  ;;  %9868 = vst.msk [vmem:[#allocation4 + $0x60] sm:$0xf] %vm23041_vm10, %v9675_v1  ;;  %v9716_v24 = vrot.slane %v21109_v33, 4  ;;  %v9718_v13 = vshrl.u32 %v14620_v10, 16  ;;  %v9721_v34 = vshll.u32 %v14620_v10, 16  ;;  %vm23048_vm10 = vmmov %vm23044_vm6 }
 0x696   : > { %v9329_v54 = vsel %vm9293_vm13, %v9041_v26, 0.0  ;;  %v10071_v59 = vrot.slane %v10069_v52, 1  ;;  %v9010_v58 = vadd.f32 %v21126_v32, %v20998_v18  ;;  %v9008_v35 = vadd.f32 %v21126_v32, %v21001_v2 }
 0x697   : > { %v9694_v5 = vor.u32 %v9693_v6, %v9690_v49  ;;  %v14618_v25 = vpack.c.bf16 %v9329_v54, %v9329_v54  ;;  %v9720_v63 = vrot.slane %v9718_v13, 6  ;;  %v9723_v16 = vrot.slane %v9721_v34, 7 }
 0x698   : > { %v10073_v57 = vshrl.u32 %v21099_v9, 16  ;;  %vm9299_vm5 = vcmp.eq.s32.totalorder %v21111_v41, 1  ;;  %vm9297_vm13 = vcmp.eq.s32.totalorder %v21089_v39, 1  ;;  %v10072_v27 = vsel %vm23043_vm8, %v10067_v53, %v10071_v59 }
 0x699   : > { %v9695_v50 = vsel %vm22632_vm15, %v9686_v44, %v9694_v5  ;;  %v9696_v23 = vrot.slane %v9694_v5, 4  ;;  %v9698_v40 = vshrl.u32 %v14618_v25, 16  ;;  %v9701_v60 = vshll.u32 %v14618_v25, 16  ;;  %15873 = vmatmul.mubr.msk.bf16.gmra.mrb[44].mxu0 %vm23044_vm6, %v10072_v27 }
 0x69a   : > { %9870 = vst.msk [vmem:[#allocation4 + $0x68] sm:$0xf] %vm23042_vm4, %v9695_v50  ;;  %v21140_v18 = vor.u32 %v9723_v16, %v9720_v63  ;;  %v9046_v43 = vmax.f32 %v9010_v58, 0.0  ;;  %v9044_v2 = vmax.f32 %v9008_v35, 0.0  ;;  %v10075_v44 = vor.u32 %v10073_v57, %v10071_v59 }
 0x69b   : > { %v9700_v51 = vrot.slane %v9698_v40, 6  ;;  %v9703_v37 = vrot.slane %v9701_v60, 7  ;;  %v10077_v62 = vshll.u32 %v21130_v14, 16  ;;  %v9011_v42 = vadd.f32 %v21126_v32, %v21011_v61 }
 0x69c   : > { %v9725_v11 = vsel %vm22632_vm15, %v9716_v24, %v21140_v18  ;;  %v9726_v8 = vrot.slane %v21140_v18, 4  ;;  %v9334_v4 = vsel %vm9298_vm12, %v9046_v43, 0.0  ;;  %v9332_v28 = vsel %vm9296_vm14, %v9044_v2, 0.0  ;;  %vm23046_vm12 = vmmov %vm23028_vm2  ;;  %v21169_v24 = vpop.permute.xlu1 %9266 }
 0x69d   : > { %9873 = vst.msk [vmem:[#allocation4 + $0x74] sm:$0xf] %vm23045_vm9, %v9725_v11  ;;  %v9704_v12 = vor.u32 %v9703_v37, %v9700_v51  ;;  %v14623_v0 = vpack.c.bf16 %v9334_v4, %v9334_v4  ;;  %v14621_v19 = vpack.c.bf16 %v9332_v28, %v9332_v28  ;;  %v10079_v31 = vrot.slane %v10077_v62, 1  ;;  %vm23047_vm2 = vmmov %vm23043_vm8 }
 0x69e   : > { %v9009_v10 = vadd.f32 %v21126_v32, %v21019_v21  ;;  %v10081_v26 = vshrl.u32 %v21130_v14, 16  ;;  %v10085_v56 = vshll.u32 %v21143_v7, 16  ;;  %vm9300_vm7 = vcmp.eq.s32.totalorder %v21121_v17, 1 }
 0x69f   : > { %v9705_v3 = vsel %vm22632_vm15, %v9696_v23, %v9704_v12  ;;  %v9706_v53 = vrot.slane %v9704_v12, 4  ;;  %v9748_v1 = vshrl.u32 %v14623_v0, 16  ;;  %v9751_v49 = vshll.u32 %v14623_v0, 16 }
 0x6a0   : > { %vm9302_vm14 = vcmp.eq.s32.totalorder %v9264_v55, 1  ;;  %9871 = vst.msk [vmem:[#allocation4 + $0x6c] sm:$0xf] %vm23046_vm12, %v9705_v3  ;;  %v9728_v6 = vshrl.u32 %v14621_v19, 16  ;;  %v9731_v61 = vshll.u32 %v14621_v19, 16  ;;  %v10080_v52 = vsel %vm23047_vm2, %v10075_v44, %v10079_v31  ;;  %vm23052_vm12 = vmmov %vm23042_vm4 }
 0x6a1   : > { %v9047_v21 = vmax.f32 %v9011_v42, 0.0  ;;  %v9715_v13 = vsel %vm22632_vm15, %v9706_v53, %v21109_v33  ;;  %v9750_v34 = vrot.slane %v9748_v1, 6  ;;  %v9753_v54 = vrot.slane %v9751_v49, 7  ;;  %15876 = vmatprep.mubr.msk.bf16.mxu0 %vm23048_vm10, %v10080_v52  ;;  %v21180_v33 = vld [vmem:[#allocation4 + $0x48] sm:$0xff]   ;;  %v21205_v52 = vld [vmem:[#allocation4 + $0x50] sm:$0xff]  }
 0x6a2   : > { %v9045_v5 = vmax.f32 %v9009_v10, 0.0  ;;  %9872 = vst.msk [vmem:[#allocation4 + $0x70] sm:$0xf] %vm23042_vm4, %v9715_v13  ;;  %v9730_v25 = vrot.slane %v9728_v6, 6  ;;  %v9733_v59 = vrot.slane %v9731_v61, 7  ;;  %v10083_v63 = vor.u32 %v10081_v26, %v10079_v31 }
 0x6a3   : > { %v9335_v58 = vsel %vm9299_vm5, %v9047_v21, 0.0  ;;  %v9754_v16 = vor.u32 %v9753_v54, %v9750_v34  ;;  %v10087_v50 = vrot.slane %v10085_v56, 1  ;;  %vm9303_vm8 = vcmp.eq.s32.totalorder %v21169_v24, 1  ;;  %vm23049_vm5 = vmmov %vm23047_vm2 }
 0x6a4   : > { %v14624_v35 = vpack.c.bf16 %v9335_v58, %v9335_v58  ;;  %v9333_v57 = vsel %vm9297_vm13, %v9045_v5, 0.0  ;;  %v9734_v23 = vor.u32 %v9733_v59, %v9730_v25  ;;  %v9014_v60 = vadd.f32 %v21126_v32, %v21035_v30  ;;  %vm23050_vm13 = vmmov %vm23044_vm6 }
 0x6a5   : > { %v14622_v40 = vpack.c.bf16 %v9333_v57, %v9333_v57  ;;  %v9012_v41 = vadd.f32 %v21126_v32, %v21038_v48  ;;  %v9756_v18 = vrot.slane %v9754_v16, 4  ;;  %v10088_v2 = vsel %vm23049_vm5, %v10083_v63, %v10087_v50  ;;  %vm23051_vm6 = vmmov %vm23042_vm4 }
 0x6a6   : > { %v9758_v27 = vshrl.u32 %v14624_v35, 16  ;;  %v9761_v43 = vshll.u32 %v14624_v35, 16  ;;  %v9735_v39 = vsel %vm22632_vm15, %v9726_v8, %v9734_v23  ;;  %v9736_v51 = vrot.slane %v9734_v23, 4  ;;  %15877 = vmatmul.mubr.msk.bf16.gmra.mrb[48].mxu0 %vm23050_vm13, %v10088_v2  ;;  %v21218_v23 = vld [vmem:[#allocation4 + $0x58] sm:$0xff]   ;;  %v21222_v2 = vld [vmem:[#allocation4 + $0x60] sm:$0xff]   ;;  %vm23059_vm13 = vmmov %vm23042_vm4 }
 0x6a7   : > { %v9738_v37 = vshrl.u32 %v14622_v40, 16  ;;  %v9741_v44 = vshll.u32 %v14622_v40, 16  ;;  %9874 = vst.msk [vmem:[#allocation4 + $0x78] sm:$0xf] %vm23051_vm6, %v9735_v39  ;;  %v9050_v11 = vmax.f32 %v9014_v60, 0.0  ;;  %v9048_v4 = vmax.f32 %v9012_v41, 0.0 }
 0x6a8   : > { %v9760_v62 = vrot.slane %v9758_v27, 6  ;;  %v9763_v30 = vrot.slane %v9761_v43, 7  ;;  %v10089_v12 = vshrl.u32 %v21143_v7, 16  ;;  %v10093_v0 = vshll.u32 %v21180_v33, 16 }
 0x6a9   : > { %v9740_v48 = vrot.slane %v9738_v37, 6  ;;  %v9743_v28 = vrot.slane %v9741_v44, 7  ;;  %v9338_v8 = vsel %vm9302_vm14, %v9050_v11, 0.0  ;;  %v9336_v31 = vsel %vm9300_vm7, %v9048_v4, 0.0  ;;  %vm23053_vm7 = vmmov %vm23042_vm4  ;;  %v9882_v4 = vld [vmem:[#allocation4 + $0x98] sm:$0x3] }
 0x6aa   : > { %v9764_v19 = vor.u32 %v9763_v30, %v9760_v62  ;;  %v9015_v42 = vadd.f32 %v21126_v32, %v21046_v36  ;;  %vm9301_vm9 = vcmp.eq.s32.totalorder %v21145_v47, 1  ;;  %v14627_v26 = vpack.c.bf16 %v9338_v8, %v9338_v8  ;;  %vm23054_vm14 = vmmov %vm23047_vm2  ;;  %v21229_v30 = vld [vmem:[#allocation4 + $0x68] sm:$0xff]  }
 0x6ab   : > { %v9744_v10 = vor.u32 %v9743_v28, %v9740_v48  ;;  %v14625_v56 = vpack.c.bf16 %v9336_v31, %v9336_v31  ;;  %v10091_v3 = vor.u32 %v10089_v12, %v10087_v50  ;;  %v10095_v49 = vrot.slane %v10093_v0, 1  ;;  %vm23055_vm2 = vmmov %vm23048_vm10  ;;  %v21237_v31 = vld [vmem:[#allocation4 + $0x70] sm:$0xff]  }
 0x6ac   : > { %v9765_v53 = vsel %vm22632_vm15, %v9756_v18, %v9764_v19  ;;  %v9766_v1 = vrot.slane %v9764_v19, 4  ;;  %v9051_v6 = vmax.f32 %v9015_v42, 0.0  ;;  %v9788_v61 = vshrl.u32 %v14627_v26, 16  ;;  %vm23056_vm10 = vmmov %vm23042_vm4 }
 0x6ad   : > { %9877 = vst.msk [vmem:[#allocation4 + $0x84] sm:$0xf] %vm23052_vm12, %v9765_v53  ;;  %v9745_v17 = vsel %vm22632_vm15, %v9736_v51, %v9744_v10  ;;  %v9746_v55 = vrot.slane %v9744_v10, 4  ;;  %v9791_v36 = vshll.u32 %v14627_v26, 16  ;;  %v9768_v21 = vshrl.u32 %v14625_v56, 16 }
 0x6ae   : > { %9875 = vst.msk [vmem:[#allocation4 + $0x7c] sm:$0xf] %vm23053_vm7, %v9745_v17  ;;  %v9771_v13 = vshll.u32 %v14625_v56, 16  ;;  %v10096_v34 = vsel %vm23054_vm14, %v10091_v3, %v10095_v49  ;;  %v9339_v54 = vsel %vm9303_vm8, %v9051_v6, 0.0  ;;  %v9790_v25 = vrot.slane %v9788_v61, 6  ;;  %vm23057_vm8 = vmmov %vm23049_vm5 }
 0x6af   : > { %v9755_v5 = vsel %vm22632_vm15, %v9746_v55, %v9754_v16  ;;  %v9793_v59 = vrot.slane %v9791_v36, 7  ;;  %15880 = vmatprep.mubr.msk.bf16.mxu0 %vm23055_vm2, %v10096_v34  ;;  %v14628_v58 = vpack.c.bf16 %v9339_v54, %v9339_v54  ;;  %v9770_v63 = vrot.slane %v9768_v21, 6  ;;  %vm23058_vm5 = vmmov %vm23055_vm2 }
 0x6b0   : > { %9876 = vst.msk [vmem:[#allocation4 + $0x80] sm:$0xf] %vm23056_vm10, %v9755_v5  ;;  %v9773_v35 = vrot.slane %v9771_v13, 7  ;;  %v9013_v57 = vadd.f32 %v21126_v32, %v21050_v29  ;;  %v10097_v50 = vshrl.u32 %v21180_v33, 16  ;;  %v10101_v16 = vshll.u32 %v21205_v52, 16  ;;  %vm23060_vm6 = vmmov %vm23057_vm8 }
 0x6b1   : > { %v9794_v24 = vor.u32 %v9793_v59, %v9790_v25  ;;  %v9798_v40 = vshrl.u32 %v14628_v58, 16  ;;  %v9801_v60 = vshll.u32 %v14628_v58, 16  ;;  %v10105_v43 = vshrl.u32 %v21205_v52, 16  ;;  %vm23062_vm12 = vmmov %vm23060_vm6 }
 0x6b2   : > { %v9774_v41 = vor.u32 %v9773_v35, %v9770_v63  ;;  %v9049_v18 = vmax.f32 %v9013_v57, 0.0  ;;  %v10099_v27 = vor.u32 %v10097_v50, %v10095_v49  ;;  %v10103_v29 = vrot.slane %v10101_v16, 1  ;;  %vm23063_vm7 = vmmov %vm23060_vm6 }
 0x6b3   : > { %v9796_v39 = vrot.slane %v9794_v24, 4  ;;  %v9800_v51 = vrot.slane %v9798_v40, 6  ;;  %v9803_v37 = vrot.slane %v9801_v60, 7  ;;  %v10109_v62 = vshll.u32 %v21218_v23, 16  ;;  %vm23065_vm14 = vmmov %vm23055_vm2 }
 0x6b4   : > { %v9775_v32 = vsel %vm22632_vm15, %v9766_v1, %v9774_v41  ;;  %v9337_v44 = vsel %vm9301_vm9, %v9049_v18, 0.0  ;;  %v10104_v28 = vsel %vm23057_vm8, %v10099_v27, %v10103_v29  ;;  %v10107_v12 = vor.u32 %v10105_v43, %v10103_v29  ;;  %vm23061_vm9 = vmmov %vm23055_vm2 }
 0x6b5   : > { %9878 = vst.msk [vmem:[#allocation4 + $0x88] sm:$0xf] %vm23042_vm4, %v9775_v32  ;;  %v9804_v11 = vor.u32 %v9803_v37, %v9800_v51  ;;  %v14626_v48 = vpack.c.bf16 %v9337_v44, %v9337_v44  ;;  %15881 = vmatmul.mubr.msk.bf16.gmra.mrb[52].mxu0 %vm23058_vm5, %v10104_v28  ;;  %v10111_v0 = vrot.slane %v10109_v62, 1  ;;  %v10113_v19 = vshrl.u32 %v21218_v23, 16  ;;  %v21241_v3 = vld [vmem:[#allocation4 + $0x78] sm:$0xff]   ;;  %vm23070_vm5 = vmmov %vm23055_vm2 }
 0x6b6   : > { %v10117_v47 = vshll.u32 %v21222_v2, 16  ;;  %v10121_v8 = vshrl.u32 %v21222_v2, 16  ;;  %v10125_v6 = vshll.u32 %v21229_v30, 16  ;;  %v9776_v17 = vrot.slane %v9774_v41, 4 }
 0x6b7   : > { %v9805_v42 = vsel %vm22632_vm15, %v9796_v39, %v9804_v11  ;;  %v9806_v10 = vrot.slane %v9804_v11, 4  ;;  %v9778_v26 = vshrl.u32 %v14626_v48, 16  ;;  %v9781_v56 = vshll.u32 %v14626_v48, 16  ;;  %v21258_v57 = vld [vmem:[#allocation4 + $0x80] sm:$0xff]  }
 0x6b8   : > { %9881 = vst.msk [vmem:[#allocation4 + $0x94] sm:$0xf] %vm23059_vm13, %v9805_v42  ;;  %v10112_v53 = vsel %vm23060_vm6, %v10107_v12, %v10111_v0  ;;  %v10115_v1 = vor.u32 %v10113_v19, %v10111_v0  ;;  %v10119_v49 = vrot.slane %v10117_v47, 1  ;;  %v10127_v13 = vrot.slane %v10125_v6, 1  ;;  %v21281_v12 = vld [vmem:[#allocation4 + $0xc] sm:$0xf] }
 0x6b9   : > { %v9883_v55 = vsel %vm22628_vm3, %v9806_v10, %v9882_v4  ;;  %v9780_v61 = vrot.slane %v9778_v26, 6  ;;  %v9783_v36 = vrot.slane %v9781_v56, 7  ;;  %15884 = vmatprep.mubr.msk.bf16.mxu0 %vm23061_vm9, %v10112_v53  ;;  %v10133_v34 = vshll.u32 %v21237_v31, 16  ;;  %vm23064_vm3 = vmmov %vm23042_vm4  ;;  %v10942_v47 = vld [vmem:[#allocation4 + $0x8] sm:$0xe]  ;;  %v21288_v42 = vld [vmem:[#allocation4 + $0x10] sm:$0xff]  }
 0x6ba   : > { %9884 = vst [vmem:[#allocation4 + $0x98] sm:$0x3] %v9883_v55  ;;  %v10123_v21 = vor.u32 %v10121_v8, %v10119_v49  ;;  %v10120_v5 = vsel %vm23062_vm12, %v10115_v1, %v10119_v49  ;;  %v10141_v59 = vshll.u32 %v21241_v3, 16  ;;  %v10129_v63 = vshrl.u32 %v21229_v30, 16  ;;  %vm23066_vm10 = vmmov %vm23064_vm3  ;;  %v21290_v10 = vld [vmem:[#allocation4 + $0x18] sm:$0xff]   ;;  %v21292_v26 = vld [vmem:[#allocation4 + $0x20] sm:$0xff]  }
 0x6bb   : > { %v9784_v54 = vor.u32 %v9783_v36, %v9780_v61  ;;  %v10135_v35 = vrot.slane %v10133_v34, 1  ;;  %v10137_v60 = vshrl.u32 %v21237_v31, 16  ;;  %v10149_v18 = vshll.u32 %v21258_v57, 16  ;;  %vm23067_vm4 = vmmov %vm23060_vm6  ;;  %v21295_v53 = vld [vmem:[#allocation4 + $0x28] sm:$0xff]   ;;  %v21302_v55 = vld [vmem:[#allocation4 + $0x30] sm:$0xff]  }
 0x6bc   : > { %v10128_v25 = vsel %vm23063_vm7, %v10123_v21, %v10127_v13  ;;  %v10131_v40 = vor.u32 %v10129_v63, %v10127_v13  ;;  %v10143_v16 = vrot.slane %v10141_v59, 1  ;;  %vm23068_vm8 = vmmov %vm23067_vm4  ;;  %v10145_v39 = vshrl.u32 %v21241_v3, 16  ;;  %v21309_v34 = vld [vmem:[#allocation4 + $0x38] sm:$0xff]  }
 0x6bd   : > { %v9785_v45 = vsel %vm22632_vm15, %v9776_v17, %v9784_v54  ;;  %v9786_v58 = vrot.slane %v9784_v54, 4  ;;  %15885 = vmatmul.mubr.msk.bf16.gmra.mrb[56].mxu0 %vm23065_vm14, %v10120_v5  ;;  %v10139_v41 = vor.u32 %v10137_v60, %v10135_v35  ;;  %v10151_v22 = vrot.slane %v10149_v18, 1  ;;  %vm23071_vm13 = vmmov %vm23067_vm4 }
 0x6be   : > { %9879 = vst.msk [vmem:[#allocation4 + $0x8c] sm:$0xf] %vm23064_vm3, %v9785_v45  ;;  %15888 = vmatprep.mubr.msk.bf16.mxu0 %vm23055_vm2, %v10128_v25  ;;  %v10136_v27 = vsel %vm23067_vm4, %v10131_v40, %v10135_v35  ;;  %v10153_v32 = vshrl.u32 %v21258_v57, 16  ;;  %vm23072_vm6 = vmmov %vm23067_vm4  ;;  %v21286_v8 = vcombine.low %v10942_v47, %v21281_v12  ;;  %v11401_v6 = vshrl.u32 %v21288_v42, 16 }
 0x6bf   : > { %v9795_v50 = vsel %vm22632_vm15, %v9786_v58, %v9794_v24  ;;  %v10144_v43 = vsel %vm23068_vm8, %v10139_v41, %v10143_v16  ;;  %vm23069_vm15 = vmmov %vm23055_vm2  ;;  %v10147_v24 = vor.u32 %v10145_v39, %v10143_v16  ;;  %v11404_v17 = vshll.u32 %v21288_v42, 16 }
 0x6c0   : > { %9880 = vst.msk [vmem:[#allocation4 + $0x90] sm:$0xf] %vm23066_vm10, %v9795_v50  ;;  %v10155_v62 = vor.u32 %v10153_v32, %v10151_v22  ;;  %vm23073_vm9 = vmmov %vm23055_vm2  ;;  %v11393_v1 = vshrl.u32 %v21286_v8, 16  ;;  %v11396_v49 = vshll.u32 %v21286_v8, 16  ;;  %v11410_v36 = vshrl.u32 %v21290_v10, 16  ;;  %v21313_v50 = vld [vmem:[#allocation4 + $0x40] sm:$0xff]  }
 0x6c1   : > { %v10152_v11 = vsel %vm23071_vm13, %v10147_v24, %v10151_v22  ;;  %vm23074_vm12 = vmmov %vm23055_vm2  ;;  %v11413_v21 = vshll.u32 %v21290_v10, 16  ;;  %v11419_v13 = vshrl.u32 %v21292_v26, 16  ;;  %v11403_v5 = vrot.slane %v11401_v6, 1  ;;  %v21320_v22 = vld [vmem:[#allocation4 + $0x50] sm:$0xff]   ;;  %v21342_v6 = vld [vmem:[#allocation4 + $0x60] sm:$0xff]  }
 0x6c2   : > { %vm23075_vm7 = vmmov %vm23067_vm4  ;;  %v11395_v61 = vrot.slane %v11393_v1, 1  ;;  %v11398_v54 = vrot.slane %v11396_v49, 2  ;;  %v11406_v25 = vrot.slane %v11404_v17, 2  ;;  %v11422_v59 = vshll.u32 %v21292_v26, 16  ;;  %v21338_v49 = vld [vmem:[#allocation4 + $0x8] sm:$0xff]   ;;  %23085 = vst [vmem:[#allocation30_spill] sm:$0xff] %v21342_v6 }
 0x6c3   : > { %vm23076_vm3 = vmmov %vm23055_vm2  ;;  %v11412_v45 = vrot.slane %v11410_v36, 1  ;;  %v11415_v58 = vrot.slane %v11413_v21, 2  ;;  %v11421_v63 = vrot.slane %v11419_v13, 1  ;;  %v11428_v35 = vshrl.u32 %v21295_v53, 16  ;;  %v21347_v13 = vld [vmem:[#allocation4 + $0x10] sm:$0xff]  }
 0x6c4   : > { %vm23077_vm14 = vmmov %vm23055_vm2  ;;  %v11399_v40 = vor.u32 %v11398_v54, %v11395_v61  ;;  %v11407_v60 = vor.u32 %v11406_v25, %v11403_v5  ;;  %v11424_v16 = vrot.slane %v11422_v59, 2  ;;  %v11431_v41 = vshll.u32 %v21295_v53, 16 }
 0x6c5   : > { %v21269_v51 = vld [vmem:[#allocation4 + $0x88] sm:$0xff]   ;;  %15889 = vmatmul.mubr.msk.bf16.gmra.mrb[60].mxu0 %vm23069_vm15, %v10136_v27  ;;  %v11416_v18 = vor.u32 %v11415_v58, %v11412_v45  ;;  %v11430_v27 = vrot.slane %v11428_v35, 1  ;;  %v11440_v39 = vshll.u32 %v21302_v55, 16  ;;  %vm23078_vm2 = vsmask.f32 6400  ;;  %vm23084_vm8 = vmmov %vm23076_vm3 }
 0x6c6   : > { %15892 = vmatprep.mubr.msk.bf16.mxu0 %vm23070_vm5, %v10144_v43  ;;  %v10157_v37 = vshll.u32 %v21269_v51, 16  ;;  %v10161_v28 = vshrl.u32 %v21269_v51, 16  ;;  %v11437_v43 = vshrl.u32 %v21302_v55, 16  ;;  %v21323_v24 = vsel %vm23078_vm2, %v11399_v40, %v11407_v60  ;;  %vm23080_vm10 = vmmov %vm23078_vm2  ;;  %v21357_v45 = vld [vmem:[#allocation4 + $0x68] sm:$0xff]  }
 0x6c7   : > { %v21274_v29 = vld [vmem:[#allocation4 + $0x90] ss:$0 sps:$4 sm:$0x11]   ;;  %23079 = vst [vmem:[#allocation18_spill] sm:$0xff] %v21323_v24  ;;  %v11433_v32 = vrot.slane %v11431_v41, 2  ;;  %vm23082_vm4 = vmmov %vm23078_vm2  ;;  %v11455_v1 = vshrl.u32 %v21313_v50, 16 }
 0x6c8   : > { %v10159_v44 = vrot.slane %v10157_v37, 1  ;;  %v10165_v4 = vshll.u32 %v21274_v29, 16  ;;  %v11425_v37 = vor.u32 %v11424_v16, %v11421_v63  ;;  %v11458_v36 = vshll.u32 %v21313_v50, 16  ;;  %vm23086_vm15 = vmmov %vm23076_vm3  ;;  %23089 = vst [vmem:[#allocation33_spill] sm:$0xff] %v21357_v45 }
 0x6c9   : > { %v11434_v47 = vor.u32 %v11433_v32, %v11430_v27  ;;  %vm23087_vm5 = vmmov %vm23078_vm2  ;;  %v11457_v5 = vrot.slane %v11455_v1, 1  ;;  %v11473_v59 = vshrl.u32 %v21320_v22, 16  ;;  %v11476_v16 = vshll.u32 %v21320_v22, 16  ;;  %v21371_v32 = vld [vmem:[#allocation4 + $0x78] sm:$0xff]  }
 0x6ca   : > { %v10160_v48 = vsel %vm23072_vm6, %v10155_v62, %v10159_v44  ;;  %v10163_v0 = vor.u32 %v10161_v28, %v10159_v44  ;;  %v10167_v19 = vrot.slane %v10165_v4, 1  ;;  %v11446_v44 = vshrl.u32 %v21309_v34, 16  ;;  %v21326_v62 = vld [vmem:[#allocation10 + $0x18] sm:$0xff]   ;;  %vm23090_vm13 = vmmov %vm23078_vm2  ;;  %23095 = vst [vmem:[#allocation24_spill] sm:$0xff] %v21371_v32 }
 0x6cb   : > { %v11439_v4 = vrot.slane %v11437_v43, 1  ;;  %v11449_v28 = vshll.u32 %v21309_v34, 16  ;;  %v21352_v54 = vsel %vm23087_vm5, %v11425_v37, %v11434_v47  ;;  %v11460_v63 = vrot.slane %v11458_v36, 2  ;;  %vm23093_vm6 = vmmov %vm23078_vm2 }
 0x6cc   : > { %v10168_v56 = vsel %vm23075_vm7, %v10163_v0, %v10167_v19  ;;  %v21332_v0 = vld [vmem:[#allocation4 + $0x58] sm:$0xff]   ;;  %v21335_v19 = vsel %vm23082_vm4, %v11416_v18, %v11425_v37  ;;  %23088 = vst [vmem:[#allocation31_spill] sm:$0xff] %v21352_v54  ;;  %v11491_v37 = vshrl.u32 %v21342_v6, 16  ;;  %vm23101_vm7 = vmmov %vm23076_vm3 }
 0x6cd   : > { %15893 = vmatmul.mubr.msk.bf16.gmra.mrb[64].mxu0 %vm23073_vm9, %v10152_v11  ;;  %v21329_v11 = vsel %vm23080_vm10, %v11407_v60, %v11416_v18  ;;  %23083 = vst [vmem:[#allocation29_spill] sm:$0xff] %v21335_v19  ;;  %v11451_v61 = vrot.slane %v11449_v28, 2  ;;  %v11475_v60 = vrot.slane %v11473_v59, 1  ;;  %v11482_v41 = vshrl.u32 %v21332_v0, 16  ;;  %v21364_v18 = vld [vmem:[#allocation4 + $0x70] sm:$0xff]   ;;  %vm23096_vm9 = vmmov %vm23078_vm2  ;;  %v21384_v59 = vld [vmem:[#allocation4 + $0x18] sm:$0xff]  }
 0x6ce   : > { %15896 = vmatprep.mubr.msk.bf16.mxu0 %vm23074_vm12, %v10160_v48  ;;  %23081 = vst [vmem:[#allocation26_spill] sm:$0xff] %v21329_v11  ;;  %v11442_v48 = vrot.slane %v11440_v39, 2  ;;  %23092 = vst [vmem:[#allocation23_spill] sm:$0xff] %v21364_v18  ;;  %v11461_v43 = vor.u32 %v11460_v63, %v11457_v5  ;;  %v11485_v39 = vshll.u32 %v21332_v0, 16  ;;  %v11494_v28 = vshll.u32 %v21342_v6, 16 }
 0x6cf   : > { %v11493_v1 = vrot.slane %v11491_v37, 1  ;;  %vm23099_vm12 = vmmov %vm23078_vm2  ;;  %v11518_v37 = vshrl.u32 %v21371_v32, 16 }
 0x6d0   : > { %v11443_v17 = vor.u32 %v11442_v48, %v11439_v4  ;;  %v11478_v4 = vrot.slane %v11476_v16, 2  ;;  %v11484_v48 = vrot.slane %v11482_v41, 1  ;;  %v11496_v5 = vrot.slane %v11494_v28, 2  ;;  %vm23107_vm10 = vmmov %vm23078_vm2 }
 0x6d1   : > { %v11512_v16 = vshll.u32 %v21364_v18, 16  ;;  %vm23109_vm4 = vmmov %vm23078_vm2 }
 0x6d2   : > { %v21360_v58 = vsel %vm23090_vm13, %v11434_v47, %v11443_v17  ;;  %vm23114_vm5 = vmmov %vm23078_vm2 }
 0x6d3   : > { %23091 = vst [vmem:[#allocation22_spill] sm:$0xff] %v21360_v58  ;;  %v11514_v28 = vrot.slane %v11512_v16, 2  ;;  %vm23116_vm13 = vmmov %vm23076_vm3 }
 0x6d5   : > { %15897 = vmatmul.mubr.msk.bf16.gmra.mrb[68].mxu0 %vm23076_vm3, %v10168_v56  ;;  %v11448_v56 = vrot.slane %v11446_v44, 1 }
 0x6d6   : > { %15902 = vmatprep.mubr.msk.bf16.mxu0 %vm23077_vm14, %v20782_v15  ;;  %v21316_v15 = vld [vmem:[#allocation4 + $0x48] sm:$0xff]   ;;  %vm23104_vm14 = vmmov %vm23078_vm2 }
 0x6d7   : > { %v11464_v21 = vshrl.u32 %v21316_v15, 16  ;;  %v11467_v25 = vshll.u32 %v21316_v15, 16 }
 0x6d9   : > { %v11466_v35 = vrot.slane %v11464_v21, 1  ;;  %v11469_v40 = vrot.slane %v11467_v25, 2  ;;  %v11479_v21 = vor.u32 %v11478_v4, %v11475_v60  ;;  %v11503_v25 = vshll.u32 %v21357_v45, 16  ;;  %v21394_v60 = vld [vmem:[#allocation4 + $0x90] sm:$0xff]  }
 0x6da   : > { %23103 = vst [vmem:[#allocation32_spill] sm:$0xff] %v21394_v60  ;;  %v11545_v16 = vshrl.u32 %v21394_v60, 16 }
 0x6db   : > { %v11470_v44 = vor.u32 %v11469_v40, %v11466_v35  ;;  %v11509_v40 = vshrl.u32 %v21364_v18, 16 }
 0x6dd   : > { %15903 = vmatmul.mubr.msk.bf16.vlgmr.msra.gmra.mrb[36].mxu0 %vm23084_vm8, %v21338_v49  ;;  %v21381_v36 = vsel %vm23099_vm12, %v11461_v43, %v11470_v44  ;;  %v21397_v41 = vsel %vm23104_vm14, %v11470_v44, %v11479_v21  ;;  %vm23111_vm8 = vmmov %vm23078_vm2  ;;  %vm23122_vm12 = vcmask 1045504  }
 0x6de   : > { %15939 = vmatpush3.bf16.msra.mxu0 %v21003_v38  ;;  %15906 = vmatprep.mubr.msk.bf16.mxu0 %vm23086_vm15, %v21347_v13  ;;  %v11452_v38 = vor.u32 %v11451_v61, %v11448_v56  ;;  %v11487_v56 = vrot.slane %v11485_v39, 2  ;;  %v21378_v61 = vld [vmem:[#allocation4 + $0x80] sm:$0xff]   ;;  %23100 = vst [vmem:[#allocation28_spill] sm:$0xff] %v21381_v36  ;;  %23105 = vst [vmem:[#allocation34_spill] sm:$0xff] %v21397_v41  ;;  %v11505_v39 = vrot.slane %v11503_v25, 2  ;;  %v11520_v36 = vrot.slane %v11518_v37, 1 }
 0x6df   : > { %15976 = vmatprep.subr.bf16.mxu0 %v21326_v62  ;;  %23098 = vst [vmem:[#allocation27_spill] sm:$0xff] %v21378_v61  ;;  %vm23113_vm15 = vmmov %vm23076_vm3 }
 0x6e0   : > { %v21367_v27 = vsel %vm23093_vm6, %v11443_v17, %v11452_v38  ;;  %v21375_v47 = vsel %vm23096_vm9, %v11452_v38, %v11461_v43  ;;  %v11500_v17 = vshrl.u32 %v21357_v45, 16  ;;  %v21388_v38 = vld [vmem:[#allocation4 + $0x88] sm:$0xff]   ;;  %v11488_v63 = vor.u32 %v11487_v56, %v11484_v48  ;;  %vm23117_vm6 = vmmov %vm23078_vm2 }
 0x6e1   : > { %23094 = vst [vmem:[#allocation20_spill] sm:$0xff] %v21367_v27  ;;  %23097 = vst [vmem:[#allocation25_spill] sm:$0xff] %v21375_v47  ;;  %v11497_v43 = vor.u32 %v11496_v5, %v11493_v1  ;;  %v11511_v48 = vrot.slane %v11509_v40, 1  ;;  %v11521_v56 = vshll.u32 %v21371_v32, 16  ;;  %v11527_v47 = vshrl.u32 %v21378_v61, 16 }
 0x6e2   : > { %23102 = vst [vmem:[#allocation35_spill] sm:$0xff] %v21388_v38  ;;  %v11502_v35 = vrot.slane %v11500_v17, 1  ;;  %v21401_v4 = vsel %vm23078_vm2, %v11479_v21, %v11488_v63  ;;  %v11530_v1 = vshll.u32 %v21378_v61, 16  ;;  %v11536_v5 = vshrl.u32 %v21388_v38, 16  ;;  %vm23119_vm9 = vmmov %vm23078_vm2 }
 0x6e3   : > { %23106 = vst [vmem:[#allocation21_spill] sm:$0xff] %v21401_v4  ;;  %v21405_v17 = vsel %vm23107_vm10, %v11488_v63, %v11497_v43  ;;  %v11515_v44 = vor.u32 %v11514_v28, %v11511_v48  ;;  %v11523_v41 = vrot.slane %v11521_v56, 2  ;;  %v11529_v25 = vrot.slane %v11527_v47, 1 }
 0x6e4   : > { %23108 = vst [vmem:[#allocation19_spill] sm:$0xff] %v21405_v17  ;;  %v11539_v40 = vshll.u32 %v21388_v38, 16  ;;  %v11538_v37 = vrot.slane %v11536_v5, 1  ;;  %v11547_v28 = vrot.slane %v11545_v16, 1  ;;  %v11548_v56 = vshll.u32 %v21394_v60, 16 }
 0x6e5   : > { %15907 = vmatmul.mubr.msk.bf16.gmra.mrb[40].mxu0 %vm23101_vm7, %v21384_v59  ;;  %v11835_v17 = vld [vmem:[#allocation4 + $0x8] sm:$0xc]  ;;  %vm23124_vm7 = vmmov %vm23122_vm12  ;;  %v11851_v16 = vrot.slane %v21302_v55, 2 }
 0x6e6   : > { %15910 = vmatprep.mubr.msk.bf16.mxu0 %vm23076_vm3, %v21043_v20  ;;  %v11506_v20 = vor.u32 %v11505_v39, %v11502_v35  ;;  %v11524_v35 = vor.u32 %v11523_v41, %v11520_v36  ;;  %v11532_v39 = vrot.slane %v11530_v1, 2  ;;  %v11541_v48 = vrot.slane %v11539_v40, 2  ;;  %vm23126_vm3 = vmmov %vm23078_vm2 }
 0x6e7   : > { %v11550_v41 = vrot.slane %v11548_v56, 2  ;;  %v11845_v40 = vrot.slane %v21290_v10, 2  ;;  %vm23128_vm14 = vmmov %vm23124_vm7  ;;  %v11857_v56 = vrot.slane %v21316_v15, 2 }
 0x6e8   : > { %v21411_v21 = vsel %vm23109_vm4, %v11497_v43, %v11506_v20  ;;  %v21416_v63 = vsel %vm23111_vm8, %v11506_v20, %v11515_v44  ;;  %v21422_v47 = vsel %vm23114_vm5, %v11515_v44, %v11524_v35  ;;  %v11533_v43 = vor.u32 %v11532_v39, %v11529_v25  ;;  %vm23130_vm2 = vmmov %vm23124_vm7 }
 0x6e9   : > { %23110 = vst [vmem:[#allocation36_spill] sm:$0xff] %v21411_v21  ;;  %23112 = vst [vmem:[#allocation37_spill] sm:$0xff] %v21416_v63  ;;  %v14418_v21 = vcombine.low %v11835_v17, %v21281_v12  ;;  %v11542_v36 = vor.u32 %v11541_v48, %v11538_v37  ;;  %v11843_v20 = vrot.slane %v21288_v42, 2  ;;  %v21435_v44 = vor.u32 %v11550_v41, %v11547_v28 }
 0x6ea   : > { %23115 = vst [vmem:[#allocation38_spill] sm:$0xff] %v21422_v47  ;;  %v21429_v1 = vsel %vm23117_vm6, %v11524_v35, %v11533_v43  ;;  %v11847_v12 = vrot.slane %v21292_v26, 2  ;;  %v11849_v17 = vrot.slane %v21295_v53, 2  ;;  %v11853_v37 = vrot.slane %v21309_v34, 2  ;;  %vm23132_vm10 = vmmov %vm23130_vm2 }
 0x6eb   : > { %23118 = vst [vmem:[#allocation46_spill] sm:$0xff] %v21429_v1  ;;  %v11842_v5 = vrot.slane %v14418_v21, 2  ;;  %23121 = vst [vmem:[#allocation42_spill] sm:$0xff] %v21435_v44  ;;  %v21443_v25 = vsel %vm23124_vm7, %v11843_v20, %v11845_v40  ;;  %v21448_v21 = vsel %vm23126_vm3, %v11542_v36, %v21435_v44  ;;  %v11855_v28 = vrot.slane %v21313_v50, 2 }
 0x6ec   : > { %23125 = vst [vmem:[#allocation43_spill] sm:$0xff] %v21443_v25  ;;  %23127 = vst [vmem:[#allocation41_spill] sm:$0xff] %v21448_v21  ;;  %v21451_v35 = vsel %vm23128_vm14, %v11845_v40, %v11847_v12  ;;  %v21454_v39 = vsel %vm23130_vm2, %v11847_v12, %v11849_v17  ;;  %v21458_v48 = vsel %vm23132_vm10, %v11849_v17, %v11851_v16  ;;  %v11859_v41 = vrot.slane %v21320_v22, 2 }
 0x6ed   : > { %15911 = vmatmul.mubr.msk.bf16.gmra.mrb[44].mxu0 %vm23113_vm15, %v21057_v46  ;;  %v21433_v46 = vsel %vm23119_vm9, %v11533_v43, %v11542_v36  ;;  %23129 = vst [vmem:[#allocation44_spill] sm:$0xff] %v21451_v35  ;;  %23131 = vst [vmem:[#allocation45_spill] sm:$0xff] %v21454_v39  ;;  %v21462_v43 = vld [vmem:[#allocation4 + $0x98] ss:$0 sps:$4 sm:$0x33]   ;;  %v11865_v17 = vrot.slane %v21357_v45, 2 }
 0x6ee   : > { %15914 = vmatprep.mubr.msk.bf16.mxu0 %vm23116_vm13, %v21099_v9  ;;  %23120 = vst [vmem:[#allocation40_spill] sm:$0xff] %v21433_v46  ;;  %v21440_v9 = vsel %vm23122_vm12, %v11842_v5, %v11843_v20  ;;  %23133 = vst [vmem:[#allocation47_spill] sm:$0xff] %v21458_v48  ;;  %v11861_v20 = vrot.slane %v21332_v0, 2  ;;  %v11863_v5 = vrot.slane %v21342_v6, 2  ;;  %v21547_v35 = vld [vmem:[#allocation4 + $0x40] sm:$0xff]   ;;  %v21554_v46 = vld [vmem:[#allocation4 + $0x48] sm:$0xff]  }
 0x6ef   : > { %23123 = vst [vmem:[#allocation39_spill] sm:$0xff] %v21440_v9  ;;  %23134 = vst [vmem:[#allocation48_spill] sm:$0xff] %v21462_v43  ;;  %v12656_v54 = vshrl.u32 %v21547_v35, 16  ;;  %v12668_v19 = vshll.u32 %v21554_v46, 16  ;;  %v10635_v6 = vrot.slane %v21347_v13, 1  ;;  %v10637_v13 = vrot.slane %v21384_v59, 1 }
 0x6f0   : > { %vm23135_vm4 = vmmov %vm23130_vm2 }
 0x6f1   : > { %v21465_v36 = vsel %vm23135_vm4, %v11851_v16, %v11853_v37  ;;  %vm23137_vm8 = vmmov %vm23116_vm13  ;;  %v11867_v16 = vrot.slane %v21364_v18, 2 }
 0x6f2   : > { %23136 = vst [vmem:[#allocation49_spill] sm:$0xff] %v21465_v36  ;;  %vm23138_vm15 = vmmov %vm23130_vm2 }
 0x6f3   : > { %v21473_v40 = vsel %vm23138_vm15, %v11853_v37, %v11855_v28  ;;  %vm23140_vm5 = vmmov %vm23130_vm2  ;;  %v11869_v37 = vrot.slane %v21371_v32, 2 }
 0x6f4   : > { %23139 = vst [vmem:[#allocation50_spill] sm:$0xff] %v21473_v40  ;;  %v21476_v12 = vsel %vm23140_vm5, %v11855_v28, %v11857_v56  ;;  %vm23142_vm13 = vmmov %vm23137_vm8  ;;  %v11871_v40 = vrot.slane %v21378_v61, 2 }
 0x6f5   : > { %15915 = vmatmul.mubr.msk.bf16.gmra.mrb[48].mxu0 %vm23137_vm8, %v21130_v14  ;;  %23141 = vst [vmem:[#allocation51_spill] sm:$0xff] %v21476_v12  ;;  %vm23143_vm6 = vmmov %vm23130_vm2 }
 0x6f6   : > { %15918 = vmatprep.mubr.msk.bf16.mxu0 %vm23142_vm13, %v21143_v7  ;;  %v21483_v36 = vsel %vm23143_vm6, %v11857_v56, %v11859_v41  ;;  %vm23145_vm9 = vmmov %vm23130_vm2  ;;  %v11873_v7 = vrot.slane %v21388_v38, 2 }
 0x6f7   : > { %23144 = vst [vmem:[#allocation52_spill] sm:$0xff] %v21483_v36  ;;  %v21486_v48 = vsel %vm23145_vm9, %v11859_v41, %v11861_v20  ;;  %vm23147_vm12 = vmmov %vm23130_vm2  ;;  %v11875_v41 = vrot.slane %v21394_v60, 2  ;;  %v21541_v36 = vld [vmem:[#allocation4 + $0x38] sm:$0xff]  }
 0x6f8   : > { %23146 = vst [vmem:[#allocation53_spill] sm:$0xff] %v21486_v48  ;;  %v21489_v14 = vsel %vm23147_vm12, %v11861_v20, %v11863_v5  ;;  %vm23149_vm7 = vmmov %vm23130_vm2  ;;  %v11877_v20 = vrot.slane %v21462_v43, 2  ;;  %v12647_v27 = vshrl.u32 %v21541_v36, 16  ;;  %v12650_v58 = vshll.u32 %v21541_v36, 16 }
 0x6f9   : > { %23148 = vst [vmem:[#allocation54_spill] sm:$0xff] %v21489_v14  ;;  %v21493_v28 = vsel %vm23149_vm7, %v11863_v5, %v11865_v17  ;;  %vm23151_vm3 = vmmov %vm23130_vm2  ;;  %v21506_v14 = vsel %vm23130_vm2, %v11869_v37, %v11871_v40 }
 0x6fa   : > { %23150 = vst [vmem:[#allocation55_spill] sm:$0xff] %v21493_v28  ;;  %v21496_v12 = vsel %vm23151_vm3, %v11865_v17, %v11867_v16  ;;  %vm23153_vm14 = vmmov %vm23130_vm2  ;;  %v12152_v28 = vld [vmem:[#allocation4 + $0x10] sm:$0xc] }
 0x6fb   : > { %23152 = vst [vmem:[#allocation56_spill] sm:$0xff] %v21496_v12  ;;  %v21501_v56 = vsel %vm23153_vm14, %v11867_v16, %v11869_v37  ;;  %23155 = vst [vmem:[#allocation58_spill] sm:$0xff] %v21506_v14  ;;  %v10625_v16 = vld [vmem:[#allocation4] sm:$0xe] }
 0x6fc   : > { %23154 = vst [vmem:[#allocation57_spill] sm:$0xff] %v21501_v56  ;;  %vm23156_vm10 = vmmov %vm23130_vm2  ;;  %v21519_v56 = vld [vmem:[#allocation4 + $0x14] sm:$0xf] }
 0x6fd   : > { %v21509_v5 = vsel %vm23156_vm10, %v11871_v40, %v11873_v7  ;;  %vm23158_vm4 = vmmov %vm23130_vm2  ;;  %v21524_v37 = vcombine.low %v12152_v28, %v21519_v56  ;;  %v21526_v40 = vld [vmem:[#allocation4 + $0x18] sm:$0xff]  }
 0x6fe   : > { %23157 = vst [vmem:[#allocation59_spill] sm:$0xff] %v21509_v5  ;;  %v21512_v17 = vsel %vm23158_vm4, %v11873_v7, %v11875_v41  ;;  %vm23160_vm8 = vmmov %vm23130_vm2  ;;  %v17412_v7 = vld [vmem:[#allocation4 + $0x4] sm:$0xf]  ;;  %v12614_v28 = vshll.u32 %v21526_v40, 16 }
 0x6ff   : > { %23159 = vst [vmem:[#allocation61_spill] sm:$0xff] %v21512_v17  ;;  %v21515_v12 = vsel %vm23160_vm8, %v11875_v41, %v11877_v20  ;;  %vm23162_vm15 = vmmov %vm23142_vm13  ;;  %v14340_v17 = vcombine.low %v10625_v16, %v17412_v7  ;;  %v21528_v5 = vld [vmem:[#allocation4 + $0x20] sm:$0xff]   ;;  %v21530_v41 = vld [vmem:[#allocation4 + $0x28] sm:$0xff]   ;;  %v12606_v14 = vshll.u32 %v21524_v37, 16 }
 0x700   : > { %23161 = vst [vmem:[#allocation60_spill] sm:$0xff] %v21515_v12  ;;  %15919 = vmatmul.mubr.msk.bf16.gmra.mrb[52].mxu0 %vm23162_vm15, %v21180_v33  ;;  %vm23163_vm5 = vmmov %vm23142_vm13  ;;  %v21532_v20 = vld [vmem:[#allocation4 + $0x30] sm:$0xff]   ;;  %v12603_v33 = vshrl.u32 %v21524_v37, 16  ;;  %v12620_v7 = vshrl.u32 %v21528_v5, 16  ;;  %v12623_v39 = vshll.u32 %v21528_v5, 16  ;;  %v12616_v25 = vrot.slane %v12614_v28, 3 }
 0x701   : > { %15922 = vmatprep.mubr.msk.bf16.mxu0 %vm23163_vm5, %v21205_v52  ;;  %23164 = vst [vmem:[#allocation62_spill] sm:$0xff] %v21524_v37  ;;  %v12611_v52 = vshrl.u32 %v21526_v40, 16  ;;  %v21539_v48 = vrot.slane %v14340_v17, 1  ;;  %vm23165_vm13 = vmmov %vm23163_vm5  ;;  %v12608_v12 = vrot.slane %v12606_v14, 3  ;;  %v12629_v9 = vshrl.u32 %v21530_v41, 16 }
 0x702   : > { %v12605_v16 = vrot.slane %v12603_v33, 2  ;;  %vm23166_vm6 = vmmov %vm23163_vm5  ;;  %v12622_v17 = vrot.slane %v12620_v7, 2  ;;  %v12625_v44 = vrot.slane %v12623_v39, 3  ;;  %v12632_v33 = vshll.u32 %v21530_v41, 16 }
 0x703   : > { %v12613_v37 = vrot.slane %v12611_v52, 2  ;;  %v12638_v21 = vshrl.u32 %v21532_v20, 16  ;;  %v12631_v47 = vrot.slane %v12629_v9, 2  ;;  %v12641_v14 = vshll.u32 %v21532_v20, 16  ;;  %v21557_v52 = vld [vmem:[#allocation4 + $0x50] sm:$0xff]   ;;  %vm23170_vm9 = vmmov %vm23163_vm5 }
 0x704   : > { %v12609_v43 = vor.u32 %v12608_v12, %v12605_v16  ;;  %v12626_v28 = vor.u32 %v12625_v44, %v12622_v17  ;;  %v12634_v63 = vrot.slane %v12632_v33, 3  ;;  %v21565_v12 = vld [vmem:[#allocation4 + $0x58] sm:$0xff]   ;;  %v12659_v44 = vshll.u32 %v21547_v35, 16  ;;  %vm23172_vm12 = vmmov %vm23163_vm5 }
 0x705   : > { %v12617_v1 = vor.u32 %v12616_v25, %v12613_v37  ;;  %v12640_v4 = vrot.slane %v12638_v21, 2  ;;  %v12643_v7 = vrot.slane %v12641_v14, 3  ;;  %v12649_v37 = vrot.slane %v12647_v27, 2  ;;  %v21571_v21 = vld [vmem:[#allocation4 + $0x60] sm:$0xff]   ;;  %v21581_v27 = vld [vmem:[#allocation4 + $0x68] sm:$0xff]   ;;  %vm23177_vm7 = vmmov %vm23163_vm5 }
 0x706   : > { %v12635_v25 = vor.u32 %v12634_v63, %v12631_v47  ;;  %v12652_v17 = vrot.slane %v12650_v58, 3  ;;  %v12665_v33 = vshrl.u32 %v21554_v46, 16  ;;  %v21589_v47 = vld [vmem:[#allocation4 + $0x70] sm:$0xff]   ;;  %v12704_v38 = vshll.u32 %v21581_v27, 16  ;;  %vm23179_vm3 = vmmov %vm23163_vm5 }
 0x707   : > { %v21561_v39 = vsel %vm3828_vm0, %v12609_v43, %v12617_v1  ;;  %v21568_v9 = vsel %vm3828_vm0, %v12617_v1, %v12626_v28  ;;  %v12644_v16 = vor.u32 %v12643_v7, %v12640_v4  ;;  %v12658_v43 = vrot.slane %v12656_v54, 2  ;;  %vm23182_vm14 = vmmov %vm23179_vm3 }
 0x708   : > { %15923 = vmatmul.mubr.msk.bf16.gmra.mrb[56].mxu0 %vm23165_vm13, %v21218_v23  ;;  %23167 = vst [vmem:[#allocation63_spill] sm:$0xff] %v21561_v39  ;;  %23168 = vst [vmem:[#allocation64_spill] sm:$0xff] %v21568_v9  ;;  %v21575_v14 = vsel %vm3828_vm0, %v12626_v28, %v12635_v25  ;;  %v12661_v39 = vrot.slane %v12659_v44, 3  ;;  %v12674_v1 = vshrl.u32 %v21557_v52, 16  ;;  %v12653_v58 = vor.u32 %v12652_v17, %v12649_v37  ;;  %v21597_v17 = vld [vmem:[#allocation4 + $0x78] sm:$0xff]  }
 0x709   : > { %15926 = vmatprep.mubr.msk.bf16.mxu0 %vm23166_vm6, %v21222_v2  ;;  %23169 = vst [vmem:[#allocation65_spill] sm:$0xff] %v21575_v14  ;;  %v21584_v63 = vsel %vm3828_vm0, %v12635_v25, %v12644_v16  ;;  %v12667_v54 = vrot.slane %v12665_v33, 2  ;;  %v12677_v4 = vshll.u32 %v21557_v52, 16  ;;  %v12670_v7 = vrot.slane %v12668_v19, 3  ;;  %vm23184_vm2 = vmmov %vm23179_vm3 }
 0x70a   : > { %23171 = vst [vmem:[#allocation66_spill] sm:$0xff] %v21584_v63  ;;  %v12662_v28 = vor.u32 %v12661_v39, %v12658_v43  ;;  %v12676_v44 = vrot.slane %v12674_v1, 2  ;;  %v12683_v14 = vshrl.u32 %v21565_v12, 16  ;;  %v21593_v9 = vsel %vm3828_vm0, %v12644_v16, %v12653_v58  ;;  %v21603_v39 = vld [vmem:[#allocation4 + $0x80] sm:$0xff]   ;;  %vm23190_vm10 = vmmov %vm23184_vm2 }
 0x70b   : > { %23173 = vst [vmem:[#allocation67_spill] sm:$0xff] %v21593_v9  ;;  %v12679_v11 = vrot.slane %v12677_v4, 3  ;;  %v12686_v25 = vshll.u32 %v21565_v12, 16  ;;  %v12692_v37 = vshrl.u32 %v21571_v21, 16  ;;  %v12671_v63 = vor.u32 %v12670_v7, %v12667_v54  ;;  %vm23194_vm4 = vmmov %vm23184_vm2 }
 0x70c   : > { %v21600_v33 = vsel %vm3828_vm0, %v12653_v58, %v12662_v28  ;;  %v12685_v24 = vrot.slane %v12683_v14, 2  ;;  %v12695_v19 = vshll.u32 %v21571_v21, 16  ;;  %v12701_v4 = vshrl.u32 %v21581_v27, 16  ;;  %vm23200_vm8 = vmmov %vm23184_vm2 }
 0x70d   : > { %23174 = vst [vmem:[#allocation68_spill] sm:$0xff] %v21600_v33  ;;  %v12680_v43 = vor.u32 %v12679_v11, %v12676_v44  ;;  %v12688_v1 = vrot.slane %v12686_v25, 3  ;;  %v12694_v16 = vrot.slane %v12692_v37, 2  ;;  %v21607_v9 = vsel %vm3828_vm0, %v12662_v28, %v12671_v63  ;;  %v21611_v33 = vld [vmem:[#allocation4 + $0x88] sm:$0xff]   ;;  %v21617_v44 = vld [vmem:[#allocation4 + $0x90] sm:$0xff]   ;;  %vm23201_vm15 = vmmov %vm23184_vm2 }
 0x70e   : > { %23175 = vst [vmem:[#allocation69_spill] sm:$0xff] %v21607_v9  ;;  %v12697_v60 = vrot.slane %v12695_v19, 3  ;;  %v12710_v58 = vshrl.u32 %v21589_v47, 16  ;;  %v12703_v7 = vrot.slane %v12701_v4, 2  ;;  %v12713_v11 = vshll.u32 %v21589_v47, 16  ;;  %vm23202_vm5 = vmmov %vm23184_vm2 }
 0x70f   : > { %v21614_v14 = vsel %vm3828_vm0, %v12671_v63, %v12680_v43  ;;  %v12689_v54 = vor.u32 %v12688_v1, %v12685_v24  ;;  %v12706_v37 = vrot.slane %v12704_v38, 3  ;;  %v12719_v19 = vshrl.u32 %v21597_v17, 16  ;;  %v21629_v1 = vld [vmem:[#allocation4 + $0x98] sm:$0xff]  }
 0x710   : > { %15927 = vmatmul.mubr.msk.bf16.gmra.mrb[60].mxu0 %vm23170_vm9, %v21229_v30  ;;  %23176 = vst [vmem:[#allocation70_spill] sm:$0xff] %v21614_v14  ;;  %v12698_v25 = vor.u32 %v12697_v60, %v12694_v16  ;;  %v12712_v28 = vrot.slane %v12710_v58, 2  ;;  %v12715_v61 = vrot.slane %v12713_v11, 3  ;;  %v12722_v63 = vshll.u32 %v21597_v17, 16 }
 0x711   : > { %15930 = vmatprep.mubr.msk.bf16.mxu0 %vm23172_vm12, %v21237_v31  ;;  %v21623_v9 = vsel %vm3828_vm0, %v12680_v43, %v12689_v54  ;;  %v12728_v24 = vshrl.u32 %v21603_v39, 16  ;;  %v12707_v60 = vor.u32 %v12706_v37, %v12703_v7  ;;  %v12721_v16 = vrot.slane %v12719_v19, 2 }
 0x712   : > { %23178 = vst [vmem:[#allocation71_spill] sm:$0xff] %v21623_v9  ;;  %v21632_v38 = vsel %vm3828_vm0, %v12689_v54, %v12698_v25  ;;  %v12731_v4 = vshll.u32 %v21603_v39, 16  ;;  %v12716_v58 = vor.u32 %v12715_v61, %v12712_v28  ;;  %v12724_v43 = vrot.slane %v12722_v63, 3 }
 0x713   : > { %23180 = vst [vmem:[#allocation72_spill] sm:$0xff] %v21632_v38  ;;  %v12730_v9 = vrot.slane %v12728_v24, 2  ;;  %v12737_v11 = vshrl.u32 %v21611_v33, 16  ;;  %v21637_v14 = vsel %vm3828_vm0, %v12698_v25, %v12707_v60  ;;  %v12740_v18 = vshll.u32 %v21611_v33, 16  ;;  %v13045_v38 = vld [vmem:[#allocation4 + $0x10] sm:$0x8] }
 0x714   : > { %23181 = vst [vmem:[#allocation73_spill] sm:$0xff] %v21637_v14  ;;  %v12733_v32 = vrot.slane %v12731_v4, 3  ;;  %v12746_v45 = vshrl.u32 %v21617_v44, 16  ;;  %v21642_v54 = vsel %vm3828_vm0, %v12707_v60, %v12716_v58  ;;  %v12725_v7 = vor.u32 %v12724_v43, %v12721_v16 }
 0x715   : > { %v12739_v37 = vrot.slane %v12737_v11, 2  ;;  %v12749_v19 = vshll.u32 %v21617_v44, 16  ;;  %v12742_v28 = vrot.slane %v12740_v18, 3  ;;  %v12755_v24 = vshrl.u32 %v21629_v1, 16 }
 0x716   : > { %v12734_v61 = vor.u32 %v12733_v32, %v12730_v9  ;;  %v12748_v63 = vrot.slane %v12746_v45, 2  ;;  %v21647_v25 = vsel %vm3828_vm0, %v12716_v58, %v12725_v7  ;;  %v12758_v14 = vshll.u32 %v21629_v1, 16 }
 0x717   : > { %v12751_v4 = vrot.slane %v12749_v19, 3  ;;  %v12743_v16 = vor.u32 %v12742_v28, %v12739_v37  ;;  %v12757_v43 = vrot.slane %v12755_v24, 2  ;;  %v23183_v45 = vrot.slane %v21338_v49, 1 }
 0x718   : > { %15931 = vmatmul.mubr.msk.bf16.gmra.mrb[64].mxu0 %vm23177_vm7, %v21241_v3  ;;  %v21652_v60 = vsel %vm3828_vm0, %v12725_v7, %v12734_v61  ;;  %v12760_v9 = vrot.slane %v12758_v14, 3  ;;  %v14496_v58 = vcombine.low %v13045_v38, %v21519_v56  ;;  %v13053_v7 = vrot.slane %v21526_v40, 3 }
 0x719   : > { %15934 = vmatprep.mubr.msk.bf16.mxu0 %vm23179_vm3, %v21258_v57  ;;  %v10634_v18 = vsel %vm1855_vm11, %v21539_v48, %v23183_v45  ;;  %v12752_v32 = vor.u32 %v12751_v4, %v12748_v63  ;;  %v21664_v11 = vsel %vm3828_vm0, %v12734_v61, %v12743_v16  ;;  %v13055_v37 = vrot.slane %v21528_v5, 3 }
 0x71a   : > { %v21671_v28 = vor.u32 %v12760_v9, %v12757_v43  ;;  %v13052_v48 = vrot.slane %v14496_v58, 3  ;;  %v13057_v14 = vrot.slane %v21530_v41, 3  ;;  %v23185_v56 = vmov %v23183_v45  ;;  %v21694_v45 = vld [vmem:[#allocation4 + $0xa0] ss:$0 sps:$4 sm:$0x77]  }
 0x71b   : > { %v21669_v19 = vsel %vm3828_vm0, %v12743_v16, %v12752_v32  ;;  %v10636_v38 = vsel %vm1855_vm11, %v23185_v56, %v10635_v6  ;;  %v21678_v59 = vsel %vm4279_vm1, %v13053_v7, %v13055_v37  ;;  %v13059_v61 = vrot.slane %v21532_v20, 3  ;;  %v21703_v58 = vld [vmem:[#allocation10 + $0x20] sm:$0xff]  }
 0x71c   : > { %v13061_v63 = vrot.slane %v21541_v36, 3  ;;  %v21684_v24 = vsel %vm3828_vm0, %v12752_v32, %v21671_v28  ;;  %v21687_v4 = vsel %vm4279_vm1, %v13052_v48, %v13053_v7  ;;  %v21690_v16 = vsel %vm4279_vm1, %v13055_v37, %v13057_v14 }
 0x71d   : > { %v13063_v49 = vrot.slane %v21547_v35, 3  ;;  %v10638_v43 = vsel %vm1855_vm11, %v10635_v6, %v10637_v13  ;;  %v13065_v32 = vrot.slane %v21554_v46, 3  ;;  %v13067_v37 = vrot.slane %v21557_v52, 3 }
 0x71e   : > { %v21700_v9 = vsel %vm4279_vm1, %v13059_v61, %v13061_v63  ;;  %v13069_v48 = vrot.slane %v21565_v12, 3  ;;  %v13071_v6 = vrot.slane %v21571_v21, 3 }
 0x71f   : > { %23187 = vst [vmem:[#allocation75_spill] sm:$0xff] %v21700_v9  ;;  %v21706_v7 = vsel %vm4279_vm1, %v13061_v63, %v13063_v49  ;;  %v21712_v56 = vsel %vm4279_vm1, %v13063_v49, %v13065_v32  ;;  %v13077_v9 = vrot.slane %v21597_v17, 3  ;;  %v21719_v63 = vsel %vm4279_vm1, %v13065_v32, %v13067_v37 }
 0x720   : > { %15935 = vmatmul.mubr.msk.bf16.gmra.mrb[68].mxu0 %vm23182_vm14, %v21269_v51  ;;  %23188 = vst [vmem:[#allocation76_spill] sm:$0xff] %v21706_v7  ;;  %23189 = vst [vmem:[#allocation77_spill] sm:$0xff] %v21712_v56  ;;  %v21722_v7 = vsel %vm4279_vm1, %v13067_v37, %v13069_v48  ;;  %v13079_v49 = vrot.slane %v21603_v39, 3  ;;  %v13081_v37 = vrot.slane %v21611_v33, 3 }
 0x721   : > { %15940 = vmatprep.mubr.msk.bf16.mxu0 %vm23184_vm2, %v10634_v18  ;;  %v21697_v18 = vsel %vm4279_vm1, %v13057_v14, %v13059_v61  ;;  %v13073_v14 = vrot.slane %v21581_v27, 3  ;;  %v13075_v61 = vrot.slane %v21589_v47, 3  ;;  %23191 = vst [vmem:[#allocation78_spill] sm:$0xff] %v21719_v63  ;;  %23192 = vst [vmem:[#allocation79_spill] sm:$0xff] %v21722_v7 }
 0x722   : > { %23186 = vst [vmem:[#allocation74_spill] sm:$0xff] %v21697_v18  ;;  %v21725_v18 = vsel %vm4279_vm1, %v13069_v48, %v13071_v6  ;;  %v21742_v48 = vsel %vm4279_vm1, %v13077_v9, %v13079_v49 }
 0x723   : > { %23193 = vst [vmem:[#allocation80_spill] sm:$0xff] %v21725_v18  ;;  %v21731_v56 = vsel %vm4279_vm1, %v13071_v6, %v13073_v14  ;;  %v21737_v32 = vsel %vm4279_vm1, %v13075_v61, %v13077_v9  ;;  %23198 = vst [vmem:[#allocation84_spill] sm:$0xff] %v21742_v48  ;;  %v13087_v6 = vrot.slane %v21694_v45, 3 }
 0x724   : > { %23195 = vst [vmem:[#allocation81_spill] sm:$0xff] %v21731_v56  ;;  %23197 = vst [vmem:[#allocation83_spill] sm:$0xff] %v21737_v32  ;;  %v17413_v56 = vld [vmem:[#allocation4 + $0x20] sm:$0xff]  }
 0x725   : > { %v10639_v18 = vrot.slane %v17413_v56, 1 }
 0x727   : > { %v10640_v48 = vsel %vm1855_vm11, %v10637_v13, %v10639_v18 }
 0x728   : > { %15941 = vmatmul.mubr.msk.bf16.vlgmr.msra.gmra.mrb[36].mxu0 %vm23190_vm10, %v10636_v38  ;;  %v21734_v38 = vsel %vm4279_vm1, %v13073_v14, %v13075_v61  ;;  %v21748_v14 = vsel %vm4279_vm1, %v13079_v49, %v13081_v37  ;;  %v17414_v61 = vld [vmem:[#allocation4 + $0x28] sm:$0xff]   ;;  %v17415_v49 = vld [vmem:[#allocation4 + $0x30] sm:$0xff]  }
 0x729   : > { %15977 = vmatpush3.bf16.msra.mxu0 %v21326_v62  ;;  %15944 = vmatprep.mubr.msk.bf16.mxu0 %vm23194_vm4, %v10638_v43  ;;  %23196 = vst [vmem:[#allocation82_spill] sm:$0xff] %v21734_v38  ;;  %v13083_v62 = vrot.slane %v21617_v44, 3  ;;  %v13085_v43 = vrot.slane %v21629_v1, 3  ;;  %23199 = vst [vmem:[#allocation15_spill] sm:$0xff] %v21748_v14  ;;  %v10641_v32 = vrot.slane %v17414_v61, 1  ;;  %v10643_v14 = vrot.slane %v17415_v49, 1 }
 0x72a   : > { %16014 = vmatprep.subr.bf16.mxu0 %v21703_v58  ;;  %v17416_v61 = vld [vmem:[#allocation4 + $0x38] sm:$0xff]   ;;  %v17419_v49 = vld [vmem:[#allocation4 + $0x50] sm:$0xff]  }
 0x72b   : > { %v21751_v38 = vsel %vm4279_vm1, %v13081_v37, %v13083_v62  ;;  %v21754_v7 = vsel %vm4279_vm1, %v13083_v62, %v13085_v43  ;;  %v21757_v9 = vsel %vm4279_vm1, %v13085_v43, %v13087_v6  ;;  %v10642_v56 = vsel %vm1855_vm11, %v10639_v18, %v10641_v32  ;;  %vm23203_vm1 = vmmov %vm23184_vm2  ;;  %v17417_v43 = vld [vmem:[#allocation4 + $0x40] sm:$0xff]   ;;  %v17418_v6 = vld [vmem:[#allocation4 + $0x48] sm:$0xff]  }
 0x72c   : > { %v10645_v63 = vrot.slane %v17416_v61, 1  ;;  %v10644_v37 = vsel %vm1855_vm11, %v10641_v32, %v10643_v14  ;;  %v10647_v13 = vrot.slane %v17417_v43, 1  ;;  %vm23204_vm13 = vmmov %vm23203_vm1  ;;  %v10651_v32 = vrot.slane %v17419_v49, 1 }
 0x72d   : > { %vm23205_vm6 = vmmov %vm23203_vm1  ;;  %v10653_v61 = vrot.slane %v21218_v23, 1  ;;  %v10659_v23 = vrot.slane %v21237_v31, 1  ;;  %v11075_v49 = vrot.slane %v21286_v8, 1  ;;  %v11082_v8 = vrot.slane %v21295_v53, 1 }
 0x72e   : > { %v10646_v62 = vsel %vm1855_vm11, %v10643_v14, %v10645_v63  ;;  %v10648_v18 = vsel %vm1855_vm11, %v10645_v63, %v10647_v13  ;;  %vm23206_vm9 = vmmov %vm23203_vm1  ;;  %v10655_v63 = vrot.slane %v21222_v2, 1 }
 0x72f   : > { %vm23207_vm12 = vmmov %vm23203_vm1 }
 0x730   : > { %15945 = vmatmul.mubr.msk.bf16.gmra.mrb[40].mxu0 %vm23200_vm8, %v10640_v48  ;;  %v10649_v48 = vrot.slane %v17418_v6, 1  ;;  %v10656_v43 = vsel %vm1855_vm11, %v10653_v61, %v10655_v63  ;;  %vm23208_vm7 = vmmov %vm23203_vm1  ;;  %v10661_v6 = vrot.slane %v21241_v3, 1  ;;  %v10667_v3 = vrot.slane %v21274_v29, 1 }
 0x731   : > { %15948 = vmatprep.mubr.msk.bf16.mxu0 %vm23201_vm15, %v10642_v56  ;;  %vm23209_vm3 = vmmov %vm23203_vm1 }
 0x732   : > { %v10650_v56 = vsel %vm1855_vm11, %v10647_v13, %v10649_v48  ;;  %v10652_v14 = vsel %vm1855_vm11, %v10649_v48, %v10651_v32  ;;  %vm23210_vm14 = vmmov %vm23203_vm1  ;;  %v10662_v2 = vsel %vm1855_vm11, %v10659_v23, %v10661_v6 }
 0x733   : > { %vm23211_vm2 = vmmov %vm23203_vm1 }
 0x734   : > { %vm23212_vm10 = vmmov %vm23203_vm1 }
 0x735   : > { %vm23213_vm4 = vmmov %vm23203_vm1 }
 0x736   : > { %vm23214_vm8 = vmmov %vm23203_vm1 }
 0x737   : > { %vm23215_vm15 = vmmov %vm23203_vm1 }
 0x738   : > { %15949 = vmatmul.mubr.msk.bf16.gmra.mrb[44].mxu0 %vm23202_vm5, %v10644_v37  ;;  %v10654_v37 = vsel %vm1855_vm11, %v10651_v32, %v10653_v61  ;;  %v11076_v32 = vrot.slane %v21288_v42, 1  ;;  %vm23216_vm5 = vmmov %vm23203_vm1  ;;  %v11084_v42 = vrot.slane %v21302_v55, 1  ;;  %v11090_v55 = vrot.slane %v21316_v15, 1 }
 0x739   : > { %15952 = vmatprep.mubr.msk.bf16.mxu0 %vm23203_vm1, %v10646_v62  ;;  %v10657_v62 = vrot.slane %v21229_v30, 1  ;;  %v10663_v30 = vrot.slane %v21258_v57, 1 }
 0x73a   : > { %v11077_v57 = vsel %vm1855_vm11, %v11075_v49, %v11076_v32 }
 0x73b   : > { %v10658_v13 = vsel %vm1855_vm11, %v10655_v63, %v10657_v62  ;;  %v10660_v48 = vsel %vm1855_vm11, %v10657_v62, %v10659_v23  ;;  %v11086_v62 = vrot.slane %v21309_v34, 1 }
 0x740   : > { %15953 = vmatmul.mubr.msk.bf16.gmra.mrb[48].mxu0 %vm23204_vm13, %v10648_v18  ;;  %v10665_v18 = vrot.slane %v21269_v51, 1  ;;  %v11078_v51 = vrot.slane %v21290_v10, 1  ;;  %vm23217_vm13 = vmmov %vm23203_vm1 }
 0x741   : > { %15956 = vmatprep.mubr.msk.bf16.mxu0 %vm23205_vm6, %v10650_v56  ;;  %v10664_v56 = vsel %vm1855_vm11, %v10661_v6, %v10663_v30  ;;  %vm23218_vm6 = vmmov %vm23203_vm1  ;;  %v23223_v6 = vld [vmem:[#allocation30_spill] sm:$0xff] }
 0x742   : > { %v10666_v31 = vsel %vm1855_vm11, %v10663_v30, %v10665_v18  ;;  %v10668_v61 = vsel %vm1855_vm11, %v10665_v18, %v10667_v3  ;;  %v11079_v63 = vsel %vm1855_vm11, %v11076_v32, %v11078_v51  ;;  %v23227_v18 = vld [vmem:[#allocation23_spill] sm:$0xff]  ;;  %v23230_v3 = vld [vmem:[#allocation24_spill] sm:$0xff] }
 0x743   : > { %v11102_v49 = vrot.slane %v23230_v3, 1  ;;  %v23231_v32 = vld [vmem:[#allocation27_spill] sm:$0xff] }
 0x748   : > { %15957 = vmatmul.mubr.msk.bf16.gmra.mrb[52].mxu0 %vm23206_vm9, %v10652_v14  ;;  %v11080_v14 = vrot.slane %v21292_v26, 1  ;;  %v11085_v26 = vsel %vm1855_vm11, %v11082_v8, %v11084_v42  ;;  %vm23219_vm9 = vmmov %vm23203_vm1 }
 0x749   : > { %15960 = vmatprep.mubr.msk.bf16.mxu0 %vm23207_vm12, %v10654_v37  ;;  %v17328_v37 = vld [vmem:[#allocation10 + $0x28] sm:$0xff]   ;;  %vm23220_vm12 = vmmov %vm23203_vm1 }
 0x74a   : > { %v11081_v29 = vsel %vm1855_vm11, %v11078_v51, %v11080_v14  ;;  %v11083_v10 = vsel %vm1855_vm11, %v11080_v14, %v11082_v8  ;;  %v23234_v14 = vld [vmem:[#allocation35_spill] sm:$0xff] }
 0x750   : > { %15961 = vmatmul.mubr.msk.bf16.gmra.mrb[56].mxu0 %vm23208_vm7, %v10656_v43  ;;  %v11088_v43 = vrot.slane %v21313_v50, 1  ;;  %vm23221_vm7 = vmmov %vm23203_vm1  ;;  %v11094_v50 = vrot.slane %v21332_v0, 1 }
 0x751   : > { %15964 = vmatprep.mubr.msk.bf16.mxu0 %vm23209_vm3, %v10658_v13  ;;  %v11092_v13 = vrot.slane %v21320_v22, 1  ;;  %vm23222_vm3 = vmmov %vm23203_vm1  ;;  %v23226_v22 = vld [vmem:[#allocation33_spill] sm:$0xff] }
 0x752   : > { %v11089_v53 = vsel %vm1855_vm11, %v11086_v62, %v11088_v43  ;;  %v11091_v23 = vsel %vm1855_vm11, %v11088_v43, %v11090_v55  ;;  %v11098_v30 = vrot.slane %v23226_v22, 1  ;;  %v23260_v22 = vld [vmem:[#allocation36_spill] sm:$0xff] }
 0x753   : > { %v11093_v34 = vsel %vm1855_vm11, %v11090_v55, %v11092_v13  ;;  %v23240_v55 = vld [vmem:[#allocation26_spill] sm:$0xff] }
 0x758   : > { %15965 = vmatmul.mubr.msk.bf16.gmra.mrb[60].mxu0 %vm23210_vm14, %v10660_v48  ;;  %v11096_v48 = vrot.slane %v23223_v6, 1  ;;  %vm23224_vm14 = vmmov %vm23203_vm1  ;;  %v23250_v6 = vld [vmem:[#allocation25_spill] sm:$0xff] }
 0x759   : > { %15968 = vmatprep.mubr.msk.bf16.mxu0 %vm23211_vm2, %v10662_v2  ;;  %v11095_v2 = vsel %vm1855_vm11, %v11092_v13, %v11094_v50  ;;  %vm23225_vm2 = vmmov %vm23203_vm1  ;;  %v23242_v13 = vld [vmem:[#allocation29_spill] sm:$0xff] }
 0x75a   : > { %v11097_v15 = vsel %vm1855_vm11, %v11094_v50, %v11096_v48  ;;  %v23248_v50 = vld [vmem:[#allocation20_spill] sm:$0xff] }
 0x760   : > { %15969 = vmatmul.mubr.msk.bf16.gmra.mrb[64].mxu0 %vm23212_vm10, %v10664_v56  ;;  %v11100_v56 = vrot.slane %v23227_v18, 1  ;;  %vm23228_vm10 = vmmov %vm23203_vm1  ;;  %v23264_v18 = vld [vmem:[#allocation38_spill] sm:$0xff] }
 0x761   : > { %15972 = vmatprep.mubr.msk.bf16.mxu0 %vm23213_vm4, %v10666_v31  ;;  %v11099_v31 = vsel %vm1855_vm11, %v11096_v48, %v11098_v30  ;;  %vm23229_vm4 = vmmov %vm23203_vm1  ;;  %v23252_v48 = vld [vmem:[#allocation28_spill] sm:$0xff] }
 0x762   : > { %v11101_v0 = vsel %vm1855_vm11, %v11098_v30, %v11100_v56  ;;  %v23262_v30 = vld [vmem:[#allocation37_spill] sm:$0xff] }
 0x768   : > { %15973 = vmatmul.mubr.msk.bf16.gmra.mrb[68].mxu0 %vm23214_vm8, %v10668_v61  ;;  %v11104_v61 = vrot.slane %v23231_v32, 1  ;;  %vm23232_vm8 = vmmov %vm23203_vm1 }
 0x769   : > { %15978 = vmatprep.mubr.msk.bf16.mxu0 %vm23215_vm15, %v11077_v57  ;;  %v11103_v57 = vsel %vm1855_vm11, %v11100_v56, %v11102_v49  ;;  %vm23233_vm15 = vmmov %vm23203_vm1  ;;  %v23265_v56 = vld [vmem:[#allocation46_spill] sm:$0xff] }
 0x76a   : > { %v11105_v51 = vsel %vm1855_vm11, %v11102_v49, %v11104_v61 }
 0x770   : > { %15979 = vmatmul.mubr.msk.bf16.vlgmr.msra.gmra.mrb[36].mxu0 %vm23216_vm5, %v11079_v63  ;;  %v11106_v63 = vrot.slane %v23234_v14, 1  ;;  %vm23236_vm5 = vmmov %vm23203_vm1  ;;  %v23272_v14 = vld [vmem:[#allocation42_spill] sm:$0xff] }
 0x771   : > { %16015 = vmatpush3.bf16.msra.mxu0 %v21703_v58  ;;  %15982 = vmatprep.mubr.msk.bf16.mxu0 %vm23203_vm1, %v11081_v29  ;;  %v11087_v58 = vsel %vm1855_vm11, %v11084_v42, %v11086_v62  ;;  %v23235_v29 = vld [vmem:[#allocation32_spill] sm:$0xff] }
 0x772   : > { %16052 = vmatprep.subr.bf16.mxu0 %v17328_v37  ;;  %v11108_v8 = vrot.slane %v23235_v29, 1  ;;  %v11107_v42 = vsel %vm1855_vm11, %v11104_v61, %v11106_v63  ;;  %v23268_v61 = vld [vmem:[#allocation40_spill] sm:$0xff]  ;;  %v23275_v29 = vld [vmem:[#allocation39_spill] sm:$0xff] }
 0x778   : > { %15983 = vmatmul.mubr.msk.bf16.gmra.mrb[40].mxu0 %vm23217_vm13, %v11083_v10  ;;  %v17327_v10 = vld [vmem:[#allocation4 + $0x98] ss:$0 sps:$4 sm:$0x11]   ;;  %vm23237_vm13 = vmmov %vm23203_vm1 }
 0x779   : > { %15986 = vmatprep.mubr.msk.bf16.mxu0 %vm23218_vm6, %v11085_v26  ;;  %v11109_v26 = vsel %vm1855_vm11, %v11106_v63, %v11108_v8  ;;  %v11110_v62 = vrot.slane %v17327_v10, 1  ;;  %vm23239_vm6 = vmmov %vm23203_vm1  ;;  %v23279_v10 = vld [vmem:[#allocation44_spill] sm:$0xff] }
 0x77b   : > { %v11111_v43 = vsel %vm1855_vm11, %v11108_v8, %v11110_v62  ;;  %vm23249_vm11 = vmmov %vm23203_vm1  ;;  %v17334_v8 = vld [vmem:[#allocation10 + $0x38] sm:$0xff]   ;;  %v23283_v62 = vld [vmem:[#allocation47_spill] sm:$0xff] }
 0x780   : > { %15987 = vmatmul.mubr.msk.bf16.gmra.mrb[44].mxu0 %vm23219_vm9, %v11087_v58  ;;  %v23238_v58 = vld [vmem:[#allocation18_spill] sm:$0xff]  ;;  %vm23241_vm9 = vmmov %vm23203_vm1 }
 0x781   : > { %15990 = vmatprep.mubr.msk.bf16.mxu0 %vm23220_vm12, %v11089_v53  ;;  %v17331_v53 = vld [vmem:[#allocation10 + $0x30] sm:$0xff]   ;;  %vm23243_vm12 = vmmov %vm23203_vm1 }
 0x788   : > { %15991 = vmatmul.mubr.msk.bf16.gmra.mrb[48].mxu0 %vm23221_vm7, %v11091_v23  ;;  %v23244_v23 = vld [vmem:[#allocation31_spill] sm:$0xff]  ;;  %vm23245_vm7 = vmmov %vm23203_vm1 }
 0x789   : > { %15994 = vmatprep.mubr.msk.bf16.mxu0 %vm23222_vm3, %v11093_v34  ;;  %v23246_v34 = vld [vmem:[#allocation22_spill] sm:$0xff]  ;;  %vm23247_vm3 = vmmov %vm23203_vm1 }
 0x790   : > { %15995 = vmatmul.mubr.msk.bf16.gmra.mrb[52].mxu0 %vm23224_vm14, %v11095_v2  ;;  %vm23251_vm14 = vmmov %vm23203_vm1  ;;  %v23256_v2 = vld [vmem:[#allocation21_spill] sm:$0xff] }
 0x791   : > { %15998 = vmatprep.mubr.msk.bf16.mxu0 %vm23225_vm2, %v11097_v15  ;;  %vm23253_vm2 = vmmov %vm23203_vm1  ;;  %v23258_v15 = vld [vmem:[#allocation19_spill] sm:$0xff] }
 0x798   : > { %15999 = vmatmul.mubr.msk.bf16.gmra.mrb[56].mxu0 %vm23228_vm10, %v11099_v31  ;;  %vm23255_vm10 = vmmov %vm23203_vm1  ;;  %v23267_v31 = vld [vmem:[#allocation48_spill] sm:$0xff] }
 0x799   : > { %16002 = vmatprep.mubr.msk.bf16.mxu0 %vm23229_vm4, %v11101_v0  ;;  %vm23257_vm4 = vmmov %vm23203_vm1  ;;  %v11554_v0 = vshrl.u32 %v23267_v31, 16  ;;  %v11557_v3 = vshll.u32 %v23267_v31, 16  ;;  %v12288_v31 = vrot.slane %v21528_v5, 2 }
 0x79b   : > { %v11556_v49 = vrot.slane %v11554_v0, 1  ;;  %v11559_v32 = vrot.slane %v11557_v3, 2  ;;  %v12290_v0 = vrot.slane %v21530_v41, 2  ;;  %v17352_v3 = vld [vmem:[#allocation10 + $0x40] sm:$0xff]   ;;  %v12296_v41 = vrot.slane %v21547_v35, 2 }
 0x7a0   : > { %16003 = vmatmul.mubr.msk.bf16.gmra.mrb[60].mxu0 %vm23232_vm8, %v11103_v57  ;;  %vm23259_vm8 = vmmov %vm23203_vm1  ;;  %v23270_v57 = vld [vmem:[#allocation41_spill] sm:$0xff] }
 0x7a1   : > { %16006 = vmatprep.mubr.msk.bf16.mxu0 %vm23233_vm15, %v11105_v51  ;;  %vm23261_vm15 = vmmov %vm23203_vm1  ;;  %v11560_v51 = vor.u32 %v11559_v32, %v11556_v49  ;;  %v12292_v32 = vrot.slane %v21532_v20, 2 }
 0x7a8   : > { %16007 = vmatmul.mubr.msk.bf16.gmra.mrb[64].mxu0 %vm23236_vm5, %v11107_v42  ;;  %vm23263_vm5 = vmmov %vm23203_vm1  ;;  %v23277_v42 = vld [vmem:[#allocation43_spill] sm:$0xff] }
 0x7a9   : > { %16010 = vmatprep.mubr.msk.bf16.mxu0 %vm23203_vm1, %v11109_v26  ;;  %v23281_v26 = vld [vmem:[#allocation45_spill] sm:$0xff] }
 0x7b0   : > { %16011 = vmatmul.mubr.msk.bf16.gmra.mrb[68].mxu0 %vm23237_vm13, %v11111_v43  ;;  %vm23266_vm13 = vmmov %vm23203_vm1  ;;  %v23285_v43 = vld [vmem:[#allocation49_spill] sm:$0xff] }
 0x7b1   : > { %16016 = vmatprep.mubr.msk.bf16.mxu0 %vm23239_vm6, %v23238_v58  ;;  %vm23269_vm6 = vmmov %vm23203_vm1  ;;  %v23287_v58 = vld [vmem:[#allocation50_spill] sm:$0xff] }
 0x7b8   : > { %16017 = vmatmul.mubr.msk.bf16.vlgmr.msra.gmra.mrb[36].mxu0 %vm23241_vm9, %v23240_v55  ;;  %vm23271_vm9 = vmmov %vm23203_vm1  ;;  %v23289_v55 = vld [vmem:[#allocation51_spill] sm:$0xff] }
 0x7b9   : > { %16053 = vmatpush3.bf16.msra.mxu0 %v17328_v37  ;;  %16020 = vmatprep.mubr.msk.bf16.mxu0 %vm23243_vm12, %v23242_v13  ;;  %v23254_v37 = vld [vmem:[#allocation34_spill] sm:$0xff]  ;;  %vm23273_vm12 = vsmask.f32 6400  ;;  %v23293_v13 = vld [vmem:[#allocation53_spill] sm:$0xff] }
 0x7ba   : > { %16090 = vmatprep.subr.bf16.mxu0 %v17331_v53  ;;  %v11561_v63 = vsel %vm23273_vm12, %v23272_v14, %v11560_v51  ;;  %vm23301_vm12 = vmmov %vm23203_vm1  ;;  %v12298_v51 = vrot.slane %v21554_v46, 2  ;;  %v12304_v46 = vrot.slane %v21571_v21, 2 }
 0x7c0   : > { %16021 = vmatmul.mubr.msk.bf16.gmra.mrb[40].mxu0 %vm23245_vm7, %v23244_v23  ;;  %vm23274_vm7 = vmmov %vm23203_vm1  ;;  %v23294_v23 = vld [vmem:[#allocation54_spill] sm:$0xff] }
 0x7c1   : > { %16024 = vmatprep.mubr.msk.bf16.mxu0 %vm23247_vm3, %v23246_v34  ;;  %vm23276_vm3 = vmmov %vm23203_vm1  ;;  %v23296_v34 = vld [vmem:[#allocation55_spill] sm:$0xff] }
 0x7c8   : > { %16025 = vmatmul.mubr.msk.bf16.gmra.mrb[44].mxu0 %vm23249_vm11, %v23248_v50  ;;  %vm23278_vm11 = vmmov %vm23203_vm1  ;;  %v23298_v50 = vld [vmem:[#allocation56_spill] sm:$0xff] }
 0x7c9   : > { %16028 = vmatprep.mubr.msk.bf16.mxu0 %vm23251_vm14, %v23250_v6  ;;  %vm23280_vm14 = vmmov %vm23203_vm1  ;;  %v23300_v6 = vld [vmem:[#allocation57_spill] sm:$0xff] }
 0x7d0   : > { %16029 = vmatmul.mubr.msk.bf16.gmra.mrb[48].mxu0 %vm23253_vm2, %v23252_v48  ;;  %vm23282_vm2 = vmmov %vm23203_vm1  ;;  %v23302_v48 = vld [vmem:[#allocation58_spill] sm:$0xff] }
 0x7d1   : > { %16032 = vmatprep.mubr.msk.bf16.mxu0 %vm23255_vm10, %v23254_v37  ;;  %vm23284_vm10 = vmmov %vm23203_vm1  ;;  %v23304_v37 = vld [vmem:[#allocation59_spill] sm:$0xff] }
 0x7d8   : > { %16033 = vmatmul.mubr.msk.bf16.gmra.mrb[52].mxu0 %vm23257_vm4, %v23256_v2  ;;  %vm23286_vm4 = vmmov %vm23203_vm1  ;;  %v23306_v2 = vld [vmem:[#allocation61_spill] sm:$0xff] }
 0x7d9   : > { %16036 = vmatprep.mubr.msk.bf16.mxu0 %vm23259_vm8, %v23258_v15  ;;  %vm23288_vm8 = vmmov %vm23203_vm1  ;;  %v12286_v15 = vrot.slane %v21526_v40, 2 }
 0x7e0   : > { %16037 = vmatmul.mubr.msk.bf16.gmra.mrb[56].mxu0 %vm23261_vm15, %v23260_v22  ;;  %vm23290_vm15 = vmmov %vm23203_vm1  ;;  %v23308_v22 = vld [vmem:[#allocation62_spill] sm:$0xff] }
 0x7e1   : > { %16040 = vmatprep.mubr.msk.bf16.mxu0 %vm23263_vm5, %v23262_v30  ;;  %vm23292_vm5 = vmmov %vm23203_vm1  ;;  %v12285_v30 = vrot.slane %v23308_v22, 2  ;;  %v23366_v22 = vld [vmem:[#allocation73_spill] sm:$0xff] }
 0x7e8   : > { %16041 = vmatmul.mubr.msk.bf16.gmra.mrb[60].mxu0 %vm23203_vm1, %v23264_v18  ;;  %v23309_v18 = vld [vmem:[#allocation60_spill] sm:$0xff] }
 0x7e9   : > { %16044 = vmatprep.mubr.msk.bf16.mxu0 %vm23266_vm13, %v23265_v56  ;;  %vm23295_vm13 = vmmov %vm23203_vm1 }
 0x7f0   : > { %16045 = vmatmul.mubr.msk.bf16.gmra.mrb[64].mxu0 %vm23269_vm6, %v23268_v61  ;;  %vm23297_vm6 = vmmov %vm23203_vm1  ;;  %v12294_v61 = vrot.slane %v21541_v36, 2  ;;  %v12300_v36 = vrot.slane %v21557_v52, 2 }
 0x7f1   : > { %16048 = vmatprep.mubr.msk.bf16.mxu0 %vm23271_vm9, %v23270_v57  ;;  %vm23299_vm9 = vmmov %vm23203_vm1 }
 0x7f8   : > { %16049 = vmatmul.mubr.msk.bf16.gmra.mrb[68].mxu0 %vm23274_vm7, %v11561_v63  ;;  %vm23303_vm7 = vmmov %vm23203_vm1  ;;  %v12302_v63 = vrot.slane %v21565_v12, 2  ;;  %v12308_v12 = vrot.slane %v21589_v47, 2 }
 0x7f9   : > { %16054 = vmatprep.mubr.msk.bf16.mxu0 %vm23276_vm3, %v23275_v29  ;;  %vm23305_vm3 = vmmov %vm23203_vm1 }
 0x800   : > { %16055 = vmatmul.mubr.msk.bf16.vlgmr.msra.gmra.mrb[36].mxu0 %vm23278_vm11, %v23277_v42  ;;  %vm23307_vm11 = vmmov %vm23203_vm1 }
 0x801   : > { %16091 = vmatpush3.bf16.msra.mxu0 %v17331_v53  ;;  %16058 = vmatprep.mubr.msk.bf16.mxu0 %vm23280_vm14, %v23279_v10  ;;  %v23291_v53 = vld [vmem:[#allocation52_spill] sm:$0xff]  ;;  %vm23310_vm14 = vmmov %vm23203_vm1  ;;  %v12310_v10 = vrot.slane %v21597_v17, 2  ;;  %v12316_v17 = vrot.slane %v21617_v44, 2 }
 0x802   : > { %16128 = vmatprep.subr.bf16.mxu0 %v17334_v8  ;;  %v23348_v44 = vld [vmem:[#allocation64_spill] sm:$0xff] }
 0x808   : > { %16059 = vmatmul.mubr.msk.bf16.gmra.mrb[40].mxu0 %vm23282_vm2, %v23281_v26  ;;  %vm23311_vm2 = vcmask 1045504  }
 0x809   : > { %16062 = vmatprep.mubr.msk.bf16.mxu0 %vm23284_vm10, %v23283_v62  ;;  %v12287_v56 = vsel %vm23311_vm2, %v12285_v30, %v12286_v15  ;;  %vm23312_vm10 = vmmov %vm23203_vm1  ;;  %v12314_v62 = vrot.slane %v21611_v33, 2  ;;  %v12764_v30 = vshrl.u32 %v21694_v45, 16 }
 0x810   : > { %16063 = vmatmul.mubr.msk.bf16.gmra.mrb[44].mxu0 %vm23286_vm4, %v23285_v43  ;;  %vm23313_vm4 = vmmov %vm23311_vm2 }
 0x811   : > { %16066 = vmatprep.mubr.msk.bf16.mxu0 %vm23288_vm8, %v23287_v58  ;;  %v12289_v49 = vsel %vm23313_vm4, %v12286_v15, %v12288_v31  ;;  %vm23314_vm8 = vmmov %vm23203_vm1  ;;  %v12318_v58 = vrot.slane %v21629_v1, 2  ;;  %v23350_v1 = vld [vmem:[#allocation65_spill] sm:$0xff]  ;;  %v23364_v15 = vld [vmem:[#allocation72_spill] sm:$0xff] }
 0x818   : > { %16067 = vmatmul.mubr.msk.bf16.gmra.mrb[48].mxu0 %vm23290_vm15, %v23289_v55  ;;  %vm23315_vm15 = vmmov %vm23311_vm2 }
 0x819   : > { %16070 = vmatprep.mubr.msk.bf16.mxu0 %vm23292_vm5, %v23291_v53  ;;  %v12291_v40 = vsel %vm23315_vm15, %v12288_v31, %v12290_v0  ;;  %vm23316_vm5 = vmmov %vm23203_vm1  ;;  %v17351_v53 = vld [vmem:[#allocation4 + $0xa0] ss:$0 sps:$4 sm:$0x33]  }
 0x81a   : > { %v12320_v33 = vrot.slane %v17351_v53, 2 }
 0x820   : > { %16071 = vmatmul.mubr.msk.bf16.gmra.mrb[52].mxu0 %vm23203_vm1, %v23293_v13  ;;  %vm23317_vm1 = vmmov %vm23311_vm2 }
 0x821   : > { %16074 = vmatprep.mubr.msk.bf16.mxu0 %vm23295_vm13, %v23294_v23  ;;  %v12293_v57 = vsel %vm23317_vm1, %v12290_v0, %v12292_v32  ;;  %vm23318_vm13 = vmmov %vm23305_vm3  ;;  %v23347_v23 = vld [vmem:[#allocation63_spill] sm:$0xff] }
 0x822   : > { %vm23326_vm2 = vmmov %vm23316_vm5  ;;  %v23395_v0 = vld [vmem:[#allocation83_spill] sm:$0xff] }
 0x823   : > { %vm23328_vm4 = vmmov %vm23326_vm2 }
 0x824   : > { %vm23330_vm15 = vmmov %vm23326_vm2 }
 0x828   : > { %16075 = vmatmul.mubr.msk.bf16.gmra.mrb[56].mxu0 %vm23297_vm6, %v23296_v34  ;;  %vm23319_vm6 = vmmov %vm23317_vm1  ;;  %v23352_v34 = vld [vmem:[#allocation66_spill] sm:$0xff] }
 0x829   : > { %16078 = vmatprep.mubr.msk.bf16.mxu0 %vm23299_vm9, %v23298_v50  ;;  %v12295_v5 = vsel %vm23319_vm6, %v12292_v32, %v12294_v61  ;;  %vm23320_vm9 = vmmov %vm23305_vm3  ;;  %v23354_v50 = vld [vmem:[#allocation67_spill] sm:$0xff] }
 0x830   : > { %16079 = vmatmul.mubr.msk.bf16.gmra.mrb[60].mxu0 %vm23301_vm12, %v23300_v6  ;;  %vm23321_vm12 = vmmov %vm23317_vm1  ;;  %v23356_v6 = vld [vmem:[#allocation68_spill] sm:$0xff] }
 0x831   : > { %16082 = vmatprep.mubr.msk.bf16.mxu0 %vm23303_vm7, %v23302_v48  ;;  %v12297_v14 = vsel %vm23321_vm12, %v12294_v61, %v12296_v41  ;;  %vm23322_vm7 = vmmov %vm23305_vm3  ;;  %v23358_v48 = vld [vmem:[#allocation69_spill] sm:$0xff] }
 0x838   : > { %16083 = vmatmul.mubr.msk.bf16.gmra.mrb[64].mxu0 %vm23305_vm3, %v23304_v37  ;;  %vm23323_vm3 = vmmov %vm23317_vm1  ;;  %v23360_v37 = vld [vmem:[#allocation70_spill] sm:$0xff] }
 0x839   : > { %16086 = vmatprep.mubr.msk.bf16.mxu0 %vm23307_vm11, %v23306_v2  ;;  %v12299_v20 = vsel %vm23323_vm3, %v12296_v41, %v12298_v51  ;;  %vm23324_vm11 = vmmov %vm23316_vm5  ;;  %v23362_v2 = vld [vmem:[#allocation71_spill] sm:$0xff] }
 0x840   : > { %16087 = vmatmul.mubr.msk.bf16.gmra.mrb[68].mxu0 %vm23310_vm14, %v23309_v18  ;;  %vm23325_vm14 = vmmov %vm23317_vm1  ;;  %v12767_v18 = vshll.u32 %v21694_v45, 16  ;;  %v23393_v45 = vld [vmem:[#allocation82_spill] sm:$0xff] }
 0x841   : > { %16092 = vmatprep.mubr.msk.bf16.mxu0 %vm23312_vm10, %v12287_v56  ;;  %v12301_v29 = vsel %vm23325_vm14, %v12298_v51, %v12300_v36  ;;  %vm23327_vm10 = vmmov %vm23317_vm1  ;;  %v12766_v56 = vrot.slane %v12764_v30, 2 }
 0x842   : > { %v12303_v35 = vsel %vm23327_vm10, %v12300_v36, %v12302_v63  ;;  %v12769_v31 = vrot.slane %v12767_v18, 3 }
 0x848   : > { %16093 = vmatmul.mubr.msk.bf16.vlgmr.msra.gmra.mrb[36].mxu0 %vm23314_vm8, %v12289_v49  ;;  %vm23329_vm8 = vmmov %vm23317_vm1  ;;  %v23399_v49 = vld [vmem:[#allocation15_spill] sm:$0xff] }
 0x849   : > { %16129 = vmatpush3.bf16.msra.mxu0 %v17334_v8  ;;  %16096 = vmatprep.mubr.msk.bf16.mxu0 %vm23316_vm5, %v12291_v40  ;;  %v12306_v8 = vrot.slane %v21581_v27, 2  ;;  %v12305_v42 = vsel %vm23329_vm8, %v12302_v63, %v12304_v46  ;;  %vm23331_vm5 = vmmov %vm23317_vm1  ;;  %v12312_v27 = vrot.slane %v21603_v39, 2  ;;  %v22059_v40 = vld [vmem:[%s22194_s6 + $0x2] ss:$0 sm:$0xff] }
 0x84a   : > { %16166 = vmatprep.subr.bf16.mxu0 %v17352_v3  ;;  %vm23332_vm1 = vmmov %vm23326_vm2 }
 0x84b   : > { %v12307_v52 = vsel %vm23331_vm5, %v12304_v46, %v12306_v8  ;;  %vm23334_vm6 = vmmov %vm23332_vm1 }
 0x84c   : > { %vm23336_vm12 = vmmov %vm23332_vm1 }
 0x84d   : > { %vm23340_vm14 = vmmov %vm23332_vm1 }
 0x84e   : > { %vm23342_vm10 = vmmov %vm23332_vm1 }
 0x84f   : > { %vm23344_vm8 = vmmov %vm23332_vm1 }
 0x850   : > { %16097 = vmatmul.mubr.msk.bf16.gmra.mrb[40].mxu0 %vm23318_vm13, %v12293_v57  ;;  %vm23333_vm13 = vmmov %vm23323_vm3 }
 0x851   : > { %16100 = vmatprep.mubr.msk.bf16.mxu0 %vm23320_vm9, %v12295_v5  ;;  %v12309_v26 = vsel %vm23333_vm13, %v12306_v8, %v12308_v12  ;;  %vm23335_vm9 = vmmov %vm23323_vm3 }
 0x852   : > { %v12311_v21 = vsel %vm23335_vm9, %v12308_v12, %v12310_v10  ;;  %vm23349_vm13 = vmmov %vm23332_vm1 }
 0x853   : > { %vm23353_vm9 = vmmov %vm23332_vm1 }
 0x858   : > { %16101 = vmatmul.mubr.msk.bf16.gmra.mrb[44].mxu0 %vm23322_vm7, %v12297_v14  ;;  %vm23337_vm7 = vmmov %vm23323_vm3 }
 0x859   : > { %16104 = vmatprep.mubr.msk.bf16.mxu0 %vm23324_vm11, %v12299_v20  ;;  %v12313_v43 = vsel %vm23337_vm7, %v12310_v10, %v12312_v27  ;;  %vm23338_vm3 = vmmov %vm23332_vm1 }
 0x85a   : > { %vm23339_vm11 = vmmov %vm23331_vm5 }
 0x85b   : > { %v12315_v47 = vsel %vm23339_vm11, %v12312_v27, %v12314_v62  ;;  %vm23357_vm7 = vmmov %vm23332_vm1 }
 0x85c   : > { %vm23361_vm11 = vmmov %vm23332_vm1 }
 0x860   : > { %16105 = vmatmul.mubr.msk.bf16.gmra.mrb[48].mxu0 %vm23326_vm2, %v12301_v29  ;;  %vm23341_vm2 = vmmov %vm23331_vm5 }
 0x861   : > { %16108 = vmatprep.mubr.msk.bf16.mxu0 %vm23328_vm4, %v12303_v35  ;;  %v12317_v55 = vsel %vm23341_vm2, %v12314_v62, %v12316_v17  ;;  %vm23343_vm4 = vmmov %vm23341_vm2 }
 0x862   : > { %v12319_v39 = vsel %vm23343_vm4, %v12316_v17, %v12318_v58  ;;  %vm23346_vm5 = vmmov %vm23332_vm1 }
 0x863   : > { %vm23368_vm4 = vmmov %vm23332_vm1 }
 0x868   : > { %16109 = vmatmul.mubr.msk.bf16.gmra.mrb[52].mxu0 %vm23330_vm15, %v12305_v42  ;;  %vm23345_vm15 = vmmov %vm23341_vm2 }
 0x869   : > { %16112 = vmatprep.mubr.msk.bf16.mxu0 %vm23332_vm1, %v12307_v52  ;;  %v12321_v13 = vsel %vm23345_vm15, %v12318_v58, %v12320_v33  ;;  %vm23365_vm2 = vmmov %vm23332_vm1 }
 0x86a   : > { %vm23370_vm15 = vmmov %vm23332_vm1 }
 0x870   : > { %16113 = vmatmul.mubr.msk.bf16.gmra.mrb[56].mxu0 %vm23334_vm6, %v12309_v26  ;;  %vm23351_vm6 = vmmov %vm23332_vm1 }
 0x871   : > { %16116 = vmatprep.mubr.msk.bf16.mxu0 %vm23336_vm12, %v12311_v21  ;;  %vm23355_vm12 = vmmov %vm23332_vm1 }
 0x878   : > { %16117 = vmatmul.mubr.msk.bf16.gmra.mrb[60].mxu0 %vm23338_vm3, %v12313_v43  ;;  %vm23359_vm3 = vmmov %vm23332_vm1 }
 0x879   : > { %16120 = vmatprep.mubr.msk.bf16.mxu0 %vm23340_vm14, %v12315_v47  ;;  %vm23363_vm14 = vmmov %vm23332_vm1 }
 0x880   : > { %16121 = vmatmul.mubr.msk.bf16.gmra.mrb[64].mxu0 %vm23342_vm10, %v12317_v55  ;;  %vm23367_vm10 = vmmov %vm23332_vm1 }
 0x881   : > { %16124 = vmatprep.mubr.msk.bf16.mxu0 %vm23344_vm8, %v12319_v39  ;;  %vm23369_vm8 = vmmov %vm23332_vm1 }
 0x888   : > { %16125 = vmatmul.mubr.msk.bf16.gmra.mrb[68].mxu0 %vm23346_vm5, %v12321_v13  ;;  %vm23371_vm5 = vmmov %vm23332_vm1 }
 0x889   : > { %16130 = vmatprep.mubr.msk.bf16.mxu0 %vm23332_vm1, %v23347_v23 }
 0x890   : > { %16131 = vmatmul.mubr.msk.bf16.vlgmr.msra.gmra.mrb[36].mxu0 %vm23349_vm13, %v23348_v44  ;;  %vm23372_vm13 = vmmov %vm23332_vm1 }
 0x891   : > { %16167 = vmatpush3.bf16.msra.mxu0 %v17352_v3  ;;  %16134 = vmatprep.mubr.msk.bf16.mxu0 %vm23351_vm6, %v23350_v1  ;;  %vm23373_vm6 = vmmov %vm23332_vm1  ;;  %v23397_v3 = vld [vmem:[#allocation84_spill] sm:$0xff] }
 0x898   : > { %16135 = vmatmul.mubr.msk.bf16.gmra.mrb[40].mxu0 %vm23353_vm9, %v23352_v34  ;;  %vm23374_vm9 = vmmov %vm23332_vm1 }
 0x899   : > { %16138 = vmatprep.mubr.msk.bf16.mxu0 %vm23355_vm12, %v23354_v50  ;;  %vm23375_vm12 = vmmov %vm23332_vm1 }
 0x8a0   : > { %16139 = vmatmul.mubr.msk.bf16.gmra.mrb[44].mxu0 %vm23357_vm7, %v23356_v6  ;;  %vm23376_vm7 = vmmov %vm23332_vm1 }
 0x8a1   : > { %16142 = vmatprep.mubr.msk.bf16.mxu0 %vm23359_vm3, %v23358_v48  ;;  %vm23378_vm3 = vmmov %vm23332_vm1 }
 0x8a8   : > { %16143 = vmatmul.mubr.msk.bf16.gmra.mrb[48].mxu0 %vm23361_vm11, %v23360_v37  ;;  %vm23380_vm11 = vmmov %vm23332_vm1 }
 0x8a9   : > { %16146 = vmatprep.mubr.msk.bf16.mxu0 %vm23363_vm14, %v23362_v2 }
 0x8b0   : > { %16147 = vmatmul.mubr.msk.bf16.gmra.mrb[52].mxu0 %vm23365_vm2, %v23364_v15 }
 0x8b1   : > { %16150 = vmatprep.mubr.msk.bf16.mxu0 %vm23367_vm10, %v23366_v22 }
 0x8b8   : > { %16151 = vmatmul.mubr.msk.bf16.gmra.mrb[56].mxu0 %vm23368_vm4, %v21642_v54  ;;  %v12770_v54 = vor.u32 %v12769_v31, %v12766_v56 }
 0x8b9   : > { %16154 = vmatprep.mubr.msk.bf16.mxu0 %vm23369_vm8, %v21647_v25 }
 0x8ba   : > { %v12771_v25 = vsel %vm3828_vm0, %v21671_v28, %v12770_v54  ;;  %vm23382_vm0 = vmmov %vm23332_vm1  ;;  %v23383_v28 = vld [vmem:[#allocation77_spill] sm:$0xff] }
 0x8bb   : > { %vm23384_vm14 = vmmov %vm23382_vm0 }
 0x8bc   : > { %vm23386_vm2 = vmmov %vm23382_vm0 }
 0x8bd   : > { %vm23388_vm10 = vmmov %vm23382_vm0 }
 0x8be   : > { %vm23390_vm4 = vmmov %vm23382_vm0 }
 0x8bf   : > { %vm23392_vm8 = vmmov %vm23382_vm0 }
 0x8c0   : > { %16155 = vmatmul.mubr.msk.bf16.gmra.mrb[60].mxu0 %vm23370_vm15, %v21652_v60  ;;  %v23377_v60 = vld [vmem:[#allocation74_spill] sm:$0xff]  ;;  %vm23394_vm15 = vmmov %vm23382_vm0 }
 0x8c1   : > { %16158 = vmatprep.mubr.msk.bf16.mxu0 %vm23371_vm5, %v21664_v11  ;;  %v23379_v11 = vld [vmem:[#allocation75_spill] sm:$0xff]  ;;  %vm23396_vm5 = vmmov %vm23382_vm0 }
 0x8c8   : > { %16159 = vmatmul.mubr.msk.bf16.gmra.mrb[64].mxu0 %vm23332_vm1, %v21669_v19  ;;  %v23381_v19 = vld [vmem:[#allocation76_spill] sm:$0xff]  ;;  %vm23398_vm1 = vmmov %vm23382_vm0 }
 0x8c9   : > { %16162 = vmatprep.mubr.msk.bf16.mxu0 %vm23372_vm13, %v21684_v24  ;;  %v23385_v24 = vld [vmem:[#allocation78_spill] sm:$0xff]  ;;  %vm23400_vm13 = vmmov %vm23382_vm0 }
 0x8d0   : > { %16163 = vmatmul.mubr.msk.bf16.gmra.mrb[68].mxu0 %vm23373_vm6, %v12771_v25  ;;  %vm23401_vm6 = vmmov %vm23382_vm0 }
 0x8d1   : > { %16168 = vmatprep.mubr.msk.bf16.mxu0 %vm23374_vm9, %v21687_v4  ;;  %v23389_v4 = vld [vmem:[#allocation80_spill] sm:$0xff]  ;;  %vm23402_vm9 = vmmov %vm23382_vm0 }
 0x8d8   : > { %16169 = vmatmul.mubr.msk.bf16.vlgmr.msra.gmra.mrb[36].mxu0 %vm23375_vm12, %v21678_v59  ;;  %v23387_v59 = vld [vmem:[#allocation79_spill] sm:$0xff]  ;;  %vm23403_vm12 = vmmov %vm23382_vm0 }
 0x8d9   : > { %16172 = vmatprep.mubr.msk.bf16.mxu0 %vm23376_vm7, %v21690_v16  ;;  %v23391_v16 = vld [vmem:[#allocation81_spill] sm:$0xff]  ;;  %vm23404_vm7 = vcmask 125952  }
 0x8e0   : > { %16173 = vmatmul.mubr.msk.bf16.gmra.mrb[40].mxu0 %vm23378_vm3, %v23377_v60  ;;  %vm23405_vm3 = vmmov %vm23404_vm7 }
 0x8e1   : > { %16176 = vmatprep.mubr.msk.bf16.mxu0 %vm23380_vm11, %v23379_v11  ;;  %vm23406_vm11 = vmmov %vm23405_vm3 }
 0x8e8   : > { %16177 = vmatmul.mubr.msk.bf16.gmra.mrb[44].mxu0 %vm23382_vm0, %v23381_v19  ;;  %vm23407_vm0 = vmmov %vm23405_vm3 }
 0x8e9   : > { %16180 = vmatprep.mubr.msk.bf16.mxu0 %vm23384_vm14, %v23383_v28  ;;  %vm23408_vm14 = vmmov %vm23407_vm0 }
 0x8f0   : > { %16181 = vmatmul.mubr.msk.bf16.gmra.mrb[48].mxu0 %vm23386_vm2, %v23385_v24  ;;  %vm23409_vm2 = vmmov %vm23407_vm0 }
 0x8f1   : > { %16184 = vmatprep.mubr.msk.bf16.mxu0 %vm23388_vm10, %v23387_v59  ;;  %vm23410_vm10 = vmmov %vm23407_vm0 }
 0x8f8   : > { %16185 = vmatmul.mubr.msk.bf16.gmra.mrb[52].mxu0 %vm23390_vm4, %v23389_v4  ;;  %vm23411_vm4 = vmmov %vm23407_vm0 }
 0x8f9   : > { %16188 = vmatprep.mubr.msk.bf16.mxu0 %vm23392_vm8, %v23391_v16  ;;  %vm23412_vm8 = vmmov %vm23407_vm0 }
 0x900   : > { %16189 = vmatmul.mubr.msk.bf16.gmra.mrb[56].mxu0 %vm23394_vm15, %v23393_v45  ;;  %vm23413_vm15 = vmmov %vm23407_vm0 }
 0x901   : > { %16192 = vmatprep.mubr.msk.bf16.mxu0 %vm23396_vm5, %v23395_v0  ;;  %vm23414_vm5 = vmmov %vm23407_vm0 }
 0x908   : > { %16193 = vmatmul.mubr.msk.bf16.gmra.mrb[60].mxu0 %vm23398_vm1, %v23397_v3  ;;  %vm23415_vm1 = vmmov %vm23407_vm0 }
 0x909   : > { %16196 = vmatprep.mubr.msk.bf16.mxu0 %vm23400_vm13, %v23399_v49  ;;  %vm23416_vm13 = vmmov %vm23407_vm0 }
 0x910   : > { %16197 = vmatmul.mubr.msk.bf16.gmra.mrb[64].mxu0 %vm23401_vm6, %v21751_v38  ;;  %vm23417_vm6 = vmmov %vm23407_vm0 }
 0x911   : > { %16200 = vmatprep.mubr.msk.bf16.mxu0 %vm23402_vm9, %v21754_v7  ;;  %vm23418_vm9 = vmmov %vm23407_vm0 }
 0x918   : > { %16201 = vmatmul.mubr.msk.bf16.gmra.mrb[68].mxu0 %vm23403_vm12, %v21757_v9  ;;  %vm23419_vm12 = vmmov %vm23407_vm0 }
 0x9ab   : > { %v16170_v32 = vpop.f32.mrb[36].mxu0 }
 0x9ac   : > { %v13368_v61 = vadd.f32 %v16170_v32, %v22059_v40  ;;  %v13183_v57 = vpop.f32.mrb[37].mxu0 }
 0x9ad   : > { %v13366_v5 = vadd.f32 %v22059_v40, %v13183_v57  ;;  %v16171_v41 = vpop.f32.mrb[38].mxu0 }
 0x9ae   : > { %v13404_v38 = vmax.f32 %v13368_v61, 0.0  ;;  %v13369_v51 = vadd.f32 %v16171_v41, %v22059_v40  ;;  %v13186_v7 = vpop.f32.mrb[39].mxu0 }
 0x9af   : > { %v13402_v9 = vmax.f32 %v13366_v5, 0.0  ;;  %v13367_v14 = vadd.f32 %v22059_v40, %v13186_v7 }
 0x9b0   : > { %v14631_v20 = vpack.c.bf16 %v13404_v38, %v13404_v38  ;;  %v13405_v36 = vmax.f32 %v13369_v51, 0.0 }
 0x9b1   : > { %v14629_v63 = vpack.c.bf16 %v13402_v9, %v13402_v9  ;;  %v13403_v29 = vmax.f32 %v13367_v14, 0.0 }
 0x9b2   : > { %13584 = vst.msk [vmem:[%s22068_s23 + $0x8] sm:$0xf] %vm23404_vm7, %v14631_v20  ;;  %v14632_v35 = vpack.c.bf16 %v13405_v36, %v13405_v36  ;;  %vm23420_vm7 = vmmov %vm23407_vm0 }
 0x9b3   : > { %13582 = vst.msk [vmem:[%s22068_s23] sm:$0xf] %vm23405_vm3, %v14629_v63  ;;  %v14630_v46 = vpack.c.bf16 %v13403_v29, %v13403_v29  ;;  %v16174_v8 = vpop.f32.mrb[40].mxu0  ;;  %vm23421_vm3 = vmmov %vm23407_vm0 }
 0x9b4   : > { %13585 = vst.msk [vmem:[%s22068_s23 + $0xc] sm:$0xf] %vm23406_vm11, %v14632_v35  ;;  %v13372_v42 = vadd.f32 %v16174_v8, %v22059_v40  ;;  %v13199_v52 = vpop.f32.mrb[41].mxu0  ;;  %vm23422_vm11 = vmmov %vm23407_vm0 }
 0x9b5   : > { %13583 = vst.msk [vmem:[%s22068_s23 + $0x4] sm:$0xf] %vm23407_vm0, %v14630_v46  ;;  %v13370_v12 = vadd.f32 %v22059_v40, %v13199_v52  ;;  %v16175_v10 = vpop.f32.mrb[42].mxu0 }
 0x9b6   : > { %v13408_v26 = vmax.f32 %v13372_v42, 0.0  ;;  %v13373_v21 = vadd.f32 %v16175_v10, %v22059_v40  ;;  %v13202_v27 = vpop.f32.mrb[43].mxu0 }
 0x9b7   : > { %v13406_v62 = vmax.f32 %v13370_v12, 0.0  ;;  %v13371_v43 = vadd.f32 %v22059_v40, %v13202_v27 }
 0x9b8   : > { %v14635_v47 = vpack.c.bf16 %v13408_v26, %v13408_v26  ;;  %v13409_v17 = vmax.f32 %v13373_v21, 0.0 }
 0x9b9   : > { %v14633_v58 = vpack.c.bf16 %v13406_v62, %v13406_v62  ;;  %v13407_v55 = vmax.f32 %v13371_v43, 0.0 }
 0x9ba   : > { %13588 = vst.msk [vmem:[%s22068_s23 + $0x18] sm:$0xf] %vm23408_vm14, %v14635_v47  ;;  %v14636_v53 = vpack.c.bf16 %v13409_v17, %v13409_v17  ;;  %vm23423_vm14 = vmmov %vm23407_vm0 }
 0x9bb   : > { %13586 = vst.msk [vmem:[%s22068_s23 + $0x10] sm:$0xf] %vm23409_vm2, %v14633_v58  ;;  %v14634_v39 = vpack.c.bf16 %v13407_v55, %v13407_v55  ;;  %v16178_v33 = vpop.f32.mrb[44].mxu0  ;;  %vm23424_vm2 = vmmov %vm23407_vm0 }
 0x9bc   : > { %13589 = vst.msk [vmem:[%s22068_s23 + $0x1c] sm:$0xf] %vm23410_vm10, %v14636_v53  ;;  %v13376_v13 = vadd.f32 %v16178_v33, %v22059_v40  ;;  %v13215_v23 = vpop.f32.mrb[45].mxu0  ;;  %vm23425_vm10 = vmmov %vm23407_vm0 }
 0x9bd   : > { %13587 = vst.msk [vmem:[%s22068_s23 + $0x14] sm:$0xf] %vm23411_vm4, %v14634_v39  ;;  %v13374_v44 = vadd.f32 %v22059_v40, %v13215_v23  ;;  %v16179_v1 = vpop.f32.mrb[46].mxu0  ;;  %vm23426_vm4 = vmmov %vm23407_vm0 }
 0x9be   : > { %v13412_v34 = vmax.f32 %v13376_v13, 0.0  ;;  %v13377_v50 = vadd.f32 %v16179_v1, %v22059_v40  ;;  %v13218_v6 = vpop.f32.mrb[47].mxu0 }
 0x9bf   : > { %v13410_v48 = vmax.f32 %v13374_v44, 0.0  ;;  %v13375_v37 = vadd.f32 %v22059_v40, %v13218_v6 }
 0x9c0   : > { %v14639_v2 = vpack.c.bf16 %v13412_v34, %v13412_v34  ;;  %v13413_v15 = vmax.f32 %v13377_v50, 0.0 }
 0x9c1   : > { %v14637_v22 = vpack.c.bf16 %v13410_v48, %v13410_v48  ;;  %v13411_v30 = vmax.f32 %v13375_v37, 0.0 }
 0x9c2   : > { %13592 = vst.msk [vmem:[%s22068_s23 + $0x28] sm:$0xf] %vm23412_vm8, %v14639_v2  ;;  %v14640_v18 = vpack.c.bf16 %v13413_v15, %v13413_v15  ;;  %vm23427_vm8 = vmmov %vm23407_vm0 }
 0x9c3   : > { %13590 = vst.msk [vmem:[%s22068_s23 + $0x20] sm:$0xf] %vm23413_vm15, %v14637_v22  ;;  %v14638_v56 = vpack.c.bf16 %v13411_v30, %v13411_v30  ;;  %v16182_v31 = vpop.f32.mrb[48].mxu0  ;;  %vm23428_vm15 = vmmov %vm23407_vm0 }
 0x9c4   : > { %13593 = vst.msk [vmem:[%s22068_s23 + $0x2c] sm:$0xf] %vm23414_vm5, %v14640_v18  ;;  %v13380_v54 = vadd.f32 %v16182_v31, %v22059_v40  ;;  %v13231_v25 = vpop.f32.mrb[49].mxu0  ;;  %vm23429_vm5 = vmmov %vm23407_vm0 }
 0x9c5   : > { %13591 = vst.msk [vmem:[%s22068_s23 + $0x24] sm:$0xf] %vm23415_vm1, %v14638_v56  ;;  %v13378_v60 = vadd.f32 %v22059_v40, %v13231_v25  ;;  %v16183_v11 = vpop.f32.mrb[50].mxu0  ;;  %vm23430_vm1 = vmmov %vm23407_vm0 }
 0x9c6   : > { %v13416_v19 = vmax.f32 %v13380_v54, 0.0  ;;  %v13381_v28 = vadd.f32 %v16183_v11, %v22059_v40  ;;  %v13234_v24 = vpop.f32.mrb[51].mxu0 }
 0x9c7   : > { %v13414_v59 = vmax.f32 %v13378_v60, 0.0  ;;  %v13379_v4 = vadd.f32 %v22059_v40, %v13234_v24 }
 0x9c8   : > { %v14643_v16 = vpack.c.bf16 %v13416_v19, %v13416_v19  ;;  %v13417_v45 = vmax.f32 %v13381_v28, 0.0 }
 0x9c9   : > { %v14641_v0 = vpack.c.bf16 %v13414_v59, %v13414_v59  ;;  %v13415_v3 = vmax.f32 %v13379_v4, 0.0 }
 0x9ca   : > { %13596 = vst.msk [vmem:[%s22068_s23 + $0x38] sm:$0xf] %vm23416_vm13, %v14643_v16  ;;  %v14644_v49 = vpack.c.bf16 %v13417_v45, %v13417_v45  ;;  %vm23431_vm13 = vmmov %vm23407_vm0 }
 0x9cb   : > { %13594 = vst.msk [vmem:[%s22068_s23 + $0x30] sm:$0xf] %vm23417_vm6, %v14641_v0  ;;  %v14642_v32 = vpack.c.bf16 %v13415_v3, %v13415_v3  ;;  %v16186_v61 = vpop.f32.mrb[52].mxu0  ;;  %vm23432_vm6 = vmmov %vm23407_vm0 }
 0x9cc   : > { %13597 = vst.msk [vmem:[%s22068_s23 + $0x3c] sm:$0xf] %vm23418_vm9, %v14644_v49  ;;  %v13384_v57 = vadd.f32 %v16186_v61, %v22059_v40  ;;  %v13247_v5 = vpop.f32.mrb[53].mxu0  ;;  %vm23433_vm9 = vmmov %vm23407_vm0 }
 0x9cd   : > { %13595 = vst.msk [vmem:[%s22068_s23 + $0x34] sm:$0xf] %vm23419_vm12, %v14642_v32  ;;  %v13382_v41 = vadd.f32 %v22059_v40, %v13247_v5  ;;  %v16187_v38 = vpop.f32.mrb[54].mxu0  ;;  %vm23434_vm12 = vmmov %vm23407_vm0 }
 0x9ce   : > { %v13420_v51 = vmax.f32 %v13384_v57, 0.0  ;;  %v13385_v7 = vadd.f32 %v16187_v38, %v22059_v40  ;;  %v13250_v9 = vpop.f32.mrb[55].mxu0 }
 0x9cf   : > { %v13418_v14 = vmax.f32 %v13382_v41, 0.0  ;;  %v13383_v20 = vadd.f32 %v22059_v40, %v13250_v9 }
 0x9d0   : > { %v14647_v36 = vpack.c.bf16 %v13420_v51, %v13420_v51  ;;  %v13421_v63 = vmax.f32 %v13385_v7, 0.0 }
 0x9d1   : > { %v14645_v29 = vpack.c.bf16 %v13418_v14, %v13418_v14  ;;  %v13419_v35 = vmax.f32 %v13383_v20, 0.0 }
 0x9d2   : > { %13600 = vst.msk [vmem:[%s22068_s23 + $0x48] sm:$0xf] %vm23420_vm7, %v14647_v36  ;;  %v14648_v46 = vpack.c.bf16 %v13421_v63, %v13421_v63  ;;  %vm23435_vm7 = vmmov %vm23407_vm0 }
 0x9d3   : > { %13598 = vst.msk [vmem:[%s22068_s23 + $0x40] sm:$0xf] %vm23421_vm3, %v14645_v29  ;;  %v14646_v8 = vpack.c.bf16 %v13419_v35, %v13419_v35  ;;  %v16190_v42 = vpop.f32.mrb[56].mxu0  ;;  %vm23436_vm3 = vmmov %vm23407_vm0 }
 0x9d4   : > { %13601 = vst.msk [vmem:[%s22068_s23 + $0x4c] sm:$0xf] %vm23422_vm11, %v14648_v46  ;;  %v13388_v52 = vadd.f32 %v16190_v42, %v22059_v40  ;;  %v13263_v12 = vpop.f32.mrb[57].mxu0  ;;  %vm23437_vm11 = vmmov %vm23407_vm0 }
 0x9d5   : > { %13599 = vst.msk [vmem:[%s22068_s23 + $0x44] sm:$0xf] %vm23407_vm0, %v14646_v8  ;;  %v13386_v10 = vadd.f32 %v22059_v40, %v13263_v12  ;;  %v16191_v26 = vpop.f32.mrb[58].mxu0 }
 0x9d6   : > { %v13424_v21 = vmax.f32 %v13388_v52, 0.0  ;;  %v13389_v27 = vadd.f32 %v16191_v26, %v22059_v40  ;;  %v13266_v62 = vpop.f32.mrb[59].mxu0 }
 0x9d7   : > { %v13422_v43 = vmax.f32 %v13386_v10, 0.0  ;;  %v13387_v47 = vadd.f32 %v22059_v40, %v13266_v62 }
 0x9d8   : > { %v14651_v17 = vpack.c.bf16 %v13424_v21, %v13424_v21  ;;  %v13425_v58 = vmax.f32 %v13389_v27, 0.0 }
 0x9d9   : > { %v14649_v55 = vpack.c.bf16 %v13422_v43, %v13422_v43  ;;  %v13423_v53 = vmax.f32 %v13387_v47, 0.0 }
 0x9da   : > { %13604 = vst.msk [vmem:[%s22068_s23 + $0x58] sm:$0xf] %vm23423_vm14, %v14651_v17  ;;  %v14652_v39 = vpack.c.bf16 %v13425_v58, %v13425_v58 }
 0x9db   : > { %13602 = vst.msk [vmem:[%s22068_s23 + $0x50] sm:$0xf] %vm23424_vm2, %v14649_v55  ;;  %v14650_v33 = vpack.c.bf16 %v13423_v53, %v13423_v53  ;;  %v16194_v13 = vpop.f32.mrb[60].mxu0 }
 0x9dc   : > { %13605 = vst.msk [vmem:[%s22068_s23 + $0x5c] sm:$0xf] %vm23425_vm10, %v14652_v39  ;;  %v13392_v23 = vadd.f32 %v16194_v13, %v22059_v40  ;;  %v13279_v44 = vpop.f32.mrb[61].mxu0 }
 0x9dd   : > { %13603 = vst.msk [vmem:[%s22068_s23 + $0x54] sm:$0xf] %vm23426_vm4, %v14650_v33  ;;  %v13390_v1 = vadd.f32 %v22059_v40, %v13279_v44  ;;  %v16195_v34 = vpop.f32.mrb[62].mxu0 }
 0x9de   : > { %v13428_v50 = vmax.f32 %v13392_v23, 0.0  ;;  %v13393_v6 = vadd.f32 %v16195_v34, %v22059_v40  ;;  %v13282_v48 = vpop.f32.mrb[63].mxu0 }
 0x9df   : > { %v13426_v37 = vmax.f32 %v13390_v1, 0.0  ;;  %v13391_v2 = vadd.f32 %v22059_v40, %v13282_v48 }
 0x9e0   : > { %v14655_v15 = vpack.c.bf16 %v13428_v50, %v13428_v50  ;;  %v13429_v22 = vmax.f32 %v13393_v6, 0.0 }
 0x9e1   : > { %v14653_v30 = vpack.c.bf16 %v13426_v37, %v13426_v37  ;;  %v13427_v18 = vmax.f32 %v13391_v2, 0.0 }
 0x9e2   : > { %13608 = vst.msk [vmem:[%s22068_s23 + $0x68] sm:$0xf] %vm23427_vm8, %v14655_v15  ;;  %v14656_v56 = vpack.c.bf16 %v13429_v22, %v13429_v22 }
 0x9e3   : > { %13606 = vst.msk [vmem:[%s22068_s23 + $0x60] sm:$0xf] %vm23428_vm15, %v14653_v30  ;;  %v14654_v31 = vpack.c.bf16 %v13427_v18, %v13427_v18  ;;  %v16198_v54 = vpop.f32.mrb[64].mxu0 }
 0x9e4   : > { %13609 = vst.msk [vmem:[%s22068_s23 + $0x6c] sm:$0xf] %vm23429_vm5, %v14656_v56  ;;  %v13396_v25 = vadd.f32 %v16198_v54, %v22059_v40  ;;  %v13295_v60 = vpop.f32.mrb[65].mxu0 }
 0x9e5   : > { %13607 = vst.msk [vmem:[%s22068_s23 + $0x64] sm:$0xf] %vm23430_vm1, %v14654_v31  ;;  %v13394_v11 = vadd.f32 %v22059_v40, %v13295_v60  ;;  %v16199_v19 = vpop.f32.mrb[66].mxu0 }
 0x9e6   : > { %v13432_v28 = vmax.f32 %v13396_v25, 0.0  ;;  %v13397_v24 = vadd.f32 %v16199_v19, %v22059_v40  ;;  %v13298_v59 = vpop.f32.mrb[67].mxu0 }
 0x9e7   : > { %v13430_v4 = vmax.f32 %v13394_v11, 0.0  ;;  %v13395_v16 = vadd.f32 %v22059_v40, %v13298_v59 }
 0x9e8   : > { %v14659_v45 = vpack.c.bf16 %v13432_v28, %v13432_v28  ;;  %v13433_v0 = vmax.f32 %v13397_v24, 0.0 }
 0x9e9   : > { %v14657_v3 = vpack.c.bf16 %v13430_v4, %v13430_v4  ;;  %v13431_v49 = vmax.f32 %v13395_v16, 0.0 }
 0x9ea   : > { %13612 = vst.msk [vmem:[%s22068_s23 + $0x78] sm:$0xf] %vm23431_vm13, %v14659_v45  ;;  %v14660_v32 = vpack.c.bf16 %v13433_v0, %v13433_v0 }
 0x9eb   : > { %13610 = vst.msk [vmem:[%s22068_s23 + $0x70] sm:$0xf] %vm23432_vm6, %v14657_v3  ;;  %v14658_v61 = vpack.c.bf16 %v13431_v49, %v13431_v49  ;;  %v16202_v57 = vpop.f32.mrb[68].mxu0 }
 0x9ec   : > { %13613 = vst.msk [vmem:[%s22068_s23 + $0x7c] sm:$0xf] %vm23433_vm9, %v14660_v32  ;;  %v13400_v5 = vadd.f32 %v16202_v57, %v22059_v40  ;;  %v13311_v41 = vpop.f32.mrb[69].mxu0 }
 0x9ed   : > { %13611 = vst.msk [vmem:[%s22068_s23 + $0x74] sm:$0xf] %vm23434_vm12, %v14658_v61  ;;  %v13398_v38 = vadd.f32 %v22059_v40, %v13311_v41  ;;  %v16203_v51 = vpop.f32.mrb[70].mxu0 }
 0x9ee   : > { %v13436_v7 = vmax.f32 %v13400_v5, 0.0  ;;  %v13401_v9 = vadd.f32 %v16203_v51, %v22059_v40  ;;  %v13314_v14 = vpop.f32.mrb[71].mxu0 }
 0x9ef   : > { %v13434_v20 = vmax.f32 %v13398_v38, 0.0  ;;  %v13399_v36 = vadd.f32 %v22059_v40, %v13314_v14 }
 0x9f0   : > { %v14663_v63 = vpack.c.bf16 %v13436_v7, %v13436_v7  ;;  %v13437_v29 = vmax.f32 %v13401_v9, 0.0 }
 0x9f1   : > { %v14661_v35 = vpack.c.bf16 %v13434_v20, %v13434_v20  ;;  %v13435_v46 = vmax.f32 %v13399_v36, 0.0 }
 0x9f2   : > { %13616 = vst.msk [vmem:[%s22068_s23 + $0x88] sm:$0xf] %vm23435_vm7, %v14663_v63  ;;  %v14664_v8 = vpack.c.bf16 %v13437_v29, %v13437_v29 }
 0x9f3   : > { %13614 = vst.msk [vmem:[%s22068_s23 + $0x80] sm:$0xf] %vm23436_vm3, %v14661_v35  ;;  %v14662_v42 = vpack.c.bf16 %v13435_v46, %v13435_v46 }
 0x9f4   : > { %13617 = vst.msk [vmem:[%s22068_s23 + $0x8c] sm:$0xf] %vm23437_vm11, %v14664_v8 }
 0x9f5   : > { %13615 = vst.msk [vmem:[%s22068_s23 + $0x84] sm:$0xf] %vm23407_vm0, %v14662_v42 }
 0x9f6 PF: > { %p19_p9 = scmp.ge.s32.totalorder %s17755_s20, 4   ;;  %s23438_s24 = smov %s17568_s25 }
 0x9f7   : > { %s23439_s25 = smov %s17572_s26  ;;  %s23440_s26 = smov %s17765_s11 }
 0x9f8   : > { %s23441_s27 = smov %s17755_s20  ;;  %21 = sbr.rel (!%p19_p9) target bundleno = 5 (0x5), region = 127 }
 0x9ff   :  { %13639 = vsyncpa [#allocation6], 1 }
 0xa00   :  { %13641 = vsyncpa [#allocation6 + $0x1], 1 }
 0xa01   :  { %13642 = vsyncpa [#allocation8], 1 }
 0xa02   :  { %13643 = vsyncpa [#allocation11], 1 }

</bundles_post_ra>
